<compile_context>
chip_gen: v7x
topology: tpu7x:2x2x1
jax: 0.10.0
libtpu: 0.0.40
codegen_flags: <defaults>
</compile_context>

<pallas_src>
import numpy as np
import jax
import jax.numpy as jnp
from jax.experimental import pallas as pl
from jax.experimental.pallas import tpu as pltpu


# ----------------------------------------------------------------------------
# Geometry helpers
# ----------------------------------------------------------------------------
def _ceil8(x):
    return (x + 7) // 8 * 8


def _geom(H, W):
    H2, W2, H3, W3 = H // 2, W // 2, H // 4, W // 4
    Wp1, Wp2, Wp3 = W + 2, W2 + 2, W3 + 2
    M1, M2, M3 = H * Wp1, H2 * Wp2, H3 * Wp3            # conv anchor row counts
    return dict(
        H2=H2, W2=W2, H3=H3, W3=W3,
        Wp1=Wp1, Wp2=Wp2, Wp3=Wp3,
        M1=M1, M2=M2, M3=M3,
        A1=_ceil8(M1 + 2 * Wp1 + 2),                     # padded-slab row counts
        A2=_ceil8(M2 + 2 * Wp2 + 2),
        A3=_ceil8(M3 + 2 * Wp3 + 2),
        k1=2 * (H2 - 1) * Wp1 + 2 * (W2 - 1) + 1,        # pool source lengths
        k2=2 * (H3 - 1) * Wp2 + 2 * (W3 - 1) + 1,
    )


# ----------------------------------------------------------------------------
# One-time host-side parameter packing
# ----------------------------------------------------------------------------
def _bilinear_matrix(n_in, n_out):
    """1-D interpolation matrix for align_corners=True bilinear resize."""
    m = np.zeros((n_out, n_in), np.float32)
    if n_in == 1:
        m[:, 0] = 1.0
        return m
    scale = (n_in - 1) / (n_out - 1)
    for i in range(n_out):
        src = i * scale
        p0 = min(int(np.floor(src)), n_in - 2)
        frac = src - p0
        m[i, p0] += 1.0 - frac
        m[i, p0 + 1] += frac
    return m


def _pack_conv3x3(w_oihw):
    """OIHW -> (9*Cin, Cout): row index = (dy*3+dx)*Cin + ci (true weights only)."""
    w = np.asarray(w_oihw, np.float32)
    cin, cout = int(w.shape[1]), int(w.shape[0])
    return np.transpose(w, (2, 3, 1, 0)).reshape(9 * cin, cout)


def _pool_select(rows_dst, wp_dst, h_pool, w_pool, wp_src, k_len):
    """0/1 matrix: (pooled value at source anchor 2h*wp_src+2w) -> interior row of
    the next stage's zero-padded flat slab.  Non-interior rows stay all-zero, so
    the matmul also writes the padding."""
    sel = np.zeros((rows_dst, k_len), np.float32)
    for r in range(rows_dst):
        y, x = divmod(r, wp_dst)
        if 1 <= y <= h_pool and 1 <= x <= w_pool:
            sel[r, 2 * (y - 1) * wp_src + 2 * (x - 1)] = 1.0
    return sel


def _upsample_matrix(H, W, H3, W3, Wp3):
    """Bilinear x4 (align_corners=True) + extraction of valid anchors from the
    flat stage-3 output, as one (H*W, H3*Wp3) matrix."""
    mh = _bilinear_matrix(H3, H)                 # (H, H3)
    mw = _bilinear_matrix(W3, W)                 # (W, W3)
    u = np.zeros((H * W, H3 * Wp3), np.float32)
    for i in range(H):
        for j in range(W):
            for h in range(H3):
                for w in range(W3):
                    u[i * W + j, h * Wp3 + w] = mh[i, h] * mw[j, w]
    return u


def pack_params(params, H, W):
    g = _geom(H, W)
    bf16 = jnp.bfloat16

    def bias(b):
        return jnp.asarray(np.asarray(b, np.float32).reshape(1, -1))

    w4 = np.asarray(params["w4"], np.float32)[:, :, 0, 0].T          # (C3, NC)
    return {
        "w1": jnp.asarray(_pack_conv3x3(params["w1"]), jnp.float32),  # tiny; f32
        "b1": bias(params["b1"]),
        "w2": jnp.asarray(_pack_conv3x3(params["w2"]), bf16),
        "b2": bias(params["b2"]),
        "w3": jnp.asarray(_pack_conv3x3(params["w3"]), bf16),
        "b3": bias(params["b3"]),
        "w4": jnp.asarray(w4, bf16),
        "b4": bias(params["b4"]),
        "u": jnp.asarray(_upsample_matrix(H, W, g["H3"], g["W3"], g["Wp3"])),
        "sel2": jnp.asarray(
            _pool_select(g["A2"], g["Wp2"], g["H2"], g["W2"], g["Wp1"], g["k1"]), bf16),
        "sel3": jnp.asarray(
            _pool_select(g["A3"], g["Wp3"], g["H3"], g["W3"], g["Wp2"], g["k2"]), bf16),
    }


# ----------------------------------------------------------------------------
# The fused Pallas kernel (single grid step, static batch loop inside)
# ----------------------------------------------------------------------------
def _make_kernel(N, H, W, Cin, C1, C2):
    g = _geom(H, W)
    A1, M1, Wp1 = g["A1"], g["M1"], g["Wp1"]
    M2, Wp2 = g["M2"], g["Wp2"]
    M3, Wp3 = g["M3"], g["Wp3"]
    k1, k2 = g["k1"], g["k2"]
    HW = H * W
    bf16, f32 = jnp.bfloat16, jnp.float32

    def conv9(src_ref, base, rows, wp, cin, w_ref, b_ref):
        # 3x3 conv as 9 shifted (rows, Cin) @ (Cin, Cout) MXU matmuls + bias + ReLU.
        acc = None
        for dy in range(3):
            for dx in range(3):
                off = base + dy * wp + dx
                k = dy * 3 + dx
                t = jnp.dot(src_ref[off:off + rows, :].astype(bf16),
                            w_ref[k * cin:(k + 1) * cin, :].astype(bf16),
                            preferred_element_type=f32)
                acc = t if acc is None else acc + t
        return jnp.maximum(acc + b_ref[...], 0.0)

    def pool_pad(y_ref, klen, wp, sel_ref):
        # 2x2 maxpool = elementwise max of 4 shifted slices, then one 0/1
        # selection matmul that also scatters into the zero-padded next slab.
        t = jnp.maximum(
            jnp.maximum(y_ref[0:klen, :], y_ref[1:klen + 1, :]),
            jnp.maximum(y_ref[wp:wp + klen, :], y_ref[wp + 1:wp + 1 + klen, :]))
        return jnp.dot(sel_ref[...], t.astype(bf16), preferred_element_type=f32)

    def kernel(x_ref, w1_ref, b1_ref, w2_ref, b2_ref, w3_ref, b3_ref,
               w4_ref, b4_ref, u_ref, sel2_ref, sel3_ref, o_ref,
               y1_ref, a2_ref, y2_ref, a3_ref):
        for n in range(N):
            # stage 1: conv3x3(Cin->C1)+ReLU on the wrapper-prepadded flat slab
            y1_ref[...] = conv9(x_ref, n * A1, M1, Wp1, Cin, w1_ref, b1_ref)
            # maxpool 2x2 + scatter into padded stage-2 slab (one matmul)
            a2_ref[...] = pool_pad(y1_ref, k1, Wp1, sel2_ref)
            # stage 2: conv3x3(C1->C2)+ReLU, then pool into stage-3 slab
            y2_ref[...] = conv9(a2_ref, 0, M2, Wp2, C1, w2_ref, b2_ref)
            a3_ref[...] = pool_pad(y2_ref, k2, Wp2, sel3_ref)
            # stage 3: conv3x3(C2->C3)+ReLU, 1x1 classifier, bilinear x4 upsample
            y3 = conv9(a3_ref, 0, M3, Wp3, C2, w3_ref, b3_ref)          # (M3, C3)
            y4 = jnp.dot(y3.astype(bf16), w4_ref[...],
                         preferred_element_type=f32)                     # (M3, NC)
            out = jnp.dot(u_ref[...], y4, preferred_element_type=f32)    # (H*W, NC)
            o_ref[n * HW:(n + 1) * HW, :] = out + b4_ref[...]

    return kernel


# ----------------------------------------------------------------------------
# Forward pass (single fused pallas_call)
# ----------------------------------------------------------------------------
def simple_fcn_forward(x_nchw, packed):
    N, Cin, H, W = x_nchw.shape
    assert H % 4 == 0 and W % 4 == 0, "two 2x2 pools + x4 upsample need H,W % 4 == 0"
    g = _geom(H, W)
    C1 = packed["b1"].shape[1]
    C2 = packed["b2"].shape[1]
    NC = packed["b4"].shape[1]

    # NCHW -> zero-padded flat slab: rows = padded pixels (row-major), lanes = channels.
    x = jnp.transpose(x_nchw, (0, 2, 3, 1)).astype(jnp.float32)
    x = jnp.pad(x, ((0, 0), (1, 1), (1, 1), (0, 0)))                  # (N, H+2, W+2, Cin)
    x = x.reshape(N, (H + 2) * g["Wp1"], Cin)
    x = jnp.pad(x, ((0, 0), (0, g["A1"] - (H + 2) * g["Wp1"]), (0, 0)))
    x = x.reshape(N * g["A1"], Cin)

    order = ("w1", "b1", "w2", "b2", "w3", "b3", "w4", "b4", "u", "sel2", "sel3")
    args = [x] + [packed[k] for k in order]
    in_specs = [pl.BlockSpec(a.shape, lambda i: (0, 0)) for a in args]

    kernel = _make_kernel(N, H, W, Cin, C1, C2)
    out = pl.pallas_call(
        kernel,
        out_shape=jax.ShapeDtypeStruct((N * H * W, NC), jnp.float32),
        grid_spec=pltpu.PrefetchScalarGridSpec(
            num_scalar_prefetch=0,
            grid=(1,),
            in_specs=in_specs,
            out_specs=pl.BlockSpec((N * H * W, NC), lambda i: (0, 0)),
            scratch_shapes=[
                pltpu.VMEM((g["M1"], C1), jnp.float32),   # conv1 output (flat)
                pltpu.VMEM((g["A2"], C1), jnp.float32),   # padded stage-2 slab
                pltpu.VMEM((g["M2"], C2), jnp.float32),   # conv2 output (flat)
                pltpu.VMEM((g["A3"], C2), jnp.float32),   # padded stage-3 slab
            ],
        ),
        compiler_params=pltpu.CompilerParams(
            dimension_semantics=("arbitrary",),
        ),
    )(*args)

    return jnp.transpose(out.reshape(N, H, W, NC), (0, 3, 1, 2))       # -> NCHW


# ----------------------------------------------------------------------------
# Pure-JAX reference (f32) for correctness checking
# ----------------------------------------------------------------------------
def reference_forward(x_nchw, params):
    x = jnp.transpose(x_nchw, (0, 2, 3, 1)).astype(jnp.float32)

    def conv(x, w, b, relu):
        wh = jnp.transpose(w, (2, 3, 1, 0))     # OIHW -> HWIO
        y = jax.lax.conv_general_dilated(
            x, wh, window_strides=(1, 1), padding="SAME",
            dimension_numbers=("NHWC", "HWIO", "NHWC"))
        y = y + b
        return jnp.maximum(y, 0.0) if relu else y

    def pool(x):
        return jax.lax.reduce_window(x, -jnp.inf, jax.lax.max,
                                     (1, 2, 2, 1), (1, 2, 2, 1), "VALID")

    x = pool(conv(x, params["w1"], params["b1"], True))
    x = pool(conv(x, params["w2"], params["b2"], True))
    x = conv(x, params["w3"], params["b3"], True)
    x = conv(x, params["w4"], params["b4"], False)
    n, h, w, c = x.shape
    mh = jnp.asarray(_bilinear_matrix(h, 4 * h))
    mw = jnp.asarray(_bilinear_matrix(w, 4 * w))
    x = jnp.einsum("ah,nhwc->nawc", mh, x)
    x = jnp.einsum("bw,nawc->nabc", mw, x)
    return jnp.transpose(x, (0, 3, 1, 2))


# ----------------------------------------------------------------------------
# Params
# ----------------------------------------------------------------------------
def init_params(num_classes, key):
    def conv_init(k, cout, cin, ks):
        kw, kb = jax.random.split(k)
        fan_in = cin * ks * ks
        w = jax.random.normal(kw, (cout, cin, ks, ks), jnp.float32) / np.sqrt(fan_in)
        b = 0.01 * jax.random.normal(kb, (cout,), jnp.float32)
        return w, b

    k1, k2, k3, k4 = jax.random.split(key, 4)
    p = {}
    p["w1"], p["b1"] = conv_init(k1, 64, 3, 3)
    p["w2"], p["b2"] = conv_init(k2, 128, 64, 3)
    p["w3"], p["b3"] = conv_init(k3, 256, 128, 3)
    p["w4"], p["b4"] = conv_init(k4, num_classes, 256, 1)
    return p


if __name__ == "__main__":
    num_classes = 8
    N, H, W = 2, 16, 16
    key = jax.random.PRNGKey(0)
    kx, kp = jax.random.split(key)
    x = jax.random.normal(kx, (N, 3, H, W), jnp.float32)      # NCHW like PyTorch
    params = init_params(num_classes, kp)
    packed = pack_params(params, H, W)                        # one-time host packing

    fwd = jax.jit(simple_fcn_forward)
    out = jax.block_until_ready(fwd(x, packed))

    assert out.shape == (N, num_classes, H, W), out.shape
    assert np.all(np.isfinite(np.asarray(out)))

    ref = jax.block_until_ready(reference_forward(x, params))
    np.testing.assert_allclose(np.asarray(out), np.asarray(ref), rtol=5e-2, atol=5e-2)
    print("KERNEL_OK")
</pallas_src>

<mosaic_0001>
module attributes {stable_mosaic.version = 11 : i64} {
  func.func @kernel(%arg0: i32, %arg1: memref<656x3xf32, #tpu.memory_space<vmem>>, %arg2: memref<27x64xf32, #tpu.memory_space<vmem>>, %arg3: memref<1x64xf32, #tpu.memory_space<vmem>>, %arg4: memref<576x128xbf16, #tpu.memory_space<vmem>>, %arg5: memref<1x128xf32, #tpu.memory_space<vmem>>, %arg6: memref<1152x256xbf16, #tpu.memory_space<vmem>>, %arg7: memref<1x256xf32, #tpu.memory_space<vmem>>, %arg8: memref<256x8xbf16, #tpu.memory_space<vmem>>, %arg9: memref<1x8xf32, #tpu.memory_space<vmem>>, %arg10: memref<256x24xf32, #tpu.memory_space<vmem>>, %arg11: memref<104x267xbf16, #tpu.memory_space<vmem>>, %arg12: memref<40x67xbf16, #tpu.memory_space<vmem>>, %arg13: memref<512x8xf32, #tpu.memory_space<vmem>>, %arg14: memref<288x64xf32, #tpu.memory_space<vmem>>, %arg15: memref<104x64xf32, #tpu.memory_space<vmem>>, %arg16: memref<80x128xf32, #tpu.memory_space<vmem>>, %arg17: memref<40x128xf32, #tpu.memory_space<vmem>>) attributes {dimension_semantics = [#tpu.dimension_semantics<arbitrary>], iteration_bounds = array<i64: 1>, scalar_prefetch = 0 : i64, scratch_operands = 4 : i64, tpu.core_type = #tpu.core_type<tc>, window_params = [{pipeline_mode = #tpu.pipeline_mode<synchronous>, transform_indices = @transform_0, window_bounds = array<i64: 656, 3>}, {pipeline_mode = #tpu.pipeline_mode<synchronous>, transform_indices = @transform_1, window_bounds = array<i64: 27, 64>}, {pipeline_mode = #tpu.pipeline_mode<synchronous>, transform_indices = @transform_2, window_bounds = array<i64: 1, 64>}, {pipeline_mode = #tpu.pipeline_mode<synchronous>, transform_indices = @transform_3, window_bounds = array<i64: 576, 128>}, {pipeline_mode = #tpu.pipeline_mode<synchronous>, transform_indices = @transform_4, window_bounds = array<i64: 1, 128>}, {pipeline_mode = #tpu.pipeline_mode<synchronous>, transform_indices = @transform_5, window_bounds = array<i64: 1152, 256>}, {pipeline_mode = #tpu.pipeline_mode<synchronous>, transform_indices = @transform_6, window_bounds = array<i64: 1, 256>}, {pipeline_mode = #tpu.pipeline_mode<synchronous>, transform_indices = @transform_7, window_bounds = array<i64: 256, 8>}, {pipeline_mode = #tpu.pipeline_mode<synchronous>, transform_indices = @transform_8, window_bounds = array<i64: 1, 8>}, {pipeline_mode = #tpu.pipeline_mode<synchronous>, transform_indices = @transform_9, window_bounds = array<i64: 256, 24>}, {pipeline_mode = #tpu.pipeline_mode<synchronous>, transform_indices = @transform_10, window_bounds = array<i64: 104, 267>}, {pipeline_mode = #tpu.pipeline_mode<synchronous>, transform_indices = @transform_11, window_bounds = array<i64: 40, 67>}, {pipeline_mode = #tpu.pipeline_mode<synchronous>, transform_indices = @transform_12, window_bounds = array<i64: 512, 8>}]} {
    %c0 = arith.constant 0 : index
    %c0_0 = arith.constant 0 : index
    %0 = vector.load %arg1[%c0, %c0_0] : memref<656x3xf32, #tpu.memory_space<vmem>>, vector<288x3xf32>
    %1 = arith.truncf %0 : vector<288x3xf32> to vector<288x3xbf16>
    %c0_1 = arith.constant 0 : index
    %c0_2 = arith.constant 0 : index
    %2 = vector.load %arg2[%c0_1, %c0_2] : memref<27x64xf32, #tpu.memory_space<vmem>>, vector<3x64xf32>
    %3 = arith.truncf %2 : vector<3x64xf32> to vector<3x64xbf16>
    %cst = arith.constant dense<0.000000e+00> : vector<288x64xf32>
    %4 = tpu.matmul %1, %3, %cst {dimension_numbers = #tpu.dot_dimension_numbers<[1], [0], [0], [1], [0, 0, 1, 1], [], []>} : vector<288x3xbf16>, vector<3x64xbf16>, vector<288x64xf32> -> vector<288x64xf32>
    %c1 = arith.constant 1 : index
    %c0_3 = arith.constant 0 : index
    %5 = vector.load %arg1[%c1, %c0_3] : memref<656x3xf32, #tpu.memory_space<vmem>>, vector<288x3xf32>
    %6 = arith.truncf %5 : vector<288x3xf32> to vector<288x3xbf16>
    %c3 = arith.constant 3 : index
    %c0_4 = arith.constant 0 : index
    %7 = vector.load %arg2[%c3, %c0_4] : memref<27x64xf32, #tpu.memory_space<vmem>>, vector<3x64xf32>
    %8 = arith.truncf %7 : vector<3x64xf32> to vector<3x64xbf16>
    %cst_5 = arith.constant dense<0.000000e+00> : vector<288x64xf32>
    %9 = tpu.matmul %6, %8, %cst_5 {dimension_numbers = #tpu.dot_dimension_numbers<[1], [0], [0], [1], [0, 0, 1, 1], [], []>} : vector<288x3xbf16>, vector<3x64xbf16>, vector<288x64xf32> -> vector<288x64xf32>
    %10 = arith.addf %4, %9 : vector<288x64xf32>
    %c2 = arith.constant 2 : index
    %c0_6 = arith.constant 0 : index
    %11 = vector.load %arg1[%c2, %c0_6] : memref<656x3xf32, #tpu.memory_space<vmem>>, vector<288x3xf32>
    %12 = arith.truncf %11 : vector<288x3xf32> to vector<288x3xbf16>
    %c6 = arith.constant 6 : index
    %c0_7 = arith.constant 0 : index
    %13 = vector.load %arg2[%c6, %c0_7] : memref<27x64xf32, #tpu.memory_space<vmem>>, vector<3x64xf32>
    %14 = arith.truncf %13 : vector<3x64xf32> to vector<3x64xbf16>
    %cst_8 = arith.constant dense<0.000000e+00> : vector<288x64xf32>
    %15 = tpu.matmul %12, %14, %cst_8 {dimension_numbers = #tpu.dot_dimension_numbers<[1], [0], [0], [1], [0, 0, 1, 1], [], []>} : vector<288x3xbf16>, vector<3x64xbf16>, vector<288x64xf32> -> vector<288x64xf32>
    %16 = arith.addf %10, %15 : vector<288x64xf32>
    %c18 = arith.constant 18 : index
    %c0_9 = arith.constant 0 : index
    %17 = vector.load %arg1[%c18, %c0_9] : memref<656x3xf32, #tpu.memory_space<vmem>>, vector<288x3xf32>
    %18 = arith.truncf %17 : vector<288x3xf32> to vector<288x3xbf16>
    %c9 = arith.constant 9 : index
    %c0_10 = arith.constant 0 : index
    %19 = vector.load %arg2[%c9, %c0_10] : memref<27x64xf32, #tpu.memory_space<vmem>>, vector<3x64xf32>
    %20 = arith.truncf %19 : vector<3x64xf32> to vector<3x64xbf16>
    %cst_11 = arith.constant dense<0.000000e+00> : vector<288x64xf32>
    %21 = tpu.matmul %18, %20, %cst_11 {dimension_numbers = #tpu.dot_dimension_numbers<[1], [0], [0], [1], [0, 0, 1, 1], [], []>} : vector<288x3xbf16>, vector<3x64xbf16>, vector<288x64xf32> -> vector<288x64xf32>
    %22 = arith.addf %16, %21 : vector<288x64xf32>
    %c19 = arith.constant 19 : index
    %c0_12 = arith.constant 0 : index
    %23 = vector.load %arg1[%c19, %c0_12] : memref<656x3xf32, #tpu.memory_space<vmem>>, vector<288x3xf32>
    %24 = arith.truncf %23 : vector<288x3xf32> to vector<288x3xbf16>
    %c12 = arith.constant 12 : index
    %c0_13 = arith.constant 0 : index
    %25 = vector.load %arg2[%c12, %c0_13] : memref<27x64xf32, #tpu.memory_space<vmem>>, vector<3x64xf32>
    %26 = arith.truncf %25 : vector<3x64xf32> to vector<3x64xbf16>
    %cst_14 = arith.constant dense<0.000000e+00> : vector<288x64xf32>
    %27 = tpu.matmul %24, %26, %cst_14 {dimension_numbers = #tpu.dot_dimension_numbers<[1], [0], [0], [1], [0, 0, 1, 1], [], []>} : vector<288x3xbf16>, vector<3x64xbf16>, vector<288x64xf32> -> vector<288x64xf32>
    %28 = arith.addf %22, %27 : vector<288x64xf32>
    %c20 = arith.constant 20 : index
    %c0_15 = arith.constant 0 : index
    %29 = vector.load %arg1[%c20, %c0_15] : memref<656x3xf32, #tpu.memory_space<vmem>>, vector<288x3xf32>
    %30 = arith.truncf %29 : vector<288x3xf32> to vector<288x3xbf16>
    %c15 = arith.constant 15 : index
    %c0_16 = arith.constant 0 : index
    %31 = vector.load %arg2[%c15, %c0_16] : memref<27x64xf32, #tpu.memory_space<vmem>>, vector<3x64xf32>
    %32 = arith.truncf %31 : vector<3x64xf32> to vector<3x64xbf16>
    %cst_17 = arith.constant dense<0.000000e+00> : vector<288x64xf32>
    %33 = tpu.matmul %30, %32, %cst_17 {dimension_numbers = #tpu.dot_dimension_numbers<[1], [0], [0], [1], [0, 0, 1, 1], [], []>} : vector<288x3xbf16>, vector<3x64xbf16>, vector<288x64xf32> -> vector<288x64xf32>
    %34 = arith.addf %28, %33 : vector<288x64xf32>
    %c36 = arith.constant 36 : index
    %c0_18 = arith.constant 0 : index
    %35 = vector.load %arg1[%c36, %c0_18] : memref<656x3xf32, #tpu.memory_space<vmem>>, vector<288x3xf32>
    %36 = arith.truncf %35 : vector<288x3xf32> to vector<288x3xbf16>
    %c18_19 = arith.constant 18 : index
    %c0_20 = arith.constant 0 : index
    %37 = vector.load %arg2[%c18_19, %c0_20] : memref<27x64xf32, #tpu.memory_space<vmem>>, vector<3x64xf32>
    %38 = arith.truncf %37 : vector<3x64xf32> to vector<3x64xbf16>
    %cst_21 = arith.constant dense<0.000000e+00> : vector<288x64xf32>
    %39 = tpu.matmul %36, %38, %cst_21 {dimension_numbers = #tpu.dot_dimension_numbers<[1], [0], [0], [1], [0, 0, 1, 1], [], []>} : vector<288x3xbf16>, vector<3x64xbf16>, vector<288x64xf32> -> vector<288x64xf32>
    %40 = arith.addf %34, %39 : vector<288x64xf32>
    %c37 = arith.constant 37 : index
    %c0_22 = arith.constant 0 : index
    %41 = vector.load %arg1[%c37, %c0_22] : memref<656x3xf32, #tpu.memory_space<vmem>>, vector<288x3xf32>
    %42 = arith.truncf %41 : vector<288x3xf32> to vector<288x3xbf16>
    %c21 = arith.constant 21 : index
    %c0_23 = arith.constant 0 : index
    %43 = vector.load %arg2[%c21, %c0_23] : memref<27x64xf32, #tpu.memory_space<vmem>>, vector<3x64xf32>
    %44 = arith.truncf %43 : vector<3x64xf32> to vector<3x64xbf16>
    %cst_24 = arith.constant dense<0.000000e+00> : vector<288x64xf32>
    %45 = tpu.matmul %42, %44, %cst_24 {dimension_numbers = #tpu.dot_dimension_numbers<[1], [0], [0], [1], [0, 0, 1, 1], [], []>} : vector<288x3xbf16>, vector<3x64xbf16>, vector<288x64xf32> -> vector<288x64xf32>
    %46 = arith.addf %40, %45 : vector<288x64xf32>
    %c38 = arith.constant 38 : index
    %c0_25 = arith.constant 0 : index
    %47 = vector.load %arg1[%c38, %c0_25] : memref<656x3xf32, #tpu.memory_space<vmem>>, vector<288x3xf32>
    %48 = arith.truncf %47 : vector<288x3xf32> to vector<288x3xbf16>
    %c24 = arith.constant 24 : index
    %c0_26 = arith.constant 0 : index
    %49 = vector.load %arg2[%c24, %c0_26] : memref<27x64xf32, #tpu.memory_space<vmem>>, vector<3x64xf32>
    %50 = arith.truncf %49 : vector<3x64xf32> to vector<3x64xbf16>
    %cst_27 = arith.constant dense<0.000000e+00> : vector<288x64xf32>
    %51 = tpu.matmul %48, %50, %cst_27 {dimension_numbers = #tpu.dot_dimension_numbers<[1], [0], [0], [1], [0, 0, 1, 1], [], []>} : vector<288x3xbf16>, vector<3x64xbf16>, vector<288x64xf32> -> vector<288x64xf32>
    %52 = arith.addf %46, %51 : vector<288x64xf32>
    %c0_28 = arith.constant 0 : index
    %c0_29 = arith.constant 0 : index
    %53 = vector.load %arg3[%c0_28, %c0_29] : memref<1x64xf32, #tpu.memory_space<vmem>>, vector<1x64xf32>
    %54 = vector.broadcast %53 : vector<1x64xf32> to vector<288x64xf32>
    %55 = arith.addf %52, %54 : vector<288x64xf32>
    %cst_30 = arith.constant 0.000000e+00 : f32
    %56 = vector.broadcast %cst_30 : f32 to vector<288x64xf32>
    %57 = arith.maximumf %55, %56 : vector<288x64xf32>
    %c0_31 = arith.constant 0 : index
    %c0_32 = arith.constant 0 : index
    %58 = vector.load %arg14[%c0_31, %c0_32] : memref<288x64xf32, #tpu.memory_space<vmem>>, vector<288x64xf32>
    tpu.vector_store %arg14[%c0_31, %c0_32], %57 {strides = array<i32>} : memref<288x64xf32, #tpu.memory_space<vmem>>, vector<288x64xf32>,
    %c0_33 = arith.constant 0 : index
    %c0_34 = arith.constant 0 : index
    %59 = vector.load %arg14[%c0_33, %c0_34] : memref<288x64xf32, #tpu.memory_space<vmem>>, vector<267x64xf32>
    %c1_35 = arith.constant 1 : index
    %c0_36 = arith.constant 0 : index
    %60 = vector.load %arg14[%c1_35, %c0_36] : memref<288x64xf32, #tpu.memory_space<vmem>>, vector<267x64xf32>
    %61 = arith.maximumf %59, %60 : vector<267x64xf32>
    %c18_37 = arith.constant 18 : index
    %c0_38 = arith.constant 0 : index
    %62 = vector.load %arg14[%c18_37, %c0_38] : memref<288x64xf32, #tpu.memory_space<vmem>>, vector<267x64xf32>
    %c19_39 = arith.constant 19 : index
    %c0_40 = arith.constant 0 : index
    %63 = vector.load %arg14[%c19_39, %c0_40] : memref<288x64xf32, #tpu.memory_space<vmem>>, vector<267x64xf32>
    %64 = arith.maximumf %62, %63 : vector<267x64xf32>
    %65 = arith.maximumf %61, %64 : vector<267x64xf32>
    %c0_41 = arith.constant 0 : index
    %c0_42 = arith.constant 0 : index
    %66 = vector.load %arg11[%c0_41, %c0_42] : memref<104x267xbf16, #tpu.memory_space<vmem>>, vector<104x267xbf16>
    %67 = arith.truncf %65 : vector<267x64xf32> to vector<267x64xbf16>
    %cst_43 = arith.constant dense<0.000000e+00> : vector<104x64xf32>
    %68 = tpu.matmul %66, %67, %cst_43 {dimension_numbers = #tpu.dot_dimension_numbers<[1], [0], [0], [1], [0, 0, 1, 1], [], []>} : vector<104x267xbf16>, vector<267x64xbf16>, vector<104x64xf32> -> vector<104x64xf32>
    %c0_44 = arith.constant 0 : index
    %c0_45 = arith.constant 0 : index
    %69 = vector.load %arg15[%c0_44, %c0_45] : memref<104x64xf32, #tpu.memory_space<vmem>>, vector<104x64xf32>
    tpu.vector_store %arg15[%c0_44, %c0_45], %68 {strides = array<i32>} : memref<104x64xf32, #tpu.memory_space<vmem>>, vector<104x64xf32>,
    %c0_46 = arith.constant 0 : index
    %c0_47 = arith.constant 0 : index
    %70 = vector.load %arg15[%c0_46, %c0_47] : memref<104x64xf32, #tpu.memory_space<vmem>>, vector<80x64xf32>
    %71 = arith.truncf %70 : vector<80x64xf32> to vector<80x64xbf16>
    %c0_48 = arith.constant 0 : index
    %c0_49 = arith.constant 0 : index
    %72 = vector.load %arg4[%c0_48, %c0_49] : memref<576x128xbf16, #tpu.memory_space<vmem>>, vector<64x128xbf16>
    %cst_50 = arith.constant dense<0.000000e+00> : vector<80x128xf32>
    %73 = tpu.matmul %71, %72, %cst_50 {dimension_numbers = #tpu.dot_dimension_numbers<[1], [0], [0], [1], [0, 0, 1, 1], [], []>} : vector<80x64xbf16>, vector<64x128xbf16>, vector<80x128xf32> -> vector<80x128xf32>
    %c1_51 = arith.constant 1 : index
    %c0_52 = arith.constant 0 : index
    %74 = vector.load %arg15[%c1_51, %c0_52] : memref<104x64xf32, #tpu.memory_space<vmem>>, vector<80x64xf32>
    %75 = arith.truncf %74 : vector<80x64xf32> to vector<80x64xbf16>
    %c64 = arith.constant 64 : index
    %c0_53 = arith.constant 0 : index
    %76 = vector.load %arg4[%c64, %c0_53] : memref<576x128xbf16, #tpu.memory_space<vmem>>, vector<64x128xbf16>
    %cst_54 = arith.constant dense<0.000000e+00> : vector<80x128xf32>
    %77 = tpu.matmul %75, %76, %cst_54 {dimension_numbers = #tpu.dot_dimension_numbers<[1], [0], [0], [1], [0, 0, 1, 1], [], []>} : vector<80x64xbf16>, vector<64x128xbf16>, vector<80x128xf32> -> vector<80x128xf32>
    %78 = arith.addf %73, %77 : vector<80x128xf32>
    %c2_55 = arith.constant 2 : index
    %c0_56 = arith.constant 0 : index
    %79 = vector.load %arg15[%c2_55, %c0_56] : memref<104x64xf32, #tpu.memory_space<vmem>>, vector<80x64xf32>
    %80 = arith.truncf %79 : vector<80x64xf32> to vector<80x64xbf16>
    %c128 = arith.constant 128 : index
    %c0_57 = arith.constant 0 : index
    %81 = vector.load %arg4[%c128, %c0_57] : memref<576x128xbf16, #tpu.memory_space<vmem>>, vector<64x128xbf16>
    %cst_58 = arith.constant dense<0.000000e+00> : vector<80x128xf32>
    %82 = tpu.matmul %80, %81, %cst_58 {dimension_numbers = #tpu.dot_dimension_numbers<[1], [0], [0], [1], [0, 0, 1, 1], [], []>} : vector<80x64xbf16>, vector<64x128xbf16>, vector<80x128xf32> -> vector<80x128xf32>
    %83 = arith.addf %78, %82 : vector<80x128xf32>
    %c10 = arith.constant 10 : index
    %c0_59 = arith.constant 0 : index
    %84 = vector.load %arg15[%c10, %c0_59] : memref<104x64xf32, #tpu.memory_space<vmem>>, vector<80x64xf32>
    %85 = arith.truncf %84 : vector<80x64xf32> to vector<80x64xbf16>
    %c192 = arith.constant 192 : index
    %c0_60 = arith.constant 0 : index
    %86 = vector.load %arg4[%c192, %c0_60] : memref<576x128xbf16, #tpu.memory_space<vmem>>, vector<64x128xbf16>
    %cst_61 = arith.constant dense<0.000000e+00> : vector<80x128xf32>
    %87 = tpu.matmul %85, %86, %cst_61 {dimension_numbers = #tpu.dot_dimension_numbers<[1], [0], [0], [1], [0, 0, 1, 1], [], []>} : vector<80x64xbf16>, vector<64x128xbf16>, vector<80x128xf32> -> vector<80x128xf32>
    %88 = arith.addf %83, %87 : vector<80x128xf32>
    %c11 = arith.constant 11 : index
    %c0_62 = arith.constant 0 : index
    %89 = vector.load %arg15[%c11, %c0_62] : memref<104x64xf32, #tpu.memory_space<vmem>>, vector<80x64xf32>
    %90 = arith.truncf %89 : vector<80x64xf32> to vector<80x64xbf16>
    %c256 = arith.constant 256 : index
    %c0_63 = arith.constant 0 : index
    %91 = vector.load %arg4[%c256, %c0_63] : memref<576x128xbf16, #tpu.memory_space<vmem>>, vector<64x128xbf16>
    %cst_64 = arith.constant dense<0.000000e+00> : vector<80x128xf32>
    %92 = tpu.matmul %90, %91, %cst_64 {dimension_numbers = #tpu.dot_dimension_numbers<[1], [0], [0], [1], [0, 0, 1, 1], [], []>} : vector<80x64xbf16>, vector<64x128xbf16>, vector<80x128xf32> -> vector<80x128xf32>
    %93 = arith.addf %88, %92 : vector<80x128xf32>
    %c12_65 = arith.constant 12 : index
    %c0_66 = arith.constant 0 : index
    %94 = vector.load %arg15[%c12_65, %c0_66] : memref<104x64xf32, #tpu.memory_space<vmem>>, vector<80x64xf32>
    %95 = arith.truncf %94 : vector<80x64xf32> to vector<80x64xbf16>
    %c320 = arith.constant 320 : index
    %c0_67 = arith.constant 0 : index
    %96 = vector.load %arg4[%c320, %c0_67] : memref<576x128xbf16, #tpu.memory_space<vmem>>, vector<64x128xbf16>
    %cst_68 = arith.constant dense<0.000000e+00> : vector<80x128xf32>
    %97 = tpu.matmul %95, %96, %cst_68 {dimension_numbers = #tpu.dot_dimension_numbers<[1], [0], [0], [1], [0, 0, 1, 1], [], []>} : vector<80x64xbf16>, vector<64x128xbf16>, vector<80x128xf32> -> vector<80x128xf32>
    %98 = arith.addf %93, %97 : vector<80x128xf32>
    %c20_69 = arith.constant 20 : index
    %c0_70 = arith.constant 0 : index
    %99 = vector.load %arg15[%c20_69, %c0_70] : memref<104x64xf32, #tpu.memory_space<vmem>>, vector<80x64xf32>
    %100 = arith.truncf %99 : vector<80x64xf32> to vector<80x64xbf16>
    %c384 = arith.constant 384 : index
    %c0_71 = arith.constant 0 : index
    %101 = vector.load %arg4[%c384, %c0_71] : memref<576x128xbf16, #tpu.memory_space<vmem>>, vector<64x128xbf16>
    %cst_72 = arith.constant dense<0.000000e+00> : vector<80x128xf32>
    %102 = tpu.matmul %100, %101, %cst_72 {dimension_numbers = #tpu.dot_dimension_numbers<[1], [0], [0], [1], [0, 0, 1, 1], [], []>} : vector<80x64xbf16>, vector<64x128xbf16>, vector<80x128xf32> -> vector<80x128xf32>
    %103 = arith.addf %98, %102 : vector<80x128xf32>
    %c21_73 = arith.constant 21 : index
    %c0_74 = arith.constant 0 : index
    %104 = vector.load %arg15[%c21_73, %c0_74] : memref<104x64xf32, #tpu.memory_space<vmem>>, vector<80x64xf32>
    %105 = arith.truncf %104 : vector<80x64xf32> to vector<80x64xbf16>
    %c448 = arith.constant 448 : index
    %c0_75 = arith.constant 0 : index
    %106 = vector.load %arg4[%c448, %c0_75] : memref<576x128xbf16, #tpu.memory_space<vmem>>, vector<64x128xbf16>
    %cst_76 = arith.constant dense<0.000000e+00> : vector<80x128xf32>
    %107 = tpu.matmul %105, %106, %cst_76 {dimension_numbers = #tpu.dot_dimension_numbers<[1], [0], [0], [1], [0, 0, 1, 1], [], []>} : vector<80x64xbf16>, vector<64x128xbf16>, vector<80x128xf32> -> vector<80x128xf32>
    %108 = arith.addf %103, %107 : vector<80x128xf32>
    %c22 = arith.constant 22 : index
    %c0_77 = arith.constant 0 : index
    %109 = vector.load %arg15[%c22, %c0_77] : memref<104x64xf32, #tpu.memory_space<vmem>>, vector<80x64xf32>
    %110 = arith.truncf %109 : vector<80x64xf32> to vector<80x64xbf16>
    %c512 = arith.constant 512 : index
    %c0_78 = arith.constant 0 : index
    %111 = vector.load %arg4[%c512, %c0_78] : memref<576x128xbf16, #tpu.memory_space<vmem>>, vector<64x128xbf16>
    %cst_79 = arith.constant dense<0.000000e+00> : vector<80x128xf32>
    %112 = tpu.matmul %110, %111, %cst_79 {dimension_numbers = #tpu.dot_dimension_numbers<[1], [0], [0], [1], [0, 0, 1, 1], [], []>} : vector<80x64xbf16>, vector<64x128xbf16>, vector<80x128xf32> -> vector<80x128xf32>
    %113 = arith.addf %108, %112 : vector<80x128xf32>
    %c0_80 = arith.constant 0 : index
    %c0_81 = arith.constant 0 : index
    %114 = vector.load %arg5[%c0_80, %c0_81] : memref<1x128xf32, #tpu.memory_space<vmem>>, vector<1x128xf32>
    %115 = vector.broadcast %114 : vector<1x128xf32> to vector<80x128xf32>
    %116 = arith.addf %113, %115 : vector<80x128xf32>
    %cst_82 = arith.constant 0.000000e+00 : f32
    %117 = vector.broadcast %cst_82 : f32 to vector<80x128xf32>
    %118 = arith.maximumf %116, %117 : vector<80x128xf32>
    %c0_83 = arith.constant 0 : index
    %c0_84 = arith.constant 0 : index
    %119 = vector.load %arg16[%c0_83, %c0_84] : memref<80x128xf32, #tpu.memory_space<vmem>>, vector<80x128xf32>
    tpu.vector_store %arg16[%c0_83, %c0_84], %118 {strides = array<i32>} : memref<80x128xf32, #tpu.memory_space<vmem>>, vector<80x128xf32>,
    %c0_85 = arith.constant 0 : index
    %c0_86 = arith.constant 0 : index
    %120 = vector.load %arg16[%c0_85, %c0_86] : memref<80x128xf32, #tpu.memory_space<vmem>>, vector<67x128xf32>
    %c1_87 = arith.constant 1 : index
    %c0_88 = arith.constant 0 : index
    %121 = vector.load %arg16[%c1_87, %c0_88] : memref<80x128xf32, #tpu.memory_space<vmem>>, vector<67x128xf32>
    %122 = arith.maximumf %120, %121 : vector<67x128xf32>
    %c10_89 = arith.constant 10 : index
    %c0_90 = arith.constant 0 : index
    %123 = vector.load %arg16[%c10_89, %c0_90] : memref<80x128xf32, #tpu.memory_space<vmem>>, vector<67x128xf32>
    %c11_91 = arith.constant 11 : index
    %c0_92 = arith.constant 0 : index
    %124 = vector.load %arg16[%c11_91, %c0_92] : memref<80x128xf32, #tpu.memory_space<vmem>>, vector<67x128xf32>
    %125 = arith.maximumf %123, %124 : vector<67x128xf32>
    %126 = arith.maximumf %122, %125 : vector<67x128xf32>
    %c0_93 = arith.constant 0 : index
    %c0_94 = arith.constant 0 : index
    %127 = vector.load %arg12[%c0_93, %c0_94] : memref<40x67xbf16, #tpu.memory_space<vmem>>, vector<40x67xbf16>
    %128 = arith.truncf %126 : vector<67x128xf32> to vector<67x128xbf16>
    %cst_95 = arith.constant dense<0.000000e+00> : vector<40x128xf32>
    %129 = tpu.matmul %127, %128, %cst_95 {dimension_numbers = #tpu.dot_dimension_numbers<[1], [0], [0], [1], [0, 0, 1, 1], [], []>} : vector<40x67xbf16>, vector<67x128xbf16>, vector<40x128xf32> -> vector<40x128xf32>
    %c0_96 = arith.constant 0 : index
    %c0_97 = arith.constant 0 : index
    %130 = vector.load %arg17[%c0_96, %c0_97] : memref<40x128xf32, #tpu.memory_space<vmem>>, vector<40x128xf32>
    tpu.vector_store %arg17[%c0_96, %c0_97], %129 {strides = array<i32>} : memref<40x128xf32, #tpu.memory_space<vmem>>, vector<40x128xf32>,
    %c0_98 = arith.constant 0 : index
    %c0_99 = arith.constant 0 : index
    %131 = vector.load %arg17[%c0_98, %c0_99] : memref<40x128xf32, #tpu.memory_space<vmem>>, vector<24x128xf32>
    %132 = arith.truncf %131 : vector<24x128xf32> to vector<24x128xbf16>
    %c0_100 = arith.constant 0 : index
    %c0_101 = arith.constant 0 : index
    %133 = vector.load %arg6[%c0_100, %c0_101] : memref<1152x256xbf16, #tpu.memory_space<vmem>>, vector<128x256xbf16>
    %cst_102 = arith.constant dense<0.000000e+00> : vector<24x256xf32>
    %134 = tpu.matmul %132, %133, %cst_102 {dimension_numbers = #tpu.dot_dimension_numbers<[1], [0], [0], [1], [0, 0, 1, 1], [], []>} : vector<24x128xbf16>, vector<128x256xbf16>, vector<24x256xf32> -> vector<24x256xf32>
    %c1_103 = arith.constant 1 : index
    %c0_104 = arith.constant 0 : index
    %135 = vector.load %arg17[%c1_103, %c0_104] : memref<40x128xf32, #tpu.memory_space<vmem>>, vector<24x128xf32>
    %136 = arith.truncf %135 : vector<24x128xf32> to vector<24x128xbf16>
    %c128_105 = arith.constant 128 : index
    %c0_106 = arith.constant 0 : index
    %137 = vector.load %arg6[%c128_105, %c0_106] : memref<1152x256xbf16, #tpu.memory_space<vmem>>, vector<128x256xbf16>
    %cst_107 = arith.constant dense<0.000000e+00> : vector<24x256xf32>
    %138 = tpu.matmul %136, %137, %cst_107 {dimension_numbers = #tpu.dot_dimension_numbers<[1], [0], [0], [1], [0, 0, 1, 1], [], []>} : vector<24x128xbf16>, vector<128x256xbf16>, vector<24x256xf32> -> vector<24x256xf32>
    %139 = arith.addf %134, %138 : vector<24x256xf32>
    %c2_108 = arith.constant 2 : index
    %c0_109 = arith.constant 0 : index
    %140 = vector.load %arg17[%c2_108, %c0_109] : memref<40x128xf32, #tpu.memory_space<vmem>>, vector<24x128xf32>
    %141 = arith.truncf %140 : vector<24x128xf32> to vector<24x128xbf16>
    %c256_110 = arith.constant 256 : index
    %c0_111 = arith.constant 0 : index
    %142 = vector.load %arg6[%c256_110, %c0_111] : memref<1152x256xbf16, #tpu.memory_space<vmem>>, vector<128x256xbf16>
    %cst_112 = arith.constant dense<0.000000e+00> : vector<24x256xf32>
    %143 = tpu.matmul %141, %142, %cst_112 {dimension_numbers = #tpu.dot_dimension_numbers<[1], [0], [0], [1], [0, 0, 1, 1], [], []>} : vector<24x128xbf16>, vector<128x256xbf16>, vector<24x256xf32> -> vector<24x256xf32>
    %144 = arith.addf %139, %143 : vector<24x256xf32>
    %c6_113 = arith.constant 6 : index
    %c0_114 = arith.constant 0 : index
    %145 = vector.load %arg17[%c6_113, %c0_114] : memref<40x128xf32, #tpu.memory_space<vmem>>, vector<24x128xf32>
    %146 = arith.truncf %145 : vector<24x128xf32> to vector<24x128xbf16>
    %c384_115 = arith.constant 384 : index
    %c0_116 = arith.constant 0 : index
    %147 = vector.load %arg6[%c384_115, %c0_116] : memref<1152x256xbf16, #tpu.memory_space<vmem>>, vector<128x256xbf16>
    %cst_117 = arith.constant dense<0.000000e+00> : vector<24x256xf32>
    %148 = tpu.matmul %146, %147, %cst_117 {dimension_numbers = #tpu.dot_dimension_numbers<[1], [0], [0], [1], [0, 0, 1, 1], [], []>} : vector<24x128xbf16>, vector<128x256xbf16>, vector<24x256xf32> -> vector<24x256xf32>
    %149 = arith.addf %144, %148 : vector<24x256xf32>
    %c7 = arith.constant 7 : index
    %c0_118 = arith.constant 0 : index
    %150 = vector.load %arg17[%c7, %c0_118] : memref<40x128xf32, #tpu.memory_space<vmem>>, vector<24x128xf32>
    %151 = arith.truncf %150 : vector<24x128xf32> to vector<24x128xbf16>
    %c512_119 = arith.constant 512 : index
    %c0_120 = arith.constant 0 : index
    %152 = vector.load %arg6[%c512_119, %c0_120] : memref<1152x256xbf16, #tpu.memory_space<vmem>>, vector<128x256xbf16>
    %cst_121 = arith.constant dense<0.000000e+00> : vector<24x256xf32>
    %153 = tpu.matmul %151, %152, %cst_121 {dimension_numbers = #tpu.dot_dimension_numbers<[1], [0], [0], [1], [0, 0, 1, 1], [], []>} : vector<24x128xbf16>, vector<128x256xbf16>, vector<24x256xf32> -> vector<24x256xf32>
    %154 = arith.addf %149, %153 : vector<24x256xf32>
    %c8 = arith.constant 8 : index
    %c0_122 = arith.constant 0 : index
    %155 = vector.load %arg17[%c8, %c0_122] : memref<40x128xf32, #tpu.memory_space<vmem>>, vector<24x128xf32>
    %156 = arith.truncf %155 : vector<24x128xf32> to vector<24x128xbf16>
    %c640 = arith.constant 640 : index
    %c0_123 = arith.constant 0 : index
    %157 = vector.load %arg6[%c640, %c0_123] : memref<1152x256xbf16, #tpu.memory_space<vmem>>, vector<128x256xbf16>
    %cst_124 = arith.constant dense<0.000000e+00> : vector<24x256xf32>
    %158 = tpu.matmul %156, %157, %cst_124 {dimension_numbers = #tpu.dot_dimension_numbers<[1], [0], [0], [1], [0, 0, 1, 1], [], []>} : vector<24x128xbf16>, vector<128x256xbf16>, vector<24x256xf32> -> vector<24x256xf32>
    %159 = arith.addf %154, %158 : vector<24x256xf32>
    %c12_125 = arith.constant 12 : index
    %c0_126 = arith.constant 0 : index
    %160 = vector.load %arg17[%c12_125, %c0_126] : memref<40x128xf32, #tpu.memory_space<vmem>>, vector<24x128xf32>
    %161 = arith.truncf %160 : vector<24x128xf32> to vector<24x128xbf16>
    %c768 = arith.constant 768 : index
    %c0_127 = arith.constant 0 : index
    %162 = vector.load %arg6[%c768, %c0_127] : memref<1152x256xbf16, #tpu.memory_space<vmem>>, vector<128x256xbf16>
    %cst_128 = arith.constant dense<0.000000e+00> : vector<24x256xf32>
    %163 = tpu.matmul %161, %162, %cst_128 {dimension_numbers = #tpu.dot_dimension_numbers<[1], [0], [0], [1], [0, 0, 1, 1], [], []>} : vector<24x128xbf16>, vector<128x256xbf16>, vector<24x256xf32> -> vector<24x256xf32>
    %164 = arith.addf %159, %163 : vector<24x256xf32>
    %c13 = arith.constant 13 : index
    %c0_129 = arith.constant 0 : index
    %165 = vector.load %arg17[%c13, %c0_129] : memref<40x128xf32, #tpu.memory_space<vmem>>, vector<24x128xf32>
    %166 = arith.truncf %165 : vector<24x128xf32> to vector<24x128xbf16>
    %c896 = arith.constant 896 : index
    %c0_130 = arith.constant 0 : index
    %167 = vector.load %arg6[%c896, %c0_130] : memref<1152x256xbf16, #tpu.memory_space<vmem>>, vector<128x256xbf16>
    %cst_131 = arith.constant dense<0.000000e+00> : vector<24x256xf32>
    %168 = tpu.matmul %166, %167, %cst_131 {dimension_numbers = #tpu.dot_dimension_numbers<[1], [0], [0], [1], [0, 0, 1, 1], [], []>} : vector<24x128xbf16>, vector<128x256xbf16>, vector<24x256xf32> -> vector<24x256xf32>
    %169 = arith.addf %164, %168 : vector<24x256xf32>
    %c14 = arith.constant 14 : index
    %c0_132 = arith.constant 0 : index
    %170 = vector.load %arg17[%c14, %c0_132] : memref<40x128xf32, #tpu.memory_space<vmem>>, vector<24x128xf32>
    %171 = arith.truncf %170 : vector<24x128xf32> to vector<24x128xbf16>
    %c1024 = arith.constant 1024 : index
    %c0_133 = arith.constant 0 : index
    %172 = vector.load %arg6[%c1024, %c0_133] : memref<1152x256xbf16, #tpu.memory_space<vmem>>, vector<128x256xbf16>
    %cst_134 = arith.constant dense<0.000000e+00> : vector<24x256xf32>
    %173 = tpu.matmul %171, %172, %cst_134 {dimension_numbers = #tpu.dot_dimension_numbers<[1], [0], [0], [1], [0, 0, 1, 1], [], []>} : vector<24x128xbf16>, vector<128x256xbf16>, vector<24x256xf32> -> vector<24x256xf32>
    %174 = arith.addf %169, %173 : vector<24x256xf32>
    %c0_135 = arith.constant 0 : index
    %c0_136 = arith.constant 0 : index
    %175 = vector.load %arg7[%c0_135, %c0_136] : memref<1x256xf32, #tpu.memory_space<vmem>>, vector<1x256xf32>
    %176 = vector.broadcast %175 : vector<1x256xf32> to vector<24x256xf32>
    %177 = arith.addf %174, %176 : vector<24x256xf32>
    %cst_137 = arith.constant 0.000000e+00 : f32
    %178 = vector.broadcast %cst_137 : f32 to vector<24x256xf32>
    %179 = arith.maximumf %177, %178 : vector<24x256xf32>
    %180 = arith.truncf %179 : vector<24x256xf32> to vector<24x256xbf16>
    %c0_138 = arith.constant 0 : index
    %c0_139 = arith.constant 0 : index
    %181 = vector.load %arg8[%c0_138, %c0_139] : memref<256x8xbf16, #tpu.memory_space<vmem>>, vector<256x8xbf16>
    %cst_140 = arith.constant dense<0.000000e+00> : vector<24x8xf32>
    %182 = tpu.matmul %180, %181, %cst_140 {dimension_numbers = #tpu.dot_dimension_numbers<[1], [0], [0], [1], [0, 0, 1, 1], [], []>} : vector<24x256xbf16>, vector<256x8xbf16>, vector<24x8xf32> -> vector<24x8xf32>
    %c0_141 = arith.constant 0 : index
    %c0_142 = arith.constant 0 : index
    %183 = vector.load %arg10[%c0_141, %c0_142] : memref<256x24xf32, #tpu.memory_space<vmem>>, vector<256x24xf32>
    %cst_143 = arith.constant dense<0.000000e+00> : vector<256x8xf32>
    %184 = tpu.matmul %183, %182, %cst_143 {dimension_numbers = #tpu.dot_dimension_numbers<[1], [0], [0], [1], [0, 0, 1, 1], [], []>} : vector<256x24xf32>, vector<24x8xf32>, vector<256x8xf32> -> vector<256x8xf32>
    %c0_144 = arith.constant 0 : index
    %c0_145 = arith.constant 0 : index
    %185 = vector.load %arg9[%c0_144, %c0_145] : memref<1x8xf32, #tpu.memory_space<vmem>>, vector<1x8xf32>
    %186 = vector.broadcast %185 : vector<1x8xf32> to vector<256x8xf32>
    %187 = arith.addf %184, %186 : vector<256x8xf32>
    %c0_146 = arith.constant 0 : index
    %c0_147 = arith.constant 0 : index
    %188 = vector.load %arg13[%c0_146, %c0_147] : memref<512x8xf32, #tpu.memory_space<vmem>>, vector<256x8xf32>
    tpu.vector_store %arg13[%c0_146, %c0_147], %187 {strides = array<i32>} : memref<512x8xf32, #tpu.memory_space<vmem>>, vector<256x8xf32>,
    %c328 = arith.constant 328 : index
    %c0_148 = arith.constant 0 : index
    %189 = vector.load %arg1[%c328, %c0_148] : memref<656x3xf32, #tpu.memory_space<vmem>>, vector<288x3xf32>
    %190 = arith.truncf %189 : vector<288x3xf32> to vector<288x3xbf16>
    %c0_149 = arith.constant 0 : index
    %c0_150 = arith.constant 0 : index
    %191 = vector.load %arg2[%c0_149, %c0_150] : memref<27x64xf32, #tpu.memory_space<vmem>>, vector<3x64xf32>
    %192 = arith.truncf %191 : vector<3x64xf32> to vector<3x64xbf16>
    %cst_151 = arith.constant dense<0.000000e+00> : vector<288x64xf32>
    %193 = tpu.matmul %190, %192, %cst_151 {dimension_numbers = #tpu.dot_dimension_numbers<[1], [0], [0], [1], [0, 0, 1, 1], [], []>} : vector<288x3xbf16>, vector<3x64xbf16>, vector<288x64xf32> -> vector<288x64xf32>
    %c329 = arith.constant 329 : index
    %c0_152 = arith.constant 0 : index
    %194 = vector.load %arg1[%c329, %c0_152] : memref<656x3xf32, #tpu.memory_space<vmem>>, vector<288x3xf32>
    %195 = arith.truncf %194 : vector<288x3xf32> to vector<288x3xbf16>
    %c3_153 = arith.constant 3 : index
    %c0_154 = arith.constant 0 : index
    %196 = vector.load %arg2[%c3_153, %c0_154] : memref<27x64xf32, #tpu.memory_space<vmem>>, vector<3x64xf32>
    %197 = arith.truncf %196 : vector<3x64xf32> to vector<3x64xbf16>
    %cst_155 = arith.constant dense<0.000000e+00> : vector<288x64xf32>
    %198 = tpu.matmul %195, %197, %cst_155 {dimension_numbers = #tpu.dot_dimension_numbers<[1], [0], [0], [1], [0, 0, 1, 1], [], []>} : vector<288x3xbf16>, vector<3x64xbf16>, vector<288x64xf32> -> vector<288x64xf32>
    %199 = arith.addf %193, %198 : vector<288x64xf32>
    %c330 = arith.constant 330 : index
    %c0_156 = arith.constant 0 : index
    %200 = vector.load %arg1[%c330, %c0_156] : memref<656x3xf32, #tpu.memory_space<vmem>>, vector<288x3xf32>
    %201 = arith.truncf %200 : vector<288x3xf32> to vector<288x3xbf16>
    %c6_157 = arith.constant 6 : index
    %c0_158 = arith.constant 0 : index
    %202 = vector.load %arg2[%c6_157, %c0_158] : memref<27x64xf32, #tpu.memory_space<vmem>>, vector<3x64xf32>
    %203 = arith.truncf %202 : vector<3x64xf32> to vector<3x64xbf16>
    %cst_159 = arith.constant dense<0.000000e+00> : vector<288x64xf32>
    %204 = tpu.matmul %201, %203, %cst_159 {dimension_numbers = #tpu.dot_dimension_numbers<[1], [0], [0], [1], [0, 0, 1, 1], [], []>} : vector<288x3xbf16>, vector<3x64xbf16>, vector<288x64xf32> -> vector<288x64xf32>
    %205 = arith.addf %199, %204 : vector<288x64xf32>
    %c346 = arith.constant 346 : index
    %c0_160 = arith.constant 0 : index
    %206 = vector.load %arg1[%c346, %c0_160] : memref<656x3xf32, #tpu.memory_space<vmem>>, vector<288x3xf32>
    %207 = arith.truncf %206 : vector<288x3xf32> to vector<288x3xbf16>
    %c9_161 = arith.constant 9 : index
    %c0_162 = arith.constant 0 : index
    %208 = vector.load %arg2[%c9_161, %c0_162] : memref<27x64xf32, #tpu.memory_space<vmem>>, vector<3x64xf32>
    %209 = arith.truncf %208 : vector<3x64xf32> to vector<3x64xbf16>
    %cst_163 = arith.constant dense<0.000000e+00> : vector<288x64xf32>
    %210 = tpu.matmul %207, %209, %cst_163 {dimension_numbers = #tpu.dot_dimension_numbers<[1], [0], [0], [1], [0, 0, 1, 1], [], []>} : vector<288x3xbf16>, vector<3x64xbf16>, vector<288x64xf32> -> vector<288x64xf32>
    %211 = arith.addf %205, %210 : vector<288x64xf32>
    %c347 = arith.constant 347 : index
    %c0_164 = arith.constant 0 : index
    %212 = vector.load %arg1[%c347, %c0_164] : memref<656x3xf32, #tpu.memory_space<vmem>>, vector<288x3xf32>
    %213 = arith.truncf %212 : vector<288x3xf32> to vector<288x3xbf16>
    %c12_165 = arith.constant 12 : index
    %c0_166 = arith.constant 0 : index
    %214 = vector.load %arg2[%c12_165, %c0_166] : memref<27x64xf32, #tpu.memory_space<vmem>>, vector<3x64xf32>
    %215 = arith.truncf %214 : vector<3x64xf32> to vector<3x64xbf16>
    %cst_167 = arith.constant dense<0.000000e+00> : vector<288x64xf32>
    %216 = tpu.matmul %213, %215, %cst_167 {dimension_numbers = #tpu.dot_dimension_numbers<[1], [0], [0], [1], [0, 0, 1, 1], [], []>} : vector<288x3xbf16>, vector<3x64xbf16>, vector<288x64xf32> -> vector<288x64xf32>
    %217 = arith.addf %211, %216 : vector<288x64xf32>
    %c348 = arith.constant 348 : index
    %c0_168 = arith.constant 0 : index
    %218 = vector.load %arg1[%c348, %c0_168] : memref<656x3xf32, #tpu.memory_space<vmem>>, vector<288x3xf32>
    %219 = arith.truncf %218 : vector<288x3xf32> to vector<288x3xbf16>
    %c15_169 = arith.constant 15 : index
    %c0_170 = arith.constant 0 : index
    %220 = vector.load %arg2[%c15_169, %c0_170] : memref<27x64xf32, #tpu.memory_space<vmem>>, vector<3x64xf32>
    %221 = arith.truncf %220 : vector<3x64xf32> to vector<3x64xbf16>
    %cst_171 = arith.constant dense<0.000000e+00> : vector<288x64xf32>
    %222 = tpu.matmul %219, %221, %cst_171 {dimension_numbers = #tpu.dot_dimension_numbers<[1], [0], [0], [1], [0, 0, 1, 1], [], []>} : vector<288x3xbf16>, vector<3x64xbf16>, vector<288x64xf32> -> vector<288x64xf32>
    %223 = arith.addf %217, %222 : vector<288x64xf32>
    %c364 = arith.constant 364 : index
    %c0_172 = arith.constant 0 : index
    %224 = vector.load %arg1[%c364, %c0_172] : memref<656x3xf32, #tpu.memory_space<vmem>>, vector<288x3xf32>
    %225 = arith.truncf %224 : vector<288x3xf32> to vector<288x3xbf16>
    %c18_173 = arith.constant 18 : index
    %c0_174 = arith.constant 0 : index
    %226 = vector.load %arg2[%c18_173, %c0_174] : memref<27x64xf32, #tpu.memory_space<vmem>>, vector<3x64xf32>
    %227 = arith.truncf %226 : vector<3x64xf32> to vector<3x64xbf16>
    %cst_175 = arith.constant dense<0.000000e+00> : vector<288x64xf32>
    %228 = tpu.matmul %225, %227, %cst_175 {dimension_numbers = #tpu.dot_dimension_numbers<[1], [0], [0], [1], [0, 0, 1, 1], [], []>} : vector<288x3xbf16>, vector<3x64xbf16>, vector<288x64xf32> -> vector<288x64xf32>
    %229 = arith.addf %223, %228 : vector<288x64xf32>
    %c365 = arith.constant 365 : index
    %c0_176 = arith.constant 0 : index
    %230 = vector.load %arg1[%c365, %c0_176] : memref<656x3xf32, #tpu.memory_space<vmem>>, vector<288x3xf32>
    %231 = arith.truncf %230 : vector<288x3xf32> to vector<288x3xbf16>
    %c21_177 = arith.constant 21 : index
    %c0_178 = arith.constant 0 : index
    %232 = vector.load %arg2[%c21_177, %c0_178] : memref<27x64xf32, #tpu.memory_space<vmem>>, vector<3x64xf32>
    %233 = arith.truncf %232 : vector<3x64xf32> to vector<3x64xbf16>
    %cst_179 = arith.constant dense<0.000000e+00> : vector<288x64xf32>
    %234 = tpu.matmul %231, %233, %cst_179 {dimension_numbers = #tpu.dot_dimension_numbers<[1], [0], [0], [1], [0, 0, 1, 1], [], []>} : vector<288x3xbf16>, vector<3x64xbf16>, vector<288x64xf32> -> vector<288x64xf32>
    %235 = arith.addf %229, %234 : vector<288x64xf32>
    %c366 = arith.constant 366 : index
    %c0_180 = arith.constant 0 : index
    %236 = vector.load %arg1[%c366, %c0_180] : memref<656x3xf32, #tpu.memory_space<vmem>>, vector<288x3xf32>
    %237 = arith.truncf %236 : vector<288x3xf32> to vector<288x3xbf16>
    %c24_181 = arith.constant 24 : index
    %c0_182 = arith.constant 0 : index
    %238 = vector.load %arg2[%c24_181, %c0_182] : memref<27x64xf32, #tpu.memory_space<vmem>>, vector<3x64xf32>
    %239 = arith.truncf %238 : vector<3x64xf32> to vector<3x64xbf16>
    %cst_183 = arith.constant dense<0.000000e+00> : vector<288x64xf32>
    %240 = tpu.matmul %237, %239, %cst_183 {dimension_numbers = #tpu.dot_dimension_numbers<[1], [0], [0], [1], [0, 0, 1, 1], [], []>} : vector<288x3xbf16>, vector<3x64xbf16>, vector<288x64xf32> -> vector<288x64xf32>
    %241 = arith.addf %235, %240 : vector<288x64xf32>
    %c0_184 = arith.constant 0 : index
    %c0_185 = arith.constant 0 : index
    %242 = vector.load %arg3[%c0_184, %c0_185] : memref<1x64xf32, #tpu.memory_space<vmem>>, vector<1x64xf32>
    %243 = vector.broadcast %242 : vector<1x64xf32> to vector<288x64xf32>
    %244 = arith.addf %241, %243 : vector<288x64xf32>
    %cst_186 = arith.constant 0.000000e+00 : f32
    %245 = vector.broadcast %cst_186 : f32 to vector<288x64xf32>
    %246 = arith.maximumf %244, %245 : vector<288x64xf32>
    %c0_187 = arith.constant 0 : index
    %c0_188 = arith.constant 0 : index
    %247 = vector.load %arg14[%c0_187, %c0_188] : memref<288x64xf32, #tpu.memory_space<vmem>>, vector<288x64xf32>
    tpu.vector_store %arg14[%c0_187, %c0_188], %246 {strides = array<i32>} : memref<288x64xf32, #tpu.memory_space<vmem>>, vector<288x64xf32>,
    %c0_189 = arith.constant 0 : index
    %c0_190 = arith.constant 0 : index
    %248 = vector.load %arg14[%c0_189, %c0_190] : memref<288x64xf32, #tpu.memory_space<vmem>>, vector<267x64xf32>
    %c1_191 = arith.constant 1 : index
    %c0_192 = arith.constant 0 : index
    %249 = vector.load %arg14[%c1_191, %c0_192] : memref<288x64xf32, #tpu.memory_space<vmem>>, vector<267x64xf32>
    %250 = arith.maximumf %248, %249 : vector<267x64xf32>
    %c18_193 = arith.constant 18 : index
    %c0_194 = arith.constant 0 : index
    %251 = vector.load %arg14[%c18_193, %c0_194] : memref<288x64xf32, #tpu.memory_space<vmem>>, vector<267x64xf32>
    %c19_195 = arith.constant 19 : index
    %c0_196 = arith.constant 0 : index
    %252 = vector.load %arg14[%c19_195, %c0_196] : memref<288x64xf32, #tpu.memory_space<vmem>>, vector<267x64xf32>
    %253 = arith.maximumf %251, %252 : vector<267x64xf32>
    %254 = arith.maximumf %250, %253 : vector<267x64xf32>
    %c0_197 = arith.constant 0 : index
    %c0_198 = arith.constant 0 : index
    %255 = vector.load %arg11[%c0_197, %c0_198] : memref<104x267xbf16, #tpu.memory_space<vmem>>, vector<104x267xbf16>
    %256 = arith.truncf %254 : vector<267x64xf32> to vector<267x64xbf16>
    %cst_199 = arith.constant dense<0.000000e+00> : vector<104x64xf32>
    %257 = tpu.matmul %255, %256, %cst_199 {dimension_numbers = #tpu.dot_dimension_numbers<[1], [0], [0], [1], [0, 0, 1, 1], [], []>} : vector<104x267xbf16>, vector<267x64xbf16>, vector<104x64xf32> -> vector<104x64xf32>
    %c0_200 = arith.constant 0 : index
    %c0_201 = arith.constant 0 : index
    %258 = vector.load %arg15[%c0_200, %c0_201] : memref<104x64xf32, #tpu.memory_space<vmem>>, vector<104x64xf32>
    tpu.vector_store %arg15[%c0_200, %c0_201], %257 {strides = array<i32>} : memref<104x64xf32, #tpu.memory_space<vmem>>, vector<104x64xf32>,
    %c0_202 = arith.constant 0 : index
    %c0_203 = arith.constant 0 : index
    %259 = vector.load %arg15[%c0_202, %c0_203] : memref<104x64xf32, #tpu.memory_space<vmem>>, vector<80x64xf32>
    %260 = arith.truncf %259 : vector<80x64xf32> to vector<80x64xbf16>
    %c0_204 = arith.constant 0 : index
    %c0_205 = arith.constant 0 : index
    %261 = vector.load %arg4[%c0_204, %c0_205] : memref<576x128xbf16, #tpu.memory_space<vmem>>, vector<64x128xbf16>
    %cst_206 = arith.constant dense<0.000000e+00> : vector<80x128xf32>
    %262 = tpu.matmul %260, %261, %cst_206 {dimension_numbers = #tpu.dot_dimension_numbers<[1], [0], [0], [1], [0, 0, 1, 1], [], []>} : vector<80x64xbf16>, vector<64x128xbf16>, vector<80x128xf32> -> vector<80x128xf32>
    %c1_207 = arith.constant 1 : index
    %c0_208 = arith.constant 0 : index
    %263 = vector.load %arg15[%c1_207, %c0_208] : memref<104x64xf32, #tpu.memory_space<vmem>>, vector<80x64xf32>
    %264 = arith.truncf %263 : vector<80x64xf32> to vector<80x64xbf16>
    %c64_209 = arith.constant 64 : index
    %c0_210 = arith.constant 0 : index
    %265 = vector.load %arg4[%c64_209, %c0_210] : memref<576x128xbf16, #tpu.memory_space<vmem>>, vector<64x128xbf16>
    %cst_211 = arith.constant dense<0.000000e+00> : vector<80x128xf32>
    %266 = tpu.matmul %264, %265, %cst_211 {dimension_numbers = #tpu.dot_dimension_numbers<[1], [0], [0], [1], [0, 0, 1, 1], [], []>} : vector<80x64xbf16>, vector<64x128xbf16>, vector<80x128xf32> -> vector<80x128xf32>
    %267 = arith.addf %262, %266 : vector<80x128xf32>
    %c2_212 = arith.constant 2 : index
    %c0_213 = arith.constant 0 : index
    %268 = vector.load %arg15[%c2_212, %c0_213] : memref<104x64xf32, #tpu.memory_space<vmem>>, vector<80x64xf32>
    %269 = arith.truncf %268 : vector<80x64xf32> to vector<80x64xbf16>
    %c128_214 = arith.constant 128 : index
    %c0_215 = arith.constant 0 : index
    %270 = vector.load %arg4[%c128_214, %c0_215] : memref<576x128xbf16, #tpu.memory_space<vmem>>, vector<64x128xbf16>
    %cst_216 = arith.constant dense<0.000000e+00> : vector<80x128xf32>
    %271 = tpu.matmul %269, %270, %cst_216 {dimension_numbers = #tpu.dot_dimension_numbers<[1], [0], [0], [1], [0, 0, 1, 1], [], []>} : vector<80x64xbf16>, vector<64x128xbf16>, vector<80x128xf32> -> vector<80x128xf32>
    %272 = arith.addf %267, %271 : vector<80x128xf32>
    %c10_217 = arith.constant 10 : index
    %c0_218 = arith.constant 0 : index
    %273 = vector.load %arg15[%c10_217, %c0_218] : memref<104x64xf32, #tpu.memory_space<vmem>>, vector<80x64xf32>
    %274 = arith.truncf %273 : vector<80x64xf32> to vector<80x64xbf16>
    %c192_219 = arith.constant 192 : index
    %c0_220 = arith.constant 0 : index
    %275 = vector.load %arg4[%c192_219, %c0_220] : memref<576x128xbf16, #tpu.memory_space<vmem>>, vector<64x128xbf16>
    %cst_221 = arith.constant dense<0.000000e+00> : vector<80x128xf32>
    %276 = tpu.matmul %274, %275, %cst_221 {dimension_numbers = #tpu.dot_dimension_numbers<[1], [0], [0], [1], [0, 0, 1, 1], [], []>} : vector<80x64xbf16>, vector<64x128xbf16>, vector<80x128xf32> -> vector<80x128xf32>
    %277 = arith.addf %272, %276 : vector<80x128xf32>
    %c11_222 = arith.constant 11 : index
    %c0_223 = arith.constant 0 : index
    %278 = vector.load %arg15[%c11_222, %c0_223] : memref<104x64xf32, #tpu.memory_space<vmem>>, vector<80x64xf32>
    %279 = arith.truncf %278 : vector<80x64xf32> to vector<80x64xbf16>
    %c256_224 = arith.constant 256 : index
    %c0_225 = arith.constant 0 : index
    %280 = vector.load %arg4[%c256_224, %c0_225] : memref<576x128xbf16, #tpu.memory_space<vmem>>, vector<64x128xbf16>
    %cst_226 = arith.constant dense<0.000000e+00> : vector<80x128xf32>
    %281 = tpu.matmul %279, %280, %cst_226 {dimension_numbers = #tpu.dot_dimension_numbers<[1], [0], [0], [1], [0, 0, 1, 1], [], []>} : vector<80x64xbf16>, vector<64x128xbf16>, vector<80x128xf32> -> vector<80x128xf32>
    %282 = arith.addf %277, %281 : vector<80x128xf32>
    %c12_227 = arith.constant 12 : index
    %c0_228 = arith.constant 0 : index
    %283 = vector.load %arg15[%c12_227, %c0_228] : memref<104x64xf32, #tpu.memory_space<vmem>>, vector<80x64xf32>
    %284 = arith.truncf %283 : vector<80x64xf32> to vector<80x64xbf16>
    %c320_229 = arith.constant 320 : index
    %c0_230 = arith.constant 0 : index
    %285 = vector.load %arg4[%c320_229, %c0_230] : memref<576x128xbf16, #tpu.memory_space<vmem>>, vector<64x128xbf16>
    %cst_231 = arith.constant dense<0.000000e+00> : vector<80x128xf32>
    %286 = tpu.matmul %284, %285, %cst_231 {dimension_numbers = #tpu.dot_dimension_numbers<[1], [0], [0], [1], [0, 0, 1, 1], [], []>} : vector<80x64xbf16>, vector<64x128xbf16>, vector<80x128xf32> -> vector<80x128xf32>
    %287 = arith.addf %282, %286 : vector<80x128xf32>
    %c20_232 = arith.constant 20 : index
    %c0_233 = arith.constant 0 : index
    %288 = vector.load %arg15[%c20_232, %c0_233] : memref<104x64xf32, #tpu.memory_space<vmem>>, vector<80x64xf32>
    %289 = arith.truncf %288 : vector<80x64xf32> to vector<80x64xbf16>
    %c384_234 = arith.constant 384 : index
    %c0_235 = arith.constant 0 : index
    %290 = vector.load %arg4[%c384_234, %c0_235] : memref<576x128xbf16, #tpu.memory_space<vmem>>, vector<64x128xbf16>
    %cst_236 = arith.constant dense<0.000000e+00> : vector<80x128xf32>
    %291 = tpu.matmul %289, %290, %cst_236 {dimension_numbers = #tpu.dot_dimension_numbers<[1], [0], [0], [1], [0, 0, 1, 1], [], []>} : vector<80x64xbf16>, vector<64x128xbf16>, vector<80x128xf32> -> vector<80x128xf32>
    %292 = arith.addf %287, %291 : vector<80x128xf32>
    %c21_237 = arith.constant 21 : index
    %c0_238 = arith.constant 0 : index
    %293 = vector.load %arg15[%c21_237, %c0_238] : memref<104x64xf32, #tpu.memory_space<vmem>>, vector<80x64xf32>
    %294 = arith.truncf %293 : vector<80x64xf32> to vector<80x64xbf16>
    %c448_239 = arith.constant 448 : index
    %c0_240 = arith.constant 0 : index
    %295 = vector.load %arg4[%c448_239, %c0_240] : memref<576x128xbf16, #tpu.memory_space<vmem>>, vector<64x128xbf16>
    %cst_241 = arith.constant dense<0.000000e+00> : vector<80x128xf32>
    %296 = tpu.matmul %294, %295, %cst_241 {dimension_numbers = #tpu.dot_dimension_numbers<[1], [0], [0], [1], [0, 0, 1, 1], [], []>} : vector<80x64xbf16>, vector<64x128xbf16>, vector<80x128xf32> -> vector<80x128xf32>
    %297 = arith.addf %292, %296 : vector<80x128xf32>
    %c22_242 = arith.constant 22 : index
    %c0_243 = arith.constant 0 : index
    %298 = vector.load %arg15[%c22_242, %c0_243] : memref<104x64xf32, #tpu.memory_space<vmem>>, vector<80x64xf32>
    %299 = arith.truncf %298 : vector<80x64xf32> to vector<80x64xbf16>
    %c512_244 = arith.constant 512 : index
    %c0_245 = arith.constant 0 : index
    %300 = vector.load %arg4[%c512_244, %c0_245] : memref<576x128xbf16, #tpu.memory_space<vmem>>, vector<64x128xbf16>
    %cst_246 = arith.constant dense<0.000000e+00> : vector<80x128xf32>
    %301 = tpu.matmul %299, %300, %cst_246 {dimension_numbers = #tpu.dot_dimension_numbers<[1], [0], [0], [1], [0, 0, 1, 1], [], []>} : vector<80x64xbf16>, vector<64x128xbf16>, vector<80x128xf32> -> vector<80x128xf32>
    %302 = arith.addf %297, %301 : vector<80x128xf32>
    %c0_247 = arith.constant 0 : index
    %c0_248 = arith.constant 0 : index
    %303 = vector.load %arg5[%c0_247, %c0_248] : memref<1x128xf32, #tpu.memory_space<vmem>>, vector<1x128xf32>
    %304 = vector.broadcast %303 : vector<1x128xf32> to vector<80x128xf32>
    %305 = arith.addf %302, %304 : vector<80x128xf32>
    %cst_249 = arith.constant 0.000000e+00 : f32
    %306 = vector.broadcast %cst_249 : f32 to vector<80x128xf32>
    %307 = arith.maximumf %305, %306 : vector<80x128xf32>
    %c0_250 = arith.constant 0 : index
    %c0_251 = arith.constant 0 : index
    %308 = vector.load %arg16[%c0_250, %c0_251] : memref<80x128xf32, #tpu.memory_space<vmem>>, vector<80x128xf32>
    tpu.vector_store %arg16[%c0_250, %c0_251], %307 {strides = array<i32>} : memref<80x128xf32, #tpu.memory_space<vmem>>, vector<80x128xf32>,
    %c0_252 = arith.constant 0 : index
    %c0_253 = arith.constant 0 : index
    %309 = vector.load %arg16[%c0_252, %c0_253] : memref<80x128xf32, #tpu.memory_space<vmem>>, vector<67x128xf32>
    %c1_254 = arith.constant 1 : index
    %c0_255 = arith.constant 0 : index
    %310 = vector.load %arg16[%c1_254, %c0_255] : memref<80x128xf32, #tpu.memory_space<vmem>>, vector<67x128xf32>
    %311 = arith.maximumf %309, %310 : vector<67x128xf32>
    %c10_256 = arith.constant 10 : index
    %c0_257 = arith.constant 0 : index
    %312 = vector.load %arg16[%c10_256, %c0_257] : memref<80x128xf32, #tpu.memory_space<vmem>>, vector<67x128xf32>
    %c11_258 = arith.constant 11 : index
    %c0_259 = arith.constant 0 : index
    %313 = vector.load %arg16[%c11_258, %c0_259] : memref<80x128xf32, #tpu.memory_space<vmem>>, vector<67x128xf32>
    %314 = arith.maximumf %312, %313 : vector<67x128xf32>
    %315 = arith.maximumf %311, %314 : vector<67x128xf32>
    %c0_260 = arith.constant 0 : index
    %c0_261 = arith.constant 0 : index
    %316 = vector.load %arg12[%c0_260, %c0_261] : memref<40x67xbf16, #tpu.memory_space<vmem>>, vector<40x67xbf16>
    %317 = arith.truncf %315 : vector<67x128xf32> to vector<67x128xbf16>
    %cst_262 = arith.constant dense<0.000000e+00> : vector<40x128xf32>
    %318 = tpu.matmul %316, %317, %cst_262 {dimension_numbers = #tpu.dot_dimension_numbers<[1], [0], [0], [1], [0, 0, 1, 1], [], []>} : vector<40x67xbf16>, vector<67x128xbf16>, vector<40x128xf32> -> vector<40x128xf32>
    %c0_263 = arith.constant 0 : index
    %c0_264 = arith.constant 0 : index
    %319 = vector.load %arg17[%c0_263, %c0_264] : memref<40x128xf32, #tpu.memory_space<vmem>>, vector<40x128xf32>
    tpu.vector_store %arg17[%c0_263, %c0_264], %318 {strides = array<i32>} : memref<40x128xf32, #tpu.memory_space<vmem>>, vector<40x128xf32>,
    %c0_265 = arith.constant 0 : index
    %c0_266 = arith.constant 0 : index
    %320 = vector.load %arg17[%c0_265, %c0_266] : memref<40x128xf32, #tpu.memory_space<vmem>>, vector<24x128xf32>
    %321 = arith.truncf %320 : vector<24x128xf32> to vector<24x128xbf16>
    %c0_267 = arith.constant 0 : index
    %c0_268 = arith.constant 0 : index
    %322 = vector.load %arg6[%c0_267, %c0_268] : memref<1152x256xbf16, #tpu.memory_space<vmem>>, vector<128x256xbf16>
    %cst_269 = arith.constant dense<0.000000e+00> : vector<24x256xf32>
    %323 = tpu.matmul %321, %322, %cst_269 {dimension_numbers = #tpu.dot_dimension_numbers<[1], [0], [0], [1], [0, 0, 1, 1], [], []>} : vector<24x128xbf16>, vector<128x256xbf16>, vector<24x256xf32> -> vector<24x256xf32>
    %c1_270 = arith.constant 1 : index
    %c0_271 = arith.constant 0 : index
    %324 = vector.load %arg17[%c1_270, %c0_271] : memref<40x128xf32, #tpu.memory_space<vmem>>, vector<24x128xf32>
    %325 = arith.truncf %324 : vector<24x128xf32> to vector<24x128xbf16>
    %c128_272 = arith.constant 128 : index
    %c0_273 = arith.constant 0 : index
    %326 = vector.load %arg6[%c128_272, %c0_273] : memref<1152x256xbf16, #tpu.memory_space<vmem>>, vector<128x256xbf16>
    %cst_274 = arith.constant dense<0.000000e+00> : vector<24x256xf32>
    %327 = tpu.matmul %325, %326, %cst_274 {dimension_numbers = #tpu.dot_dimension_numbers<[1], [0], [0], [1], [0, 0, 1, 1], [], []>} : vector<24x128xbf16>, vector<128x256xbf16>, vector<24x256xf32> -> vector<24x256xf32>
    %328 = arith.addf %323, %327 : vector<24x256xf32>
    %c2_275 = arith.constant 2 : index
    %c0_276 = arith.constant 0 : index
    %329 = vector.load %arg17[%c2_275, %c0_276] : memref<40x128xf32, #tpu.memory_space<vmem>>, vector<24x128xf32>
    %330 = arith.truncf %329 : vector<24x128xf32> to vector<24x128xbf16>
    %c256_277 = arith.constant 256 : index
    %c0_278 = arith.constant 0 : index
    %331 = vector.load %arg6[%c256_277, %c0_278] : memref<1152x256xbf16, #tpu.memory_space<vmem>>, vector<128x256xbf16>
    %cst_279 = arith.constant dense<0.000000e+00> : vector<24x256xf32>
    %332 = tpu.matmul %330, %331, %cst_279 {dimension_numbers = #tpu.dot_dimension_numbers<[1], [0], [0], [1], [0, 0, 1, 1], [], []>} : vector<24x128xbf16>, vector<128x256xbf16>, vector<24x256xf32> -> vector<24x256xf32>
    %333 = arith.addf %328, %332 : vector<24x256xf32>
    %c6_280 = arith.constant 6 : index
    %c0_281 = arith.constant 0 : index
    %334 = vector.load %arg17[%c6_280, %c0_281] : memref<40x128xf32, #tpu.memory_space<vmem>>, vector<24x128xf32>
    %335 = arith.truncf %334 : vector<24x128xf32> to vector<24x128xbf16>
    %c384_282 = arith.constant 384 : index
    %c0_283 = arith.constant 0 : index
    %336 = vector.load %arg6[%c384_282, %c0_283] : memref<1152x256xbf16, #tpu.memory_space<vmem>>, vector<128x256xbf16>
    %cst_284 = arith.constant dense<0.000000e+00> : vector<24x256xf32>
    %337 = tpu.matmul %335, %336, %cst_284 {dimension_numbers = #tpu.dot_dimension_numbers<[1], [0], [0], [1], [0, 0, 1, 1], [], []>} : vector<24x128xbf16>, vector<128x256xbf16>, vector<24x256xf32> -> vector<24x256xf32>
    %338 = arith.addf %333, %337 : vector<24x256xf32>
    %c7_285 = arith.constant 7 : index
    %c0_286 = arith.constant 0 : index
    %339 = vector.load %arg17[%c7_285, %c0_286] : memref<40x128xf32, #tpu.memory_space<vmem>>, vector<24x128xf32>
    %340 = arith.truncf %339 : vector<24x128xf32> to vector<24x128xbf16>
    %c512_287 = arith.constant 512 : index
    %c0_288 = arith.constant 0 : index
    %341 = vector.load %arg6[%c512_287, %c0_288] : memref<1152x256xbf16, #tpu.memory_space<vmem>>, vector<128x256xbf16>
    %cst_289 = arith.constant dense<0.000000e+00> : vector<24x256xf32>
    %342 = tpu.matmul %340, %341, %cst_289 {dimension_numbers = #tpu.dot_dimension_numbers<[1], [0], [0], [1], [0, 0, 1, 1], [], []>} : vector<24x128xbf16>, vector<128x256xbf16>, vector<24x256xf32> -> vector<24x256xf32>
    %343 = arith.addf %338, %342 : vector<24x256xf32>
    %c8_290 = arith.constant 8 : index
    %c0_291 = arith.constant 0 : index
    %344 = vector.load %arg17[%c8_290, %c0_291] : memref<40x128xf32, #tpu.memory_space<vmem>>, vector<24x128xf32>
    %345 = arith.truncf %344 : vector<24x128xf32> to vector<24x128xbf16>
    %c640_292 = arith.constant 640 : index
    %c0_293 = arith.constant 0 : index
    %346 = vector.load %arg6[%c640_292, %c0_293] : memref<1152x256xbf16, #tpu.memory_space<vmem>>, vector<128x256xbf16>
    %cst_294 = arith.constant dense<0.000000e+00> : vector<24x256xf32>
    %347 = tpu.matmul %345, %346, %cst_294 {dimension_numbers = #tpu.dot_dimension_numbers<[1], [0], [0], [1], [0, 0, 1, 1], [], []>} : vector<24x128xbf16>, vector<128x256xbf16>, vector<24x256xf32> -> vector<24x256xf32>
    %348 = arith.addf %343, %347 : vector<24x256xf32>
    %c12_295 = arith.constant 12 : index
    %c0_296 = arith.constant 0 : index
    %349 = vector.load %arg17[%c12_295, %c0_296] : memref<40x128xf32, #tpu.memory_space<vmem>>, vector<24x128xf32>
    %350 = arith.truncf %349 : vector<24x128xf32> to vector<24x128xbf16>
    %c768_297 = arith.constant 768 : index
    %c0_298 = arith.constant 0 : index
    %351 = vector.load %arg6[%c768_297, %c0_298] : memref<1152x256xbf16, #tpu.memory_space<vmem>>, vector<128x256xbf16>
    %cst_299 = arith.constant dense<0.000000e+00> : vector<24x256xf32>
    %352 = tpu.matmul %350, %351, %cst_299 {dimension_numbers = #tpu.dot_dimension_numbers<[1], [0], [0], [1], [0, 0, 1, 1], [], []>} : vector<24x128xbf16>, vector<128x256xbf16>, vector<24x256xf32> -> vector<24x256xf32>
    %353 = arith.addf %348, %352 : vector<24x256xf32>
    %c13_300 = arith.constant 13 : index
    %c0_301 = arith.constant 0 : index
    %354 = vector.load %arg17[%c13_300, %c0_301] : memref<40x128xf32, #tpu.memory_space<vmem>>, vector<24x128xf32>
    %355 = arith.truncf %354 : vector<24x128xf32> to vector<24x128xbf16>
    %c896_302 = arith.constant 896 : index
    %c0_303 = arith.constant 0 : index
    %356 = vector.load %arg6[%c896_302, %c0_303] : memref<1152x256xbf16, #tpu.memory_space<vmem>>, vector<128x256xbf16>
    %cst_304 = arith.constant dense<0.000000e+00> : vector<24x256xf32>
    %357 = tpu.matmul %355, %356, %cst_304 {dimension_numbers = #tpu.dot_dimension_numbers<[1], [0], [0], [1], [0, 0, 1, 1], [], []>} : vector<24x128xbf16>, vector<128x256xbf16>, vector<24x256xf32> -> vector<24x256xf32>
    %358 = arith.addf %353, %357 : vector<24x256xf32>
    %c14_305 = arith.constant 14 : index
    %c0_306 = arith.constant 0 : index
    %359 = vector.load %arg17[%c14_305, %c0_306] : memref<40x128xf32, #tpu.memory_space<vmem>>, vector<24x128xf32>
    %360 = arith.truncf %359 : vector<24x128xf32> to vector<24x128xbf16>
    %c1024_307 = arith.constant 1024 : index
    %c0_308 = arith.constant 0 : index
    %361 = vector.load %arg6[%c1024_307, %c0_308] : memref<1152x256xbf16, #tpu.memory_space<vmem>>, vector<128x256xbf16>
    %cst_309 = arith.constant dense<0.000000e+00> : vector<24x256xf32>
    %362 = tpu.matmul %360, %361, %cst_309 {dimension_numbers = #tpu.dot_dimension_numbers<[1], [0], [0], [1], [0, 0, 1, 1], [], []>} : vector<24x128xbf16>, vector<128x256xbf16>, vector<24x256xf32> -> vector<24x256xf32>
    %363 = arith.addf %358, %362 : vector<24x256xf32>
    %c0_310 = arith.constant 0 : index
    %c0_311 = arith.constant 0 : index
    %364 = vector.load %arg7[%c0_310, %c0_311] : memref<1x256xf32, #tpu.memory_space<vmem>>, vector<1x256xf32>
    %365 = vector.broadcast %364 : vector<1x256xf32> to vector<24x256xf32>
    %366 = arith.addf %363, %365 : vector<24x256xf32>
    %cst_312 = arith.constant 0.000000e+00 : f32
    %367 = vector.broadcast %cst_312 : f32 to vector<24x256xf32>
    %368 = arith.maximumf %366, %367 : vector<24x256xf32>
    %369 = arith.truncf %368 : vector<24x256xf32> to vector<24x256xbf16>
    %c0_313 = arith.constant 0 : index
    %c0_314 = arith.constant 0 : index
    %370 = vector.load %arg8[%c0_313, %c0_314] : memref<256x8xbf16, #tpu.memory_space<vmem>>, vector<256x8xbf16>
    %cst_315 = arith.constant dense<0.000000e+00> : vector<24x8xf32>
    %371 = tpu.matmul %369, %370, %cst_315 {dimension_numbers = #tpu.dot_dimension_numbers<[1], [0], [0], [1], [0, 0, 1, 1], [], []>} : vector<24x256xbf16>, vector<256x8xbf16>, vector<24x8xf32> -> vector<24x8xf32>
    %c0_316 = arith.constant 0 : index
    %c0_317 = arith.constant 0 : index
    %372 = vector.load %arg10[%c0_316, %c0_317] : memref<256x24xf32, #tpu.memory_space<vmem>>, vector<256x24xf32>
    %cst_318 = arith.constant dense<0.000000e+00> : vector<256x8xf32>
    %373 = tpu.matmul %372, %371, %cst_318 {dimension_numbers = #tpu.dot_dimension_numbers<[1], [0], [0], [1], [0, 0, 1, 1], [], []>} : vector<256x24xf32>, vector<24x8xf32>, vector<256x8xf32> -> vector<256x8xf32>
    %c0_319 = arith.constant 0 : index
    %c0_320 = arith.constant 0 : index
    %374 = vector.load %arg9[%c0_319, %c0_320] : memref<1x8xf32, #tpu.memory_space<vmem>>, vector<1x8xf32>
    %375 = vector.broadcast %374 : vector<1x8xf32> to vector<256x8xf32>
    %376 = arith.addf %373, %375 : vector<256x8xf32>
    %c256_321 = arith.constant 256 : index
    %c0_322 = arith.constant 0 : index
    %377 = vector.load %arg13[%c256_321, %c0_322] : memref<512x8xf32, #tpu.memory_space<vmem>>, vector<256x8xf32>
    tpu.vector_store %arg13[%c256_321, %c0_322], %376 {strides = array<i32>} : memref<512x8xf32, #tpu.memory_space<vmem>>, vector<256x8xf32>,
    return
  }
  func.func @transform_0(%arg0: i32) -> (i32, i32) {
    %c0_i32 = arith.constant 0 : i32
    %c0_i32_0 = arith.constant 0 : i32
    %c0_i32_1 = arith.constant 0 : i32
    return %c0_i32, %c0_i32_0 : i32, i32
  }
  func.func @transform_1(%arg0: i32) -> (i32, i32) {
    %c0_i32 = arith.constant 0 : i32
    %c0_i32_0 = arith.constant 0 : i32
    %c0_i32_1 = arith.constant 0 : i32
    return %c0_i32, %c0_i32_0 : i32, i32
  }
  func.func @transform_2(%arg0: i32) -> (i32, i32) {
    %c0_i32 = arith.constant 0 : i32
    %c0_i32_0 = arith.constant 0 : i32
    %c0_i32_1 = arith.constant 0 : i32
    return %c0_i32, %c0_i32_0 : i32, i32
  }
  func.func @transform_3(%arg0: i32) -> (i32, i32) {
    %c0_i32 = arith.constant 0 : i32
    %c0_i32_0 = arith.constant 0 : i32
    %c0_i32_1 = arith.constant 0 : i32
    return %c0_i32, %c0_i32_0 : i32, i32
  }
  func.func @transform_4(%arg0: i32) -> (i32, i32) {
    %c0_i32 = arith.constant 0 : i32
    %c0_i32_0 = arith.constant 0 : i32
    %c0_i32_1 = arith.constant 0 : i32
    return %c0_i32, %c0_i32_0 : i32, i32
  }
  func.func @transform_5(%arg0: i32) -> (i32, i32) {
    %c0_i32 = arith.constant 0 : i32
    %c0_i32_0 = arith.constant 0 : i32
    %c0_i32_1 = arith.constant 0 : i32
    return %c0_i32, %c0_i32_0 : i32, i32
  }
  func.func @transform_6(%arg0: i32) -> (i32, i32) {
    %c0_i32 = arith.constant 0 : i32
    %c0_i32_0 = arith.constant 0 : i32
    %c0_i32_1 = arith.constant 0 : i32
    return %c0_i32, %c0_i32_0 : i32, i32
  }
  func.func @transform_7(%arg0: i32) -> (i32, i32) {
    %c0_i32 = arith.constant 0 : i32
    %c0_i32_0 = arith.constant 0 : i32
    %c0_i32_1 = arith.constant 0 : i32
    return %c0_i32, %c0_i32_0 : i32, i32
  }
  func.func @transform_8(%arg0: i32) -> (i32, i32) {
    %c0_i32 = arith.constant 0 : i32
    %c0_i32_0 = arith.constant 0 : i32
    %c0_i32_1 = arith.constant 0 : i32
    return %c0_i32, %c0_i32_0 : i32, i32
  }
  func.func @transform_9(%arg0: i32) -> (i32, i32) {
    %c0_i32 = arith.constant 0 : i32
    %c0_i32_0 = arith.constant 0 : i32
    %c0_i32_1 = arith.constant 0 : i32
    return %c0_i32, %c0_i32_0 : i32, i32
  }
  func.func @transform_10(%arg0: i32) -> (i32, i32) {
    %c0_i32 = arith.constant 0 : i32
    %c0_i32_0 = arith.constant 0 : i32
    %c0_i32_1 = arith.constant 0 : i32
    return %c0_i32, %c0_i32_0 : i32, i32
  }
  func.func @transform_11(%arg0: i32) -> (i32, i32) {
    %c0_i32 = arith.constant 0 : i32
    %c0_i32_0 = arith.constant 0 : i32
    %c0_i32_1 = arith.constant 0 : i32
    return %c0_i32, %c0_i32_0 : i32, i32
  }
  func.func @transform_12(%arg0: i32) -> (i32, i32) {
    %c0_i32 = arith.constant 0 : i32
    %c0_i32_0 = arith.constant 0 : i32
    %c0_i32_1 = arith.constant 0 : i32
    return %c0_i32, %c0_i32_0 : i32, i32
  }
}

</mosaic_0001>

<bundles_post_ra>
// kernel: simple_fcn_forward.1
= control target key start
LH: loop header
LB: loop body
LE: loop exit
PB: predicated region body
PF: predicated region fallthrough
CT: control target
= control target key end

     0   :  { %vm209_vm0 = vcmask 1040384   ;;  %vm210_vm1 = vcmask 1041408   ;;  %v18546_v1 = vmov 65535   ;;  %vm154_vm2 = vcmask 23552   ;;  %s23705_s1 = inlined_call_operand.vmem [shape: f32[27,64], index: 1, kind: input, shape index: {}]   ;;  %s23706_s0 = inlined_call_operand.vmem [shape: f32[656,3], index: 0, kind: input, shape index: {}]   ;;  %s23707_s10 = inlined_call_operand.vmem [shape: bf16[104,267], index: 10, kind: input, shape index: {}]   ;;  %s23708_s2 = inlined_call_operand.vmem [shape: f32[1,64], index: 2, kind: input, shape index: {}]   ;;  %s23709_s3 = inlined_call_operand.vmem [shape: bf16[576,128], index: 3, kind: input, shape index: {}]   ;;  %s23710_s11 = inlined_call_operand.vmem [shape: bf16[40,67], index: 11, kind: input, shape index: {}]   ;;  %s23711_s5 = inlined_call_operand.vmem [shape: bf16[1152,256], index: 5, kind: input, shape index: {}]   ;;  %s23712_s4 = inlined_call_operand.vmem [shape: f32[1,128], index: 4, kind: input, shape index: {}]   ;;  %s23713_s7 = inlined_call_operand.vmem [shape: bf16[256,8], index: 7, kind: input, shape index: {}]   ;;  %s23714_s6 = inlined_call_operand.vmem [shape: f32[1,256], index: 6, kind: input, shape index: {}]   ;;  %s23715_s9 = inlined_call_operand.vmem [shape: f32[256,24], index: 9, kind: input, shape index: {}]   ;;  %s23716_s8 = inlined_call_operand.vmem [shape: f32[1,8], index: 8, kind: input, shape index: {}]   ;;  %s23717_s12 = inlined_call_operand.vmem [shape: f32[512,8], index: 12, kind: output, shape index: {}]  }
   0x1   :  { %v152_v0 = vld [vmem:[%s23705_s1 + $0x3] sm:$0x7]  ;;  %v211_v2 = vsel %vm209_vm0, 4294967295, %v18546_v1  ;;  %v99_v4 = vld [vmem:[%s23706_s0 + $0x9] sm:$0xff]  ;;  %v100_v8 = vld [vmem:[%s23706_s0 + $0x11] sm:$0xff]  ;;  %vm18548_vm3 = vmmov 0  }
   0x2   :  { %v98_v3 = vld [vmem:[%s23706_s0 + $0x1] sm:$0xff]  ;;  %v153_v5 = vpack.c.bf16 %v152_v0, %v152_v0  ;;  %v18625_v6 = vsel %vm210_vm1, %v211_v2, 0  ;;  %v101_v9 = vld [vmem:[%s23706_s0 + $0x19] sm:$0xff]  ;;  %v103_v12 = vld [vmem:[%s23706_s0 + $0x29] sm:$0xff]  ;;  %vm2988_vm4 = vcmask 523264   ;;  %vm3428_vm5 = vcmask 1044480  }
   0x3   :  { %v134_v7 = vpack.c.bf16 %v99_v4, %v98_v3  ;;  %v102_v11 = vld [vmem:[%s23706_s0 + $0x21] sm:$0xff]  ;;  %v135_v13 = vpack.c.bf16 %v101_v9, %v100_v8  ;;  %v104_v17 = vld [vmem:[%s23706_s0 + $0x31] sm:$0xff]  ;;  %v105_v18 = vld [vmem:[%s23706_s0 + $0x39] sm:$0xff]  ;;  %vm3429_vm6 = vcmask 1045504   ;;  %vm3406_vm7 = vcmask 89088  }
   0x4   :  { %v214_v10 = vand.u32 %v18625_v6, %v153_v5  ;;  %v136_v14 = vpack.c.bf16 %v103_v12, %v102_v11  ;;  %v96_v15 = vld [vmem:[%s23705_s1] sm:$0x7]  ;;  %v107_v20 = vld [vmem:[%s23706_s0 + $0x49] sm:$0xff]  ;;  %v137_v22 = vpack.c.bf16 %v105_v18, %v104_v17  ;;  %v108_v24 = vld [vmem:[%s23706_s0 + $0x51] sm:$0xff]  ;;  %vm5032_vm8 = vcmask 547840  }
   0x5   :  { %15900 = vmatprep.mubr.msk.bf16.mxu0 %vm154_vm2, %v134_v7  ;;  %v97_v16 = vpack.c.bf16 %v96_v15, %v96_v15  ;;  %v106_v19 = vld [vmem:[%s23706_s0 + $0x41] sm:$0xff]  ;;  %v109_v25 = vld [vmem:[%s23706_s0 + $0x59] sm:$0xff]  ;;  %v111_v27 = vld [vmem:[%s23706_s0 + $0x69] sm:$0xff]  ;;  %vm6759_vm9 = vcmask 195584   ;;  %vm7081_vm10 = vcmask 64512  }
   0x6   :  { %15898 = vmatprep.subr.bf16.mxu0 %v214_v10  ;;  %v138_v23 = vpack.c.bf16 %v107_v20, %v106_v19  ;;  %v110_v26 = vld [vmem:[%s23706_s0 + $0x61] sm:$0xff]  ;;  %v139_v29 = vpack.c.bf16 %v109_v25, %v108_v24  ;;  %v112_v33 = vld [vmem:[%s23706_s0 + $0x71] sm:$0xff]  ;;  %v113_v34 = vld [vmem:[%s23706_s0 + $0x79] sm:$0xff] }
   0x7   :  { %15899 = vmatpush3.bf16.msra.mxu0 %v214_v10  ;;  %v448_v21 = vand.u32 %v18625_v6, %v97_v16  ;;  %v681_v28 = vld [vmem:[%s23705_s1 + $0x6] sm:$0x7]  ;;  %v140_v31 = vpack.c.bf16 %v111_v27, %v110_v26  ;;  %v115_v36 = vld [vmem:[%s23706_s0 + $0x89] sm:$0xff]  ;;  %v141_v37 = vpack.c.bf16 %v113_v34, %v112_v33  ;;  %v116_v39 = vld [vmem:[%s23706_s0 + $0x91] sm:$0xff] }
   0x8   :  { %v682_v30 = vpack.c.bf16 %v681_v28, %v681_v28  ;;  %v114_v35 = vld [vmem:[%s23706_s0 + $0x81] sm:$0xff]  ;;  %v117_v40 = vld [vmem:[%s23706_s0 + $0x99] sm:$0xff]  ;;  %v119_v42 = vld [vmem:[%s23706_s0 + $0xa9] sm:$0xff] }
   0x9   :  { %15936 = vmatprep.subr.bf16.mxu0 %v448_v21  ;;  %v142_v38 = vpack.c.bf16 %v115_v36, %v114_v35  ;;  %v118_v41 = vld [vmem:[%s23706_s0 + $0xa1] sm:$0xff]  ;;  %v143_v43 = vpack.c.bf16 %v117_v40, %v116_v39  ;;  %v120_v45 = vld [vmem:[%s23706_s0 + $0xb1] sm:$0xff]  ;;  %v121_v46 = vld [vmem:[%s23706_s0 + $0xb9] sm:$0xff] }
   0xa   :  { %15901 = vmatmul.mubr.msk.bf16.vlgmr.msra.gmra.mrb[0].mxu0 %vm154_vm2, %v135_v13  ;;  %v18677_v32 = vand.u32 %v682_v30, %v18625_v6  ;;  %v144_v44 = vpack.c.bf16 %v119_v42, %v118_v41  ;;  %v122_v47 = vld [vmem:[%s23706_s0 + $0xc1] sm:$0xff]  ;;  %v123_v48 = vld [vmem:[%s23706_s0 + $0xc9] sm:$0xff]  ;;  %v145_v49 = vpack.c.bf16 %v121_v46, %v120_v45  ;;  %v124_v51 = vld [vmem:[%s23706_s0 + $0xd1] sm:$0xff] }
   0xb   :  { %15904 = vmatprep.mubr.msk.bf16.mxu0 %vm154_vm2, %v136_v14  ;;  %15937 = vmatpush3.bf16.msra.mxu0 %v448_v21  ;;  %v146_v50 = vpack.c.bf16 %v123_v48, %v122_v47  ;;  %v125_v52 = vld [vmem:[%s23706_s0 + $0xd9] sm:$0xff]  ;;  %v126_v53 = vld [vmem:[%s23706_s0 + $0xe1] sm:$0xff]  ;;  %v127_v54 = vld [vmem:[%s23706_s0 + $0xe9] sm:$0xff] }
   0xc   :  { %15974 = vmatprep.subr.bf16.mxu0 %v18677_v32  ;;  %v147_v55 = vpack.c.bf16 %v125_v52, %v124_v51  ;;  %v148_v56 = vpack.c.bf16 %v127_v54, %v126_v53  ;;  %v128_v57 = vld [vmem:[%s23706_s0 + $0xf1] sm:$0xff]  ;;  %v129_v58 = vld [vmem:[%s23706_s0 + $0xf9] sm:$0xff]  ;;  %v130_v59 = vld [vmem:[%s23706_s0 + $0x101] sm:$0xff] }
   0xd   :  { %v131_v60 = vld [vmem:[%s23706_s0 + $0x109] sm:$0xff]  ;;  %v149_v61 = vpack.c.bf16 %v129_v58, %v128_v57  ;;  %v132_v63 = vld [vmem:[%s23706_s0 + $0x111] sm:$0xff]  ;;  %v133_v0 = vld [vmem:[%s23706_s0 + $0x119] sm:$0xff] }
   0xe   :  { %v150_v62 = vpack.c.bf16 %v131_v60, %v130_v59  ;;  %v42_v2 = vld [vmem:[%s23706_s0] sm:$0xff]  ;;  %v43_v3 = vld [vmem:[%s23706_s0 + $0x8] sm:$0xff]  ;;  %v151_v4 = vpack.c.bf16 %v133_v0, %v132_v63  ;;  %v44_v8 = vld [vmem:[%s23706_s0 + $0x10] sm:$0xff] }
   0xf   :  { %v78_v5 = vpack.c.bf16 %v43_v3, %v42_v2  ;;  %v1007_v7 = vld [vmem:[%s23705_s1 + $0x9] sm:$0x7]  ;;  %v45_v9 = vld [vmem:[%s23706_s0 + $0x18] sm:$0xff]  ;;  %v46_v10 = vld [vmem:[%s23706_s0 + $0x20] sm:$0xff] }
  0x10   :  { %v47_v11 = vld [vmem:[%s23706_s0 + $0x28] sm:$0xff]  ;;  %v1008_v12 = vpack.c.bf16 %v1007_v7, %v1007_v7  ;;  %v79_v13 = vpack.c.bf16 %v45_v9, %v44_v8  ;;  %v48_v16 = vld [vmem:[%s23706_s0 + $0x30] sm:$0xff]  ;;  %v49_v17 = vld [vmem:[%s23706_s0 + $0x38] sm:$0xff] }
  0x11   :  { %v80_v14 = vpack.c.bf16 %v47_v11, %v46_v10  ;;  %v50_v18 = vld [vmem:[%s23706_s0 + $0x40] sm:$0xff]  ;;  %v51_v19 = vld [vmem:[%s23706_s0 + $0x48] sm:$0xff]  ;;  %v81_v20 = vpack.c.bf16 %v49_v17, %v48_v16  ;;  %v56_v28 = vld [vmem:[%s23706_s0 + $0x70] sm:$0xff] }
  0x12   :  { %15905 = vmatmul.mubr.msk.bf16.gmra.mrb[4].mxu0 %vm154_vm2, %v137_v22  ;;  %v18782_v15 = vand.u32 %v1008_v12, %v18625_v6  ;;  %v82_v21 = vpack.c.bf16 %v51_v19, %v50_v18  ;;  %v52_v22 = vld [vmem:[%s23706_s0 + $0x50] sm:$0xff]  ;;  %v54_v24 = vld [vmem:[%s23706_s0 + $0x60] sm:$0xff]  ;;  %v55_v25 = vld [vmem:[%s23706_s0 + $0x68] sm:$0xff] }
  0x13   :  { %15908 = vmatprep.mubr.msk.bf16.mxu0 %vm154_vm2, %v138_v23  ;;  %v53_v23 = vld [vmem:[%s23706_s0 + $0x58] sm:$0xff]  ;;  %v84_v27 = vpack.c.bf16 %v55_v25, %v54_v24  ;;  %v58_v30 = vld [vmem:[%s23706_s0 + $0x80] sm:$0xff]  ;;  %v60_v34 = vld [vmem:[%s23706_s0 + $0x90] sm:$0xff] }
  0x14   :  { %v83_v26 = vpack.c.bf16 %v53_v23, %v52_v22  ;;  %v61_v35 = vld [vmem:[%s23706_s0 + $0x98] sm:$0xff]  ;;  %v62_v36 = vld [vmem:[%s23706_s0 + $0xa0] sm:$0xff]  ;;  %v64_v40 = vld [vmem:[%s23706_s0 + $0xb0] sm:$0xff] }
  0x15   :  { %v65_v41 = vld [vmem:[%s23706_s0 + $0xb8] sm:$0xff]  ;;  %v66_v42 = vld [vmem:[%s23706_s0 + $0xc0] sm:$0xff]  ;;  %v68_v46 = vld [vmem:[%s23706_s0 + $0xd0] sm:$0xff] }
  0x16   :  { %v69_v47 = vld [vmem:[%s23706_s0 + $0xd8] sm:$0xff]  ;;  %v70_v48 = vld [vmem:[%s23706_s0 + $0xe0] sm:$0xff]  ;;  %v72_v52 = vld [vmem:[%s23706_s0 + $0xf0] sm:$0xff] }
  0x17   :  { %v73_v53 = vld [vmem:[%s23706_s0 + $0xf8] sm:$0xff]  ;;  %v74_v54 = vld [vmem:[%s23706_s0 + $0x100] sm:$0xff]  ;;  %v76_v58 = vld [vmem:[%s23706_s0 + $0x110] sm:$0xff] }
  0x18   :  { %v77_v59 = vld [vmem:[%s23706_s0 + $0x118] sm:$0xff]  ;;  %v627_v60 = vld [vmem:[%s23706_s0 + $0x2] sm:$0xff]  ;;  %v1333_v0 = vld [vmem:[%s23705_s1 + $0xc] sm:$0x7] }
  0x19   :  { %v629_v2 = vld [vmem:[%s23706_s0 + $0x12] sm:$0xff]  ;;  %v630_v3 = vld [vmem:[%s23706_s0 + $0x1a] sm:$0xff]  ;;  %v1334_v7 = vpack.c.bf16 %v1333_v0, %v1333_v0  ;;  %v639_v19 = vld [vmem:[%s23706_s0 + $0x62] sm:$0xff] }
  0x1a   :  { %15909 = vmatmul.mubr.msk.bf16.gmra.mrb[8].mxu0 %vm154_vm2, %v139_v29  ;;  %v57_v29 = vld [vmem:[%s23706_s0 + $0x78] sm:$0xff]  ;;  %v18915_v8 = vpack.c.bf16 %v630_v3, %v629_v2  ;;  %v643_v25 = vld [vmem:[%s23706_s0 + $0x82] sm:$0xff]  ;;  %v1985_v2 = vld [vmem:[%s23705_s1 + $0x12] sm:$0x7] }
  0x1b   :  { %15912 = vmatprep.mubr.msk.bf16.mxu0 %vm154_vm2, %v140_v31  ;;  %v59_v31 = vld [vmem:[%s23706_s0 + $0x88] sm:$0xff]  ;;  %v18920_v10 = vand.u32 %v1334_v7, %v18625_v6  ;;  %v633_v11 = vld [vmem:[%s23706_s0 + $0x32] sm:$0xff]  ;;  %v634_v12 = vld [vmem:[%s23706_s0 + $0x3a] sm:$0xff] }
  0x1c   :  { %v86_v33 = vpack.c.bf16 %v59_v31, %v58_v30  ;;  %v666_v16 = vpack.c.bf16 %v634_v12, %v633_v11  ;;  %v638_v18 = vld [vmem:[%s23706_s0 + $0x5a] sm:$0xff]  ;;  %v641_v23 = vld [vmem:[%s23706_s0 + $0x72] sm:$0xff]  ;;  %v647_v31 = vld [vmem:[%s23706_s0 + $0xa2] sm:$0xff] }
  0x1d   :  { %v642_v24 = vld [vmem:[%s23706_s0 + $0x7a] sm:$0xff]  ;;  %v1281_v3 = vld [vmem:[%s23706_s0 + $0x23] sm:$0xff] }
  0x1e   :  { %v646_v30 = vld [vmem:[%s23706_s0 + $0x9a] sm:$0xff]  ;;  %v1285_v12 = vld [vmem:[%s23706_s0 + $0x43] sm:$0xff] }
  0x1f   :  { %v1284_v7 = vld [vmem:[%s23706_s0 + $0x3b] sm:$0xff] }
  0x22   :  { %15913 = vmatmul.mubr.msk.bf16.gmra.mrb[12].mxu0 %vm154_vm2, %v141_v37  ;;  %v63_v37 = vld [vmem:[%s23706_s0 + $0xa8] sm:$0xff] }
  0x23   :  { %15916 = vmatprep.mubr.msk.bf16.mxu0 %vm154_vm2, %v142_v38  ;;  %v87_v38 = vpack.c.bf16 %v61_v35, %v60_v34  ;;  %v88_v39 = vpack.c.bf16 %v63_v37, %v62_v36  ;;  %v649_v35 = vld [vmem:[%s23706_s0 + $0xb2] sm:$0xff]  ;;  %v650_v36 = vld [vmem:[%s23706_s0 + $0xba] sm:$0xff]  ;;  %v651_v37 = vld [vmem:[%s23706_s0 + $0xc2] sm:$0xff] }
  0x2a   :  { %15917 = vmatmul.mubr.msk.bf16.gmra.mrb[16].mxu0 %vm154_vm2, %v143_v43  ;;  %v67_v43 = vld [vmem:[%s23706_s0 + $0xc8] sm:$0xff] }
  0x2b   :  { %15920 = vmatprep.mubr.msk.bf16.mxu0 %vm154_vm2, %v144_v44  ;;  %v89_v44 = vpack.c.bf16 %v65_v41, %v64_v40  ;;  %v90_v45 = vpack.c.bf16 %v67_v43, %v66_v42  ;;  %v653_v41 = vld [vmem:[%s23706_s0 + $0xd2] sm:$0xff]  ;;  %v654_v42 = vld [vmem:[%s23706_s0 + $0xda] sm:$0xff]  ;;  %v655_v43 = vld [vmem:[%s23706_s0 + $0xe2] sm:$0xff] }
  0x32   :  { %15921 = vmatmul.mubr.msk.bf16.gmra.mrb[20].mxu0 %vm154_vm2, %v145_v49  ;;  %v71_v49 = vld [vmem:[%s23706_s0 + $0xe8] sm:$0xff] }
  0x33   :  { %15924 = vmatprep.mubr.msk.bf16.mxu0 %vm154_vm2, %v146_v50  ;;  %v91_v50 = vpack.c.bf16 %v69_v47, %v68_v46  ;;  %v92_v51 = vpack.c.bf16 %v71_v49, %v70_v48  ;;  %v657_v47 = vld [vmem:[%s23706_s0 + $0xf2] sm:$0xff]  ;;  %v658_v48 = vld [vmem:[%s23706_s0 + $0xfa] sm:$0xff]  ;;  %v659_v49 = vld [vmem:[%s23706_s0 + $0x102] sm:$0xff] }
  0x3a   :  { %15925 = vmatmul.mubr.msk.bf16.gmra.mrb[24].mxu0 %vm154_vm2, %v147_v55  ;;  %v75_v55 = vld [vmem:[%s23706_s0 + $0x108] sm:$0xff] }
  0x3b   :  { %15928 = vmatprep.mubr.msk.bf16.mxu0 %vm154_vm2, %v148_v56  ;;  %v93_v56 = vpack.c.bf16 %v73_v53, %v72_v52  ;;  %v94_v57 = vpack.c.bf16 %v75_v55, %v74_v54  ;;  %v661_v53 = vld [vmem:[%s23706_s0 + $0x112] sm:$0xff]  ;;  %v662_v54 = vld [vmem:[%s23706_s0 + $0x11a] sm:$0xff] }
  0x3c   :  { %v680_v55 = vpack.c.bf16 %v662_v54, %v661_v53  ;;  %v1313_v54 = vld [vmem:[%s23706_s0 + $0x123] sm:$0xff] }
  0x42   :  { %15929 = vmatmul.mubr.msk.bf16.gmra.mrb[28].mxu0 %vm154_vm2, %v149_v61  ;;  %v628_v61 = vld [vmem:[%s23706_s0 + $0xa] sm:$0xff] }
  0x43   :  { %15932 = vmatprep.mubr.msk.bf16.mxu0 %vm154_vm2, %v150_v62  ;;  %v95_v62 = vpack.c.bf16 %v77_v59, %v76_v58  ;;  %v663_v63 = vpack.c.bf16 %v628_v61, %v627_v60  ;;  %v987_v59 = vld [vmem:[%s23706_s0 + $0x122] sm:$0xff]  ;;  %v988_v60 = vld [vmem:[%s23706_s0 + $0x12a] sm:$0xff]  ;;  %v1279_v61 = vld [vmem:[%s23706_s0 + $0x13] sm:$0xff] }
  0x4a   :  { %15933 = vmatmul.mubr.msk.bf16.gmra.mrb[32].mxu0 %vm154_vm2, %v151_v4  ;;  %v631_v4 = vld [vmem:[%s23706_s0 + $0x22] sm:$0xff] }
  0x4b   :  { %15938 = vmatprep.mubr.msk.bf16.mxu0 %vm154_vm2, %v78_v5  ;;  %v632_v5 = vld [vmem:[%s23706_s0 + $0x2a] sm:$0xff] }
  0x4c   :  { %v18917_v9 = vpack.c.bf16 %v632_v5, %v631_v4  ;;  %v1282_v4 = vld [vmem:[%s23706_s0 + $0x2b] sm:$0xff]  ;;  %v1283_v5 = vld [vmem:[%s23706_s0 + $0x33] sm:$0xff] }
  0x52   :  { %15939 = vmatmul.mubr.msk.bf16.vlgmr.msra.gmra.mrb[0].mxu0 %vm154_vm2, %v79_v13  ;;  %v635_v13 = vld [vmem:[%s23706_s0 + $0x42] sm:$0xff] }
  0x53   :  { %15942 = vmatprep.mubr.msk.bf16.mxu0 %vm154_vm2, %v80_v14  ;;  %15975 = vmatpush3.bf16.msra.mxu0 %v18677_v32  ;;  %v85_v32 = vpack.c.bf16 %v57_v29, %v56_v28  ;;  %v636_v14 = vld [vmem:[%s23706_s0 + $0x4a] sm:$0xff]  ;;  %v645_v29 = vld [vmem:[%s23706_s0 + $0x92] sm:$0xff] }
  0x54   :  { %16012 = vmatprep.subr.bf16.mxu0 %v18782_v15  ;;  %v18940_v17 = vpack.c.bf16 %v636_v14, %v635_v13  ;;  %v1286_v13 = vld [vmem:[%s23706_s0 + $0x4b] sm:$0xff]  ;;  %v1287_v14 = vld [vmem:[%s23706_s0 + $0x53] sm:$0xff] }
  0x5a   :  { %15943 = vmatmul.mubr.msk.bf16.gmra.mrb[4].mxu0 %vm154_vm2, %v81_v20  ;;  %v640_v20 = vld [vmem:[%s23706_s0 + $0x6a] sm:$0xff] }
  0x5b   :  { %15946 = vmatprep.mubr.msk.bf16.mxu0 %vm154_vm2, %v82_v21  ;;  %v669_v22 = vpack.c.bf16 %v640_v20, %v639_v19  ;;  %v1290_v19 = vld [vmem:[%s23706_s0 + $0x6b] sm:$0xff]  ;;  %v1291_v20 = vld [vmem:[%s23706_s0 + $0x73] sm:$0xff] }
  0x62   :  { %15947 = vmatmul.mubr.msk.bf16.gmra.mrb[8].mxu0 %vm154_vm2, %v83_v26  ;;  %v644_v26 = vld [vmem:[%s23706_s0 + $0x8a] sm:$0xff] }
  0x63   :  { %15950 = vmatprep.mubr.msk.bf16.mxu0 %vm154_vm2, %v84_v27  ;;  %v670_v27 = vpack.c.bf16 %v642_v24, %v641_v23  ;;  %v671_v28 = vpack.c.bf16 %v644_v26, %v643_v25  ;;  %v1293_v24 = vld [vmem:[%s23706_s0 + $0x83] sm:$0xff]  ;;  %v1294_v25 = vld [vmem:[%s23706_s0 + $0x8b] sm:$0xff]  ;;  %v1295_v26 = vld [vmem:[%s23706_s0 + $0x93] sm:$0xff] }
  0x6a   :  { %15951 = vmatmul.mubr.msk.bf16.gmra.mrb[12].mxu0 %vm154_vm2, %v85_v32  ;;  %v648_v32 = vld [vmem:[%s23706_s0 + $0xaa] sm:$0xff] }
  0x6b   :  { %15954 = vmatprep.mubr.msk.bf16.mxu0 %vm154_vm2, %v86_v33  ;;  %v672_v33 = vpack.c.bf16 %v646_v30, %v645_v29  ;;  %v673_v34 = vpack.c.bf16 %v648_v32, %v647_v31  ;;  %v1297_v30 = vld [vmem:[%s23706_s0 + $0xa3] sm:$0xff]  ;;  %v1298_v31 = vld [vmem:[%s23706_s0 + $0xab] sm:$0xff]  ;;  %v1299_v32 = vld [vmem:[%s23706_s0 + $0xb3] sm:$0xff] }
  0x72   :  { %15955 = vmatmul.mubr.msk.bf16.gmra.mrb[16].mxu0 %vm154_vm2, %v87_v38  ;;  %v652_v38 = vld [vmem:[%s23706_s0 + $0xca] sm:$0xff] }
  0x73   :  { %15958 = vmatprep.mubr.msk.bf16.mxu0 %vm154_vm2, %v88_v39  ;;  %v674_v39 = vpack.c.bf16 %v650_v36, %v649_v35  ;;  %v675_v40 = vpack.c.bf16 %v652_v38, %v651_v37  ;;  %v1301_v36 = vld [vmem:[%s23706_s0 + $0xc3] sm:$0xff]  ;;  %v1302_v37 = vld [vmem:[%s23706_s0 + $0xcb] sm:$0xff]  ;;  %v1303_v38 = vld [vmem:[%s23706_s0 + $0xd3] sm:$0xff] }
  0x7a   :  { %15959 = vmatmul.mubr.msk.bf16.gmra.mrb[20].mxu0 %vm154_vm2, %v89_v44  ;;  %v656_v44 = vld [vmem:[%s23706_s0 + $0xea] sm:$0xff] }
  0x7b   :  { %15962 = vmatprep.mubr.msk.bf16.mxu0 %vm154_vm2, %v90_v45  ;;  %v676_v45 = vpack.c.bf16 %v654_v42, %v653_v41  ;;  %v677_v46 = vpack.c.bf16 %v656_v44, %v655_v43  ;;  %v1305_v42 = vld [vmem:[%s23706_s0 + $0xe3] sm:$0xff]  ;;  %v1306_v43 = vld [vmem:[%s23706_s0 + $0xeb] sm:$0xff]  ;;  %v1307_v44 = vld [vmem:[%s23706_s0 + $0xf3] sm:$0xff] }
  0x82   :  { %15963 = vmatmul.mubr.msk.bf16.gmra.mrb[24].mxu0 %vm154_vm2, %v91_v50  ;;  %v660_v50 = vld [vmem:[%s23706_s0 + $0x10a] sm:$0xff] }
  0x83   :  { %15966 = vmatprep.mubr.msk.bf16.mxu0 %vm154_vm2, %v92_v51  ;;  %v678_v51 = vpack.c.bf16 %v658_v48, %v657_v47  ;;  %v679_v52 = vpack.c.bf16 %v660_v50, %v659_v49  ;;  %v1309_v48 = vld [vmem:[%s23706_s0 + $0x103] sm:$0xff]  ;;  %v1310_v49 = vld [vmem:[%s23706_s0 + $0x10b] sm:$0xff]  ;;  %v1311_v50 = vld [vmem:[%s23706_s0 + $0x113] sm:$0xff] }
  0x8a   :  { %15967 = vmatmul.mubr.msk.bf16.gmra.mrb[28].mxu0 %vm154_vm2, %v93_v56  ;;  %v1659_v56 = vld [vmem:[%s23705_s1 + $0xf] sm:$0x7] }
  0x8b   :  { %15970 = vmatprep.mubr.msk.bf16.mxu0 %vm154_vm2, %v94_v57  ;;  %v1660_v57 = vpack.c.bf16 %v1659_v56, %v1659_v56  ;;  %v1605_v56 = vld [vmem:[%s23706_s0 + $0x14] sm:$0xff] }
  0x8d   :  { %v1716_v58 = vand.u32 %v1660_v57, %v18625_v6  ;;  %v1606_v57 = vld [vmem:[%s23706_s0 + $0x1c] sm:$0xff] }
  0x92   :  { %15971 = vmatmul.mubr.msk.bf16.gmra.mrb[32].mxu0 %vm154_vm2, %v95_v62  ;;  %v1280_v62 = vld [vmem:[%s23706_s0 + $0x1b] sm:$0xff] }
  0x93   :  { %15976 = vmatprep.mubr.msk.bf16.mxu0 %vm154_vm2, %v663_v63  ;;  %v1006_v63 = vpack.c.bf16 %v988_v60, %v987_v59  ;;  %v1315_v0 = vpack.c.bf16 %v1280_v62, %v1279_v61  ;;  %v1641_v59 = vpack.c.bf16 %v1606_v57, %v1605_v56  ;;  %v2311_v60 = vld [vmem:[%s23705_s1 + $0x15] sm:$0x7]  ;;  %v1607_v61 = vld [vmem:[%s23706_s0 + $0x24] sm:$0xff]  ;;  %v1608_v62 = vld [vmem:[%s23706_s0 + $0x2c] sm:$0xff] }
  0x94   :  { %v1966_v56 = vld [vmem:[%s23706_s0 + $0x13c] sm:$0xff]  ;;  %v2257_v57 = vld [vmem:[%s23706_s0 + $0x25] sm:$0xff] }
  0x9a   :  { %15977 = vmatmul.mubr.msk.bf16.vlgmr.msra.gmra.mrb[0].mxu0 %vm154_vm2, %v18915_v8 }
  0x9b   :  { %15980 = vmatprep.mubr.msk.bf16.mxu0 %vm154_vm2, %v18917_v9  ;;  %16013 = vmatpush3.bf16.msra.mxu0 %v18782_v15  ;;  %v637_v15 = vld [vmem:[%s23706_s0 + $0x52] sm:$0xff] }
  0x9c   :  { %16050 = vmatprep.subr.bf16.mxu0 %v18920_v10  ;;  %v668_v21 = vpack.c.bf16 %v638_v18, %v637_v15  ;;  %v1289_v18 = vld [vmem:[%s23706_s0 + $0x63] sm:$0xff] }
  0xa2   :  { %15981 = vmatmul.mubr.msk.bf16.gmra.mrb[4].mxu0 %vm154_vm2, %v666_v16 }
  0xa3   :  { %15984 = vmatprep.mubr.msk.bf16.mxu0 %vm154_vm2, %v18940_v17 }
  0xaa   :  { %15985 = vmatmul.mubr.msk.bf16.gmra.mrb[8].mxu0 %vm154_vm2, %v668_v21 }
  0xab   :  { %15988 = vmatprep.mubr.msk.bf16.mxu0 %vm154_vm2, %v669_v22 }
  0xb2   :  { %15989 = vmatmul.mubr.msk.bf16.gmra.mrb[12].mxu0 %vm154_vm2, %v670_v27 }
  0xb3   :  { %15992 = vmatprep.mubr.msk.bf16.mxu0 %vm154_vm2, %v671_v28 }
  0xba   :  { %15993 = vmatmul.mubr.msk.bf16.gmra.mrb[16].mxu0 %vm154_vm2, %v672_v33 }
  0xbb   :  { %15996 = vmatprep.mubr.msk.bf16.mxu0 %vm154_vm2, %v673_v34 }
  0xc2   :  { %15997 = vmatmul.mubr.msk.bf16.gmra.mrb[20].mxu0 %vm154_vm2, %v674_v39 }
  0xc3   :  { %16000 = vmatprep.mubr.msk.bf16.mxu0 %vm154_vm2, %v675_v40 }
  0xca   :  { %16001 = vmatmul.mubr.msk.bf16.gmra.mrb[24].mxu0 %vm154_vm2, %v676_v45 }
  0xcb   :  { %16004 = vmatprep.mubr.msk.bf16.mxu0 %vm154_vm2, %v677_v46 }
  0xd2   :  { %16005 = vmatmul.mubr.msk.bf16.gmra.mrb[28].mxu0 %vm154_vm2, %v678_v51 }
  0xd3   :  { %16008 = vmatprep.mubr.msk.bf16.mxu0 %vm154_vm2, %v679_v52 }
  0xda   :  { %16009 = vmatmul.mubr.msk.bf16.gmra.mrb[32].mxu0 %vm154_vm2, %v680_v55 }
  0xdb   :  { %16014 = vmatprep.mubr.msk.bf16.mxu0 %vm154_vm2, %v18915_v8  ;;  %v1986_v8 = vpack.c.bf16 %v1985_v2, %v1985_v2  ;;  %v2312_v2 = vpack.c.bf16 %v2311_v60, %v2311_v60 }
  0xdd   :  { %v19091_v11 = vand.u32 %v1986_v8, %v18625_v6  ;;  %v1612_v8 = vld [vmem:[%s23706_s0 + $0x4c] sm:$0xff] }
  0xe2   :  { %16015 = vmatmul.mubr.msk.bf16.vlgmr.msra.gmra.mrb[0].mxu0 %vm154_vm2, %v18917_v9  ;;  %v1316_v9 = vpack.c.bf16 %v1282_v4, %v1281_v3  ;;  %v19223_v3 = vpack.c.bf16 %v1608_v62, %v1607_v61  ;;  %v2259_v61 = vld [vmem:[%s23706_s0 + $0x35] sm:$0xff]  ;;  %v2260_v62 = vld [vmem:[%s23706_s0 + $0x3d] sm:$0xff] }
  0xe3   :  { %16018 = vmatprep.mubr.msk.bf16.mxu0 %vm154_vm2, %v666_v16  ;;  %16051 = vmatpush3.bf16.msra.mxu0 %v18920_v10  ;;  %v1317_v10 = vpack.c.bf16 %v1284_v7, %v1283_v5  ;;  %v1288_v16 = vld [vmem:[%s23706_s0 + $0x5b] sm:$0xff]  ;;  %v19228_v5 = vand.u32 %v2312_v2, %v18625_v6  ;;  %v1611_v7 = vld [vmem:[%s23706_s0 + $0x44] sm:$0xff]  ;;  %v2294_v2 = vpack.c.bf16 %v2260_v62, %v2259_v61  ;;  %v2592_v62 = vld [vmem:[%s23706_s0 + $0x6e] sm:$0xff] }
  0xe4   :  { %16088 = vmatprep.subr.bf16.mxu0 %v1716_v58  ;;  %v1319_v15 = vpack.c.bf16 %v1288_v16, %v1287_v14  ;;  %v1616_v14 = vld [vmem:[%s23706_s0 + $0x6c] sm:$0xff]  ;;  %v1617_v16 = vld [vmem:[%s23706_s0 + $0x74] sm:$0xff] }
  0xe5   :  { %v2591_v61 = vld [vmem:[%s23706_s0 + $0x66] sm:$0xff] }
  0xea   :  { %16019 = vmatmul.mubr.msk.bf16.gmra.mrb[4].mxu0 %vm154_vm2, %v18940_v17  ;;  %v1318_v17 = vpack.c.bf16 %v1286_v13, %v1285_v12  ;;  %v1644_v12 = vpack.c.bf16 %v1612_v8, %v1611_v7  ;;  %v2265_v7 = vld [vmem:[%s23706_s0 + $0x65] sm:$0xff]  ;;  %v2266_v8 = vld [vmem:[%s23706_s0 + $0x6d] sm:$0xff] }
  0xeb   :  { %16022 = vmatprep.mubr.msk.bf16.mxu0 %vm154_vm2, %v668_v21  ;;  %v1292_v21 = vld [vmem:[%s23706_s0 + $0x7b] sm:$0xff] }
  0xec   :  { %v1321_v23 = vpack.c.bf16 %v1292_v21, %v1291_v20  ;;  %v1620_v20 = vld [vmem:[%s23706_s0 + $0x8c] sm:$0xff]  ;;  %v1621_v21 = vld [vmem:[%s23706_s0 + $0x94] sm:$0xff] }
  0xf2   :  { %16023 = vmatmul.mubr.msk.bf16.gmra.mrb[8].mxu0 %vm154_vm2, %v669_v22  ;;  %v1320_v22 = vpack.c.bf16 %v1290_v19, %v1289_v18  ;;  %v1619_v19 = vld [vmem:[%s23706_s0 + $0x84] sm:$0xff] }
  0xf3   :  { %16026 = vmatprep.mubr.msk.bf16.mxu0 %vm154_vm2, %v670_v27  ;;  %v1296_v27 = vld [vmem:[%s23706_s0 + $0x9b] sm:$0xff] }
  0xf4   :  { %v1323_v29 = vpack.c.bf16 %v1296_v27, %v1295_v26  ;;  %v1624_v26 = vld [vmem:[%s23706_s0 + $0xac] sm:$0xff]  ;;  %v1625_v27 = vld [vmem:[%s23706_s0 + $0xb4] sm:$0xff] }
  0xfa   :  { %16027 = vmatmul.mubr.msk.bf16.gmra.mrb[12].mxu0 %vm154_vm2, %v671_v28  ;;  %v1322_v28 = vpack.c.bf16 %v1294_v25, %v1293_v24  ;;  %v1623_v25 = vld [vmem:[%s23706_s0 + $0xa4] sm:$0xff] }
  0xfb   :  { %16030 = vmatprep.mubr.msk.bf16.mxu0 %vm154_vm2, %v672_v33  ;;  %v1300_v33 = vld [vmem:[%s23706_s0 + $0xbb] sm:$0xff] }
  0xfc   :  { %v1325_v35 = vpack.c.bf16 %v1300_v33, %v1299_v32  ;;  %v1628_v32 = vld [vmem:[%s23706_s0 + $0xcc] sm:$0xff]  ;;  %v1629_v33 = vld [vmem:[%s23706_s0 + $0xd4] sm:$0xff] }
 0x102   :  { %16031 = vmatmul.mubr.msk.bf16.gmra.mrb[16].mxu0 %vm154_vm2, %v673_v34  ;;  %v1324_v34 = vpack.c.bf16 %v1298_v31, %v1297_v30  ;;  %v1627_v31 = vld [vmem:[%s23706_s0 + $0xc4] sm:$0xff] }
 0x103   :  { %16034 = vmatprep.mubr.msk.bf16.mxu0 %vm154_vm2, %v674_v39  ;;  %v1304_v39 = vld [vmem:[%s23706_s0 + $0xdb] sm:$0xff] }
 0x104   :  { %v1327_v41 = vpack.c.bf16 %v1304_v39, %v1303_v38  ;;  %v1632_v38 = vld [vmem:[%s23706_s0 + $0xec] sm:$0xff]  ;;  %v1633_v39 = vld [vmem:[%s23706_s0 + $0xf4] sm:$0xff] }
 0x10a   :  { %16035 = vmatmul.mubr.msk.bf16.gmra.mrb[20].mxu0 %vm154_vm2, %v675_v40  ;;  %v1326_v40 = vpack.c.bf16 %v1302_v37, %v1301_v36  ;;  %v1631_v37 = vld [vmem:[%s23706_s0 + $0xe4] sm:$0xff] }
 0x10b   :  { %16038 = vmatprep.mubr.msk.bf16.mxu0 %vm154_vm2, %v676_v45  ;;  %v1308_v45 = vld [vmem:[%s23706_s0 + $0xfb] sm:$0xff] }
 0x10c   :  { %v1329_v47 = vpack.c.bf16 %v1308_v45, %v1307_v44  ;;  %v1636_v44 = vld [vmem:[%s23706_s0 + $0x10c] sm:$0xff]  ;;  %v1637_v45 = vld [vmem:[%s23706_s0 + $0x114] sm:$0xff] }
 0x112   :  { %16039 = vmatmul.mubr.msk.bf16.gmra.mrb[24].mxu0 %vm154_vm2, %v677_v46  ;;  %v1328_v46 = vpack.c.bf16 %v1306_v43, %v1305_v42  ;;  %v1635_v43 = vld [vmem:[%s23706_s0 + $0x104] sm:$0xff] }
 0x113   :  { %16042 = vmatprep.mubr.msk.bf16.mxu0 %vm154_vm2, %v678_v51  ;;  %v1312_v51 = vld [vmem:[%s23706_s0 + $0x11b] sm:$0xff] }
 0x114   :  { %v1331_v53 = vpack.c.bf16 %v1312_v51, %v1311_v50  ;;  %v1640_v50 = vld [vmem:[%s23706_s0 + $0x12c] sm:$0xff] }
 0x11a   :  { %16043 = vmatmul.mubr.msk.bf16.gmra.mrb[28].mxu0 %vm154_vm2, %v679_v52  ;;  %v1330_v52 = vpack.c.bf16 %v1310_v49, %v1309_v48  ;;  %v1639_v49 = vld [vmem:[%s23706_s0 + $0x124] sm:$0xff] }
 0x11b   :  { %16046 = vmatprep.mubr.msk.bf16.mxu0 %vm154_vm2, %v680_v55  ;;  %v1314_v55 = vld [vmem:[%s23706_s0 + $0x12b] sm:$0xff]  ;;  %v1658_v51 = vpack.c.bf16 %v1640_v50, %v1639_v49 }
 0x11c   :  { %v2583_v49 = vld [vmem:[%s23706_s0 + $0x26] sm:$0xff]  ;;  %v2584_v50 = vld [vmem:[%s23706_s0 + $0x2e] sm:$0xff] }
 0x122   :  { %16047 = vmatmul.mubr.msk.bf16.gmra.mrb[32].mxu0 %vm154_vm2, %v1006_v63  ;;  %v1609_v63 = vld [vmem:[%s23706_s0 + $0x34] sm:$0xff] }
 0x123   :  { %16052 = vmatprep.mubr.msk.bf16.mxu0 %vm154_vm2, %v1315_v0  ;;  %v1610_v0 = vld [vmem:[%s23706_s0 + $0x3c] sm:$0xff] }
 0x124   :  { %v19225_v4 = vpack.c.bf16 %v1610_v0, %v1609_v63  ;;  %v2261_v63 = vld [vmem:[%s23706_s0 + $0x45] sm:$0xff]  ;;  %v2262_v0 = vld [vmem:[%s23706_s0 + $0x4d] sm:$0xff] }
 0x12a   :  { %16053 = vmatmul.mubr.msk.bf16.vlgmr.msra.gmra.mrb[0].mxu0 %vm154_vm2, %v1316_v9  ;;  %v1613_v9 = vld [vmem:[%s23706_s0 + $0x54] sm:$0xff] }
 0x12b   :  { %16056 = vmatprep.mubr.msk.bf16.mxu0 %vm154_vm2, %v1317_v10  ;;  %16089 = vmatpush3.bf16.msra.mxu0 %v1716_v58  ;;  %v1332_v58 = vpack.c.bf16 %v1314_v55, %v1313_v54  ;;  %v1614_v10 = vld [vmem:[%s23706_s0 + $0x5c] sm:$0xff]  ;;  %v1965_v55 = vld [vmem:[%s23706_s0 + $0x134] sm:$0xff] }
 0x12c   :  { %16126 = vmatprep.subr.bf16.mxu0 %v19091_v11  ;;  %v19248_v13 = vpack.c.bf16 %v1614_v10, %v1613_v9  ;;  %v2297_v10 = vpack.c.bf16 %v2266_v8, %v2265_v7 }
 0x132   :  { %16057 = vmatmul.mubr.msk.bf16.gmra.mrb[4].mxu0 %vm154_vm2, %v1318_v17  ;;  %v1618_v17 = vld [vmem:[%s23706_s0 + $0x7c] sm:$0xff] }
 0x133   :  { %16060 = vmatprep.mubr.msk.bf16.mxu0 %vm154_vm2, %v1319_v15  ;;  %v1647_v18 = vpack.c.bf16 %v1618_v17, %v1617_v16 }
 0x13a   :  { %16061 = vmatmul.mubr.msk.bf16.gmra.mrb[8].mxu0 %vm154_vm2, %v1320_v22  ;;  %v1622_v22 = vld [vmem:[%s23706_s0 + $0x9c] sm:$0xff] }
 0x13b   :  { %16064 = vmatprep.mubr.msk.bf16.mxu0 %vm154_vm2, %v1321_v23  ;;  %v1648_v23 = vpack.c.bf16 %v1620_v20, %v1619_v19  ;;  %v1649_v24 = vpack.c.bf16 %v1622_v22, %v1621_v21  ;;  %v2273_v19 = vld [vmem:[%s23706_s0 + $0xa5] sm:$0xff]  ;;  %v2274_v20 = vld [vmem:[%s23706_s0 + $0xad] sm:$0xff] }
 0x13c   :  { %v2301_v22 = vpack.c.bf16 %v2274_v20, %v2273_v19 }
 0x142   :  { %16065 = vmatmul.mubr.msk.bf16.gmra.mrb[12].mxu0 %vm154_vm2, %v1322_v28  ;;  %v1626_v28 = vld [vmem:[%s23706_s0 + $0xbc] sm:$0xff] }
 0x143   :  { %16068 = vmatprep.mubr.msk.bf16.mxu0 %vm154_vm2, %v1323_v29  ;;  %v1650_v29 = vpack.c.bf16 %v1624_v26, %v1623_v25  ;;  %v1651_v30 = vpack.c.bf16 %v1626_v28, %v1625_v27  ;;  %v2277_v25 = vld [vmem:[%s23706_s0 + $0xc5] sm:$0xff]  ;;  %v2278_v26 = vld [vmem:[%s23706_s0 + $0xcd] sm:$0xff] }
 0x144   :  { %v2303_v28 = vpack.c.bf16 %v2278_v26, %v2277_v25 }
 0x14a   :  { %16069 = vmatmul.mubr.msk.bf16.gmra.mrb[16].mxu0 %vm154_vm2, %v1324_v34  ;;  %v1630_v34 = vld [vmem:[%s23706_s0 + $0xdc] sm:$0xff] }
 0x14b   :  { %16072 = vmatprep.mubr.msk.bf16.mxu0 %vm154_vm2, %v1325_v35  ;;  %v1652_v35 = vpack.c.bf16 %v1628_v32, %v1627_v31  ;;  %v1653_v36 = vpack.c.bf16 %v1630_v34, %v1629_v33  ;;  %v2281_v31 = vld [vmem:[%s23706_s0 + $0xe5] sm:$0xff]  ;;  %v2282_v32 = vld [vmem:[%s23706_s0 + $0xed] sm:$0xff] }
 0x14c   :  { %v2305_v34 = vpack.c.bf16 %v2282_v32, %v2281_v31 }
 0x152   :  { %16073 = vmatmul.mubr.msk.bf16.gmra.mrb[20].mxu0 %vm154_vm2, %v1326_v40  ;;  %v1634_v40 = vld [vmem:[%s23706_s0 + $0xfc] sm:$0xff] }
 0x153   :  { %16076 = vmatprep.mubr.msk.bf16.mxu0 %vm154_vm2, %v1327_v41  ;;  %v1654_v41 = vpack.c.bf16 %v1632_v38, %v1631_v37  ;;  %v1655_v42 = vpack.c.bf16 %v1634_v40, %v1633_v39  ;;  %v2285_v37 = vld [vmem:[%s23706_s0 + $0x105] sm:$0xff]  ;;  %v2286_v38 = vld [vmem:[%s23706_s0 + $0x10d] sm:$0xff] }
 0x154   :  { %v2307_v40 = vpack.c.bf16 %v2286_v38, %v2285_v37 }
 0x15a   :  { %16077 = vmatmul.mubr.msk.bf16.gmra.mrb[24].mxu0 %vm154_vm2, %v1328_v46  ;;  %v1638_v46 = vld [vmem:[%s23706_s0 + $0x11c] sm:$0xff] }
 0x15b   :  { %16080 = vmatprep.mubr.msk.bf16.mxu0 %vm154_vm2, %v1329_v47  ;;  %v1656_v47 = vpack.c.bf16 %v1636_v44, %v1635_v43  ;;  %v1657_v48 = vpack.c.bf16 %v1638_v46, %v1637_v45  ;;  %v2289_v43 = vld [vmem:[%s23706_s0 + $0x125] sm:$0xff]  ;;  %v2290_v44 = vld [vmem:[%s23706_s0 + $0x12d] sm:$0xff] }
 0x15c   :  { %v2309_v46 = vpack.c.bf16 %v2290_v44, %v2289_v43  ;;  %v17952_v43 = vld [vmem:[%s23707_s10 + $0x4] ss:$12 sps:$4 sm:$0xff]   ;;  %v19637_v44 = vld [vmem:[%s23708_s2] ss:$0 sm:$0xff] }
 0x162   :  { %16081 = vmatmul.mubr.msk.bf16.gmra.mrb[28].mxu0 %vm154_vm2, %v1330_v52  ;;  %v2637_v52 = vld [vmem:[%s23705_s1 + $0x18] sm:$0x7] }
 0x163   :  { %16084 = vmatprep.mubr.msk.bf16.mxu0 %vm154_vm2, %v1331_v53  ;;  %v2638_v53 = vpack.c.bf16 %v2637_v52, %v2637_v52  ;;  %v2619_v52 = vpack.c.bf16 %v2584_v50, %v2583_v49 }
 0x165   :  { %v2694_v54 = vand.u32 %v2638_v53, %v18625_v6  ;;  %v2585_v53 = vld [vmem:[%s23706_s0 + $0x36] sm:$0xff] }
 0x16a   :  { %16085 = vmatmul.mubr.msk.bf16.gmra.mrb[32].mxu0 %vm154_vm2, %v1332_v58  ;;  %v2258_v58 = vld [vmem:[%s23706_s0 + $0x2d] sm:$0xff] }
 0x16b   :  { %16090 = vmatprep.mubr.msk.bf16.mxu0 %vm154_vm2, %v1641_v59  ;;  %v1984_v59 = vpack.c.bf16 %v1966_v56, %v1965_v55  ;;  %v2293_v60 = vpack.c.bf16 %v2258_v58, %v2257_v57  ;;  %v2587_v55 = vld [vmem:[%s23706_s0 + $0x46] sm:$0xff]  ;;  %v2588_v56 = vld [vmem:[%s23706_s0 + $0x4e] sm:$0xff] }
 0x16c   :  { %v2621_v58 = vpack.c.bf16 %v2588_v56, %v2587_v55 }
 0x172   :  { %16091 = vmatmul.mubr.msk.bf16.vlgmr.msra.gmra.mrb[0].mxu0 %vm154_vm2, %v19223_v3 }
 0x173   :  { %16094 = vmatprep.mubr.msk.bf16.mxu0 %vm154_vm2, %v19225_v4  ;;  %16127 = vmatpush3.bf16.msra.mxu0 %v19091_v11  ;;  %v1615_v11 = vld [vmem:[%s23706_s0 + $0x64] sm:$0xff] }
 0x174   :  { %16164 = vmatprep.subr.bf16.mxu0 %v19228_v5  ;;  %v1646_v15 = vpack.c.bf16 %v1616_v14, %v1615_v11  ;;  %v2269_v11 = vld [vmem:[%s23706_s0 + $0x85] sm:$0xff]  ;;  %v2270_v14 = vld [vmem:[%s23706_s0 + $0x8d] sm:$0xff] }
 0x175   :  { %v2299_v17 = vpack.c.bf16 %v2270_v14, %v2269_v11 }
 0x17a   :  { %16095 = vmatmul.mubr.msk.bf16.gmra.mrb[4].mxu0 %vm154_vm2, %v1644_v12 }
 0x17b   :  { %16098 = vmatprep.mubr.msk.bf16.mxu0 %vm154_vm2, %v19248_v13 }
 0x182   :  { %16099 = vmatmul.mubr.msk.bf16.gmra.mrb[8].mxu0 %vm154_vm2, %v1646_v15 }
 0x183   :  { %16102 = vmatprep.mubr.msk.bf16.mxu0 %vm154_vm2, %v1647_v18 }
 0x18a   :  { %16103 = vmatmul.mubr.msk.bf16.gmra.mrb[12].mxu0 %vm154_vm2, %v1648_v23 }
 0x18b   :  { %16106 = vmatprep.mubr.msk.bf16.mxu0 %vm154_vm2, %v1649_v24 }
 0x192   :  { %16107 = vmatmul.mubr.msk.bf16.gmra.mrb[16].mxu0 %vm154_vm2, %v1650_v29 }
 0x193   :  { %16110 = vmatprep.mubr.msk.bf16.mxu0 %vm154_vm2, %v1651_v30 }
 0x19a   :  { %16111 = vmatmul.mubr.msk.bf16.gmra.mrb[20].mxu0 %vm154_vm2, %v1652_v35 }
 0x19b   :  { %16114 = vmatprep.mubr.msk.bf16.mxu0 %vm154_vm2, %v1653_v36 }
 0x1a2   :  { %16115 = vmatmul.mubr.msk.bf16.gmra.mrb[24].mxu0 %vm154_vm2, %v1654_v41 }
 0x1a3   :  { %16118 = vmatprep.mubr.msk.bf16.mxu0 %vm154_vm2, %v1655_v42 }
 0x1aa   :  { %16119 = vmatmul.mubr.msk.bf16.gmra.mrb[28].mxu0 %vm154_vm2, %v1656_v47 }
 0x1ab   :  { %16122 = vmatprep.mubr.msk.bf16.mxu0 %vm154_vm2, %v1657_v48 }
 0x1b2   :  { %16123 = vmatmul.mubr.msk.bf16.gmra.mrb[32].mxu0 %vm154_vm2, %v1658_v51 }
 0x1b3   :  { %16128 = vmatprep.mubr.msk.bf16.mxu0 %vm154_vm2, %v19223_v3  ;;  %v2295_v3 = vpack.c.bf16 %v2262_v0, %v2261_v63  ;;  %v2623_v0 = vpack.c.bf16 %v2592_v62, %v2591_v61 }
 0x1ba   :  { %16129 = vmatmul.mubr.msk.bf16.vlgmr.msra.gmra.mrb[0].mxu0 %vm154_vm2, %v19225_v4  ;;  %v2263_v4 = vld [vmem:[%s23706_s0 + $0x55] sm:$0xff] }
 0x1bb   :  { %16132 = vmatprep.mubr.msk.bf16.mxu0 %vm154_vm2, %v1644_v12  ;;  %16165 = vmatpush3.bf16.msra.mxu0 %v19228_v5  ;;  %v2264_v5 = vld [vmem:[%s23706_s0 + $0x5d] sm:$0xff]  ;;  %v2267_v12 = vld [vmem:[%s23706_s0 + $0x75] sm:$0xff] }
 0x1bc   :  { %16202 = vmatprep.subr.bf16.mxu0 %v2694_v54  ;;  %v2296_v9 = vpack.c.bf16 %v2264_v5, %v2263_v4  ;;  %v2595_v4 = vld [vmem:[%s23706_s0 + $0x86] sm:$0xff]  ;;  %v2596_v5 = vld [vmem:[%s23706_s0 + $0x8e] sm:$0xff] }
 0x1bd   :  { %v2625_v8 = vpack.c.bf16 %v2596_v5, %v2595_v4 }
 0x1c2   :  { %16133 = vmatmul.mubr.msk.bf16.gmra.mrb[4].mxu0 %vm154_vm2, %v19248_v13  ;;  %v2268_v13 = vld [vmem:[%s23706_s0 + $0x7d] sm:$0xff] }
 0x1c3   :  { %16136 = vmatprep.mubr.msk.bf16.mxu0 %vm154_vm2, %v1646_v15  ;;  %v2298_v16 = vpack.c.bf16 %v2268_v13, %v2267_v12  ;;  %v2271_v15 = vld [vmem:[%s23706_s0 + $0x95] sm:$0xff]  ;;  %v2599_v12 = vld [vmem:[%s23706_s0 + $0xa6] sm:$0xff] }
 0x1c4   :  { %v2600_v13 = vld [vmem:[%s23706_s0 + $0xae] sm:$0xff] }
 0x1c5   :  { %v2627_v14 = vpack.c.bf16 %v2600_v13, %v2599_v12 }
 0x1ca   :  { %16137 = vmatmul.mubr.msk.bf16.gmra.mrb[8].mxu0 %vm154_vm2, %v1647_v18  ;;  %v2272_v18 = vld [vmem:[%s23706_s0 + $0x9d] sm:$0xff] }
 0x1cb   :  { %16140 = vmatprep.mubr.msk.bf16.mxu0 %vm154_vm2, %v1648_v23  ;;  %v2300_v21 = vpack.c.bf16 %v2272_v18, %v2271_v15  ;;  %v2275_v23 = vld [vmem:[%s23706_s0 + $0xb5] sm:$0xff]  ;;  %v2603_v15 = vld [vmem:[%s23706_s0 + $0xc6] sm:$0xff] }
 0x1cc   :  { %v2604_v18 = vld [vmem:[%s23706_s0 + $0xce] sm:$0xff] }
 0x1cd   :  { %v2629_v20 = vpack.c.bf16 %v2604_v18, %v2603_v15 }
 0x1d2   :  { %16141 = vmatmul.mubr.msk.bf16.gmra.mrb[12].mxu0 %vm154_vm2, %v1649_v24  ;;  %v2276_v24 = vld [vmem:[%s23706_s0 + $0xbd] sm:$0xff] }
 0x1d3   :  { %16144 = vmatprep.mubr.msk.bf16.mxu0 %vm154_vm2, %v1650_v29  ;;  %v2302_v27 = vpack.c.bf16 %v2276_v24, %v2275_v23  ;;  %v2279_v29 = vld [vmem:[%s23706_s0 + $0xd5] sm:$0xff]  ;;  %v2607_v23 = vld [vmem:[%s23706_s0 + $0xe6] sm:$0xff] }
 0x1d4   :  { %v2608_v24 = vld [vmem:[%s23706_s0 + $0xee] sm:$0xff] }
 0x1d5   :  { %v2631_v26 = vpack.c.bf16 %v2608_v24, %v2607_v23 }
 0x1da   :  { %16145 = vmatmul.mubr.msk.bf16.gmra.mrb[16].mxu0 %vm154_vm2, %v1651_v30  ;;  %v2280_v30 = vld [vmem:[%s23706_s0 + $0xdd] sm:$0xff] }
 0x1db   :  { %16148 = vmatprep.mubr.msk.bf16.mxu0 %vm154_vm2, %v1652_v35  ;;  %v2304_v33 = vpack.c.bf16 %v2280_v30, %v2279_v29  ;;  %v2283_v35 = vld [vmem:[%s23706_s0 + $0xf5] sm:$0xff]  ;;  %v2611_v29 = vld [vmem:[%s23706_s0 + $0x106] sm:$0xff] }
 0x1dc   :  { %v2612_v30 = vld [vmem:[%s23706_s0 + $0x10e] sm:$0xff] }
 0x1dd   :  { %v2633_v32 = vpack.c.bf16 %v2612_v30, %v2611_v29 }
 0x1e2   :  { %16149 = vmatmul.mubr.msk.bf16.gmra.mrb[20].mxu0 %vm154_vm2, %v1653_v36  ;;  %v2284_v36 = vld [vmem:[%s23706_s0 + $0xfd] sm:$0xff] }
 0x1e3   :  { %16152 = vmatprep.mubr.msk.bf16.mxu0 %vm154_vm2, %v1654_v41  ;;  %v2306_v39 = vpack.c.bf16 %v2284_v36, %v2283_v35  ;;  %v2287_v41 = vld [vmem:[%s23706_s0 + $0x115] sm:$0xff]  ;;  %v2615_v35 = vld [vmem:[%s23706_s0 + $0x126] sm:$0xff] }
 0x1e4   :  { %v2616_v36 = vld [vmem:[%s23706_s0 + $0x12e] sm:$0xff] }
 0x1e5   :  { %v2635_v38 = vpack.c.bf16 %v2616_v36, %v2615_v35 }
 0x1ea   :  { %16153 = vmatmul.mubr.msk.bf16.gmra.mrb[24].mxu0 %vm154_vm2, %v1655_v42  ;;  %v2288_v42 = vld [vmem:[%s23706_s0 + $0x11d] sm:$0xff] }
 0x1eb   :  { %16156 = vmatprep.mubr.msk.bf16.mxu0 %vm154_vm2, %v1656_v47  ;;  %v2308_v45 = vpack.c.bf16 %v2288_v42, %v2287_v41  ;;  %v2291_v47 = vld [vmem:[%s23706_s0 + $0x135] sm:$0xff]  ;;  %v18547_v42 = vmov 0.0  }
 0x1ec   :  { %16240 = vmatprep.subr.bf16.mxu1 %v18547_v42  ;;  %16242 = vmatprep.mubr.msk.bf16.mxu1 %vm18548_vm3, %v18547_v42 }
 0x1f2   :  { %16157 = vmatmul.mubr.msk.bf16.gmra.mrb[28].mxu0 %vm154_vm2, %v1657_v48  ;;  %v2292_v48 = vld [vmem:[%s23706_s0 + $0x13d] sm:$0xff] }
 0x1f3   :  { %16160 = vmatprep.mubr.msk.bf16.mxu0 %vm154_vm2, %v1658_v51  ;;  %v2310_v51 = vpack.c.bf16 %v2292_v48, %v2291_v47 }
 0x1fa   :  { %16161 = vmatmul.mubr.msk.bf16.gmra.mrb[32].mxu0 %vm154_vm2, %v1984_v59  ;;  %v2589_v59 = vld [vmem:[%s23706_s0 + $0x56] sm:$0xff] }
 0x1fb   :  { %16166 = vmatprep.mubr.msk.bf16.mxu0 %vm154_vm2, %v2293_v60  ;;  %v2590_v60 = vld [vmem:[%s23706_s0 + $0x5e] sm:$0xff] }
 0x1fc   :  { %v2622_v63 = vpack.c.bf16 %v2590_v60, %v2589_v59 }
 0x202   :  { %16167 = vmatmul.mubr.msk.bf16.vlgmr.msra.gmra.mrb[0].mxu0 %vm154_vm2, %v2294_v2  ;;  %v2593_v2 = vld [vmem:[%s23706_s0 + $0x76] sm:$0xff] }
 0x203   :  { %16170 = vmatprep.mubr.msk.bf16.mxu0 %vm154_vm2, %v2295_v3  ;;  %16203 = vmatpush3.bf16.msra.mxu0 %v2694_v54  ;;  %v2586_v54 = vld [vmem:[%s23706_s0 + $0x3e] sm:$0xff] }
 0x204   :  { %v2620_v57 = vpack.c.bf16 %v2586_v54, %v2585_v53  ;;  %v2594_v3 = vld [vmem:[%s23706_s0 + $0x7e] sm:$0xff] }
 0x205   :  { %v2624_v7 = vpack.c.bf16 %v2594_v3, %v2593_v2 }
 0x20a   :  { %16171 = vmatmul.mubr.msk.bf16.gmra.mrb[4].mxu0 %vm154_vm2, %v2296_v9  ;;  %v2597_v9 = vld [vmem:[%s23706_s0 + $0x96] sm:$0xff] }
 0x20b   :  { %16174 = vmatprep.mubr.msk.bf16.mxu0 %vm154_vm2, %v2297_v10  ;;  %v2598_v10 = vld [vmem:[%s23706_s0 + $0x9e] sm:$0xff] }
 0x20c   :  { %v2626_v11 = vpack.c.bf16 %v2598_v10, %v2597_v9 }
 0x212   :  { %16175 = vmatmul.mubr.msk.bf16.gmra.mrb[8].mxu0 %vm154_vm2, %v2298_v16  ;;  %v2601_v16 = vld [vmem:[%s23706_s0 + $0xb6] sm:$0xff] }
 0x213   :  { %16178 = vmatprep.mubr.msk.bf16.mxu0 %vm154_vm2, %v2299_v17  ;;  %v2602_v17 = vld [vmem:[%s23706_s0 + $0xbe] sm:$0xff] }
 0x214   :  { %v2628_v19 = vpack.c.bf16 %v2602_v17, %v2601_v16 }
 0x21a   :  { %16179 = vmatmul.mubr.msk.bf16.gmra.mrb[12].mxu0 %vm154_vm2, %v2300_v21  ;;  %v2605_v21 = vld [vmem:[%s23706_s0 + $0xd6] sm:$0xff] }
 0x21b   :  { %16182 = vmatprep.mubr.msk.bf16.mxu0 %vm154_vm2, %v2301_v22  ;;  %v2606_v22 = vld [vmem:[%s23706_s0 + $0xde] sm:$0xff] }
 0x21c   :  { %v2630_v25 = vpack.c.bf16 %v2606_v22, %v2605_v21 }
 0x222   :  { %16183 = vmatmul.mubr.msk.bf16.gmra.mrb[16].mxu0 %vm154_vm2, %v2302_v27  ;;  %v2609_v27 = vld [vmem:[%s23706_s0 + $0xf6] sm:$0xff] }
 0x223   :  { %16186 = vmatprep.mubr.msk.bf16.mxu0 %vm154_vm2, %v2303_v28  ;;  %v2610_v28 = vld [vmem:[%s23706_s0 + $0xfe] sm:$0xff] }
 0x224   :  { %v2632_v31 = vpack.c.bf16 %v2610_v28, %v2609_v27 }
 0x22a   :  { %16187 = vmatmul.mubr.msk.bf16.gmra.mrb[20].mxu0 %vm154_vm2, %v2304_v33  ;;  %v2613_v33 = vld [vmem:[%s23706_s0 + $0x116] sm:$0xff] }
 0x22b   :  { %16190 = vmatprep.mubr.msk.bf16.mxu0 %vm154_vm2, %v2305_v34  ;;  %v2614_v34 = vld [vmem:[%s23706_s0 + $0x11e] sm:$0xff] }
 0x22c   :  { %v2634_v37 = vpack.c.bf16 %v2614_v34, %v2613_v33 }
 0x232   :  { %16191 = vmatmul.mubr.msk.bf16.gmra.mrb[24].mxu0 %vm154_vm2, %v2306_v39  ;;  %v2617_v39 = vld [vmem:[%s23706_s0 + $0x136] sm:$0xff] }
 0x233   :  { %16194 = vmatprep.mubr.msk.bf16.mxu0 %vm154_vm2, %v2307_v40  ;;  %v2618_v40 = vld [vmem:[%s23706_s0 + $0x13e] sm:$0xff] }
 0x234   :  { %v2636_v41 = vpack.c.bf16 %v2618_v40, %v2617_v39 }
 0x23a   :  { %16195 = vmatmul.mubr.msk.bf16.gmra.mrb[28].mxu0 %vm154_vm2, %v2308_v45 }
 0x23b   :  { %16198 = vmatprep.mubr.msk.bf16.mxu0 %vm154_vm2, %v2309_v46 }
 0x242   :  { %16199 = vmatmul.mubr.msk.bf16.gmra.mrb[32].mxu0 %vm154_vm2, %v2310_v51 }
 0x243   :  { %16204 = vmatprep.mubr.msk.bf16.mxu0 %vm154_vm2, %v2619_v52 }
 0x24a   :  { %16205 = vmatmul.mubr.msk.bf16.vlgmr.msra.gmra.mrb[0].mxu0 %vm154_vm2, %v2620_v57 }
 0x24b   :  { %16208 = vmatprep.mubr.msk.bf16.mxu0 %vm154_vm2, %v2621_v58 }
 0x252   :  { %16209 = vmatmul.mubr.msk.bf16.gmra.mrb[4].mxu0 %vm154_vm2, %v2622_v63 }
 0x253   :  { %16212 = vmatprep.mubr.msk.bf16.mxu0 %vm154_vm2, %v2623_v0 }
 0x25a   :  { %16213 = vmatmul.mubr.msk.bf16.gmra.mrb[8].mxu0 %vm154_vm2, %v2624_v7 }
 0x25b   :  { %16216 = vmatprep.mubr.msk.bf16.mxu0 %vm154_vm2, %v2625_v8 }
 0x262   :  { %16217 = vmatmul.mubr.msk.bf16.gmra.mrb[12].mxu0 %vm154_vm2, %v2626_v11 }
 0x263   :  { %16220 = vmatprep.mubr.msk.bf16.mxu0 %vm154_vm2, %v2627_v14 }
 0x26a   :  { %16221 = vmatmul.mubr.msk.bf16.gmra.mrb[16].mxu0 %vm154_vm2, %v2628_v19 }
 0x26b   :  { %16224 = vmatprep.mubr.msk.bf16.mxu0 %vm154_vm2, %v2629_v20 }
 0x272   :  { %16225 = vmatmul.mubr.msk.bf16.gmra.mrb[20].mxu0 %vm154_vm2, %v2630_v25 }
 0x273   :  { %16228 = vmatprep.mubr.msk.bf16.mxu0 %vm154_vm2, %v2631_v26 }
 0x27a   :  { %16229 = vmatmul.mubr.msk.bf16.gmra.mrb[24].mxu0 %vm154_vm2, %v2632_v31 }
 0x27b   :  { %16232 = vmatprep.mubr.msk.bf16.mxu0 %vm154_vm2, %v2633_v32 }
 0x282   :  { %16233 = vmatmul.mubr.msk.bf16.gmra.mrb[28].mxu0 %vm154_vm2, %v2634_v37 }
 0x283   :  { %16236 = vmatprep.mubr.msk.bf16.mxu0 %vm154_vm2, %v2635_v38 }
 0x28a   :  { %16237 = vmatmul.mubr.msk.bf16.gmra.mrb[32].mxu0 %vm154_vm2, %v2636_v41 }
 0x28b   :  { %3467 = vmatprep.mubr.bf16.mxu0 %v17952_v43 }
 0x31d   :  { %v16206_v45 = vpop.f32.mrb[0].mxu0 }
 0x31e   :  { %v2918_v46 = vadd.f32 %v16206_v45, %v19637_v44  ;;  %v2730_v47 = vpop.f32.mrb[1].mxu0 }
 0x31f   :  { %v2916_v48 = vadd.f32 %v19637_v44, %v2730_v47  ;;  %v16207_v49 = vpop.f32.mrb[2].mxu0 }
 0x320   :  { %v2954_v50 = vmax.f32 %v2918_v46, 0.0  ;;  %v2919_v51 = vadd.f32 %v16207_v49, %v19637_v44  ;;  %v2733_v52 = vpop.f32.mrb[3].mxu0 }
 0x321   :  { %v2952_v53 = vmax.f32 %v2916_v48, 0.0  ;;  %v2917_v54 = vadd.f32 %v19637_v44, %v2733_v52 }
 0x322   :  { %2991 = vst.msk [vmem:[#allocation2 + $0x10] sm:$0xff] %vm2988_vm4, %v2954_v50  ;;  %v2955_v55 = vmax.f32 %v2919_v51, 0.0 }
 0x323   :  { %2989 = vst.msk [vmem:[#allocation2] sm:$0xff] %vm2988_vm4, %v2952_v53  ;;  %v2953_v56 = vmax.f32 %v2917_v54, 0.0 }
 0x324   :  { %2992 = vst.msk [vmem:[#allocation2 + $0x18] sm:$0xff] %vm2988_vm4, %v2955_v55 }
 0x325   :  { %2990 = vst.msk [vmem:[#allocation2 + $0x8] sm:$0xff] %vm2988_vm4, %v2953_v56  ;;  %v16210_v57 = vpop.f32.mrb[4].mxu0 }
 0x326   :  { %v2922_v58 = vadd.f32 %v16210_v57, %v19637_v44  ;;  %v2746_v59 = vpop.f32.mrb[5].mxu0 }
 0x327   :  { %v2920_v60 = vadd.f32 %v19637_v44, %v2746_v59  ;;  %v16211_v61 = vpop.f32.mrb[6].mxu0 }
 0x328   :  { %v2958_v62 = vmax.f32 %v2922_v58, 0.0  ;;  %v2923_v63 = vadd.f32 %v16211_v61, %v19637_v44  ;;  %v2749_v0 = vpop.f32.mrb[7].mxu0 }
 0x329   :  { %v2956_v2 = vmax.f32 %v2920_v60, 0.0  ;;  %v2921_v3 = vadd.f32 %v19637_v44, %v2749_v0 }
 0x32a   :  { %2995 = vst.msk [vmem:[#allocation2 + $0x30] sm:$0xff] %vm2988_vm4, %v2958_v62  ;;  %v2959_v4 = vmax.f32 %v2923_v63, 0.0  ;;  %v3025_v63 = vld [vmem:[#allocation2] sm:$0xff] }
 0x32b   :  { %2993 = vst.msk [vmem:[#allocation2 + $0x20] sm:$0xff] %vm2988_vm4, %v2956_v2  ;;  %v2957_v5 = vmax.f32 %v2921_v3, 0.0  ;;  %v3127_v56 = vld [vmem:[#allocation2 + $0x12] sm:$0xff] }
 0x32c   :  { %2996 = vst.msk [vmem:[#allocation2 + $0x38] sm:$0xff] %vm2988_vm4, %v2959_v4  ;;  %v3059_v55 = vld [vmem:[#allocation2 + $0x1] sm:$0xff]  ;;  %v3161_v57 = vld [vmem:[#allocation2 + $0x13] sm:$0xff]  ;;  %v3060_v61 = vld [vmem:[#allocation2 + $0x9] sm:$0xff] }
 0x32d   :  { %2994 = vst.msk [vmem:[#allocation2 + $0x28] sm:$0xff] %vm2988_vm4, %v2957_v5  ;;  %v16214_v7 = vpop.f32.mrb[8].mxu0  ;;  %v3026_v60 = vld [vmem:[#allocation2 + $0x8] sm:$0xff]  ;;  %v3093_v3 = vmax.f32 %v3025_v63, %v3059_v55  ;;  %v3195_v4 = vmax.f32 %v3127_v56, %v3161_v57 }
 0x32e   :  { %v2926_v8 = vadd.f32 %v16214_v7, %v19637_v44  ;;  %v2762_v9 = vpop.f32.mrb[9].mxu0  ;;  %v3094_v7 = vmax.f32 %v3026_v60, %v3060_v61 }
 0x32f   :  { %v2924_v10 = vadd.f32 %v19637_v44, %v2762_v9  ;;  %v16215_v12 = vpop.f32.mrb[10].mxu0 }
 0x330   :  { %v2962_v13 = vmax.f32 %v2926_v8, 0.0  ;;  %v2927_v11 = vadd.f32 %v16215_v12, %v19637_v44  ;;  %v2765_v14 = vpop.f32.mrb[11].mxu0 }
 0x331   :  { %v2960_v16 = vmax.f32 %v2924_v10, 0.0  ;;  %v2925_v17 = vadd.f32 %v19637_v44, %v2765_v14  ;;  %v19716_v63 = vld [vmem:[#allocation2 + $0x30] sm:$0xff] }
 0x332   :  { %2999 = vst.msk [vmem:[#allocation2 + $0x50] sm:$0xff] %vm2988_vm4, %v2962_v13  ;;  %v2963_v15 = vmax.f32 %v2927_v11, 0.0  ;;  %v3128_v50 = vld [vmem:[#allocation2 + $0x1a] sm:$0xff]  ;;  %v3061_v13 = vld [vmem:[#allocation2 + $0x11] sm:$0xff] }
 0x333   :  { %2997 = vst.msk [vmem:[#allocation2 + $0x40] sm:$0xff] %vm2988_vm4, %v2960_v16  ;;  %v2961_v18 = vmax.f32 %v2925_v17, 0.0  ;;  %v3162_v51 = vld [vmem:[#allocation2 + $0x1b] sm:$0xff]  ;;  %v19685_v5 = vld [vmem:[#allocation2 + $0x32] sm:$0xff] }
 0x334   :  { %3000 = vst.msk [vmem:[#allocation2 + $0x58] sm:$0xff] %vm2988_vm4, %v2963_v15  ;;  %v3196_v0 = vmax.f32 %v3128_v50, %v3162_v51  ;;  %v19688_v8 = vld [vmem:[#allocation2 + $0x22] sm:$0xff]  ;;  %v19690_v10 = vld [vmem:[#allocation2 + $0x33] sm:$0xff]  ;;  %v3130_v14 = vld [vmem:[#allocation2 + $0x2a] sm:$0xff] }
 0x335   :  { %2998 = vst.msk [vmem:[#allocation2 + $0x48] sm:$0xff] %vm2988_vm4, %v2961_v18  ;;  %v16218_v19 = vpop.f32.mrb[12].mxu0  ;;  %v3163_v9 = vld [vmem:[#allocation2 + $0x23] sm:$0xff]  ;;  %v3062_v11 = vld [vmem:[#allocation2 + $0x19] sm:$0xff]  ;;  %v3164_v16 = vld [vmem:[#allocation2 + $0x2b] sm:$0xff] }
 0x336   :  { %v2930_v20 = vadd.f32 %v16218_v19, %v19637_v44  ;;  %v2778_v21 = vpop.f32.mrb[13].mxu0  ;;  %v3063_v17 = vld [vmem:[#allocation2 + $0x21] sm:$0xff] }
 0x337   :  { %v2928_v22 = vadd.f32 %v19637_v44, %v2778_v21  ;;  %v16219_v23 = vpop.f32.mrb[14].mxu0 }
 0x338   :  { %v2966_v24 = vmax.f32 %v2930_v20, 0.0  ;;  %v2931_v25 = vadd.f32 %v16219_v23, %v19637_v44  ;;  %v2781_v26 = vpop.f32.mrb[15].mxu0 }
 0x339   :  { %v2964_v27 = vmax.f32 %v2928_v22, 0.0  ;;  %v2929_v28 = vadd.f32 %v19637_v44, %v2781_v26  ;;  %v19694_v22 = vmax.f32 %v3094_v7, %v3196_v0  ;;  %v3027_v26 = vld [vmem:[#allocation2 + $0x10] sm:$0xff] }
 0x33a   :  { %3003 = vst.msk [vmem:[#allocation2 + $0x70] sm:$0xff] %vm2988_vm4, %v2966_v24  ;;  %v2967_v29 = vmax.f32 %v2931_v25, 0.0  ;;  %v19697_v25 = vmax.f32 %v3093_v3, %v3195_v4  ;;  %v3095_v55 = vmax.f32 %v3027_v26, %v3061_v13 }
 0x33b   :  { %3001 = vst.msk [vmem:[#allocation2 + $0x60] sm:$0xff] %vm2988_vm4, %v2964_v27  ;;  %v2965_v30 = vmax.f32 %v2929_v28, 0.0  ;;  %v3028_v27 = vld [vmem:[#allocation2 + $0x18] sm:$0xff]  ;;  %v3197_v28 = vmax.f32 %v19688_v8, %v3163_v9 }
 0x33c   :  { %3004 = vst.msk [vmem:[#allocation2 + $0x78] sm:$0xff] %vm2988_vm4, %v2967_v29  ;;  %v3029_v29 = vld [vmem:[#allocation2 + $0x20] sm:$0xff]  ;;  %v3096_v56 = vmax.f32 %v3028_v27, %v3062_v11 }
 0x33d   :  { %3002 = vst.msk [vmem:[#allocation2 + $0x68] sm:$0xff] %vm2988_vm4, %v2965_v30  ;;  %v16222_v31 = vpop.f32.mrb[16].mxu0  ;;  %v19700_v30 = vld [vmem:[#allocation2 + $0x3a] sm:$0xff]  ;;  %v19718_v0 = vld [vmem:[#allocation2 + $0x42] sm:$0xff] }
 0x33e   :  { %v2934_v32 = vadd.f32 %v16222_v31, %v19637_v44  ;;  %v2794_v33 = vpop.f32.mrb[17].mxu0  ;;  %v19702_v31 = vld [vmem:[#allocation2 + $0x3b] sm:$0xff] }
 0x33f   :  { %v2932_v34 = vadd.f32 %v19637_v44, %v2794_v33  ;;  %v16223_v35 = vpop.f32.mrb[18].mxu0 }
 0x340   :  { %v2970_v36 = vmax.f32 %v2934_v32, 0.0  ;;  %v2935_v37 = vadd.f32 %v16223_v35, %v19637_v44  ;;  %v2797_v38 = vpop.f32.mrb[19].mxu0  ;;  %v3199_v32 = vmax.f32 %v19685_v5, %v19690_v10  ;;  %v19721_v5 = vmax.f32 %v3095_v55, %v3197_v28  ;;  %v19751_v55 = vld [vmem:[#allocation2 + $0x48] sm:$0xff] }
 0x341   :  { %v2968_v39 = vmax.f32 %v2932_v34, 0.0  ;;  %v2933_v40 = vadd.f32 %v19637_v44, %v2797_v38 }
 0x342   :  { %3007 = vst.msk [vmem:[#allocation2 + $0x90] sm:$0xff] %vm2988_vm4, %v2970_v36  ;;  %v2971_v41 = vmax.f32 %v2935_v37, 0.0 }
 0x343   :  { %3005 = vst.msk [vmem:[#allocation2 + $0x80] sm:$0xff] %vm2988_vm4, %v2968_v39  ;;  %v2969_v43 = vmax.f32 %v2933_v40, 0.0  ;;  %v3198_v39 = vmax.f32 %v3130_v14, %v3164_v16  ;;  %v3097_v40 = vmax.f32 %v3029_v29, %v3063_v17  ;;  %v19733_v29 = vld [vmem:[#allocation2 + $0x52] sm:$0xff] }
 0x344   :  { %3008 = vst.msk [vmem:[#allocation2 + $0x98] sm:$0xff] %vm2988_vm4, %v2971_v41 }
 0x345   :  { %3006 = vst.msk [vmem:[#allocation2 + $0x88] sm:$0xff] %vm2988_vm4, %v2969_v43  ;;  %v16226_v45 = vpop.f32.mrb[20].mxu0  ;;  %v19723_v7 = vmax.f32 %v3096_v56, %v3198_v39  ;;  %v19725_v9 = vmax.f32 %v3097_v40, %v3199_v32  ;;  %v19753_v56 = vld [vmem:[#allocation2 + $0x41] sm:$0xff] }
 0x346   :  { %v2938_v46 = vadd.f32 %v16226_v45, %v19637_v44  ;;  %v2810_v47 = vpop.f32.mrb[21].mxu0 }
 0x347   :  { %v2936_v48 = vadd.f32 %v19637_v44, %v2810_v47  ;;  %v16227_v49 = vpop.f32.mrb[22].mxu0  ;;  %v3030_v47 = vld [vmem:[#allocation2 + $0x28] sm:$0xff] }
 0x348   :  { %v2974_v52 = vmax.f32 %v2938_v46, 0.0  ;;  %v2939_v53 = vadd.f32 %v16227_v49, %v19637_v44  ;;  %v2813_v54 = vpop.f32.mrb[23].mxu0  ;;  %v19708_v49 = vld [vmem:[#allocation2 + $0x31] sm:$0xff] }
 0x349   :  { %v2972_v58 = vmax.f32 %v2936_v48, 0.0  ;;  %v2937_v59 = vadd.f32 %v19637_v44, %v2813_v54  ;;  %v3064_v48 = vld [vmem:[#allocation2 + $0x29] sm:$0xff]  ;;  %v3099_v28 = vmax.f32 %v19716_v63, %v19708_v49 }
 0x34a   :  { %3011 = vst.msk [vmem:[#allocation2 + $0xb0] sm:$0xff] %vm2988_vm4, %v2974_v52  ;;  %v2975_v62 = vmax.f32 %v2939_v53, 0.0  ;;  %v3041_v36 = vld [vmem:[#allocation2 + $0x80] sm:$0xff]  ;;  %v3289_v53 = vpack.c.bf16 %v19694_v22, %v19697_v25  ;;  %v3043_v60 = vld [vmem:[#allocation2 + $0x90] sm:$0xff]  ;;  %v3098_v8 = vmax.f32 %v3030_v47, %v3064_v48 }
 0x34b   :  { %3009 = vst.msk [vmem:[#allocation2 + $0xa0] sm:$0xff] %vm2988_vm4, %v2972_v58  ;;  %v2973_v2 = vmax.f32 %v2937_v59, 0.0  ;;  %v3143_v20 = vld [vmem:[#allocation2 + $0x92] sm:$0xff]  ;;  %v19768_v25 = vld [vmem:[#allocation2 + $0x5b] sm:$0xff] }
 0x34c   :  { %3012 = vst.msk [vmem:[#allocation2 + $0xb8] sm:$0xff] %vm2988_vm4, %v2975_v62  ;;  %v3075_v19 = vld [vmem:[#allocation2 + $0x81] sm:$0xff]  ;;  %v3177_v21 = vld [vmem:[#allocation2 + $0x93] sm:$0xff]  ;;  %v3076_v38 = vld [vmem:[#allocation2 + $0x89] sm:$0xff]  ;;  %v3200_v62 = vmax.f32 %v19700_v30, %v19702_v31 }
 0x34d   :  { %3010 = vst.msk [vmem:[#allocation2 + $0xa8] sm:$0xff] %vm2988_vm4, %v2973_v2  ;;  %v16230_v12 = vpop.f32.mrb[24].mxu0  ;;  %v3042_v37 = vld [vmem:[#allocation2 + $0x88] sm:$0xff]  ;;  %v3109_v45 = vmax.f32 %v3041_v36, %v3075_v19  ;;  %v3211_v46 = vmax.f32 %v3143_v20, %v3177_v21  ;;  %v3077_v54 = vld [vmem:[#allocation2 + $0x91] sm:$0xff] }
 0x34e   :  { %v2942_v15 = vadd.f32 %v16230_v12, %v19637_v44  ;;  %v2826_v18 = vpop.f32.mrb[25].mxu0  ;;  %v3110_v58 = vmax.f32 %v3042_v37, %v3076_v38  ;;  %v3044_v11 = vld [vmem:[#allocation2 + $0x98] sm:$0xff]  ;;  %v3111_v14 = vmax.f32 %v3043_v60, %v3077_v54  ;;  %v19740_v36 = vld [vmem:[#allocation2 + $0x4a] sm:$0xff]  ;;  %v19749_v54 = vld [vmem:[#allocation2 + $0x40] sm:$0xff]  ;;  %v3290_v60 = vpack.c.bf16 %v19723_v7, %v19721_v5 }
 0x34f   :  { %v2940_v23 = vadd.f32 %v19637_v44, %v2826_v18  ;;  %v16231_v24 = vpop.f32.mrb[26].mxu0  ;;  %v3245_v12 = vmax.f32 %v3109_v45, %v3211_v46  ;;  %v3167_v18 = vld [vmem:[#allocation2 + $0x43] sm:$0xff]  ;;  %v19742_v37 = vld [vmem:[#allocation2 + $0x4b] sm:$0xff]  ;;  %v19744_v38 = vld [vmem:[#allocation2 + $0x53] sm:$0xff] }
 0x350   :  { %v2978_v33 = vmax.f32 %v2942_v15, 0.0  ;;  %v2943_v34 = vadd.f32 %v16231_v24, %v19637_v44  ;;  %v2829_v35 = vpop.f32.mrb[27].mxu0  ;;  %v19728_v15 = vld [vmem:[#allocation2 + $0x39] sm:$0xff]  ;;  %v3201_v48 = vmax.f32 %v19718_v0, %v3167_v18 }
 0x351   :  { %v2976_v41 = vmax.f32 %v2940_v23, 0.0  ;;  %v2941_v43 = vadd.f32 %v19637_v44, %v2829_v35  ;;  %v19738_v35 = vld [vmem:[#allocation2 + $0x38] sm:$0xff] }
 0x352   :  { %3015 = vst.msk [vmem:[#allocation2 + $0xd0] sm:$0xff] %vm2988_vm4, %v2978_v33  ;;  %v2979_v50 = vmax.f32 %v2943_v34, 0.0  ;;  %v3144_v51 = vld [vmem:[#allocation2 + $0x9a] sm:$0xff]  ;;  %v19736_v34 = vmax.f32 %v3098_v8, %v3200_v62  ;;  %v3100_v0 = vmax.f32 %v19738_v35, %v19728_v15 }
 0x353   :  { %v3178_v52 = vld [vmem:[#allocation2 + $0x9b] sm:$0xff]  ;;  %3013 = vst.msk [vmem:[#allocation2 + $0xc0] sm:$0xff] %vm2988_vm4, %v2976_v41  ;;  %v2977_v57 = vmax.f32 %v2941_v43, 0.0  ;;  %v3147_v26 = vld [vmem:[#allocation2 + $0xb2] sm:$0xff] }
 0x354   :  { %v3212_v59 = vmax.f32 %v3144_v51, %v3178_v52  ;;  %v3078_v61 = vld [vmem:[#allocation2 + $0x99] sm:$0xff]  ;;  %3016 = vst.msk [vmem:[#allocation2 + $0xd8] sm:$0xff] %vm2988_vm4, %v2979_v50  ;;  %v3145_v2 = vld [vmem:[#allocation2 + $0xa2] sm:$0xff]  ;;  %v3146_v3 = vld [vmem:[#allocation2 + $0xaa] sm:$0xff]  ;;  %v3291_v5 = vpack.c.bf16 %v19736_v34, %v19725_v9 }
 0x355   :  { %v3179_v4 = vld [vmem:[#allocation2 + $0xa3] sm:$0xff]  ;;  %3014 = vst.msk [vmem:[#allocation2 + $0xc8] sm:$0xff] %vm2988_vm4, %v2977_v57  ;;  %v16234_v10 = vpop.f32.mrb[28].mxu0  ;;  %v3180_v16 = vld [vmem:[#allocation2 + $0xab] sm:$0xff]  ;;  %v3112_v21 = vmax.f32 %v3044_v11, %v3078_v61  ;;  %v3181_v27 = vld [vmem:[#allocation2 + $0xb3] sm:$0xff]  ;;  %v3202_v11 = vmax.f32 %v19740_v36, %v19742_v37 }
 0x356   :  { %v3246_v13 = vmax.f32 %v3110_v58, %v3212_v59  ;;  %v3213_v17 = vmax.f32 %v3145_v2, %v3179_v4  ;;  %v2946_v19 = vadd.f32 %v16234_v10, %v19637_v44  ;;  %v2842_v20 = vpop.f32.mrb[29].mxu0  ;;  %v3214_v23 = vmax.f32 %v3146_v3, %v3180_v16  ;;  %v3079_v24 = vld [vmem:[#allocation2 + $0xa1] sm:$0xff]  ;;  %v3080_v47 = vld [vmem:[#allocation2 + $0xa9] sm:$0xff]  ;;  %v3081_v63 = vld [vmem:[#allocation2 + $0xb1] sm:$0xff] }
 0x357   :  { %v2944_v30 = vadd.f32 %v19637_v44, %v2842_v20  ;;  %v16235_v31 = vpop.f32.mrb[30].mxu0  ;;  %v3045_v45 = vld [vmem:[#allocation2 + $0xa0] sm:$0xff]  ;;  %v3046_v46 = vld [vmem:[#allocation2 + $0xa8] sm:$0xff]  ;;  %v3215_v52 = vmax.f32 %v3147_v26, %v3181_v27  ;;  %v3047_v10 = vld [vmem:[#allocation2 + $0xb0] sm:$0xff]  ;;  %v3101_v16 = vmax.f32 %v19749_v54, %v19753_v56 }
 0x358   :  { %v3297_v32 = vpack.c.bf16 %v3246_v13, %v3245_v12  ;;  %v3247_v33 = vmax.f32 %v3111_v14, %v3213_v17  ;;  %v2982_v39 = vmax.f32 %v2946_v19, 0.0  ;;  %v2947_v40 = vadd.f32 %v16235_v31, %v19637_v44  ;;  %v2845_v41 = vpop.f32.mrb[31].mxu0  ;;  %v19755_v57 = vld [vmem:[#allocation2 + $0x49] sm:$0xff]  ;;  %v19765_v2 = vld [vmem:[#allocation2 + $0x5a] sm:$0xff] }
 0x359   :  { %v3248_v43 = vmax.f32 %v3112_v21, %v3214_v23  ;;  %v2980_v49 = vmax.f32 %v2944_v30, 0.0  ;;  %v2945_v50 = vadd.f32 %v19637_v44, %v2845_v41  ;;  %v3113_v51 = vmax.f32 %v3045_v45, %v3079_v24  ;;  %v3048_v19 = vld [vmem:[#allocation2 + $0xb8] sm:$0xff]  ;;  %v19800_v45 = vld [vmem:[#allocation2 + $0x6a] sm:$0xff] }
 0x35a   :  { %15291 = vmatprep.subr.bf16.mxu0 %v3297_v32  ;;  %3019 = vst.msk [vmem:[#allocation2 + $0xf0] sm:$0xff] %vm2988_vm4, %v2982_v39  ;;  %v2983_v58 = vmax.f32 %v2947_v40, 0.0  ;;  %v3148_v61 = vld [vmem:[#allocation2 + $0xba] sm:$0xff]  ;;  %v3114_v4 = vmax.f32 %v3046_v46, %v3080_v47  ;;  %v19777_v14 = vmax.f32 %v3099_v28, %v3201_v48  ;;  %v3115_v20 = vmax.f32 %v3047_v10, %v3081_v63  ;;  %v19782_v23 = vld [vmem:[#allocation2 + $0x51] sm:$0xff] }
 0x35b   :  { %15292 = vmatpush3.bf16.msra.mxu0 %v3289_v53  ;;  %v3298_v59 = vpack.c.bf16 %v3248_v43, %v3247_v33  ;;  %v3182_v62 = vld [vmem:[#allocation2 + $0xbb] sm:$0xff]  ;;  %3017 = vst.msk [vmem:[#allocation2 + $0xe0] sm:$0xff] %vm2988_vm4, %v2980_v49  ;;  %v2981_v3 = vmax.f32 %v2945_v50, 0.0  ;;  %v3203_v53 = vmax.f32 %v19733_v29, %v19744_v38  ;;  %v3249_v15 = vmax.f32 %v3113_v51, %v3215_v52  ;;  %v19787_v31 = vld [vmem:[#allocation2 + $0xd2] sm:$0xff] }
 0x35c   :  { %v3216_v8 = vmax.f32 %v3148_v61, %v3182_v62  ;;  %v3082_v22 = vld [vmem:[#allocation2 + $0xb9] sm:$0xff]  ;;  %3020 = vst.msk [vmem:[#allocation2 + $0xf8] sm:$0xff] %vm2988_vm4, %v2983_v58  ;;  %v3149_v7 = vld [vmem:[#allocation2 + $0xc2] sm:$0xff]  ;;  %v3150_v12 = vld [vmem:[#allocation2 + $0xca] sm:$0xff]  ;;  %v3102_v33 = vmax.f32 %v19751_v55, %v19755_v57  ;;  %v3204_v39 = vmax.f32 %v19765_v2, %v19768_v25  ;;  %v3236_v50 = vmax.f32 %v3100_v0, %v3202_v11 }
 0x35d   :  { %15293 = vmatprep.subr.bf16.mxu0 %v3298_v59  ;;  %v3183_v13 = vld [vmem:[#allocation2 + $0xc3] sm:$0xff]  ;;  %3018 = vst.msk [vmem:[#allocation2 + $0xe8] sm:$0xff] %vm2988_vm4, %v2981_v3  ;;  %v16238_v17 = vpop.f32.mrb[32].mxu0  ;;  %v3184_v21 = vld [vmem:[#allocation2 + $0xcb] sm:$0xff]  ;;  %v3116_v27 = vmax.f32 %v3048_v19, %v3082_v22  ;;  %v3185_v32 = vld [vmem:[#allocation2 + $0xd3] sm:$0xff] }
 0x35e   :  { %v3250_v18 = vmax.f32 %v3114_v4, %v3216_v8  ;;  %v3217_v9 = vmax.f32 %v3149_v7, %v3183_v13  ;;  %v2950_v24 = vadd.f32 %v16238_v17, %v19637_v44  ;;  %v2858_v26 = vpop.f32.mrb[33].mxu0  ;;  %v3218_v28 = vmax.f32 %v3150_v12, %v3184_v21  ;;  %v19785_v30 = vld [vmem:[#allocation2 + $0xc1] sm:$0xff]  ;;  %v19794_v40 = vld [vmem:[#allocation2 + $0x50] sm:$0xff]  ;;  %v19796_v41 = vld [vmem:[#allocation2 + $0x59] sm:$0xff] }
 0x35f   :  { %15294 = vmatpush3.bf16.msra.mxu0 %v3290_v60  ;;  %v2948_v34 = vadd.f32 %v19637_v44, %v2858_v26  ;;  %v16239_v35 = vpop.f32.mrb[34].mxu0  ;;  %v19798_v43 = vld [vmem:[#allocation2 + $0x62] sm:$0xff]  ;;  %v3219_v58 = vmax.f32 %v19787_v31, %v3185_v32  ;;  %v3036_v59 = vld [vmem:[#allocation2 + $0x58] sm:$0xff]  ;;  %v3172_v61 = vld [vmem:[#allocation2 + $0x6b] sm:$0xff]  ;;  %v3237_v8 = vmax.f32 %v3101_v16, %v3203_v53  ;;  %v3103_v22 = vmax.f32 %v19794_v40, %v19782_v23 }
 0x360   :  { %v3299_v36 = vpack.c.bf16 %v3250_v18, %v3249_v15  ;;  %v3251_v37 = vmax.f32 %v3115_v20, %v3217_v9  ;;  %v2986_v46 = vmax.f32 %v2950_v24, 0.0  ;;  %v2951_v47 = vadd.f32 %v16239_v35, %v19637_v44  ;;  %v2861_v48 = vpop.f32.mrb[35].mxu0  ;;  %v3049_v51 = vld [vmem:[#allocation2 + $0xc0] sm:$0xff]  ;;  %v3050_v52 = vld [vmem:[#allocation2 + $0xc8] sm:$0xff]  ;;  %v19806_v62 = vld [vmem:[#allocation2 + $0x72] sm:$0xff] }
 0x361   :  { %v3252_v49 = vmax.f32 %v3116_v27, %v3218_v28  ;;  %v3084_v54 = vld [vmem:[#allocation2 + $0xc9] sm:$0xff]  ;;  %v2984_v55 = vmax.f32 %v2948_v34, 0.0  ;;  %v2949_v56 = vadd.f32 %v19637_v44, %v2861_v48  ;;  %v3117_v57 = vmax.f32 %v3049_v51, %v19785_v30  ;;  %v19808_v63 = vld [vmem:[#allocation2 + $0x7a] sm:$0xff]  ;;  %v3085_v10 = vld [vmem:[#allocation2 + $0xd1] sm:$0xff] }
 0x362   :  { %15295 = vmatprep.subr.bf16.mxu0 %v3299_v36  ;;  %v3171_v60 = vld [vmem:[#allocation2 + $0x63] sm:$0xff]  ;;  %v19810_v2 = vld [vmem:[#allocation2 + $0x73] sm:$0xff]  ;;  %3023 = vst.msk [vmem:[#allocation2 + $0x110] sm:$0xff] %vm2988_vm4, %v2986_v46  ;;  %v2987_v0 = vmax.f32 %v2951_v47, 0.0  ;;  %v3186_v4 = vld [vmem:[#allocation2 + $0xdb] sm:$0xff]  ;;  %v3118_v12 = vmax.f32 %v3050_v52, %v3084_v54  ;;  %v3238_v11 = vmax.f32 %v3102_v33, %v3204_v39  ;;  %v3292_v29 = vpack.c.bf16 %v3236_v50, %v19777_v14 }
 0x363   :  { %15296 = vmatpush3.bf16.msra.mxu0 %v3291_v5  ;;  %v3300_v3 = vpack.c.bf16 %v3252_v49, %v3251_v37  ;;  %v3152_v44 = vld [vmem:[#allocation2 + $0xda] sm:$0xff]  ;;  %3021 = vst.msk [vmem:[#allocation2 + $0x100] sm:$0xff] %vm2988_vm4, %v2984_v55  ;;  %v2985_v7 = vmax.f32 %v2949_v56, 0.0  ;;  %v3051_v5 = vld [vmem:[#allocation2 + $0xd0] sm:$0xff]  ;;  %v3038_v15 = vld [vmem:[#allocation2 + $0x68] sm:$0xff]  ;;  %v3104_v19 = vmax.f32 %v3036_v59, %v19796_v41  ;;  %v3205_v20 = vmax.f32 %v19798_v43, %v3171_v60 }
 0x364   :  { %v19818_v25 = vld [vmem:[#allocation2 + $0x61] sm:$0xff]  ;;  %v3220_v13 = vmax.f32 %v3152_v44, %v3186_v4  ;;  %v3086_v17 = vld [vmem:[#allocation2 + $0xd9] sm:$0xff]  ;;  %3024 = vst.msk [vmem:[#allocation2 + $0x118] sm:$0xff] %vm2988_vm4, %v2987_v0  ;;  %v3154_v53 = vld [vmem:[#allocation2 + $0xea] sm:$0xff]  ;;  %v3206_v21 = vmax.f32 %v19800_v45, %v3172_v61  ;;  %v3253_v23 = vmax.f32 %v3117_v57, %v3219_v58  ;;  %v3119_v27 = vmax.f32 %v3051_v5, %v3085_v10 }
 0x365   :  { %v3174_v18 = vld [vmem:[#allocation2 + $0x7b] sm:$0xff]  ;;  %15297 = vmatprep.subr.bf16.mxu0 %v3300_v3  ;;  %v3187_v16 = vld [vmem:[#allocation2 + $0xe3] sm:$0xff]  ;;  %3022 = vst.msk [vmem:[#allocation2 + $0x108] sm:$0xff] %vm2988_vm4, %v2985_v7  ;;  %v3188_v28 = vld [vmem:[#allocation2 + $0xeb] sm:$0xff]  ;;  %v3207_v36 = vmax.f32 %v19806_v62, %v19810_v2  ;;  %v3293_v41 = vpack.c.bf16 %v3238_v11, %v3237_v8  ;;  %v3239_v50 = vmax.f32 %v3103_v22, %v3205_v20  ;;  %v3430_v10 = vsel %vm3428_vm5, 4294967295, %v18546_v1 }
 0x366   :  { %v3153_v38 = vld [vmem:[#allocation2 + $0xe2] sm:$0xff]  ;;  %v3254_v24 = vmax.f32 %v3118_v12, %v3220_v13  ;;  %v3052_v26 = vld [vmem:[#allocation2 + $0xd8] sm:$0xff]  ;;  %v3222_v32 = vmax.f32 %v3154_v53, %v3188_v28  ;;  %v3208_v37 = vmax.f32 %v19808_v63, %v3174_v18  ;;  %v19837_v48 = vld [vmem:[#allocation2 + $0x8a] sm:$0xff]  ;;  %v3240_v51 = vmax.f32 %v3104_v19, %v3206_v21 }
 0x367   :  { %v3037_v9 = vld [vmem:[#allocation2 + $0x60] sm:$0xff]  ;;  %v3221_v30 = vmax.f32 %v3153_v38, %v3187_v16  ;;  %v3072_v31 = vld [vmem:[#allocation2 + $0x69] sm:$0xff]  ;;  %15298 = vmatpush3.bf16.msra.mxu0 %v3292_v29  ;;  %v3120_v14 = vmax.f32 %v3052_v26, %v3086_v17  ;;  %v3155_v34 = vld [vmem:[#allocation2 + $0xf2] sm:$0xff] }
 0x368   :  { %v3087_v33 = vld [vmem:[#allocation2 + $0xe1] sm:$0xff]  ;;  %v3189_v35 = vld [vmem:[#allocation2 + $0xf3] sm:$0xff]  ;;  %v3301_v40 = vpack.c.bf16 %v3254_v24, %v3253_v23  ;;  %v3105_v45 = vmax.f32 %v3037_v9, %v19818_v25  ;;  %v3088_v55 = vld [vmem:[#allocation2 + $0xe9] sm:$0xff]  ;;  %v3106_v56 = vmax.f32 %v3038_v15, %v3072_v31  ;;  %v3294_v15 = vpack.c.bf16 %v3240_v51, %v3239_v50 }
 0x369   :  { %v19830_v39 = vld [vmem:[#allocation2 + $0x71] sm:$0xff]  ;;  %v3255_v43 = vmax.f32 %v3119_v27, %v3221_v30  ;;  %v19833_v46 = vld [vmem:[#allocation2 + $0x79] sm:$0xff]  ;;  %v19835_v47 = vld [vmem:[#allocation2 + $0x82] sm:$0xff]  ;;  %v3256_v49 = vmax.f32 %v3120_v14, %v3222_v32  ;;  %v3223_v59 = vmax.f32 %v3155_v34, %v3189_v35 }
 0x36a   :  { %v3053_v52 = vld [vmem:[#allocation2 + $0xe0] sm:$0xff]  ;;  %v3054_v54 = vld [vmem:[#allocation2 + $0xe8] sm:$0xff]  ;;  %v3039_v57 = vld [vmem:[#allocation2 + $0x70] sm:$0xff]  ;;  %15299 = vmatprep.subr.bf16.mxu0 %v3301_v40  ;;  %v3242_v44 = vmax.f32 %v3106_v56, %v3208_v37  ;;  %v3241_v7 = vmax.f32 %v3105_v45, %v3207_v36 }
 0x36b   :  { %v3121_v58 = vmax.f32 %v3053_v52, %v3087_v33  ;;  %v3089_v60 = vld [vmem:[#allocation2 + $0xf1] sm:$0xff]  ;;  %v3175_v62 = vld [vmem:[#allocation2 + $0x83] sm:$0xff]  ;;  %15300 = vmatpush3.bf16.msra.mxu0 %v3293_v41  ;;  %v3302_v2 = vpack.c.bf16 %v3256_v49, %v3255_v43  ;;  %v3156_v0 = vld [vmem:[#allocation2 + $0xfa] sm:$0xff]  ;;  %v3122_v22 = vmax.f32 %v3054_v54, %v3088_v55  ;;  %v3107_v17 = vmax.f32 %v3039_v57, %v19830_v39 }
 0x36c   :  { %v3040_v61 = vld [vmem:[#allocation2 + $0x78] sm:$0xff]  ;;  %v3176_v63 = vld [vmem:[#allocation2 + $0x8b] sm:$0xff]  ;;  %v3057_v13 = vld [vmem:[#allocation2 + $0x100] sm:$0xff]  ;;  %v3209_v16 = vmax.f32 %v19835_v47, %v3175_v62  ;;  %v3295_v27 = vpack.c.bf16 %v3242_v44, %v3241_v7 }
 0x36d   :  { %v3190_v3 = vld [vmem:[#allocation2 + $0xfb] sm:$0xff]  ;;  %v3055_v4 = vld [vmem:[#allocation2 + $0xf0] sm:$0xff]  ;;  %15301 = vmatprep.subr.bf16.mxu0 %v3302_v2  ;;  %v3191_v38 = vld [vmem:[#allocation2 + $0x103] sm:$0xff]  ;;  %v3108_v53 = vmax.f32 %v3040_v61, %v19833_v46  ;;  %v3210_v1 = vmax.f32 %v19837_v48, %v3176_v63  ;;  %v3257_v19 = vmax.f32 %v3121_v58, %v3223_v59  ;;  %v19846_v48 = vsel %vm3429_vm6, %v3430_v10, 0 }
 0x36e   :  { %v3090_v8 = vld [vmem:[#allocation2 + $0xf9] sm:$0xff]  ;;  %v3224_v25 = vmax.f32 %v3156_v0, %v3190_v3  ;;  %v3157_v18 = vld [vmem:[#allocation2 + $0x102] sm:$0xff]  ;;  %v3158_v29 = vld [vmem:[#allocation2 + $0x10a] sm:$0xff]  ;;  %v3123_v21 = vmax.f32 %v3055_v4, %v3089_v60  ;;  %v3243_v41 = vmax.f32 %v3107_v17, %v3209_v16 }
 0x36f   :  { %v3056_v12 = vld [vmem:[#allocation2 + $0xf8] sm:$0xff]  ;;  %v3192_v9 = vld [vmem:[#allocation2 + $0x10b] sm:$0xff]  ;;  %v3225_v23 = vmax.f32 %v3157_v18, %v3191_v38  ;;  %v3058_v24 = vld [vmem:[#allocation2 + $0x108] sm:$0x7]  ;;  %15302 = vmatpush3.bf16.msra.mxu0 %v3294_v15  ;;  %v3244_v43 = vmax.f32 %v3108_v53, %v3210_v1 }
 0x370   :  { %v3159_v11 = vld [vmem:[#allocation2 + $0x112] sm:$0xff]  ;;  %v3160_v5 = vld [vmem:[#allocation2 + $0x11a] sm:$0x7]  ;;  %v3258_v20 = vmax.f32 %v3122_v22, %v3224_v25  ;;  %v3091_v26 = vld [vmem:[#allocation2 + $0x101] sm:$0xff]  ;;  %v3124_v28 = vmax.f32 %v3056_v12, %v3090_v8  ;;  %v3226_v30 = vmax.f32 %v3158_v29, %v3192_v9 }
 0x371   :  { %v3092_v31 = vld [vmem:[#allocation2 + $0x109] sm:$0x7]  ;;  %v3125_v14 = vmax.f32 %v3057_v13, %v3091_v26  ;;  %v3193_v32 = vld [vmem:[#allocation2 + $0x113] sm:$0xff]  ;;  %v3194_v33 = vld [vmem:[#allocation2 + $0x11b] sm:$0x7]  ;;  %v3259_v35 = vmax.f32 %v3123_v21, %v3225_v23  ;;  %v3296_v50 = vpack.c.bf16 %v3244_v43, %v3243_v41 }
 0x372   :  { %v3303_v34 = vpack.c.bf16 %v3258_v20, %v3257_v19  ;;  %v3126_v36 = vmax.f32 %v3058_v24, %v3092_v31  ;;  %v3227_v37 = vmax.f32 %v3159_v11, %v3193_v32  ;;  %v3260_v39 = vmax.f32 %v3124_v28, %v3226_v30  ;;  %v17950_v51 = vld [vmem:[%s23707_s10] ss:$12 sps:$4 sm:$0xff]   ;;  %v17954_v54 = vld [vmem:[%s23707_s10 + $0x1c] ss:$12 sps:$4 sm:$0xff]   ;;  %v17956_v56 = vld [vmem:[%s23707_s10 + $0x18] ss:$12 sps:$4 sm:$0xff]  }
 0x373   :  { %v3228_v40 = vmax.f32 %v3160_v5, %v3194_v33  ;;  %v17953_v55 = vld [vmem:[%s23707_s10 + $0x8] ss:$12 sps:$4 sm:$0xff]   ;;  %v17957_v58 = vld [vmem:[%s23707_s10 + $0x20] ss:$12 sps:$4 sm:$0xff]   ;;  %v17960_v59 = vld [vmem:[%s23707_s10 + $0x30] ss:$12 sps:$4 sm:$0xff]  }
 0x374   :  { %15303 = vmatprep.subr.bf16.mxu0 %v3303_v34  ;;  %v3261_v45 = vmax.f32 %v3125_v14, %v3227_v37  ;;  %v3304_v46 = vpack.c.bf16 %v3260_v39, %v3259_v35  ;;  %v17958_v57 = vld [vmem:[%s23707_s10 + $0x34] ss:$12 sps:$4 sm:$0xff]   ;;  %v17962_v60 = vld [vmem:[%s23707_s10 + $0x4c] ss:$12 sps:$4 sm:$0xff]   ;;  %v17966_v63 = vld [vmem:[%s23707_s10 + $0x64] ss:$12 sps:$4 sm:$0xff]  }
 0x375   :  { %15304 = vmatpush3.bf16.msra.mxu0 %v3295_v27  ;;  %v3262_v47 = vmax.f32 %v3126_v36, %v3228_v40  ;;  %v17961_v61 = vld [vmem:[%s23707_s10 + $0x38] ss:$12 sps:$4 sm:$0xff]   ;;  %v17964_v62 = vld [vmem:[%s23707_s10 + $0x48] ss:$12 sps:$4 sm:$0xff]   ;;  %v17965_v2 = vld [vmem:[%s23707_s10 + $0x50] ss:$12 sps:$4 sm:$0xff]  }
 0x376   :  { %15305 = vmatprep.subr.bf16.mxu0 %v3304_v46  ;;  %v17968_v0 = vld [vmem:[%s23707_s10 + $0x60] ss:$12 sps:$4 sm:$0xff]   ;;  %v17970_v3 = vld [vmem:[%s23707_s10 + $0x7c] ss:$12 sps:$4 sm:$0xff]   ;;  %v3287_v4 = vld [vmem:[%s23707_s10 + $0x90] sm:$0xff] }
 0x377   :  { %v3305_v49 = vpack.c.bf16 %v3262_v47, %v3261_v45  ;;  %v17969_v44 = vld [vmem:[%s23707_s10 + $0x68] ss:$12 sps:$4 sm:$0xff]   ;;  %v17972_v8 = vld [vmem:[%s23707_s10 + $0x78] ss:$12 sps:$4 sm:$0xff]   ;;  %v14358_v10 = vcombine.high %v3287_v4, %v3287_v4  ;;  %v17973_v22 = vld [vmem:[%s23707_s10 + $0x80] ss:$12 sps:$4 sm:$0xff]   ;;  %v14357_v25 = vcombine.low %v3287_v4, %v3287_v4 }
 0x378   :  { %v17976_v7 = vld [vmem:[%s23707_s10 + $0x98] ss:$0 sps:$4 sm:$0xff]   ;;  %v17977_v12 = vld [vmem:[%s23709_s3 + $0x20] sm:$0xff]   ;;  %v17978_v13 = vld [vmem:[%s23709_s3 + $0x28] sm:$0xff]  }
 0x379   :  { %v3433_v52 = vand.u32 %v19846_v48, %v3305_v49  ;;  %15306 = vmatpush3.bf16.msra.mxu0 %v3296_v50  ;;  %v17979_v11 = vld [vmem:[%s23709_s3 + $0x30] sm:$0xff]   ;;  %v17980_v5 = vld [vmem:[%s23709_s3 + $0x38] sm:$0xff]  }
 0x37b   :  { %16241 = vmatpush3.bf16.msra.mxu1 %v3433_v52 }
 0x37c   :  { %3468 = vmatmul.mubr.bf16.vlgmr.msra.gmra.mrb[36].mxu0 %v17950_v51  ;;  %16270 = vmatprep.subr.bf16.mxu1 %v18547_v42 }
 0x37d   :  { %3475 = vmatprep.mubr.bf16.mxu0 %v17954_v54  ;;  %v17981_v54 = vld [vmem:[%s23709_s3] sm:$0xff]  }
 0x37e   :  { %16243 = vmatmul.mubr.msk.bf16.vlgmr.msra.gmra.mrb[0].mxu1 %vm3406_vm7, %v17953_v55 }
 0x37f   :  { %16246 = vmatprep.mubr.msk.bf16.mxu1 %vm18548_vm3, %v18547_v42  ;;  %16271 = vmatpush3.bf16.msra.mxu1 %v17977_v12 }
 0x380   :  { %16272 = vmatprep.subr.bf16.mxu1 %v18547_v42 }
 0x383   :  { %16273 = vmatpush3.bf16.msra.mxu1 %v17978_v13 }
 0x384   :  { %3476 = vmatmul.mubr.bf16.gmra.mrb[40].mxu0 %v17956_v56  ;;  %16274 = vmatprep.subr.bf16.mxu1 %v18547_v42 }
 0x385   :  { %3483 = vmatprep.mubr.bf16.mxu0 %v17958_v57 }
 0x386   :  { %16247 = vmatmul.mubr.msk.bf16.gmra.mrb[4].mxu1 %vm3406_vm7, %v17957_v58 }
 0x387   :  { %16250 = vmatprep.mubr.msk.bf16.mxu1 %vm18548_vm3, %v18547_v42  ;;  %16275 = vmatpush3.bf16.msra.mxu1 %v17979_v11  ;;  %v17984_v11 = vld [vmem:[%s23709_s3 + $0x18] sm:$0xff]  }
 0x388   :  { %16276 = vmatprep.subr.bf16.mxu1 %v18547_v42 }
 0x38b   :  { %16277 = vmatpush3.bf16.msra.mxu1 %v17980_v5 }
 0x38c   :  { %3484 = vmatmul.mubr.bf16.gmra.mrb[44].mxu0 %v17960_v59  ;;  %16298 = vmatprep.subr.bf16.mxu1 %v18547_v42  ;;  %v17982_v59 = vld [vmem:[%s23709_s3 + $0x8] sm:$0xff]  }
 0x38d   :  { %3491 = vmatprep.mubr.bf16.mxu0 %v17962_v60 }
 0x38e   :  { %16251 = vmatmul.mubr.msk.bf16.gmra.mrb[8].mxu1 %vm3406_vm7, %v17961_v61 }
 0x38f   :  { %16254 = vmatprep.mubr.msk.bf16.mxu1 %vm18548_vm3, %v18547_v42 }
 0x394   :  { %3492 = vmatmul.mubr.bf16.gmra.mrb[48].mxu0 %v17964_v62 }
 0x395   :  { %3499 = vmatprep.mubr.bf16.mxu0 %v17966_v63 }
 0x396   :  { %16255 = vmatmul.mubr.msk.bf16.gmra.mrb[12].mxu1 %vm3406_vm7, %v17965_v2 }
 0x397   :  { %16258 = vmatprep.mubr.msk.bf16.mxu1 %vm18548_vm3, %v18547_v42 }
 0x39c   :  { %3500 = vmatmul.mubr.bf16.gmra.mrb[52].mxu0 %v17968_v0 }
 0x39d   :  { %3507 = vmatprep.mubr.bf16.mxu0 %v17970_v3 }
 0x39e   :  { %16259 = vmatmul.mubr.msk.bf16.gmra.mrb[16].mxu1 %vm3406_vm7, %v17969_v44 }
 0x39f   :  { %16262 = vmatprep.mubr.msk.bf16.mxu1 %vm18548_vm3, %v18547_v42 }
 0x3a4   :  { %3508 = vmatmul.mubr.bf16.gmra.mrb[56].mxu0 %v17972_v8 }
 0x3a5   :  { %3515 = vmatprep.mubr.bf16.mxu0 %v14358_v10 }
 0x3a6   :  { %16263 = vmatmul.mubr.msk.bf16.gmra.mrb[20].mxu1 %vm3406_vm7, %v17973_v22  ;;  %v17983_v22 = vld [vmem:[%s23709_s3 + $0x10] sm:$0xff]  }
 0x3a7   :  { %16266 = vmatprep.mubr.msk.bf16.mxu1 %vm18548_vm3, %v18547_v42 }
 0x3ac   :  { %3516 = vmatmul.mubr.bf16.gmra.mrb[60].mxu0 %v14357_v25 }
 0x3ae   :  { %16267 = vmatmul.mubr.msk.bf16.gmra.mrb[24].mxu1 %vm3406_vm7, %v17976_v7 }
 0x3af   :  { %16278 = vmatprep.mubr.msk.bf16.mxu1 %vm18548_vm3, %v18547_v42 }
 0x44f   :  { %v15307_v17 = vpop.f32.mrb[36].mxu0 }
 0x450   :  { %v15308_v15 = vpop.f32.mrb[37].mxu0 }
 0x451   :  { %v15309_v18 = vadd.f32 %v15308_v15, %v15307_v17  ;;  %v15310_v29 = vpop.f32.mrb[38].mxu0  ;;  %v3557_v38 = vpop.f32.mrb[0].mxu1 }
 0x452   :  { %v15311_v53 = vpop.f32.mrb[39].mxu0  ;;  %v16244_v16 = vpop.f32.mrb[1].mxu1 }
 0x453   :  { %v15312_v1 = vadd.f32 %v15311_v53, %v15310_v29  ;;  %v3558_v19 = vadd.f32 %v15309_v18, %v3557_v38  ;;  %v3560_v20 = vpop.f32.mrb[2].mxu1 }
 0x454   :  { %v16245_v21 = vpop.f32.mrb[3].mxu1 }
 0x455   :  { %3611 = vst.msk [vmem:[#allocation3] sm:$0xff] %vm2988_vm4, %v3558_v19  ;;  %v3561_v9 = vadd.f32 %v15312_v1, %v3560_v20 }
 0x457   :  { %v15313_v23 = vpop.f32.mrb[40].mxu0  ;;  %3612 = vst.msk [vmem:[#allocation3 + $0x8] sm:$0xff] %vm2988_vm4, %v3561_v9 }
 0x458   :  { %v15314_v24 = vpop.f32.mrb[41].mxu0 }
 0x459   :  { %v15315_v26 = vadd.f32 %v15314_v24, %v15313_v23  ;;  %v3565_v27 = vpop.f32.mrb[4].mxu1  ;;  %v15316_v28 = vpop.f32.mrb[42].mxu0 }
 0x45a   :  { %v15317_v30 = vpop.f32.mrb[43].mxu0  ;;  %v16248_v31 = vpop.f32.mrb[5].mxu1 }
 0x45b   :  { %v3566_v14 = vadd.f32 %v15315_v26, %v3565_v27  ;;  %v15318_v32 = vadd.f32 %v15317_v30, %v15316_v28  ;;  %v3568_v33 = vpop.f32.mrb[6].mxu1 }
 0x45c   :  { %v16249_v34 = vpop.f32.mrb[7].mxu1 }
 0x45d   :  { %3613 = vst.msk [vmem:[#allocation3 + $0x10] sm:$0xff] %vm2988_vm4, %v3566_v14  ;;  %v3569_v35 = vadd.f32 %v15318_v32, %v3568_v33 }
 0x45e   :  { %v3647_v50 = vld [vmem:[#allocation3 + $0x1] sm:$0xff] }
 0x45f   :  { %v15319_v36 = vpop.f32.mrb[44].mxu0  ;;  %3614 = vst.msk [vmem:[#allocation3 + $0x18] sm:$0xff] %vm2988_vm4, %v3569_v35 }
 0x460   :  { %v15320_v37 = vpop.f32.mrb[45].mxu0 }
 0x461   :  { %v15321_v39 = vadd.f32 %v15320_v37, %v15319_v36  ;;  %v3573_v40 = vpop.f32.mrb[8].mxu1  ;;  %v15322_v41 = vpop.f32.mrb[46].mxu0 }
 0x462   :  { %v15323_v43 = vpop.f32.mrb[47].mxu0  ;;  %v16252_v45 = vpop.f32.mrb[9].mxu1 }
 0x463   :  { %v3574_v46 = vadd.f32 %v15321_v39, %v3573_v40  ;;  %v15324_v47 = vadd.f32 %v15323_v43, %v15322_v41  ;;  %v3576_v49 = vpop.f32.mrb[10].mxu1 }
 0x464   :  { %v3648_v51 = vld [vmem:[#allocation3 + $0x9] sm:$0xff]  ;;  %v16253_v52 = vpop.f32.mrb[11].mxu1 }
 0x465   :  { %3615 = vst.msk [vmem:[#allocation3 + $0x20] sm:$0xff] %vm2988_vm4, %v3574_v46  ;;  %v3657_v55 = vpack.c.bf16 %v3648_v51, %v3647_v50  ;;  %v3577_v56 = vadd.f32 %v15324_v47, %v3576_v49 }
 0x466   :  { %v3649_v4 = vld [vmem:[#allocation3 + $0x11] sm:$0xff] }
 0x467   :  { %v15325_v57 = vpop.f32.mrb[48].mxu0  ;;  %16279 = vmatmul.mubr.msk.bf16.vlgmr.msra.gmra.mrb[28].mxu1 %vm2988_vm4, %v3657_v55  ;;  %3616 = vst.msk [vmem:[#allocation3 + $0x28] sm:$0xff] %vm2988_vm4, %v3577_v56 }
 0x468   :  { %v15326_v58 = vpop.f32.mrb[49].mxu0  ;;  %16282 = vmatprep.mubr.msk.bf16.mxu1 %vm18548_vm3, %v18547_v42  ;;  %16299 = vmatpush3.bf16.msra.mxu1 %v17981_v54 }
 0x469   :  { %v15327_v60 = vadd.f32 %v15326_v58, %v15325_v57  ;;  %v3581_v61 = vpop.f32.mrb[12].mxu1  ;;  %v15328_v62 = vpop.f32.mrb[50].mxu0  ;;  %16300 = vmatprep.subr.bf16.mxu1 %v18547_v42  ;;  %v3625_v57 = vld [vmem:[#allocation3 + $0x8] sm:$0xff]  ;;  %v3624_v58 = vld [vmem:[#allocation3] sm:$0xff] }
 0x46a   :  { %v15329_v63 = vpop.f32.mrb[51].mxu0  ;;  %v16256_v2 = vpop.f32.mrb[13].mxu1 }
 0x46b   :  { %v3582_v0 = vadd.f32 %v15327_v60, %v3581_v61  ;;  %v15330_v3 = vadd.f32 %v15329_v63, %v15328_v62  ;;  %v3584_v44 = vpop.f32.mrb[14].mxu1  ;;  %v3634_v60 = vpack.c.bf16 %v3625_v57, %v3624_v58  ;;  %v17986_v61 = vld [vmem:[%s23709_s3 + $0x48] sm:$0xff]   ;;  %v3627_v62 = vld [vmem:[#allocation3 + $0x18] sm:$0xff]  ;;  %v3626_v63 = vld [vmem:[#allocation3 + $0x10] sm:$0xff] }
 0x46c   :  { %v3650_v8 = vld [vmem:[#allocation3 + $0x19] sm:$0xff]  ;;  %v16257_v10 = vpop.f32.mrb[15].mxu1  ;;  %16301 = vmatpush3.bf16.msra.mxu1 %v17982_v59  ;;  %v17987_v2 = vld [vmem:[%s23709_s3 + $0x50] sm:$0xff]  }
 0x46d   :  { %3617 = vst.msk [vmem:[#allocation3 + $0x30] sm:$0xff] %vm2988_vm4, %v3582_v0  ;;  %v3658_v25 = vpack.c.bf16 %v3650_v8, %v3649_v4  ;;  %v3585_v7 = vadd.f32 %v15330_v3, %v3584_v44  ;;  %16302 = vmatprep.subr.bf16.mxu1 %v18547_v42  ;;  %v17985_v59 = vld [vmem:[%s23709_s3 + $0x40] sm:$0xff]   ;;  %v3635_v0 = vpack.c.bf16 %v3627_v62, %v3626_v63  ;;  %v17988_v3 = vld [vmem:[%s23709_s3 + $0x58] sm:$0xff]  }
 0x46e   :  { %v3651_v1 = vld [vmem:[#allocation3 + $0x21] sm:$0xff]  ;;  %v4330_v63 = vld [vmem:[#allocation3 + $0x14] sm:$0xff] }
 0x46f   :  { %v15331_v12 = vpop.f32.mrb[52].mxu0  ;;  %16283 = vmatmul.mubr.msk.bf16.gmra.mrb[32].mxu1 %vm2988_vm4, %v3658_v25  ;;  %3618 = vst.msk [vmem:[#allocation3 + $0x38] sm:$0xff] %vm2988_vm4, %v3585_v7  ;;  %v3629_v44 = vld [vmem:[#allocation3 + $0x28] sm:$0xff]  ;;  %v3628_v4 = vld [vmem:[#allocation3 + $0x20] sm:$0xff] }
 0x470   :  { %v15332_v13 = vpop.f32.mrb[53].mxu0  ;;  %16286 = vmatprep.mubr.msk.bf16.mxu1 %vm18548_vm3, %v18547_v42  ;;  %16303 = vmatpush3.bf16.msra.mxu1 %v17983_v22  ;;  %v3636_v8 = vpack.c.bf16 %v3629_v44, %v3628_v4  ;;  %v18002_v44 = vld [vmem:[%s23709_s3 + $0xc8] sm:$0xff]  }
 0x471   :  { %v15333_v5 = vadd.f32 %v15332_v13, %v15331_v12  ;;  %v3589_v17 = vpop.f32.mrb[16].mxu1  ;;  %v15334_v15 = vpop.f32.mrb[54].mxu0  ;;  %16304 = vmatprep.subr.bf16.mxu1 %v18547_v42  ;;  %v4332_v4 = vld [vmem:[#allocation3 + $0x24] sm:$0xff] }
 0x472   :  { %v15335_v18 = vpop.f32.mrb[55].mxu0  ;;  %v16260_v29 = vpop.f32.mrb[17].mxu1 }
 0x473   :  { %v3590_v38 = vadd.f32 %v15333_v5, %v3589_v17  ;;  %v15336_v53 = vadd.f32 %v15335_v18, %v15334_v15  ;;  %v3592_v16 = vpop.f32.mrb[18].mxu1  ;;  %v3894_v5 = vld [vmem:[#allocation3 + $0x2] sm:$0xff]  ;;  %v3897_v29 = vld [vmem:[#allocation3 + $0x1a] sm:$0xff] }
 0x474   :  { %v3652_v19 = vld [vmem:[#allocation3 + $0x29] sm:$0xff]  ;;  %v16261_v20 = vpop.f32.mrb[19].mxu1  ;;  %16305 = vmatpush3.bf16.msra.mxu1 %v17984_v11  ;;  %v17989_v17 = vld [vmem:[%s23709_s3 + $0x60] sm:$0xff]  }
 0x475   :  { %3619 = vst.msk [vmem:[#allocation3 + $0x40] sm:$0xff] %vm2988_vm4, %v3590_v38  ;;  %v3659_v21 = vpack.c.bf16 %v3652_v19, %v3651_v1  ;;  %v3593_v9 = vadd.f32 %v15336_v53, %v3592_v16  ;;  %16326 = vmatprep.subr.bf16.mxu1 %v18547_v42  ;;  %v3630_v22 = vld [vmem:[#allocation3 + $0x30] sm:$0xff]  ;;  %v17990_v18 = vld [vmem:[%s23709_s3 + $0x68] sm:$0xff]   ;;  %v17992_v1 = vld [vmem:[%s23709_s3 + $0x78] sm:$0xff]  }
 0x476   :  { %v3653_v34 = vld [vmem:[#allocation3 + $0x31] sm:$0xff]  ;;  %v3898_v20 = vld [vmem:[#allocation3 + $0x22] sm:$0xff] }
 0x477   :  { %v15337_v23 = vpop.f32.mrb[56].mxu0  ;;  %16287 = vmatmul.mubr.msk.bf16.gmra.mrb[36].mxu1 %vm2988_vm4, %v3659_v21  ;;  %3620 = vst.msk [vmem:[#allocation3 + $0x48] sm:$0xff] %vm2988_vm4, %v3593_v9  ;;  %v3631_v10 = vld [vmem:[#allocation3 + $0x38] sm:$0xff]  ;;  %v3895_v11 = vld [vmem:[#allocation3 + $0xa] sm:$0xff] }
 0x478   :  { %v15338_v24 = vpop.f32.mrb[57].mxu0  ;;  %16290 = vmatprep.mubr.msk.bf16.mxu1 %vm18548_vm3, %v18547_v42  ;;  %v3637_v25 = vpack.c.bf16 %v3631_v10, %v3630_v22  ;;  %v3904_v15 = vpack.c.bf16 %v3895_v11, %v3894_v5  ;;  %v3896_v38 = vld [vmem:[#allocation3 + $0x12] sm:$0xff]  ;;  %v3899_v19 = vld [vmem:[#allocation3 + $0x2a] sm:$0xff] }
 0x479   :  { %v15339_v26 = vadd.f32 %v15338_v24, %v15337_v23  ;;  %v3597_v27 = vpop.f32.mrb[20].mxu1  ;;  %v15340_v28 = vpop.f32.mrb[58].mxu0  ;;  %v17991_v53 = vld [vmem:[%s23709_s3 + $0x70] sm:$0xff]   ;;  %v3905_v16 = vpack.c.bf16 %v3897_v29, %v3896_v38  ;;  %v3906_v21 = vpack.c.bf16 %v3899_v19, %v3898_v20 }
 0x47a   :  { %v15341_v30 = vpop.f32.mrb[59].mxu0  ;;  %v16264_v31 = vpop.f32.mrb[21].mxu1  ;;  %v3900_v23 = vld [vmem:[#allocation3 + $0x32] sm:$0xff] }
 0x47b   :  { %v3598_v14 = vadd.f32 %v15339_v26, %v3597_v27  ;;  %v15342_v32 = vadd.f32 %v15341_v30, %v15340_v28  ;;  %v3600_v33 = vpop.f32.mrb[22].mxu1  ;;  %v17993_v30 = vld [vmem:[%s23709_s3 + $0x80] sm:$0xff]   ;;  %v4049_v31 = vpack.c.bf16 %v3896_v38, %v3895_v11  ;;  %v18003_v10 = vld [vmem:[%s23709_s3 + $0xd0] sm:$0xff]  }
 0x47c   :  { %v3654_v35 = vld [vmem:[#allocation3 + $0x39] sm:$0xff]  ;;  %v16265_v36 = vpop.f32.mrb[23].mxu1  ;;  %v4333_v11 = vld [vmem:[#allocation3 + $0x2c] sm:$0xff] }
 0x47d   :  { %3621 = vst.msk [vmem:[#allocation3 + $0x50] sm:$0xff] %vm2988_vm4, %v3598_v14  ;;  %v3660_v37 = vpack.c.bf16 %v3654_v35, %v3653_v34  ;;  %v3601_v39 = vadd.f32 %v15342_v32, %v3600_v33  ;;  %v3632_v12 = vld [vmem:[#allocation3 + $0x40] sm:$0xff]  ;;  %v17994_v14 = vld [vmem:[%s23709_s3 + $0x88] sm:$0xff]   ;;  %v17995_v32 = vld [vmem:[%s23709_s3 + $0x90] sm:$0xff]   ;;  %v4050_v33 = vpack.c.bf16 %v3898_v20, %v3897_v29  ;;  %v4051_v35 = vpack.c.bf16 %v3900_v23, %v3899_v19 }
 0x47e   :  { %v3655_v52 = vld [vmem:[#allocation3 + $0x41] sm:$0xff]  ;;  %v17996_v34 = vld [vmem:[%s23709_s3 + $0x98] sm:$0xff]  }
 0x47f   :  { %16291 = vmatmul.mubr.msk.bf16.gmra.mrb[40].mxu1 %vm2988_vm4, %v3660_v37  ;;  %3622 = vst.msk [vmem:[#allocation3 + $0x58] sm:$0xff] %vm2988_vm4, %v3601_v39  ;;  %v15343_v40 = vpop.f32.mrb[60].mxu0  ;;  %v3633_v7 = vld [vmem:[#allocation3 + $0x48] sm:$0xff]  ;;  %v3901_v9 = vld [vmem:[#allocation3 + $0x3a] sm:$0xff] }
 0x480   :  { %16294 = vmatprep.mubr.msk.bf16.mxu1 %vm18548_vm3, %v18547_v42  ;;  %v15344_v41 = vpop.f32.mrb[61].mxu0  ;;  %v3638_v13 = vpack.c.bf16 %v3633_v7, %v3632_v12  ;;  %v3907_v24 = vpack.c.bf16 %v3901_v9, %v3900_v23  ;;  %v3902_v27 = vld [vmem:[#allocation3 + $0x42] sm:$0xff]  ;;  %v20133_v7 = vld [vmem:[#allocation3 + $0x34] sm:$0xff] }
 0x481   :  { %v15345_v43 = vadd.f32 %v15344_v41, %v15343_v40  ;;  %v3605_v45 = vpop.f32.mrb[24].mxu1  ;;  %v15346_v46 = vpop.f32.mrb[62].mxu0  ;;  %v4052_v36 = vpack.c.bf16 %v3902_v27, %v3901_v9  ;;  %v4185_v40 = vld [vmem:[#allocation3 + $0x13] sm:$0xff]  ;;  %v4184_v41 = vld [vmem:[#allocation3 + $0xb] sm:$0xff]  ;;  %v4191_v57 = vld [vmem:[#allocation3 + $0x43] sm:$0xff] }
 0x482   :  { %v16268_v47 = vpop.f32.mrb[25].mxu1  ;;  %v15347_v49 = vpop.f32.mrb[63].mxu0  ;;  %v17998_v46 = vld [vmem:[%s23709_s3 + $0xa8] sm:$0xff]   ;;  %v4190_v58 = vld [vmem:[#allocation3 + $0x3b] sm:$0xff] }
 0x483   :  { %v3606_v50 = vadd.f32 %v15345_v43, %v3605_v45  ;;  %v3608_v51 = vpop.f32.mrb[26].mxu1  ;;  %v17997_v43 = vld [vmem:[%s23709_s3 + $0xa0] sm:$0xff]   ;;  %v4194_v45 = vpack.c.bf16 %v4185_v40, %v4184_v41  ;;  %v4485_v40 = vpack.c.bf16 %v4333_v11, %v4332_v4 }
 0x484   :  { %v3656_v54 = vld [vmem:[#allocation3 + $0x49] sm:$0xff]  ;;  %v16269_v55 = vpop.f32.mrb[27].mxu1  ;;  %v4186_v49 = vld [vmem:[#allocation3 + $0x1b] sm:$0xff] }
 0x485   :  { %v3661_v56 = vpack.c.bf16 %v3656_v54, %v3655_v52  ;;  %3623 = vst.msk [vmem:[#allocation3 + $0x60] sm:$0xff] %vm2988_vm4, %v3606_v50  ;;  %v3903_v26 = vld [vmem:[#allocation3 + $0x4a] sm:$0xff]  ;;  %v18000_v52 = vld [vmem:[%s23709_s3 + $0xb8] sm:$0xff]  }
 0x486   :  { %v3908_v28 = vpack.c.bf16 %v3903_v26, %v3902_v27  ;;  %v4048_v37 = vld [vmem:[#allocation3 + $0x52] sm:$0xff]  ;;  %v4187_v47 = vld [vmem:[#allocation3 + $0x23] sm:$0xff] }
 0x487   :  { %16295 = vmatmul.mubr.msk.bf16.gmra.mrb[44].mxu1 %vm2988_vm4, %v3661_v56  ;;  %v4053_v39 = vpack.c.bf16 %v4048_v37, %v3903_v26  ;;  %v17999_v50 = vld [vmem:[%s23709_s3 + $0xb0] sm:$0xff]   ;;  %v4195_v51 = vpack.c.bf16 %v4187_v47, %v4186_v49 }
 0x488   :  { %16306 = vmatprep.mubr.msk.bf16.mxu1 %vm18548_vm3, %v18547_v42  ;;  %v4189_v54 = vld [vmem:[#allocation3 + $0x33] sm:$0xff]  ;;  %v4188_v55 = vld [vmem:[#allocation3 + $0x2b] sm:$0xff] }
 0x489   :  { %v4196_v56 = vpack.c.bf16 %v4189_v54, %v4188_v55  ;;  %v4338_v20 = vld [vmem:[#allocation3 + $0x54] sm:$0xff]  ;;  %v4337_v23 = vld [vmem:[#allocation3 + $0x4c] sm:$0xff] }
 0x48a   :  { %v4343_v26 = vpack.c.bf16 %v4338_v20, %v4337_v23 }
 0x48f   :  { %16307 = vmatmul.mubr.msk.bf16.vlgmr.msra.gmra.mrb[48].mxu1 %vm2988_vm4, %v3634_v60  ;;  %v4193_v60 = vld [vmem:[#allocation3 + $0x53] sm:$0xff] }
 0x490   :  { %16310 = vmatprep.mubr.msk.bf16.mxu1 %vm18548_vm3, %v18547_v42  ;;  %16327 = vmatpush3.bf16.msra.mxu1 %v17985_v59  ;;  %v4197_v59 = vpack.c.bf16 %v4191_v57, %v4190_v58 }
 0x491   :  { %16328 = vmatprep.subr.bf16.mxu1 %v18547_v42 }
 0x494   :  { %16329 = vmatpush3.bf16.msra.mxu1 %v17986_v61  ;;  %v4192_v61 = vld [vmem:[#allocation3 + $0x4b] sm:$0xff] }
 0x495   :  { %16330 = vmatprep.subr.bf16.mxu1 %v18547_v42  ;;  %v4198_v62 = vpack.c.bf16 %v4193_v60, %v4192_v61 }
 0x497   :  { %16311 = vmatmul.mubr.msk.bf16.gmra.mrb[52].mxu1 %vm2988_vm4, %v3635_v0  ;;  %v18001_v0 = vld [vmem:[%s23709_s3 + $0xc0] sm:$0xff]  }
 0x498   :  { %16314 = vmatprep.mubr.msk.bf16.mxu1 %vm18548_vm3, %v18547_v42  ;;  %16331 = vmatpush3.bf16.msra.mxu1 %v17987_v2  ;;  %v4329_v2 = vld [vmem:[#allocation3 + $0xc] sm:$0xff] }
 0x499   :  { %16332 = vmatprep.subr.bf16.mxu1 %v18547_v42 }
 0x49c   :  { %16333 = vmatpush3.bf16.msra.mxu1 %v17988_v3  ;;  %v4339_v3 = vpack.c.bf16 %v4330_v63, %v4329_v2 }
 0x49d   :  { %16354 = vmatprep.subr.bf16.mxu1 %v18547_v42 }
 0x49f   :  { %16315 = vmatmul.mubr.msk.bf16.gmra.mrb[56].mxu1 %vm2988_vm4, %v3636_v8  ;;  %v4331_v8 = vld [vmem:[#allocation3 + $0x1c] sm:$0xff] }
 0x4a0   :  { %16318 = vmatprep.mubr.msk.bf16.mxu1 %vm18548_vm3, %v18547_v42  ;;  %v4340_v22 = vpack.c.bf16 %v4332_v4, %v4331_v8 }
 0x4a7   :  { %16319 = vmatmul.mubr.msk.bf16.gmra.mrb[60].mxu1 %vm2988_vm4, %v3637_v25  ;;  %v18004_v25 = vld [vmem:[%s23709_s3 + $0xd8] sm:$0xff]  }
 0x4a8   :  { %16322 = vmatprep.mubr.msk.bf16.mxu1 %vm18548_vm3, %v18547_v42 }
 0x4af   :  { %16323 = vmatmul.mubr.msk.bf16.gmra.mrb[64].mxu1 %vm2988_vm4, %v3638_v13 }
 0x4b0   :  { %16334 = vmatprep.mubr.msk.bf16.mxu1 %vm18548_vm3, %v18547_v42 }
 0x4b7   :  { %16335 = vmatmul.mubr.msk.bf16.vlgmr.msra.gmra.mrb[68].mxu1 %vm2988_vm4, %v3904_v15 }
 0x4b8   :  { %16338 = vmatprep.mubr.msk.bf16.mxu1 %vm18548_vm3, %v18547_v42  ;;  %16355 = vmatpush3.bf16.msra.mxu1 %v17989_v17  ;;  %v4341_v17 = vpack.c.bf16 %v20133_v7, %v4333_v11 }
 0x4b9   :  { %16356 = vmatprep.subr.bf16.mxu1 %v18547_v42 }
 0x4bc   :  { %16357 = vmatpush3.bf16.msra.mxu1 %v17990_v18  ;;  %v4336_v18 = vld [vmem:[#allocation3 + $0x44] sm:$0xff] }
 0x4bd   :  { %16358 = vmatprep.subr.bf16.mxu1 %v18547_v42  ;;  %v4487_v60 = vpack.c.bf16 %v4337_v23, %v4336_v18  ;;  %v18012_v23 = vld [vmem:[%s23709_s3 + $0x118] sm:$0xff]  }
 0x4bf   :  { %16339 = vmatmul.mubr.msk.bf16.gmra.mrb[72].mxu1 %vm2988_vm4, %v3905_v16 }
 0x4c0   :  { %16342 = vmatprep.mubr.msk.bf16.mxu1 %vm18548_vm3, %v18547_v42  ;;  %16359 = vmatpush3.bf16.msra.mxu1 %v17991_v53  ;;  %v4335_v53 = vld [vmem:[#allocation3 + $0x3c] sm:$0xff] }
 0x4c1   :  { %16360 = vmatprep.subr.bf16.mxu1 %v18547_v42 }
 0x4c4   :  { %16361 = vmatpush3.bf16.msra.mxu1 %v17992_v1  ;;  %v4342_v1 = vpack.c.bf16 %v4336_v18, %v4335_v53 }
 0x4c5   :  { %16382 = vmatprep.subr.bf16.mxu1 %v18547_v42 }
 0x4c7   :  { %16343 = vmatmul.mubr.msk.bf16.gmra.mrb[76].mxu1 %vm2988_vm4, %v3906_v21 }
 0x4c8   :  { %16346 = vmatprep.mubr.msk.bf16.mxu1 %vm18548_vm3, %v18547_v42 }
 0x4cf   :  { %16347 = vmatmul.mubr.msk.bf16.gmra.mrb[80].mxu1 %vm2988_vm4, %v3907_v24 }
 0x4d0   :  { %16350 = vmatprep.mubr.msk.bf16.mxu1 %vm18548_vm3, %v18547_v42 }
 0x4d7   :  { %16351 = vmatmul.mubr.msk.bf16.gmra.mrb[84].mxu1 %vm2988_vm4, %v3908_v28 }
 0x4d8   :  { %16362 = vmatprep.mubr.msk.bf16.mxu1 %vm18548_vm3, %v18547_v42 }
 0x4df   :  { %16363 = vmatmul.mubr.msk.bf16.vlgmr.msra.gmra.mrb[88].mxu1 %vm2988_vm4, %v4049_v31 }
 0x4e0   :  { %16366 = vmatprep.mubr.msk.bf16.mxu1 %vm18548_vm3, %v18547_v42  ;;  %16383 = vmatpush3.bf16.msra.mxu1 %v17993_v30 }
 0x4e1   :  { %16384 = vmatprep.subr.bf16.mxu1 %v18547_v42 }
 0x4e4   :  { %16385 = vmatpush3.bf16.msra.mxu1 %v17994_v14  ;;  %v18005_v14 = vld [vmem:[%s23709_s3 + $0xe0] sm:$0xff]  }
 0x4e5   :  { %16386 = vmatprep.subr.bf16.mxu1 %v18547_v42 }
 0x4e7   :  { %16367 = vmatmul.mubr.msk.bf16.gmra.mrb[92].mxu1 %vm2988_vm4, %v4050_v33 }
 0x4e8   :  { %16370 = vmatprep.mubr.msk.bf16.mxu1 %vm18548_vm3, %v18547_v42  ;;  %16387 = vmatpush3.bf16.msra.mxu1 %v17995_v32  ;;  %v4484_v32 = vpack.c.bf16 %v4331_v8, %v4330_v63 }
 0x4e9   :  { %16388 = vmatprep.subr.bf16.mxu1 %v18547_v42 }
 0x4ec   :  { %16389 = vmatpush3.bf16.msra.mxu1 %v17996_v34  ;;  %v18006_v34 = vld [vmem:[%s23709_s3 + $0xe8] sm:$0xff]  }
 0x4ed   :  { %16410 = vmatprep.subr.bf16.mxu1 %v18547_v42 }
 0x4ef   :  { %16371 = vmatmul.mubr.msk.bf16.gmra.mrb[96].mxu1 %vm2988_vm4, %v4051_v35 }
 0x4f0   :  { %16374 = vmatprep.mubr.msk.bf16.mxu1 %vm18548_vm3, %v18547_v42 }
 0x4f7   :  { %16375 = vmatmul.mubr.msk.bf16.gmra.mrb[100].mxu1 %vm2988_vm4, %v4052_v36 }
 0x4f8   :  { %16378 = vmatprep.mubr.msk.bf16.mxu1 %vm18548_vm3, %v18547_v42 }
 0x4ff   :  { %16379 = vmatmul.mubr.msk.bf16.gmra.mrb[104].mxu1 %vm2988_vm4, %v4053_v39  ;;  %v18007_v39 = vld [vmem:[%s23709_s3 + $0xf0] sm:$0xff]  }
 0x500   :  { %16390 = vmatprep.mubr.msk.bf16.mxu1 %vm18548_vm3, %v18547_v42 }
 0x507   :  { %16391 = vmatmul.mubr.msk.bf16.vlgmr.msra.gmra.mrb[108].mxu1 %vm2988_vm4, %v4194_v45 }
 0x508   :  { %16394 = vmatprep.mubr.msk.bf16.mxu1 %vm18548_vm3, %v18547_v42  ;;  %16411 = vmatpush3.bf16.msra.mxu1 %v17997_v43  ;;  %v18008_v43 = vld [vmem:[%s23709_s3 + $0xf8] sm:$0xff]  }
 0x509   :  { %16412 = vmatprep.subr.bf16.mxu1 %v18547_v42 }
 0x50c   :  { %16413 = vmatpush3.bf16.msra.mxu1 %v17998_v46 }
 0x50d   :  { %16414 = vmatprep.subr.bf16.mxu1 %v18547_v42 }
 0x50f   :  { %16395 = vmatmul.mubr.msk.bf16.gmra.mrb[112].mxu1 %vm2988_vm4, %v4195_v51 }
 0x510   :  { %16398 = vmatprep.mubr.msk.bf16.mxu1 %vm18548_vm3, %v18547_v42  ;;  %16415 = vmatpush3.bf16.msra.mxu1 %v17999_v50 }
 0x511   :  { %16416 = vmatprep.subr.bf16.mxu1 %v18547_v42 }
 0x514   :  { %16417 = vmatpush3.bf16.msra.mxu1 %v18000_v52  ;;  %v4486_v52 = vpack.c.bf16 %v4335_v53, %v20133_v7 }
 0x515   :  { %16438 = vmatprep.subr.bf16.mxu1 %v18547_v42 }
 0x517   :  { %16399 = vmatmul.mubr.msk.bf16.gmra.mrb[116].mxu1 %vm2988_vm4, %v4196_v56 }
 0x518   :  { %16402 = vmatprep.mubr.msk.bf16.mxu1 %vm18548_vm3, %v18547_v42 }
 0x51f   :  { %16403 = vmatmul.mubr.msk.bf16.gmra.mrb[120].mxu1 %vm2988_vm4, %v4197_v59 }
 0x520   :  { %16406 = vmatprep.mubr.msk.bf16.mxu1 %vm18548_vm3, %v18547_v42 }
 0x527   :  { %16407 = vmatmul.mubr.msk.bf16.gmra.mrb[124].mxu1 %vm2988_vm4, %v4198_v62  ;;  %v4483_v62 = vld [vmem:[#allocation3 + $0x5c] sm:$0xff] }
 0x528   :  { %16418 = vmatprep.mubr.msk.bf16.mxu1 %vm18548_vm3, %v18547_v42  ;;  %v4488_v4 = vpack.c.bf16 %v4483_v62, %v4338_v20  ;;  %v4764_v62 = vld [vmem:[#allocation3 + $0x16] sm:$0xff] }
 0x52f   :  { %16419 = vmatmul.mubr.msk.bf16.vlgmr.msra.gmra.mrb[128].mxu1 %vm2988_vm4, %v4339_v3 }
 0x530   :  { %16422 = vmatprep.mubr.msk.bf16.mxu1 %vm18548_vm3, %v18547_v42  ;;  %16439 = vmatpush3.bf16.msra.mxu1 %v18001_v0 }
 0x531   :  { %16440 = vmatprep.subr.bf16.mxu1 %v18547_v42 }
 0x534   :  { %16441 = vmatpush3.bf16.msra.mxu1 %v18002_v44 }
 0x535   :  { %16442 = vmatprep.subr.bf16.mxu1 %v18547_v42 }
 0x537   :  { %16423 = vmatmul.mubr.msk.bf16.gmra.mrb[132].mxu1 %vm2988_vm4, %v4340_v22 }
 0x538   :  { %16426 = vmatprep.mubr.msk.bf16.mxu1 %vm18548_vm3, %v18547_v42  ;;  %16443 = vmatpush3.bf16.msra.mxu1 %v18003_v10  ;;  %v4620_v10 = vld [vmem:[#allocation3 + $0x1d] sm:$0xff] }
 0x539   :  { %16444 = vmatprep.subr.bf16.mxu1 %v18547_v42 }
 0x53a   :  { %v3743_v12 = vpop.f32.mrb[28].mxu1 }
 0x53b   :  { %v16280_v13 = vpop.f32.mrb[29].mxu1 }
 0x53c   :  { %v3746_v5 = vpop.f32.mrb[30].mxu1  ;;  %16445 = vmatpush3.bf16.msra.mxu1 %v18004_v25  ;;  %v18009_v13 = vld [vmem:[%s23709_s3 + $0x100] sm:$0xff]  }
 0x53d   :  { %v16281_v15 = vpop.f32.mrb[31].mxu1  ;;  %16466 = vmatprep.subr.bf16.mxu1 %v18547_v42 }
 0x53e   :  { %v18010_v15 = vld [vmem:[%s23709_s3 + $0x108] sm:$0xff]  }
 0x53f   :  { %16427 = vmatmul.mubr.msk.bf16.gmra.mrb[136].mxu1 %vm2988_vm4, %v4341_v17 }
 0x540   :  { %16430 = vmatprep.mubr.msk.bf16.mxu1 %vm18548_vm3, %v18547_v42 }
 0x542   :  { %v3751_v29 = vpop.f32.mrb[32].mxu1 }
 0x543   :  { %v16284_v38 = vpop.f32.mrb[33].mxu1 }
 0x544   :  { %v3754_v16 = vpop.f32.mrb[34].mxu1 }
 0x545   :  { %v16285_v19 = vpop.f32.mrb[35].mxu1 }
 0x546   :  { %v18011_v19 = vld [vmem:[%s23709_s3 + $0x110] sm:$0xff]  }
 0x547   :  { %16431 = vmatmul.mubr.msk.bf16.gmra.mrb[140].mxu1 %vm2988_vm4, %v4342_v1  ;;  %v4621_v1 = vld [vmem:[#allocation3 + $0x25] sm:$0xff] }
 0x548   :  { %16434 = vmatprep.mubr.msk.bf16.mxu1 %vm18548_vm3, %v18547_v42 }
 0x54a   :  { %v3759_v21 = vpop.f32.mrb[36].mxu1 }
 0x54b   :  { %v16288_v9 = vpop.f32.mrb[37].mxu1 }
 0x54c   :  { %v3762_v24 = vpop.f32.mrb[38].mxu1 }
 0x54d   :  { %v16289_v27 = vpop.f32.mrb[39].mxu1 }
 0x54f   :  { %16435 = vmatmul.mubr.msk.bf16.gmra.mrb[144].mxu1 %vm2988_vm4, %v4343_v26  ;;  %v4624_v26 = vld [vmem:[#allocation3 + $0x3d] sm:$0xff] }
 0x550   :  { %16446 = vmatprep.mubr.msk.bf16.mxu1 %vm18548_vm3, %v18547_v42 }
 0x552   :  { %v3767_v28 = vpop.f32.mrb[40].mxu1 }
 0x553   :  { %v16292_v30 = vpop.f32.mrb[41].mxu1 }
 0x554   :  { %v3770_v31 = vpop.f32.mrb[42].mxu1 }
 0x555   :  { %v16293_v33 = vpop.f32.mrb[43].mxu1 }
 0x557   :  { %16447 = vmatmul.mubr.msk.bf16.vlgmr.msra.gmra.mrb[148].mxu1 %vm2988_vm4, %v4484_v32 }
 0x558   :  { %16450 = vmatprep.mubr.msk.bf16.mxu1 %vm18548_vm3, %v18547_v42  ;;  %16467 = vmatpush3.bf16.msra.mxu1 %v18005_v14 }
 0x559   :  { %16468 = vmatprep.subr.bf16.mxu1 %v18547_v42 }
 0x55a   :  { %v3775_v35 = vpop.f32.mrb[44].mxu1 }
 0x55b   :  { %v16296_v36 = vpop.f32.mrb[45].mxu1 }
 0x55c   :  { %v20156_v37 = vpop.f32.mrb[46].mxu1  ;;  %16469 = vmatpush3.bf16.msra.mxu1 %v18006_v34 }
 0x55d   :  { %v16297_v41 = vpop.f32.mrb[47].mxu1  ;;  %16470 = vmatprep.subr.bf16.mxu1 %v18547_v42 }
 0x55f   :  { %16451 = vmatmul.mubr.msk.bf16.gmra.mrb[152].mxu1 %vm2988_vm4, %v4485_v40  ;;  %v4625_v40 = vld [vmem:[#allocation3 + $0x45] sm:$0xff] }
 0x560   :  { %16454 = vmatprep.mubr.msk.bf16.mxu1 %vm18548_vm3, %v18547_v42  ;;  %16471 = vmatpush3.bf16.msra.mxu1 %v18007_v39 }
 0x561   :  { %16472 = vmatprep.subr.bf16.mxu1 %v18547_v42 }
 0x562   :  { %v3855_v45 = vpop.f32.mrb[48].mxu1 }
 0x563   :  { %v20169_v46 = vadd.f32 %v3855_v45, %v3743_v12  ;;  %v16308_v47 = vpop.f32.mrb[49].mxu1  ;;  %v4619_v12 = vld [vmem:[#allocation3 + $0x15] sm:$0xff] }
 0x564   :  { %v3858_v49 = vpop.f32.mrb[50].mxu1  ;;  %16473 = vmatpush3.bf16.msra.mxu1 %v18008_v43  ;;  %v4629_v17 = vpack.c.bf16 %v4620_v10, %v4619_v12  ;;  %v4628_v47 = vld [vmem:[#allocation3 + $0x5d] sm:$0xff] }
 0x565   :  { %v20171_v50 = vadd.f32 %v3858_v49, %v3746_v5  ;;  %v16309_v51 = vpop.f32.mrb[51].mxu1  ;;  %16494 = vmatprep.subr.bf16.mxu1 %v18547_v42 }
 0x567   :  { %16455 = vmatmul.mubr.msk.bf16.gmra.mrb[156].mxu1 %vm2988_vm4, %v4486_v52  ;;  %v4627_v52 = vld [vmem:[#allocation3 + $0x55] sm:$0xff] }
 0x568   :  { %16458 = vmatprep.mubr.msk.bf16.mxu1 %vm18548_vm3, %v18547_v42 }
 0x56a   :  { %v3863_v54 = vpop.f32.mrb[52].mxu1 }
 0x56b   :  { %v20178_v55 = vadd.f32 %v3863_v54, %v3751_v29  ;;  %v16312_v56 = vpop.f32.mrb[53].mxu1  ;;  %v4622_v29 = vld [vmem:[#allocation3 + $0x2d] sm:$0xff] }
 0x56c   :  { %v3866_v57 = vpop.f32.mrb[54].mxu1  ;;  %v4630_v9 = vpack.c.bf16 %v4622_v29, %v4621_v1  ;;  %v4633_v56 = vpack.c.bf16 %v4628_v47, %v4627_v52  ;;  %v4771_v1 = vld [vmem:[#allocation3 + $0x4e] sm:$0xff] }
 0x56d   :  { %v20180_v58 = vadd.f32 %v3866_v57, %v3754_v16  ;;  %v16313_v59 = vpop.f32.mrb[55].mxu1 }
 0x56f   :  { %16459 = vmatmul.mubr.msk.bf16.gmra.mrb[160].mxu1 %vm2988_vm4, %v4487_v60 }
 0x570   :  { %16462 = vmatprep.mubr.msk.bf16.mxu1 %vm18548_vm3, %v18547_v42 }
 0x572   :  { %v3871_v61 = vpop.f32.mrb[56].mxu1 }
 0x573   :  { %v20185_v63 = vadd.f32 %v3871_v61, %v3759_v21  ;;  %v16316_v2 = vpop.f32.mrb[57].mxu1 }
 0x574   :  { %v3874_v0 = vpop.f32.mrb[58].mxu1 }
 0x575   :  { %v20187_v3 = vadd.f32 %v3874_v0, %v3762_v24  ;;  %v16317_v44 = vpop.f32.mrb[59].mxu1 }
 0x576   :  { %v4767_v44 = vld [vmem:[#allocation3 + $0x2e] sm:$0xff] }
 0x577   :  { %16463 = vmatmul.mubr.msk.bf16.gmra.mrb[164].mxu1 %vm2988_vm4, %v4488_v4 }
 0x578   :  { %16474 = vmatprep.mubr.msk.bf16.mxu1 %vm18548_vm3, %v18547_v42 }
 0x57a   :  { %v3879_v8 = vpop.f32.mrb[60].mxu1 }
 0x57b   :  { %v20192_v22 = vadd.f32 %v3879_v8, %v3767_v28  ;;  %v16320_v25 = vpop.f32.mrb[61].mxu1 }
 0x57c   :  { %v3882_v7 = vpop.f32.mrb[62].mxu1  ;;  %v4766_v25 = vld [vmem:[#allocation3 + $0x26] sm:$0xff] }
 0x57d   :  { %v20197_v11 = vadd.f32 %v3882_v7, %v3770_v31  ;;  %v16321_v5 = vpop.f32.mrb[63].mxu1  ;;  %v4623_v31 = vld [vmem:[#allocation3 + $0x35] sm:$0xff]  ;;  %v4775_v12 = vpack.c.bf16 %v4767_v44, %v4766_v25 }
 0x57e   :  { %v4631_v33 = vpack.c.bf16 %v4624_v26, %v4623_v31 }
 0x57f   :  { %16475 = vmatmul.mubr.msk.bf16.vlgmr.msra.gmra.mrb[168].mxu1 %vm2988_vm4, %v4629_v17 }
 0x580   :  { %16478 = vmatprep.mubr.msk.bf16.mxu1 %vm18548_vm3, %v18547_v42  ;;  %16495 = vmatpush3.bf16.msra.mxu1 %v18009_v13 }
 0x581   :  { %16496 = vmatprep.subr.bf16.mxu1 %v18547_v42 }
 0x582   :  { %v3887_v18 = vpop.f32.mrb[64].mxu1 }
 0x583   :  { %v20206_v38 = vadd.f32 %v3887_v18, %v3775_v35  ;;  %v16324_v53 = vpop.f32.mrb[65].mxu1  ;;  %v4626_v35 = vld [vmem:[#allocation3 + $0x4d] sm:$0xff]  ;;  %v4768_v18 = vld [vmem:[#allocation3 + $0x36] sm:$0xff] }
 0x584   :  { %v3890_v16 = vpop.f32.mrb[66].mxu1  ;;  %16497 = vmatpush3.bf16.msra.mxu1 %v18010_v15  ;;  %v4632_v45 = vpack.c.bf16 %v4626_v35, %v4625_v40 }
 0x585   :  { %v3891_v20 = vadd.f32 %v3890_v16, %v20156_v37  ;;  %v16325_v21 = vpop.f32.mrb[67].mxu1  ;;  %16498 = vmatprep.subr.bf16.mxu1 %v18547_v42 }
 0x587   :  { %16479 = vmatmul.mubr.msk.bf16.gmra.mrb[172].mxu1 %vm2988_vm4, %v4630_v9  ;;  %v4770_v9 = vld [vmem:[#allocation3 + $0x46] sm:$0xff] }
 0x588   :  { %16482 = vmatprep.mubr.msk.bf16.mxu1 %vm18548_vm3, %v18547_v42  ;;  %16499 = vmatpush3.bf16.msra.mxu1 %v18011_v19  ;;  %v4777_v26 = vpack.c.bf16 %v4771_v1, %v4770_v9 }
 0x589   :  { %16500 = vmatprep.subr.bf16.mxu1 %v18547_v42 }
 0x58a   :  { %v3990_v24 = vpop.f32.mrb[68].mxu1 }
 0x58b   :  { %v4029_v27 = vadd.f32 %v3990_v24, %v20169_v46  ;;  %v16336_v28 = vpop.f32.mrb[69].mxu1 }
 0x58c   :  { %v3993_v30 = vpop.f32.mrb[70].mxu1  ;;  %16501 = vmatpush3.bf16.msra.mxu1 %v18012_v23  ;;  %v4773_v28 = vld [vmem:[#allocation3 + $0x5e] sm:$0xff] }
 0x58d   :  { %v4030_v14 = vadd.f32 %v3993_v30, %v20171_v50  ;;  %v16337_v32 = vpop.f32.mrb[71].mxu1  ;;  %16522 = vmatprep.subr.bf16.mxu1 %v18547_v42 }
 0x58e   :  { %v4772_v32 = vld [vmem:[#allocation3 + $0x56] sm:$0xff] }
 0x58f   :  { %16483 = vmatmul.mubr.msk.bf16.gmra.mrb[176].mxu1 %vm2988_vm4, %v4631_v33  ;;  %v4778_v35 = vpack.c.bf16 %v4773_v28, %v4772_v32 }
 0x590   :  { %16486 = vmatprep.mubr.msk.bf16.mxu1 %vm18548_vm3, %v18547_v42 }
 0x592   :  { %v3998_v34 = vpop.f32.mrb[72].mxu1 }
 0x593   :  { %v4031_v36 = vadd.f32 %v3998_v34, %v20178_v55  ;;  %v16340_v37 = vpop.f32.mrb[73].mxu1 }
 0x594   :  { %v4001_v39 = vpop.f32.mrb[74].mxu1 }
 0x595   :  { %v4032_v41 = vadd.f32 %v4001_v39, %v20180_v58  ;;  %v16341_v43 = vpop.f32.mrb[75].mxu1  ;;  %v4765_v58 = vld [vmem:[#allocation3 + $0x1e] sm:$0xff] }
 0x596   :  { %v4774_v0 = vpack.c.bf16 %v4765_v58, %v4764_v62 }
 0x597   :  { %16487 = vmatmul.mubr.msk.bf16.gmra.mrb[180].mxu1 %vm2988_vm4, %v4632_v45 }
 0x598   :  { %16490 = vmatprep.mubr.msk.bf16.mxu1 %vm18548_vm3, %v18547_v42 }
 0x59a   :  { %v4006_v46 = vpop.f32.mrb[76].mxu1 }
 0x59b   :  { %v4033_v49 = vadd.f32 %v4006_v46, %v20185_v63  ;;  %v16344_v50 = vpop.f32.mrb[77].mxu1 }
 0x59c   :  { %v4009_v51 = vpop.f32.mrb[78].mxu1 }
 0x59d   :  { %v4034_v54 = vadd.f32 %v4009_v51, %v20187_v3  ;;  %v16345_v55 = vpop.f32.mrb[79].mxu1 }
 0x59f   :  { %16491 = vmatmul.mubr.msk.bf16.gmra.mrb[184].mxu1 %vm2988_vm4, %v4633_v56 }
 0x5a0   :  { %16502 = vmatprep.mubr.msk.bf16.mxu1 %vm18548_vm3, %v18547_v42 }
 0x5a2   :  { %v4014_v57 = vpop.f32.mrb[80].mxu1 }
 0x5a3   :  { %v4035_v59 = vadd.f32 %v4014_v57, %v20192_v22  ;;  %v16348_v60 = vpop.f32.mrb[81].mxu1 }
 0x5a4   :  { %v4017_v61 = vpop.f32.mrb[82].mxu1 }
 0x5a5   :  { %v4036_v63 = vadd.f32 %v4017_v61, %v20197_v11  ;;  %v16349_v2 = vpop.f32.mrb[83].mxu1  ;;  %v4769_v11 = vld [vmem:[#allocation3 + $0x3e] sm:$0xff] }
 0x5a7   :  { %16503 = vmatmul.mubr.msk.bf16.vlgmr.msra.gmra.mrb[188].mxu1 %vm2988_vm4, %v4774_v0 }
 0x5a8   :  { %16506 = vmatprep.mubr.msk.bf16.mxu1 %vm18548_vm3, %v18547_v42 }
 0x5aa   :  { %v4022_v3 = vpop.f32.mrb[84].mxu1 }
 0x5ab   :  { %v4037_v4 = vadd.f32 %v4022_v3, %v20206_v38  ;;  %v16352_v8 = vpop.f32.mrb[85].mxu1  ;;  %v4776_v38 = vpack.c.bf16 %v4769_v11, %v4768_v18 }
 0x5ac   :  { %v4025_v10 = vpop.f32.mrb[86].mxu1 }
 0x5ad   :  { %v4038_v22 = vadd.f32 %v4025_v10, %v3891_v20  ;;  %v16353_v7 = vpop.f32.mrb[87].mxu1 }
 0x5af   :  { %16507 = vmatmul.mubr.msk.bf16.gmra.mrb[192].mxu1 %vm2988_vm4, %v4775_v12 }
 0x5b0   :  { %16510 = vmatprep.mubr.msk.bf16.mxu1 %vm18548_vm3, %v18547_v42 }
 0x5b2   :  { %v4135_v13 = vpop.f32.mrb[88].mxu1 }
 0x5b3   :  { %v4174_v5 = vadd.f32 %v4135_v13, %v4029_v27  ;;  %v16364_v17 = vpop.f32.mrb[89].mxu1 }
 0x5b4   :  { %v4138_v15 = vpop.f32.mrb[90].mxu1 }
 0x5b5   :  { %v4175_v29 = vadd.f32 %v4138_v15, %v4030_v14  ;;  %v16365_v53 = vpop.f32.mrb[91].mxu1 }
 0x5b7   :  { %16511 = vmatmul.mubr.msk.bf16.gmra.mrb[196].mxu1 %vm2988_vm4, %v4776_v38 }
 0x5b8   :  { %16514 = vmatprep.mubr.msk.bf16.mxu1 %vm18548_vm3, %v18547_v42 }
 0x5ba   :  { %v4143_v16 = vpop.f32.mrb[92].mxu1 }
 0x5bb   :  { %v4176_v19 = vadd.f32 %v4143_v16, %v4031_v36  ;;  %v16368_v20 = vpop.f32.mrb[93].mxu1 }
 0x5bc   :  { %v4146_v21 = vpop.f32.mrb[94].mxu1 }
 0x5bd   :  { %v4177_v23 = vadd.f32 %v4146_v21, %v4032_v41  ;;  %v16369_v24 = vpop.f32.mrb[95].mxu1 }
 0x5bf   :  { %16515 = vmatmul.mubr.msk.bf16.gmra.mrb[200].mxu1 %vm2988_vm4, %v4777_v26 }
 0x5c0   :  { %16518 = vmatprep.mubr.msk.bf16.mxu1 %vm18548_vm3, %v18547_v42 }
 0x5c2   :  { %v4151_v27 = vpop.f32.mrb[96].mxu1 }
 0x5c3   :  { %v4178_v30 = vadd.f32 %v4151_v27, %v4033_v49  ;;  %v16372_v31 = vpop.f32.mrb[97].mxu1 }
 0x5c4   :  { %v4154_v14 = vpop.f32.mrb[98].mxu1 }
 0x5c5   :  { %v4179_v33 = vadd.f32 %v4154_v14, %v4034_v54  ;;  %v16373_v34 = vpop.f32.mrb[99].mxu1 }
 0x5c7   :  { %16519 = vmatmul.mubr.msk.bf16.gmra.mrb[204].mxu1 %vm2988_vm4, %v4778_v35 }
 0x5c8   :  { %16532 = vmatprep.mubr.msk.bf16.mxu1 %vm18548_vm3, %v18547_v42 }
 0x5ca   :  { %v4159_v36 = vpop.f32.mrb[100].mxu1 }
 0x5cb   :  { %v4180_v37 = vadd.f32 %v4159_v36, %v4035_v59  ;;  %v16376_v39 = vpop.f32.mrb[101].mxu1 }
 0x5cc   :  { %v4162_v40 = vpop.f32.mrb[102].mxu1 }
 0x5cd   :  { %v4181_v41 = vadd.f32 %v4162_v40, %v4036_v63  ;;  %v16377_v43 = vpop.f32.mrb[103].mxu1 }
 0x5d2   :  { %v4167_v45 = vpop.f32.mrb[104].mxu1 }
 0x5d3   :  { %v4182_v46 = vadd.f32 %v4167_v45, %v4037_v4  ;;  %v16380_v47 = vpop.f32.mrb[105].mxu1 }
 0x5d4   :  { %v4170_v49 = vpop.f32.mrb[106].mxu1 }
 0x5d5   :  { %v4183_v50 = vadd.f32 %v4170_v49, %v4038_v22  ;;  %v16381_v51 = vpop.f32.mrb[107].mxu1 }
 0x5da   :  { %v4280_v52 = vpop.f32.mrb[108].mxu1 }
 0x5db   :  { %v4319_v54 = vadd.f32 %v4280_v52, %v4174_v5  ;;  %v16392_v55 = vpop.f32.mrb[109].mxu1 }
 0x5dc   :  { %v4283_v56 = vpop.f32.mrb[110].mxu1 }
 0x5dd   :  { %v4320_v57 = vadd.f32 %v4283_v56, %v4175_v29  ;;  %v16393_v58 = vpop.f32.mrb[111].mxu1 }
 0x5e2   :  { %v4288_v60 = vpop.f32.mrb[112].mxu1 }
 0x5e3   :  { %v4321_v61 = vadd.f32 %v4288_v60, %v4176_v19  ;;  %v16396_v62 = vpop.f32.mrb[113].mxu1 }
 0x5e4   :  { %v4291_v59 = vpop.f32.mrb[114].mxu1 }
 0x5e5   :  { %v4322_v2 = vadd.f32 %v4291_v59, %v4177_v23  ;;  %v16397_v0 = vpop.f32.mrb[115].mxu1 }
 0x5ea   :  { %v4296_v63 = vpop.f32.mrb[116].mxu1 }
 0x5eb   :  { %v4323_v3 = vadd.f32 %v4296_v63, %v4178_v30  ;;  %v16400_v44 = vpop.f32.mrb[117].mxu1 }
 0x5ec   :  { %v4299_v4 = vpop.f32.mrb[118].mxu1 }
 0x5ed   :  { %v4324_v8 = vadd.f32 %v4299_v4, %v4179_v33  ;;  %v16401_v10 = vpop.f32.mrb[119].mxu1 }
 0x5f2   :  { %v4304_v25 = vpop.f32.mrb[120].mxu1 }
 0x5f3   :  { %v4325_v22 = vadd.f32 %v4304_v25, %v4180_v37  ;;  %v16404_v7 = vpop.f32.mrb[121].mxu1 }
 0x5f4   :  { %v4307_v12 = vpop.f32.mrb[122].mxu1 }
 0x5f5   :  { %v4326_v13 = vadd.f32 %v4307_v12, %v4181_v41  ;;  %v16405_v11 = vpop.f32.mrb[123].mxu1 }
 0x5fa   :  { %v4312_v5 = vpop.f32.mrb[124].mxu1 }
 0x5fb   :  { %v4327_v17 = vadd.f32 %v4312_v5, %v4182_v46  ;;  %v16408_v15 = vpop.f32.mrb[125].mxu1 }
 0x5fc   :  { %v4315_v18 = vpop.f32.mrb[126].mxu1 }
 0x5fd   :  { %v4328_v29 = vadd.f32 %v4315_v18, %v4183_v50  ;;  %v16409_v53 = vpop.f32.mrb[127].mxu1 }
 0x602   :  { %v4425_v38 = vpop.f32.mrb[128].mxu1 }
 0x603   :  { %v4464_v16 = vadd.f32 %v4425_v38, %v4319_v54  ;;  %v16420_v1 = vpop.f32.mrb[129].mxu1 }
 0x604   :  { %v4428_v19 = vpop.f32.mrb[130].mxu1 }
 0x605   :  { %v4465_v20 = vadd.f32 %v4428_v19, %v4320_v57  ;;  %v16421_v21 = vpop.f32.mrb[131].mxu1 }
 0x60a   :  { %v4433_v9 = vpop.f32.mrb[132].mxu1 }
 0x60b   :  { %v4466_v23 = vadd.f32 %v4433_v9, %v4321_v61  ;;  %v16424_v24 = vpop.f32.mrb[133].mxu1 }
 0x60c   :  { %v4436_v26 = vpop.f32.mrb[134].mxu1 }
 0x60d   :  { %v4467_v27 = vadd.f32 %v4436_v26, %v4322_v2  ;;  %v16425_v28 = vpop.f32.mrb[135].mxu1 }
 0x612   :  { %v4441_v30 = vpop.f32.mrb[136].mxu1 }
 0x613   :  { %v4468_v31 = vadd.f32 %v4441_v30, %v4323_v3  ;;  %v16428_v14 = vpop.f32.mrb[137].mxu1 }
 0x614   :  { %v4444_v32 = vpop.f32.mrb[138].mxu1 }
 0x615   :  { %v4469_v33 = vadd.f32 %v4444_v32, %v4324_v8  ;;  %v16429_v34 = vpop.f32.mrb[139].mxu1 }
 0x61a   :  { %v4449_v35 = vpop.f32.mrb[140].mxu1 }
 0x61b   :  { %v4470_v36 = vadd.f32 %v4449_v35, %v4325_v22  ;;  %v16432_v37 = vpop.f32.mrb[141].mxu1 }
 0x61c   :  { %v4452_v39 = vpop.f32.mrb[142].mxu1 }
 0x61d   :  { %v4471_v40 = vadd.f32 %v4452_v39, %v4326_v13  ;;  %v16433_v41 = vpop.f32.mrb[143].mxu1 }
 0x622   :  { %v4457_v43 = vpop.f32.mrb[144].mxu1 }
 0x623   :  { %v4472_v45 = vadd.f32 %v4457_v43, %v4327_v17  ;;  %v16436_v46 = vpop.f32.mrb[145].mxu1 }
 0x624   :  { %v4460_v47 = vpop.f32.mrb[146].mxu1 }
 0x625   :  { %v4473_v49 = vadd.f32 %v4460_v47, %v4328_v29  ;;  %v16437_v50 = vpop.f32.mrb[147].mxu1 }
 0x626   :  { %v20261_v50 = vld [vmem:[%s23712_s4] ss:$0 sm:$0xff] }
 0x62a   :  { %v4570_v51 = vpop.f32.mrb[148].mxu1 }
 0x62b   :  { %v4609_v52 = vadd.f32 %v4570_v51, %v4464_v16  ;;  %v16448_v54 = vpop.f32.mrb[149].mxu1 }
 0x62c   :  { %v4573_v55 = vpop.f32.mrb[150].mxu1 }
 0x62d   :  { %v4610_v56 = vadd.f32 %v4573_v55, %v4465_v20  ;;  %v16449_v57 = vpop.f32.mrb[151].mxu1 }
 0x632   :  { %v4578_v58 = vpop.f32.mrb[152].mxu1 }
 0x633   :  { %v4611_v60 = vadd.f32 %v4578_v58, %v4466_v23  ;;  %v16452_v61 = vpop.f32.mrb[153].mxu1 }
 0x634   :  { %v4581_v62 = vpop.f32.mrb[154].mxu1 }
 0x635   :  { %v4612_v59 = vadd.f32 %v4581_v62, %v4467_v27  ;;  %v16453_v2 = vpop.f32.mrb[155].mxu1 }
 0x63a   :  { %v4586_v0 = vpop.f32.mrb[156].mxu1 }
 0x63b   :  { %v4613_v63 = vadd.f32 %v4586_v0, %v4468_v31  ;;  %v16456_v3 = vpop.f32.mrb[157].mxu1 }
 0x63c   :  { %v4589_v44 = vpop.f32.mrb[158].mxu1 }
 0x63d   :  { %v4614_v4 = vadd.f32 %v4589_v44, %v4469_v33  ;;  %v16457_v8 = vpop.f32.mrb[159].mxu1 }
 0x642   :  { %v4594_v10 = vpop.f32.mrb[160].mxu1 }
 0x643   :  { %v4615_v25 = vadd.f32 %v4594_v10, %v4470_v36  ;;  %v16460_v22 = vpop.f32.mrb[161].mxu1 }
 0x644   :  { %v4597_v7 = vpop.f32.mrb[162].mxu1 }
 0x645   :  { %v4616_v12 = vadd.f32 %v4597_v7, %v4471_v40  ;;  %v16461_v13 = vpop.f32.mrb[163].mxu1 }
 0x64a   :  { %v4602_v11 = vpop.f32.mrb[164].mxu1 }
 0x64b   :  { %v4617_v5 = vadd.f32 %v4602_v11, %v4472_v45  ;;  %v16464_v17 = vpop.f32.mrb[165].mxu1 }
 0x64c   :  { %v4605_v15 = vpop.f32.mrb[166].mxu1 }
 0x64d   :  { %v4618_v18 = vadd.f32 %v4605_v15, %v4473_v49  ;;  %v16465_v29 = vpop.f32.mrb[167].mxu1 }
 0x652   :  { %v4715_v53 = vpop.f32.mrb[168].mxu1 }
 0x653   :  { %v4754_v38 = vadd.f32 %v4715_v53, %v4609_v52  ;;  %v16476_v16 = vpop.f32.mrb[169].mxu1 }
 0x654   :  { %v4718_v1 = vpop.f32.mrb[170].mxu1 }
 0x655   :  { %v4755_v19 = vadd.f32 %v4718_v1, %v4610_v56  ;;  %v16477_v20 = vpop.f32.mrb[171].mxu1 }
 0x65a   :  { %v4723_v21 = vpop.f32.mrb[172].mxu1 }
 0x65b   :  { %v4756_v9 = vadd.f32 %v4723_v21, %v4611_v60  ;;  %v16480_v23 = vpop.f32.mrb[173].mxu1 }
 0x65c   :  { %v4726_v24 = vpop.f32.mrb[174].mxu1 }
 0x65d   :  { %v4757_v26 = vadd.f32 %v4726_v24, %v4612_v59  ;;  %v16481_v27 = vpop.f32.mrb[175].mxu1 }
 0x662   :  { %v4731_v28 = vpop.f32.mrb[176].mxu1 }
 0x663   :  { %v4758_v30 = vadd.f32 %v4731_v28, %v4613_v63  ;;  %v16484_v31 = vpop.f32.mrb[177].mxu1 }
 0x664   :  { %v4734_v14 = vpop.f32.mrb[178].mxu1 }
 0x665   :  { %v4759_v32 = vadd.f32 %v4734_v14, %v4614_v4  ;;  %v16485_v33 = vpop.f32.mrb[179].mxu1 }
 0x66a   :  { %v4739_v34 = vpop.f32.mrb[180].mxu1 }
 0x66b   :  { %v4760_v35 = vadd.f32 %v4739_v34, %v4615_v25  ;;  %v16488_v36 = vpop.f32.mrb[181].mxu1 }
 0x66c   :  { %v4742_v37 = vpop.f32.mrb[182].mxu1 }
 0x66d   :  { %v4761_v39 = vadd.f32 %v4742_v37, %v4616_v12  ;;  %v16489_v40 = vpop.f32.mrb[183].mxu1 }
 0x672   :  { %v4747_v41 = vpop.f32.mrb[184].mxu1 }
 0x673   :  { %v20254_v43 = vadd.f32 %v4747_v41, %v4617_v5  ;;  %v16492_v45 = vpop.f32.mrb[185].mxu1 }
 0x674   :  { %v4750_v46 = vpop.f32.mrb[186].mxu1 }
 0x675   :  { %v20256_v47 = vadd.f32 %v4750_v46, %v4618_v18  ;;  %v16493_v49 = vpop.f32.mrb[187].mxu1 }
 0x67a   :  { %v4860_v51 = vpop.f32.mrb[188].mxu1 }
 0x67b   :  { %v4899_v52 = vadd.f32 %v4860_v51, %v4754_v38  ;;  %v16504_v54 = vpop.f32.mrb[189].mxu1 }
 0x67c   :  { %v4863_v55 = vpop.f32.mrb[190].mxu1 }
 0x67d   :  { %v4916_v56 = vadd.f32 %v20261_v50, %v4899_v52  ;;  %v4900_v57 = vadd.f32 %v4863_v55, %v4755_v19  ;;  %v16505_v58 = vpop.f32.mrb[191].mxu1 }
 0x67f   :  { %v4926_v60 = vmax.f32 %v4916_v56, 0.0  ;;  %v4917_v61 = vadd.f32 %v20261_v50, %v4900_v57 }
 0x681   :  { %4936 = vst [vmem:[#allocation4] sm:$0xff] %v4926_v60  ;;  %v4927_v62 = vmax.f32 %v4917_v61, 0.0 }
 0x682   :  { %v4868_v59 = vpop.f32.mrb[192].mxu1 }
 0x683   :  { %4937 = vst [vmem:[#allocation4 + $0x8] sm:$0xff] %v4927_v62  ;;  %v4901_v2 = vadd.f32 %v4868_v59, %v4756_v9  ;;  %v16508_v0 = vpop.f32.mrb[193].mxu1 }
 0x684   :  { %v4871_v63 = vpop.f32.mrb[194].mxu1 }
 0x685   :  { %v4918_v3 = vadd.f32 %v20261_v50, %v4901_v2  ;;  %v4902_v44 = vadd.f32 %v4871_v63, %v4757_v26  ;;  %v16509_v4 = vpop.f32.mrb[195].mxu1 }
 0x687   :  { %v4928_v8 = vmax.f32 %v4918_v3, 0.0  ;;  %v4919_v10 = vadd.f32 %v20261_v50, %v4902_v44 }
 0x689   :  { %4938 = vst [vmem:[#allocation4 + $0x10] sm:$0xff] %v4928_v8  ;;  %v4929_v25 = vmax.f32 %v4919_v10, 0.0 }
 0x68a   :  { %v4876_v22 = vpop.f32.mrb[196].mxu1  ;;  %v4955_v15 = vld [vmem:[#allocation4 + $0x1] sm:$0xff] }
 0x68b   :  { %4939 = vst [vmem:[#allocation4 + $0x18] sm:$0xff] %v4929_v25  ;;  %v4903_v7 = vadd.f32 %v4876_v22, %v4758_v30  ;;  %v16512_v12 = vpop.f32.mrb[197].mxu1  ;;  %v4964_v26 = vmax.f32 %v4926_v60, %v4955_v15 }
 0x68c   :  { %v4879_v13 = vpop.f32.mrb[198].mxu1 }
 0x68d   :  { %v20268_v11 = vadd.f32 %v20261_v50, %v4903_v7  ;;  %v4904_v5 = vadd.f32 %v4879_v13, %v4759_v32  ;;  %v16513_v17 = vpop.f32.mrb[199].mxu1 }
 0x68f   :  { %v4930_v18 = vmax.f32 %v20268_v11, 0.0  ;;  %v20272_v29 = vadd.f32 %v20261_v50, %v4904_v5 }
 0x690   :  { %v4956_v53 = vld [vmem:[#allocation4 + $0x9] sm:$0xff] }
 0x691   :  { %v4973_v38 = vld [vmem:[#allocation4 + $0xa] sm:$0xff]  ;;  %4940 = vst [vmem:[#allocation4 + $0x20] sm:$0xff] %v4930_v18  ;;  %v4931_v1 = vmax.f32 %v20272_v29, 0.0  ;;  %v4965_v27 = vmax.f32 %v4927_v62, %v4956_v53 }
 0x692   :  { %v4982_v16 = vld [vmem:[#allocation4 + $0xb] sm:$0xff]  ;;  %v4884_v20 = vpop.f32.mrb[200].mxu1  ;;  %v4983_v9 = vld [vmem:[#allocation4 + $0x13] sm:$0xff] }
 0x693   :  { %v4991_v19 = vmax.f32 %v4973_v38, %v4982_v16  ;;  %v4974_v21 = vld [vmem:[#allocation4 + $0x12] sm:$0xff]  ;;  %4941 = vst [vmem:[#allocation4 + $0x28] sm:$0xff] %v4931_v1  ;;  %v4905_v23 = vadd.f32 %v4884_v20, %v4760_v35  ;;  %v16516_v24 = vpop.f32.mrb[201].mxu1 }
 0x694   :  { %v4992_v28 = vmax.f32 %v4974_v21, %v4983_v9  ;;  %v4887_v30 = vpop.f32.mrb[202].mxu1  ;;  %v4957_v36 = vld [vmem:[#allocation4 + $0x11] sm:$0xff] }
 0x695   :  { %v20278_v31 = vadd.f32 %v20261_v50, %v4905_v23  ;;  %v4906_v14 = vadd.f32 %v4887_v30, %v4761_v39  ;;  %v16517_v32 = vpop.f32.mrb[203].mxu1  ;;  %v5000_v33 = vmax.f32 %v4964_v26, %v4991_v19  ;;  %v4966_v57 = vmax.f32 %v4928_v8, %v4957_v36  ;;  %v18018_v36 = vld [vmem:[%s23711_s5 + $0x84] ss:$8 sps:$4 sm:$0xff]  }
 0x696   :  { %v5001_v34 = vmax.f32 %v4965_v27, %v4992_v28 }
 0x697   :  { %v4932_v37 = vmax.f32 %v20278_v31, 0.0  ;;  %v4923_v40 = vadd.f32 %v20261_v50, %v4906_v14 }
 0x698   :  { %v5014_v41 = vpack.c.bf16 %v5001_v34, %v5000_v33  ;;  %v4958_v45 = vld [vmem:[#allocation4 + $0x19] sm:$0xff] }
 0x699   :  { %v4975_v35 = vld [vmem:[#allocation4 + $0x1a] sm:$0xff]  ;;  %4942 = vst [vmem:[#allocation4 + $0x30] sm:$0xff] %v4932_v37  ;;  %v4933_v49 = vmax.f32 %v4923_v40, 0.0  ;;  %v4967_v58 = vmax.f32 %v4929_v25, %v4958_v45  ;;  %v18021_v45 = vld [vmem:[%s23711_s5 + $0x94] ss:$8 sps:$4 sm:$0xff]  }
 0x69a   :  { %v4984_v46 = vld [vmem:[#allocation4 + $0x1b] sm:$0xff]  ;;  %16523 = vmatpush3.bf16.msra.mxu1 %v5014_v41  ;;  %v4892_v52 = vpop.f32.mrb[204].mxu1  ;;  %v4985_v54 = vld [vmem:[#allocation4 + $0x23] sm:$0xff] }
 0x69b   :  { %v4993_v51 = vmax.f32 %v4975_v35, %v4984_v46  ;;  %16524 = vmatprep.subr.bf16.mxu1 %v18547_v42  ;;  %v4976_v39 = vld [vmem:[#allocation4 + $0x22] sm:$0xff]  ;;  %4943 = vst [vmem:[#allocation4 + $0x38] sm:$0xff] %v4933_v49  ;;  %v4907_v55 = vadd.f32 %v4892_v52, %v20254_v43  ;;  %v16520_v56 = vpop.f32.mrb[205].mxu1  ;;  %v18027_v52 = vld [vmem:[%s23711_s5 + $0xb4] ss:$8 sps:$4 sm:$0xff]  }
 0x69c   :  { %v4994_v60 = vmax.f32 %v4976_v39, %v4985_v54  ;;  %v4895_v61 = vpop.f32.mrb[206].mxu1  ;;  %v4959_v3 = vld [vmem:[#allocation4 + $0x21] sm:$0xff] }
 0x69d   :  { %v4924_v62 = vadd.f32 %v20261_v50, %v4907_v55  ;;  %v4908_v59 = vadd.f32 %v4895_v61, %v20256_v47  ;;  %v16521_v2 = vpop.f32.mrb[207].mxu1  ;;  %v5002_v0 = vmax.f32 %v4966_v57, %v4993_v51  ;;  %v4968_v47 = vmax.f32 %v4930_v18, %v4959_v3  ;;  %v18016_v41 = vld [vmem:[%s23711_s5 + $0x80] ss:$8 sps:$4 sm:$0xff]   ;;  %v18019_v35 = vld [vmem:[%s23711_s5 + $0x90] ss:$8 sps:$4 sm:$0xff]  }
 0x69e   :  { %v5003_v63 = vmax.f32 %v4967_v58, %v4994_v60  ;;  %v18024_v46 = vld [vmem:[%s23711_s5 + $0xa4] ss:$8 sps:$4 sm:$0xff]   ;;  %v18022_v51 = vld [vmem:[%s23711_s5 + $0xa0] ss:$8 sps:$4 sm:$0xff]   ;;  %v18025_v39 = vld [vmem:[%s23711_s5 + $0xb0] ss:$8 sps:$4 sm:$0xff]  }
 0x69f   :  { %v4934_v44 = vmax.f32 %v4924_v62, 0.0  ;;  %v4925_v4 = vadd.f32 %v20261_v50, %v4908_v59  ;;  %v18030_v54 = vld [vmem:[%s23711_s5 + $0xc4] ss:$8 sps:$4 sm:$0xff]   ;;  %v18015_v55 = vld [vmem:[%s23710_s11 + $0x10] ss:$0 sps:$4 sm:$0xff]   ;;  %v18549_v59 = vmov 0  }
 0x6a0   :  { %v5015_v10 = vpack.c.bf16 %v5003_v63, %v5002_v0  ;;  %v4960_v22 = vld [vmem:[#allocation4 + $0x29] sm:$0xff]  ;;  %v18028_v56 = vld [vmem:[%s23711_s5 + $0xc0] ss:$8 sps:$4 sm:$0xff]   ;;  %v18036_v61 = vld [vmem:[%s23711_s5 + $0xe4] ss:$8 sps:$4 sm:$0xff]  }
 0x6a1   :  { %v4977_v7 = vld [vmem:[#allocation4 + $0x2a] sm:$0xff]  ;;  %4944 = vst [vmem:[#allocation4 + $0x40] sm:$0xff] %v4934_v44  ;;  %v4935_v8 = vmax.f32 %v4925_v4, 0.0  ;;  %v4969_v5 = vmax.f32 %v4931_v1, %v4960_v22  ;;  %v18034_v60 = vld [vmem:[%s23711_s5 + $0xe0] ss:$8 sps:$4 sm:$0xff]  }
 0x6a2   :  { %v4986_v43 = vld [vmem:[#allocation4 + $0x2b] sm:$0xff]  ;;  %16525 = vmatpush3.bf16.msra.mxu1 %v5015_v10  ;;  %v4987_v13 = vld [vmem:[#allocation4 + $0x33] sm:$0xff]  ;;  %v18042_v0 = vld [vmem:[%s23711_s5 + $0x4] ss:$8 sps:$4 sm:$0xff]  }
 0x6a3   :  { %v4995_v25 = vmax.f32 %v4977_v7, %v4986_v43  ;;  %16526 = vmatprep.subr.bf16.mxu1 %v18547_v42  ;;  %v4978_v12 = vld [vmem:[#allocation4 + $0x32] sm:$0xff]  ;;  %4945 = vst [vmem:[#allocation4 + $0x48] sm:$0xff] %v4935_v8 }
 0x6a4   :  { %v4996_v17 = vmax.f32 %v4978_v12, %v4987_v13  ;;  %v4961_v29 = vld [vmem:[#allocation4 + $0x31] sm:$0xff] }
 0x6a5   :  { %v5004_v15 = vmax.f32 %v4968_v47, %v4995_v25  ;;  %v4970_v11 = vmax.f32 %v4932_v37, %v4961_v29  ;;  %v18013_v37 = vld [vmem:[%s23710_s11] sm:$0xff]   ;;  %v18031_v57 = vld [vmem:[%s23711_s5 + $0xd0] ss:$8 sps:$4 sm:$0xff]   ;;  %v18033_v58 = vld [vmem:[%s23711_s5 + $0xd4] ss:$8 sps:$4 sm:$0xff]  }
 0x6a6   :  { %v5005_v50 = vmax.f32 %v4969_v5, %v4996_v17  ;;  %v18039_v62 = vld [vmem:[%s23711_s5 + $0xf4] ss:$8 sps:$4 sm:$0xff]   ;;  %v18037_v2 = vld [vmem:[%s23711_s5 + $0xf0] ss:$8 sps:$4 sm:$0xff]   ;;  %v18040_v12 = vld [vmem:[%s23711_s5] ss:$8 sps:$4 sm:$0xff]  }
 0x6a8   :  { %v5016_v53 = vpack.c.bf16 %v5005_v50, %v5004_v15  ;;  %v4962_v38 = vld [vmem:[#allocation4 + $0x39] sm:$0xff]  ;;  %v4963_v9 = vld [vmem:[#allocation4 + $0x41] sm:$0x7]  ;;  %v18045_v15 = vld [vmem:[%s23711_s5 + $0x14] ss:$8 sps:$4 sm:$0xff]  }
 0x6a9   :  { %v4979_v16 = vld [vmem:[#allocation4 + $0x3a] sm:$0xff]  ;;  %v4971_v18 = vmax.f32 %v4933_v49, %v4962_v38  ;;  %v18043_v38 = vld [vmem:[%s23711_s5 + $0x10] ss:$8 sps:$4 sm:$0xff]  }
 0x6aa   :  { %v4988_v19 = vld [vmem:[#allocation4 + $0x3b] sm:$0xff]  ;;  %16527 = vmatpush3.bf16.msra.mxu1 %v5016_v53  ;;  %v4989_v24 = vld [vmem:[#allocation4 + $0x43] sm:$0xff]  ;;  %v4990_v27 = vld [vmem:[#allocation4 + $0x4b] sm:$0x7] }
 0x6ab   :  { %v4997_v20 = vmax.f32 %v4979_v16, %v4988_v19  ;;  %v4954_v21 = vld [vmem:[#allocation4 + $0x40] sm:$0x7]  ;;  %16528 = vmatprep.subr.bf16.mxu1 %v18547_v42  ;;  %v4981_v26 = vld [vmem:[#allocation4 + $0x4a] sm:$0x7]  ;;  %v18048_v16 = vld [vmem:[%s23711_s5 + $0x24] ss:$8 sps:$4 sm:$0xff]  }
 0x6ac   :  { %v4980_v23 = vld [vmem:[#allocation4 + $0x42] sm:$0xff]  ;;  %v4972_v28 = vmax.f32 %v4954_v21, %v4963_v9  ;;  %v4999_v30 = vmax.f32 %v4981_v26, %v4990_v27  ;;  %v18051_v21 = vld [vmem:[%s23711_s5 + $0x34] ss:$8 sps:$4 sm:$0xff]  }
 0x6ad   :  { %v4998_v1 = vmax.f32 %v4980_v23, %v4989_v24  ;;  %v5006_v31 = vmax.f32 %v4970_v11, %v4997_v20  ;;  %v18014_v49 = vld [vmem:[%s23710_s11 + $0x8] sm:$0xff]   ;;  %v18049_v23 = vld [vmem:[%s23711_s5 + $0x30] ss:$8 sps:$4 sm:$0xff]   ;;  %v18057_v11 = vld [vmem:[%s23711_s5 + $0x54] ss:$8 sps:$4 sm:$0xff]  }
 0x6ae   :  { %v5008_v32 = vmax.f32 %v4972_v28, %v4999_v30  ;;  %v18046_v20 = vld [vmem:[%s23711_s5 + $0x20] ss:$8 sps:$4 sm:$0xff]   ;;  %v18054_v24 = vld [vmem:[%s23711_s5 + $0x44] ss:$8 sps:$4 sm:$0xff]   ;;  %v18063_v28 = vld [vmem:[%s23711_s5 + $0x74] ss:$8 sps:$4 sm:$0xff]  }
 0x6af   :  { %v5007_v14 = vmax.f32 %v4971_v18, %v4998_v1  ;;  %v18052_v26 = vld [vmem:[%s23711_s5 + $0x40] ss:$8 sps:$4 sm:$0xff]   ;;  %v18055_v18 = vld [vmem:[%s23711_s5 + $0x50] ss:$8 sps:$4 sm:$0xff]   ;;  %v18060_v1 = vld [vmem:[%s23711_s5 + $0x64] ss:$8 sps:$4 sm:$0xff]  }
 0x6b0   :  { %v5018_v34 = vpack.c.bf16 %v5008_v32, %v5008_v32  ;;  %v18058_v27 = vld [vmem:[%s23711_s5 + $0x60] ss:$8 sps:$4 sm:$0xff]   ;;  %v18061_v30 = vld [vmem:[%s23711_s5 + $0x70] ss:$8 sps:$4 sm:$0xff]   ;;  %v18069_v32 = vld [vmem:[%s23711_s5 + $0x114] ss:$8 sps:$4 sm:$0xff]  }
 0x6b1   :  { %v5017_v33 = vpack.c.bf16 %v5007_v14, %v5006_v31  ;;  %v18066_v31 = vld [vmem:[%s23711_s5 + $0x104] ss:$8 sps:$4 sm:$0xff]   ;;  %v18064_v14 = vld [vmem:[%s23711_s5 + $0x100] ss:$8 sps:$4 sm:$0xff]  }
 0x6b2   :  { %v5043_v40 = vand.u32 %v5018_v34, %v18625_v6  ;;  %v18072_v34 = vld [vmem:[%s23711_s5 + $0x124] ss:$8 sps:$4 sm:$0xff]  }
 0x6b3   :  { %16529 = vmatpush3.bf16.msra.mxu1 %v5017_v33  ;;  %v18067_v33 = vld [vmem:[%s23711_s5 + $0x110] ss:$8 sps:$4 sm:$0xff]  }
 0x6b4   :  { %16530 = vmatprep.subr.bf16.mxu1 %v18547_v42 }
 0x6b7   :  { %16531 = vmatpush3.bf16.msra.mxu1 %v5043_v40  ;;  %v18075_v40 = vld [vmem:[%s23711_s5 + $0x134] ss:$8 sps:$4 sm:$0xff]  }
 0x6b8   :  { %5228 = vmatprep.subr.bf16.mxu1 %v18018_v36  ;;  %v18070_v36 = vld [vmem:[%s23711_s5 + $0x120] ss:$8 sps:$4 sm:$0xff]  }
 0x6ba   :  { %16533 = vmatmul.mubr.msk.bf16.vlgmr.msra.gmra.mrb[208].mxu1 %vm5032_vm8, %v18013_v37 }
 0x6bb   :  { %16536 = vmatprep.mubr.msk.bf16.mxu1 %vm18548_vm3, %v18547_v42  ;;  %5229 = vmatpush1.bf16.msra.mxu1 %v18016_v41  ;;  %v18073_v41 = vld [vmem:[%s23711_s5 + $0x130] ss:$8 sps:$4 sm:$0xff]  }
 0x6bc   :  { %5230 = vmatprep.subr.bf16.mxu1 %v18021_v45  ;;  %v18078_v45 = vld [vmem:[%s23711_s5 + $0x144] ss:$8 sps:$4 sm:$0xff]  }
 0x6bf   :  { %5231 = vmatpush1.bf16.msra.mxu1 %v18019_v35  ;;  %v18076_v35 = vld [vmem:[%s23711_s5 + $0x140] ss:$8 sps:$4 sm:$0xff]  }
 0x6c0   :  { %5232 = vmatprep.subr.bf16.mxu1 %v18024_v46  ;;  %v18081_v46 = vld [vmem:[%s23711_s5 + $0x154] ss:$8 sps:$4 sm:$0xff]  }
 0x6c2   :  { %16537 = vmatmul.mubr.msk.bf16.gmra.mrb[212].mxu1 %vm5032_vm8, %v18014_v49  ;;  %v18079_v49 = vld [vmem:[%s23711_s5 + $0x150] ss:$8 sps:$4 sm:$0xff]  }
 0x6c3   :  { %16540 = vmatprep.mubr.msk.bf16.mxu1 %vm18548_vm3, %v18547_v42  ;;  %5233 = vmatpush1.bf16.msra.mxu1 %v18022_v51  ;;  %v18084_v51 = vld [vmem:[%s23711_s5 + $0x164] ss:$8 sps:$4 sm:$0xff]  }
 0x6c4   :  { %5234 = vmatprep.subr.bf16.mxu1 %v18027_v52  ;;  %v18082_v52 = vld [vmem:[%s23711_s5 + $0x160] ss:$8 sps:$4 sm:$0xff]  }
 0x6c7   :  { %5235 = vmatpush1.bf16.msra.mxu1 %v18025_v39  ;;  %v18087_v39 = vld [vmem:[%s23711_s5 + $0x174] ss:$8 sps:$4 sm:$0xff]  }
 0x6c8   :  { %5236 = vmatprep.subr.bf16.mxu1 %v18030_v54  ;;  %v18085_v54 = vld [vmem:[%s23711_s5 + $0x170] ss:$8 sps:$4 sm:$0xff]  }
 0x6ca   :  { %16541 = vmatmul.mubr.msk.bf16.gmra.mrb[216].mxu1 %vm5032_vm8, %v18015_v55  ;;  %v18090_v55 = vld [vmem:[%s23711_s5 + $0x184] ss:$8 sps:$4 sm:$0xff]  }
 0x6cb   :  { %5237 = vmatpush1.bf16.msra.mxu1 %v18028_v56  ;;  %5260 = vmatprep.mubr.bf16.mxu1 %v18549_v59 }
 0x6cc   :  { %5238 = vmatprep.subr.bf16.mxu1 %v18033_v58  ;;  %v18088_v58 = vld [vmem:[%s23711_s5 + $0x180] ss:$8 sps:$4 sm:$0xff]  }
 0x6cf   :  { %5239 = vmatpush1.bf16.msra.mxu1 %v18031_v57 }
 0x6d0   :  { %5240 = vmatprep.subr.bf16.mxu1 %v18036_v61  ;;  %v18093_v61 = vld [vmem:[%s23711_s5 + $0x194] ss:$8 sps:$4 sm:$0xff]  }
 0x6d3   :  { %5241 = vmatpush1.bf16.msra.mxu1 %v18034_v60 }
 0x6d4   :  { %5242 = vmatprep.subr.bf16.mxu1 %v18039_v62  ;;  %v18091_v62 = vld [vmem:[%s23711_s5 + $0x190] ss:$8 sps:$4 sm:$0xff]  }
 0x6d7   :  { %5243 = vmatpush1.bf16.msra.mxu1 %v18037_v2  ;;  %v18096_v2 = vld [vmem:[%s23711_s5 + $0x1a4] ss:$8 sps:$4 sm:$0xff]  }
 0x6d8   :  { %5359 = vmatprep.subr.bf16.mxu1 %v18042_v0 }
 0x78d   :  { %v5079_v63 = vpop.f32.mrb[208].mxu1 }
 0x78e   :  { %5101 = vst [vmem:[#allocation5] sm:$0xff] %v5079_v63  ;;  %v16534_v3 = vpop.f32.mrb[209].mxu1 }
 0x78f   :  { %v20361_v44 = vpop.f32.mrb[210].mxu1 }
 0x790   :  { %5102 = vst [vmem:[#allocation5 + $0x8] sm:$0xff] %v20361_v44  ;;  %v16535_v4 = vpop.f32.mrb[211].mxu1  ;;  %v5109_v10 = vpack.c.bf16 %v20361_v44, %v5079_v63  ;;  %v18094_v63 = vld [vmem:[%s23711_s5 + $0x1a0] ss:$8 sps:$4 sm:$0xff]  }
 0x791   :  { %v18099_v4 = vld [vmem:[%s23711_s5 + $0x1b4] ss:$8 sps:$4 sm:$0xff]  }
 0x795   :  { %v20365_v22 = vpop.f32.mrb[212].mxu1 }
 0x796   :  { %5103 = vst [vmem:[#allocation5 + $0x10] sm:$0xff] %v20365_v22  ;;  %v16538_v7 = vpop.f32.mrb[213].mxu1  ;;  %v5887_v43 = vpack.c.bf16 %v20365_v22, %v20361_v44  ;;  %v5110_v37 = vpack.c.bf16 %v20365_v22, %v20365_v22  ;;  %v18171_v22 = vld [vmem:[%s23711_s5 + $0x334] ss:$8 sps:$4 sm:$0xff]  }
 0x797   :  { %v20370_v8 = vpop.f32.mrb[214].mxu1  ;;  %v5127_v13 = vld [vmem:[#allocation5 + $0x1] sm:$0xff]  ;;  %v18102_v7 = vld [vmem:[%s23711_s5 + $0x1c4] ss:$8 sps:$4 sm:$0xff]  }
 0x798   :  { %5104 = vst [vmem:[#allocation5 + $0x18] sm:$0xff] %v20370_v8  ;;  %v16539_v25 = vpop.f32.mrb[215].mxu1  ;;  %v5410_v57 = vld [vmem:[#allocation5 + $0x2] sm:$0xff]  ;;  %v5888_v44 = vpack.c.bf16 %v20370_v8, %v20370_v8 }
 0x799   :  { %v18100_v25 = vld [vmem:[%s23711_s5 + $0x1c0] ss:$8 sps:$4 sm:$0xff]  }
 0x79a   :  { %v18172_v8 = vld [vmem:[%s23711_s5 + $0x340] ss:$8 sps:$4 sm:$0xff]  }
 0x79d   :  { %v5128_v47 = vld [vmem:[#allocation5 + $0x9] sm:$0xff]  ;;  %v5095_v5 = vpop.f32.mrb[216].mxu1 }
 0x79e   :  { %v5130_v17 = vpack.c.bf16 %v5128_v47, %v5127_v13  ;;  %5105 = vst [vmem:[#allocation5 + $0x20] sm:$0xff] %v5095_v5  ;;  %v16542_v50 = vpop.f32.mrb[217].mxu1  ;;  %v5411_v56 = vld [vmem:[#allocation5 + $0xa] sm:$0xff]  ;;  %v18103_v13 = vld [vmem:[%s23711_s5 + $0x1d0] ss:$8 sps:$4 sm:$0xff]  }
 0x79f   :  { %v5098_v29 = vpop.f32.mrb[218].mxu1  ;;  %v5129_v19 = vld [vmem:[#allocation5 + $0x11] sm:$0xff]  ;;  %v5413_v60 = vpack.c.bf16 %v5411_v56, %v5410_v57  ;;  %v18153_v56 = vld [vmem:[%s23711_s5 + $0x2d4] ss:$8 sps:$4 sm:$0xff]  }
 0x7a0   :  { %5261 = vmatmul.mubr.bf16.vlgmr.msra.gmra.mrb[220].mxu1 %v5130_v17  ;;  %v16543_v53 = vpop.f32.mrb[219].mxu1  ;;  %v5131_v9 = vpack.c.bf16 %v5129_v19, %v5129_v19  ;;  %v5412_v0 = vld [vmem:[#allocation5 + $0x12] sm:$0xff]  ;;  %v18111_v17 = vld [vmem:[%s23711_s5 + $0x1f4] ss:$8 sps:$4 sm:$0xff]  }
 0x7a1   :  { %5360 = vmatpush1.bf16.msra.mxu1 %v18040_v12  ;;  %5270 = vmatprep.mubr.bf16.mxu1 %v18549_v59  ;;  %v5414_v3 = vpack.c.bf16 %v5412_v0, %v5412_v0  ;;  %v18105_v12 = vld [vmem:[%s23711_s5 + $0x1d4] ss:$8 sps:$4 sm:$0xff]   ;;  %v18108_v47 = vld [vmem:[%s23711_s5 + $0x1e4] ss:$8 sps:$4 sm:$0xff]   ;;  %v18106_v5 = vld [vmem:[%s23711_s5 + $0x1e0] ss:$8 sps:$4 sm:$0xff]  }
 0x7a2   :  { %5361 = vmatprep.subr.bf16.mxu1 %v18045_v15  ;;  %v18109_v15 = vld [vmem:[%s23711_s5 + $0x1f0] ss:$8 sps:$4 sm:$0xff]   ;;  %v18114_v50 = vld [vmem:[%s23711_s5 + $0x204] ss:$8 sps:$4 sm:$0xff]   ;;  %v18117_v19 = vld [vmem:[%s23711_s5 + $0x214] ss:$8 sps:$4 sm:$0xff]  }
 0x7a3   :  { %v20525_v29 = vld [vmem:[#allocation5 + $0xe] sm:$0xff]  ;;  %v5568_v53 = vld [vmem:[#allocation5 + $0x6] sm:$0xff]  ;;  %v18151_v57 = vld [vmem:[%s23711_s5 + $0x2d0] ss:$8 sps:$4 sm:$0xff]  }
 0x7a4   :  { %v18160_v0 = vld [vmem:[%s23711_s5 + $0x300] ss:$8 sps:$4 sm:$0xff]  }
 0x7a5   :  { %5362 = vmatpush1.bf16.msra.mxu1 %v18043_v38  ;;  %v18112_v38 = vld [vmem:[%s23711_s5 + $0x200] ss:$8 sps:$4 sm:$0xff]  }
 0x7a6   :  { %5363 = vmatprep.subr.bf16.mxu1 %v18048_v16  ;;  %v5571_v16 = vpack.c.bf16 %v20525_v29, %v5568_v53  ;;  %v6042_v53 = vld [vmem:[#allocation5 + $0xc] sm:$0xff] }
 0x7a8   :  { %5271 = vmatmul.mubr.bf16.gmra.mrb[224].mxu1 %v5131_v9  ;;  %v20541_v9 = vld [vmem:[#allocation5 + $0x16] sm:$0xff] }
 0x7a9   :  { %5364 = vmatpush1.bf16.msra.mxu1 %v18046_v20  ;;  %5391 = vmatprep.mubr.bf16.mxu1 %v18549_v59  ;;  %v18115_v20 = vld [vmem:[%s23711_s5 + $0x210] ss:$8 sps:$4 sm:$0xff]  }
 0x7aa   :  { %5365 = vmatprep.subr.bf16.mxu1 %v18051_v21  ;;  %v18120_v21 = vld [vmem:[%s23711_s5 + $0x224] ss:$8 sps:$4 sm:$0xff]  }
 0x7ad   :  { %5366 = vmatpush1.bf16.msra.mxu1 %v18049_v23  ;;  %v18118_v23 = vld [vmem:[%s23711_s5 + $0x220] ss:$8 sps:$4 sm:$0xff]  }
 0x7ae   :  { %5367 = vmatprep.subr.bf16.mxu1 %v18054_v24  ;;  %v5572_v24 = vpack.c.bf16 %v20541_v9, %v20541_v9 }
 0x7b1   :  { %5368 = vmatpush1.bf16.msra.mxu1 %v18052_v26  ;;  %v18123_v26 = vld [vmem:[%s23711_s5 + $0x234] ss:$8 sps:$4 sm:$0xff]  }
 0x7b2   :  { %5369 = vmatprep.subr.bf16.mxu1 %v18057_v11  ;;  %v18121_v11 = vld [vmem:[%s23711_s5 + $0x230] ss:$8 sps:$4 sm:$0xff]  }
 0x7b5   :  { %5370 = vmatpush1.bf16.msra.mxu1 %v18055_v18  ;;  %v18126_v18 = vld [vmem:[%s23711_s5 + $0x244] ss:$8 sps:$4 sm:$0xff]  }
 0x7b6   :  { %5371 = vmatprep.subr.bf16.mxu1 %v18060_v1  ;;  %v18124_v1 = vld [vmem:[%s23711_s5 + $0x240] ss:$8 sps:$4 sm:$0xff]  }
 0x7b9   :  { %5372 = vmatpush1.bf16.msra.mxu1 %v18058_v27  ;;  %v18129_v27 = vld [vmem:[%s23711_s5 + $0x254] ss:$8 sps:$4 sm:$0xff]  }
 0x7ba   :  { %5373 = vmatprep.subr.bf16.mxu1 %v18063_v28  ;;  %v18127_v28 = vld [vmem:[%s23711_s5 + $0x250] ss:$8 sps:$4 sm:$0xff]  }
 0x7bd   :  { %5374 = vmatpush1.bf16.msra.mxu1 %v18061_v30  ;;  %v18132_v30 = vld [vmem:[%s23711_s5 + $0x264] ss:$8 sps:$4 sm:$0xff]  }
 0x7be   :  { %5511 = vmatprep.subr.bf16.mxu1 %v18066_v31  ;;  %v18130_v31 = vld [vmem:[%s23711_s5 + $0x260] ss:$8 sps:$4 sm:$0xff]  }
 0x7c0   :  { %5392 = vmatmul.mubr.bf16.vlgmr.msra.gmra.mrb[220].mxu1 %v5109_v10  ;;  %v18097_v10 = vld [vmem:[%s23711_s5 + $0x1b0] ss:$8 sps:$4 sm:$0xff]  }
 0x7c1   :  { %5512 = vmatpush1.bf16.msra.mxu1 %v18064_v14  ;;  %5401 = vmatprep.mubr.bf16.mxu1 %v18549_v59  ;;  %v18135_v14 = vld [vmem:[%s23711_s5 + $0x274] ss:$8 sps:$4 sm:$0xff]  }
 0x7c2   :  { %5513 = vmatprep.subr.bf16.mxu1 %v18069_v32  ;;  %v18133_v32 = vld [vmem:[%s23711_s5 + $0x270] ss:$8 sps:$4 sm:$0xff]  }
 0x7c5   :  { %5514 = vmatpush1.bf16.msra.mxu1 %v18067_v33  ;;  %v18138_v33 = vld [vmem:[%s23711_s5 + $0x284] ss:$8 sps:$4 sm:$0xff]  }
 0x7c6   :  { %5515 = vmatprep.subr.bf16.mxu1 %v18072_v34  ;;  %v5727_v34 = vld [vmem:[#allocation5 + $0xf] sm:$0xff] }
 0x7c8   :  { %5402 = vmatmul.mubr.bf16.gmra.mrb[228].mxu1 %v5110_v37  ;;  %v18136_v37 = vld [vmem:[%s23711_s5 + $0x280] ss:$8 sps:$4 sm:$0xff]  }
 0x7c9   :  { %5516 = vmatpush1.bf16.msra.mxu1 %v18070_v36  ;;  %5543 = vmatprep.mubr.bf16.mxu1 %v18549_v59  ;;  %v5726_v36 = vld [vmem:[#allocation5 + $0x7] sm:$0xff] }
 0x7ca   :  { %5517 = vmatprep.subr.bf16.mxu1 %v18075_v40  ;;  %v5729_v40 = vpack.c.bf16 %v5727_v34, %v5726_v36  ;;  %v18210_v34 = vld [vmem:[%s23711_s5 + $0x404] ss:$8 sps:$4 sm:$0xff]  }
 0x7cb   :  { %v6201_v36 = vld [vmem:[#allocation5 + $0x15] sm:$0xff] }
 0x7cd   :  { %5518 = vmatpush1.bf16.msra.mxu1 %v18073_v41  ;;  %v18141_v41 = vld [vmem:[%s23711_s5 + $0x294] ss:$8 sps:$4 sm:$0xff]  }
 0x7ce   :  { %5519 = vmatprep.subr.bf16.mxu1 %v18078_v45  ;;  %v18139_v45 = vld [vmem:[%s23711_s5 + $0x290] ss:$8 sps:$4 sm:$0xff]  }
 0x7d1   :  { %5520 = vmatpush1.bf16.msra.mxu1 %v18076_v35  ;;  %v18144_v35 = vld [vmem:[%s23711_s5 + $0x2a4] ss:$8 sps:$4 sm:$0xff]  }
 0x7d2   :  { %5521 = vmatprep.subr.bf16.mxu1 %v18081_v46  ;;  %v5728_v46 = vld [vmem:[#allocation5 + $0x17] sm:$0xff] }
 0x7d5   :  { %5522 = vmatpush1.bf16.msra.mxu1 %v18079_v49  ;;  %v18142_v49 = vld [vmem:[%s23711_s5 + $0x2a0] ss:$8 sps:$4 sm:$0xff]  }
 0x7d6   :  { %5523 = vmatprep.subr.bf16.mxu1 %v18084_v51  ;;  %v5730_v51 = vpack.c.bf16 %v5728_v46, %v5728_v46 }
 0x7d9   :  { %5524 = vmatpush1.bf16.msra.mxu1 %v18082_v52  ;;  %v18147_v52 = vld [vmem:[%s23711_s5 + $0x2b4] ss:$8 sps:$4 sm:$0xff]  }
 0x7da   :  { %5525 = vmatprep.subr.bf16.mxu1 %v18087_v39  ;;  %v18145_v39 = vld [vmem:[%s23711_s5 + $0x2b0] ss:$8 sps:$4 sm:$0xff]  }
 0x7dd   :  { %5526 = vmatpush1.bf16.msra.mxu1 %v18085_v54  ;;  %v18150_v54 = vld [vmem:[%s23711_s5 + $0x2c4] ss:$8 sps:$4 sm:$0xff]  }
 0x7de   :  { %5669 = vmatprep.subr.bf16.mxu1 %v18090_v55  ;;  %v18148_v55 = vld [vmem:[%s23711_s5 + $0x2c0] ss:$8 sps:$4 sm:$0xff]  }
 0x7e0   :  { %5544 = vmatmul.mubr.bf16.vlgmr.msra.gmra.mrb[220].mxu1 %v5413_v60  ;;  %v18154_v60 = vld [vmem:[%s23711_s5 + $0x2e0] ss:$8 sps:$4 sm:$0xff]  }
 0x7e1   :  { %5670 = vmatpush1.bf16.msra.mxu1 %v18088_v58  ;;  %5553 = vmatprep.mubr.bf16.mxu1 %v18549_v59  ;;  %v18156_v58 = vld [vmem:[%s23711_s5 + $0x2e4] ss:$8 sps:$4 sm:$0xff]  }
 0x7e2   :  { %5671 = vmatprep.subr.bf16.mxu1 %v18093_v61  ;;  %v18159_v61 = vld [vmem:[%s23711_s5 + $0x2f4] ss:$8 sps:$4 sm:$0xff]  }
 0x7e5   :  { %5672 = vmatpush1.bf16.msra.mxu1 %v18091_v62  ;;  %v18157_v62 = vld [vmem:[%s23711_s5 + $0x2f0] ss:$8 sps:$4 sm:$0xff]  }
 0x7e6   :  { %5673 = vmatprep.subr.bf16.mxu1 %v18096_v2  ;;  %v18162_v2 = vld [vmem:[%s23711_s5 + $0x304] ss:$8 sps:$4 sm:$0xff]  }
 0x7e8   :  { %5554 = vmatmul.mubr.bf16.gmra.mrb[232].mxu1 %v5414_v3  ;;  %v18163_v3 = vld [vmem:[%s23711_s5 + $0x310] ss:$8 sps:$4 sm:$0xff]  }
 0x7e9   :  { %5674 = vmatpush1.bf16.msra.mxu1 %v18094_v63  ;;  %5701 = vmatprep.mubr.bf16.mxu1 %v18549_v59  ;;  %v18165_v63 = vld [vmem:[%s23711_s5 + $0x314] ss:$8 sps:$4 sm:$0xff]  }
 0x7ea   :  { %5675 = vmatprep.subr.bf16.mxu1 %v18099_v4  ;;  %v18168_v4 = vld [vmem:[%s23711_s5 + $0x324] ss:$8 sps:$4 sm:$0xff]  }
 0x7ed   :  { %5676 = vmatpush1.bf16.msra.mxu1 %v18097_v10  ;;  %v18166_v10 = vld [vmem:[%s23711_s5 + $0x320] ss:$8 sps:$4 sm:$0xff]  }
 0x7ee   :  { %5677 = vmatprep.subr.bf16.mxu1 %v18102_v7  ;;  %v18174_v7 = vld [vmem:[%s23711_s5 + $0x344] ss:$8 sps:$4 sm:$0xff]  }
 0x7f1   :  { %5678 = vmatpush1.bf16.msra.mxu1 %v18100_v25  ;;  %v18177_v25 = vld [vmem:[%s23711_s5 + $0x354] ss:$8 sps:$4 sm:$0xff]  }
 0x7f2   :  { %5679 = vmatprep.subr.bf16.mxu1 %v18105_v12  ;;  %v18175_v12 = vld [vmem:[%s23711_s5 + $0x350] ss:$8 sps:$4 sm:$0xff]  }
 0x7f5   :  { %5680 = vmatpush1.bf16.msra.mxu1 %v18103_v13  ;;  %v18180_v13 = vld [vmem:[%s23711_s5 + $0x364] ss:$8 sps:$4 sm:$0xff]  }
 0x7f6   :  { %5681 = vmatprep.subr.bf16.mxu1 %v18108_v47  ;;  %v18178_v47 = vld [vmem:[%s23711_s5 + $0x360] ss:$8 sps:$4 sm:$0xff]  }
 0x7f9   :  { %5682 = vmatpush1.bf16.msra.mxu1 %v18106_v5  ;;  %v18183_v5 = vld [vmem:[%s23711_s5 + $0x374] ss:$8 sps:$4 sm:$0xff]  }
 0x7fa   :  { %5683 = vmatprep.subr.bf16.mxu1 %v18111_v17  ;;  %v18181_v17 = vld [vmem:[%s23711_s5 + $0x370] ss:$8 sps:$4 sm:$0xff]  }
 0x7fd   :  { %5684 = vmatpush1.bf16.msra.mxu1 %v18109_v15  ;;  %v18186_v15 = vld [vmem:[%s23711_s5 + $0x384] ss:$8 sps:$4 sm:$0xff]  }
 0x7fe   :  { %5827 = vmatprep.subr.bf16.mxu1 %v18114_v50  ;;  %v6043_v50 = vld [vmem:[#allocation5 + $0x14] sm:$0xff] }
 0x800   :  { %5702 = vmatmul.mubr.bf16.vlgmr.msra.gmra.mrb[220].mxu1 %v5571_v16  ;;  %v6045_v16 = vpack.c.bf16 %v6043_v50, %v6042_v53 }
 0x801   :  { %5828 = vmatpush1.bf16.msra.mxu1 %v18112_v38  ;;  %5711 = vmatprep.mubr.bf16.mxu1 %v18549_v59  ;;  %v18184_v38 = vld [vmem:[%s23711_s5 + $0x380] ss:$8 sps:$4 sm:$0xff]  }
 0x802   :  { %5829 = vmatprep.subr.bf16.mxu1 %v18117_v19  ;;  %v18189_v19 = vld [vmem:[%s23711_s5 + $0x394] ss:$8 sps:$4 sm:$0xff]  }
 0x805   :  { %5830 = vmatpush1.bf16.msra.mxu1 %v18115_v20  ;;  %v18187_v20 = vld [vmem:[%s23711_s5 + $0x390] ss:$8 sps:$4 sm:$0xff]  }
 0x806   :  { %5831 = vmatprep.subr.bf16.mxu1 %v18120_v21  ;;  %v18192_v21 = vld [vmem:[%s23711_s5 + $0x3a4] ss:$8 sps:$4 sm:$0xff]  }
 0x808   :  { %5712 = vmatmul.mubr.bf16.gmra.mrb[236].mxu1 %v5572_v24  ;;  %v18190_v24 = vld [vmem:[%s23711_s5 + $0x3a0] ss:$8 sps:$4 sm:$0xff]  }
 0x809   :  { %5832 = vmatpush1.bf16.msra.mxu1 %v18118_v23  ;;  %5859 = vmatprep.mubr.bf16.mxu1 %v18549_v59  ;;  %v6044_v23 = vld [vmem:[#allocation5 + $0x1c] sm:$0xff] }
 0x80a   :  { %5833 = vmatprep.subr.bf16.mxu1 %v18123_v26  ;;  %v6046_v26 = vpack.c.bf16 %v6044_v23, %v6044_v23 }
 0x80d   :  { %5834 = vmatpush1.bf16.msra.mxu1 %v18121_v11  ;;  %v18195_v11 = vld [vmem:[%s23711_s5 + $0x3b4] ss:$8 sps:$4 sm:$0xff]  }
 0x80e   :  { %5835 = vmatprep.subr.bf16.mxu1 %v18126_v18  ;;  %v18193_v18 = vld [vmem:[%s23711_s5 + $0x3b0] ss:$8 sps:$4 sm:$0xff]  }
 0x811   :  { %5836 = vmatpush1.bf16.msra.mxu1 %v18124_v1  ;;  %v18198_v1 = vld [vmem:[%s23711_s5 + $0x3c4] ss:$8 sps:$4 sm:$0xff]  }
 0x812   :  { %5837 = vmatprep.subr.bf16.mxu1 %v18129_v27  ;;  %v18196_v27 = vld [vmem:[%s23711_s5 + $0x3c0] ss:$8 sps:$4 sm:$0xff]  }
 0x815   :  { %5838 = vmatpush1.bf16.msra.mxu1 %v18127_v28  ;;  %v18201_v28 = vld [vmem:[%s23711_s5 + $0x3d4] ss:$8 sps:$4 sm:$0xff]  }
 0x816   :  { %5839 = vmatprep.subr.bf16.mxu1 %v18132_v30  ;;  %v18199_v30 = vld [vmem:[%s23711_s5 + $0x3d0] ss:$8 sps:$4 sm:$0xff]  }
 0x819   :  { %5840 = vmatpush1.bf16.msra.mxu1 %v18130_v31  ;;  %v18204_v31 = vld [vmem:[%s23711_s5 + $0x3e4] ss:$8 sps:$4 sm:$0xff]  }
 0x81a   :  { %5841 = vmatprep.subr.bf16.mxu1 %v18135_v14  ;;  %v18202_v14 = vld [vmem:[%s23711_s5 + $0x3e0] ss:$8 sps:$4 sm:$0xff]  }
 0x81d   :  { %5842 = vmatpush1.bf16.msra.mxu1 %v18133_v32  ;;  %v18207_v32 = vld [vmem:[%s23711_s5 + $0x3f4] ss:$8 sps:$4 sm:$0xff]  }
 0x81e   :  { %5985 = vmatprep.subr.bf16.mxu1 %v18138_v33  ;;  %v18205_v33 = vld [vmem:[%s23711_s5 + $0x3f0] ss:$8 sps:$4 sm:$0xff]  }
 0x820   :  { %5860 = vmatmul.mubr.bf16.vlgmr.msra.gmra.mrb[220].mxu1 %v5729_v40 }
 0x821   :  { %5986 = vmatpush1.bf16.msra.mxu1 %v18136_v37  ;;  %5869 = vmatprep.mubr.bf16.mxu1 %v18549_v59 }
 0x822   :  { %5987 = vmatprep.subr.bf16.mxu1 %v18141_v41  ;;  %v6200_v41 = vld [vmem:[#allocation5 + $0xd] sm:$0xff] }
 0x823   :  { %v6203_v46 = vpack.c.bf16 %v6201_v36, %v6200_v41  ;;  %v18247_v41 = vld [vmem:[%s23713_s7 + $0x38] sm:$0xff]  }
 0x825   :  { %5988 = vmatpush1.bf16.msra.mxu1 %v18139_v45  ;;  %v18208_v45 = vld [vmem:[%s23711_s5 + $0x400] ss:$8 sps:$4 sm:$0xff]  }
 0x826   :  { %5989 = vmatprep.subr.bf16.mxu1 %v18144_v35 }
 0x828   :  { %5870 = vmatmul.mubr.bf16.gmra.mrb[240].mxu1 %v5730_v51 }
 0x829   :  { %5990 = vmatpush1.bf16.msra.mxu1 %v18142_v49  ;;  %6017 = vmatprep.mubr.bf16.mxu1 %v18549_v59  ;;  %v18213_v49 = vld [vmem:[%s23711_s5 + $0x414] ss:$8 sps:$4 sm:$0xff]  }
 0x82a   :  { %5991 = vmatprep.subr.bf16.mxu1 %v18147_v52  ;;  %v18211_v52 = vld [vmem:[%s23711_s5 + $0x410] ss:$8 sps:$4 sm:$0xff]  }
 0x82d   :  { %5992 = vmatpush1.bf16.msra.mxu1 %v18145_v39  ;;  %v18216_v39 = vld [vmem:[%s23711_s5 + $0x424] ss:$8 sps:$4 sm:$0xff]  }
 0x82e   :  { %5993 = vmatprep.subr.bf16.mxu1 %v18150_v54  ;;  %v6202_v54 = vld [vmem:[#allocation5 + $0x1d] sm:$0xff] }
 0x831   :  { %5994 = vmatpush1.bf16.msra.mxu1 %v18148_v55  ;;  %v18214_v55 = vld [vmem:[%s23711_s5 + $0x420] ss:$8 sps:$4 sm:$0xff]  }
 0x832   :  { %5995 = vmatprep.subr.bf16.mxu1 %v18153_v56  ;;  %v6204_v56 = vpack.c.bf16 %v6202_v54, %v6202_v54 }
 0x835   :  { %5996 = vmatpush1.bf16.msra.mxu1 %v18151_v57  ;;  %v18219_v57 = vld [vmem:[%s23711_s5 + $0x434] ss:$8 sps:$4 sm:$0xff]  }
 0x836   :  { %5997 = vmatprep.subr.bf16.mxu1 %v18156_v58  ;;  %v18217_v58 = vld [vmem:[%s23711_s5 + $0x430] ss:$8 sps:$4 sm:$0xff]  }
 0x839   :  { %5998 = vmatpush1.bf16.msra.mxu1 %v18154_v60  ;;  %v18222_v60 = vld [vmem:[%s23711_s5 + $0x444] ss:$8 sps:$4 sm:$0xff]  }
 0x83a   :  { %5999 = vmatprep.subr.bf16.mxu1 %v18159_v61  ;;  %v18220_v61 = vld [vmem:[%s23711_s5 + $0x440] ss:$8 sps:$4 sm:$0xff]  }
 0x83d   :  { %6000 = vmatpush1.bf16.msra.mxu1 %v18157_v62  ;;  %v18225_v62 = vld [vmem:[%s23711_s5 + $0x454] ss:$8 sps:$4 sm:$0xff]  }
 0x83e   :  { %6143 = vmatprep.subr.bf16.mxu1 %v18162_v2  ;;  %v18223_v2 = vld [vmem:[%s23711_s5 + $0x450] ss:$8 sps:$4 sm:$0xff]  }
 0x840   :  { %6018 = vmatmul.mubr.bf16.vlgmr.msra.gmra.mrb[220].mxu1 %v5887_v43  ;;  %v18169_v43 = vld [vmem:[%s23711_s5 + $0x330] ss:$8 sps:$4 sm:$0xff]  }
 0x841   :  { %6144 = vmatpush1.bf16.msra.mxu1 %v18160_v0  ;;  %6027 = vmatprep.mubr.bf16.mxu1 %v18549_v59  ;;  %v18228_v0 = vld [vmem:[%s23711_s5 + $0x464] ss:$8 sps:$4 sm:$0xff]  }
 0x842   :  { %6145 = vmatprep.subr.bf16.mxu1 %v18165_v63  ;;  %v18226_v63 = vld [vmem:[%s23711_s5 + $0x460] ss:$8 sps:$4 sm:$0xff]  }
 0x845   :  { %6146 = vmatpush1.bf16.msra.mxu1 %v18163_v3  ;;  %v18231_v3 = vld [vmem:[%s23711_s5 + $0x474] ss:$8 sps:$4 sm:$0xff]  }
 0x846   :  { %6147 = vmatprep.subr.bf16.mxu1 %v18168_v4  ;;  %v18229_v4 = vld [vmem:[%s23711_s5 + $0x470] ss:$8 sps:$4 sm:$0xff]  }
 0x848   :  { %6028 = vmatmul.mubr.bf16.gmra.mrb[244].mxu1 %v5888_v44 }
 0x849   :  { %6148 = vmatpush1.bf16.msra.mxu1 %v18166_v10  ;;  %6175 = vmatprep.mubr.bf16.mxu1 %v18549_v59 }
 0x84a   :  { %6149 = vmatprep.subr.bf16.mxu1 %v18171_v22 }
 0x84d   :  { %6150 = vmatpush1.bf16.msra.mxu1 %v18169_v43 }
 0x84e   :  { %6151 = vmatprep.subr.bf16.mxu1 %v18174_v7 }
 0x851   :  { %6152 = vmatpush1.bf16.msra.mxu1 %v18172_v8 }
 0x852   :  { %6153 = vmatprep.subr.bf16.mxu1 %v18177_v25  ;;  %v6361_v25 = vpack.c.bf16 %v20541_v9, %v20525_v29  ;;  %v18232_v29 = vld [vmem:[%s23713_s7 + $0x40] sm:$0xff]  }
 0x853   :  { %v18233_v9 = vld [vmem:[%s23713_s7] sm:$0xff]   ;;  %15446 = vmatprep.subr.bf16.mxu0 %v18232_v29 }
 0x854   :  { %15447 = vmatpush3.bf16.msra.mxu0 %v18233_v9 }
 0x855   :  { %6154 = vmatpush1.bf16.msra.mxu1 %v18175_v12  ;;  %v6360_v12 = vld [vmem:[#allocation5 + $0x1e] sm:$0xff] }
 0x856   :  { %6155 = vmatprep.subr.bf16.mxu1 %v18180_v13  ;;  %v6362_v13 = vpack.c.bf16 %v6360_v12, %v6360_v12 }
 0x859   :  { %6156 = vmatpush1.bf16.msra.mxu1 %v18178_v47 }
 0x85a   :  { %6157 = vmatprep.subr.bf16.mxu1 %v18183_v5 }
 0x85d   :  { %6158 = vmatpush1.bf16.msra.mxu1 %v18181_v17 }
 0x85e   :  { %6301 = vmatprep.subr.bf16.mxu1 %v18186_v15 }
 0x860   :  { %6176 = vmatmul.mubr.bf16.vlgmr.msra.gmra.mrb[220].mxu1 %v6045_v16 }
 0x861   :  { %6302 = vmatpush1.bf16.msra.mxu1 %v18184_v38  ;;  %6185 = vmatprep.mubr.bf16.mxu1 %v18549_v59 }
 0x862   :  { %6303 = vmatprep.subr.bf16.mxu1 %v18189_v19 }
 0x865   :  { %6304 = vmatpush1.bf16.msra.mxu1 %v18187_v20 }
 0x866   :  { %6305 = vmatprep.subr.bf16.mxu1 %v18192_v21 }
 0x868   :  { %6186 = vmatmul.mubr.bf16.gmra.mrb[248].mxu1 %v6046_v26  ;;  %v18235_v26 = vld [vmem:[%s23713_s7 + $0x8] sm:$0xff]  }
 0x869   :  { %6306 = vmatpush1.bf16.msra.mxu1 %v18190_v24  ;;  %6333 = vmatprep.mubr.bf16.mxu1 %v18549_v59  ;;  %v18234_v24 = vld [vmem:[%s23713_s7 + $0x48] sm:$0xff]  }
 0x86a   :  { %6307 = vmatprep.subr.bf16.mxu1 %v18195_v11  ;;  %15448 = vmatprep.subr.bf16.mxu0 %v18234_v24  ;;  %v18236_v11 = vld [vmem:[%s23713_s7 + $0x50] sm:$0xff]  }
 0x86b   :  { %15449 = vmatpush3.bf16.msra.mxu0 %v18235_v26 }
 0x86c   :  { %15450 = vmatprep.subr.bf16.mxu0 %v18236_v11 }
 0x86d   :  { %6308 = vmatpush1.bf16.msra.mxu1 %v18193_v18  ;;  %v18237_v18 = vld [vmem:[%s23713_s7 + $0x10] sm:$0xff]  }
 0x86e   :  { %6309 = vmatprep.subr.bf16.mxu1 %v18198_v1  ;;  %v18238_v1 = vld [vmem:[%s23713_s7 + $0x58] sm:$0xff]  }
 0x86f   :  { %15451 = vmatpush3.bf16.msra.mxu0 %v18237_v18 }
 0x870   :  { %15452 = vmatprep.subr.bf16.mxu0 %v18238_v1 }
 0x871   :  { %6310 = vmatpush1.bf16.msra.mxu1 %v18196_v27  ;;  %v18239_v27 = vld [vmem:[%s23713_s7 + $0x18] sm:$0xff]  }
 0x872   :  { %6311 = vmatprep.subr.bf16.mxu1 %v18201_v28  ;;  %v18240_v28 = vld [vmem:[%s23713_s7 + $0x60] sm:$0xff]  }
 0x873   :  { %15453 = vmatpush3.bf16.msra.mxu0 %v18239_v27 }
 0x874   :  { %15454 = vmatprep.subr.bf16.mxu0 %v18240_v28 }
 0x875   :  { %6312 = vmatpush1.bf16.msra.mxu1 %v18199_v30  ;;  %v18241_v30 = vld [vmem:[%s23713_s7 + $0x20] sm:$0xff]  }
 0x876   :  { %6313 = vmatprep.subr.bf16.mxu1 %v18204_v31  ;;  %v18242_v31 = vld [vmem:[%s23713_s7 + $0x68] sm:$0xff]  }
 0x877   :  { %15455 = vmatpush3.bf16.msra.mxu0 %v18241_v30 }
 0x878   :  { %15456 = vmatprep.subr.bf16.mxu0 %v18242_v31 }
 0x879   :  { %6314 = vmatpush1.bf16.msra.mxu1 %v18202_v14  ;;  %v18243_v14 = vld [vmem:[%s23713_s7 + $0x28] sm:$0xff]  }
 0x87a   :  { %6315 = vmatprep.subr.bf16.mxu1 %v18207_v32  ;;  %v18244_v32 = vld [vmem:[%s23713_s7 + $0x70] sm:$0xff]  }
 0x87b   :  { %v5272_v37 = vpop.f32.mrb[224].mxu1  ;;  %15457 = vmatpush3.bf16.msra.mxu0 %v18243_v14 }
 0x87c   :  { %v5274_v40 = vpop.f32.mrb[225].mxu1  ;;  %15458 = vmatprep.subr.bf16.mxu0 %v18244_v32 }
 0x87d   :  { %6316 = vmatpush1.bf16.msra.mxu1 %v18205_v33  ;;  %v5276_v35 = vpop.f32.mrb[226].mxu1  ;;  %v18245_v33 = vld [vmem:[%s23713_s7 + $0x30] sm:$0xff]  }
 0x87e   :  { %6459 = vmatprep.subr.bf16.mxu1 %v18210_v34  ;;  %v5277_v51 = vpop.f32.mrb[227].mxu1  ;;  %v18246_v34 = vld [vmem:[%s23713_s7 + $0x78] sm:$0xff]  }
 0x87f   :  { %15459 = vmatpush3.bf16.msra.mxu0 %v18245_v33  ;;  %v6720_v33 = vld [vmem:[%s23715_s9] sm:$0xff] }
 0x880   :  { %6334 = vmatmul.mubr.bf16.vlgmr.msra.gmra.mrb[220].mxu1 %v6203_v46  ;;  %15460 = vmatprep.subr.bf16.mxu0 %v18246_v34 }
 0x881   :  { %6460 = vmatpush1.bf16.msra.mxu1 %v18208_v45  ;;  %6343 = vmatprep.mubr.bf16.mxu1 %v18549_v59 }
 0x882   :  { %6461 = vmatprep.subr.bf16.mxu1 %v18213_v49 }
 0x883   :  { %15461 = vmatpush3.bf16.msra.mxu0 %v18247_v41 }
 0x885   :  { %6462 = vmatpush1.bf16.msra.mxu1 %v18211_v52 }
 0x886   :  { %6463 = vmatprep.subr.bf16.mxu1 %v18216_v39 }
 0x888   :  { %6344 = vmatmul.mubr.bf16.gmra.mrb[252].mxu1 %v6204_v56 }
 0x889   :  { %6464 = vmatpush1.bf16.msra.mxu1 %v18214_v55  ;;  %6491 = vmatprep.mubr.bf16.mxu1 %v18549_v59 }
 0x88a   :  { %6465 = vmatprep.subr.bf16.mxu1 %v18219_v57 }
 0x88d   :  { %6466 = vmatpush1.bf16.msra.mxu1 %v18217_v58 }
 0x88e   :  { %6467 = vmatprep.subr.bf16.mxu1 %v18222_v60 }
 0x891   :  { %6468 = vmatpush1.bf16.msra.mxu1 %v18220_v61 }
 0x892   :  { %6469 = vmatprep.subr.bf16.mxu1 %v18225_v62 }
 0x895   :  { %6470 = vmatpush1.bf16.msra.mxu1 %v18223_v2 }
 0x896   :  { %6471 = vmatprep.subr.bf16.mxu1 %v18228_v0 }
 0x899   :  { %6472 = vmatpush1.bf16.msra.mxu1 %v18226_v63 }
 0x89a   :  { %6473 = vmatprep.subr.bf16.mxu1 %v18231_v3 }
 0x89b   :  { %v5403_v10 = vpop.f32.mrb[228].mxu1 }
 0x89c   :  { %v5404_v44 = vadd.f32 %v5403_v10, %v5272_v37  ;;  %v5405_v22 = vpop.f32.mrb[229].mxu1 }
 0x89d   :  { %v5406_v43 = vadd.f32 %v5405_v22, %v5274_v40  ;;  %v5407_v7 = vpop.f32.mrb[230].mxu1  ;;  %6474 = vmatpush1.bf16.msra.mxu1 %v18229_v4 }
 0x89e   :  { %v5408_v8 = vpop.f32.mrb[231].mxu1  ;;  %v6516_v7 = vld [vmem:[%s23714_s6] sm:$0x3] }
 0x8a0   :  { %6492 = vmatmul.mubr.bf16.vlgmr.msra.gmra.mrb[220].mxu1 %v6361_v25 }
 0x8a1   :  { %6501 = vmatprep.mubr.bf16.mxu1 %v18549_v59 }
 0x8a8   :  { %6502 = vmatmul.mubr.bf16.gmra.mrb[0].mxu1 %v6362_v13 }
 0x8bb   :  { %v5555_v47 = vpop.f32.mrb[232].mxu1 }
 0x8bc   :  { %v5566_v5 = vadd.f32 %v5555_v47, %v5404_v44  ;;  %v5557_v17 = vpop.f32.mrb[233].mxu1  ;;  %v6518_v44 = vlaneseq }
 0x8bd   :  { %v5567_v15 = vadd.f32 %v5557_v17, %v5406_v43  ;;  %v5559_v50 = vpop.f32.mrb[234].mxu1 }
 0x8be   :  { %v5560_v53 = vpop.f32.mrb[235].mxu1  ;;  %v20835_v22 = vshrl.u32 %v6518_v44, 7  ;;  %v6729_v44 = vld [vmem:[%s23715_s9 + $0x48] sm:$0xff] }
 0x8c0   :  { %v6520_v43 = vsub.s32 0, %v20835_v22  ;;  %v6524_v8 = vsub.s32 1, %v20835_v22 }
 0x8c2   :  { %v6521_v25 = vrot.slane %v6516_v7, %v6520_v43  ;;  %v6525_v12 = vrot.slane %v6516_v7, %v6524_v8  ;;  %v6730_v7 = vld [vmem:[%s23715_s9 + $0x50] sm:$0xff] }
 0x8db   :  { %v5713_v38 = vpop.f32.mrb[236].mxu1 }
 0x8dc   :  { %v5724_v16 = vadd.f32 %v5713_v38, %v5566_v5  ;;  %v5715_v19 = vpop.f32.mrb[237].mxu1 }
 0x8dd   :  { %v5725_v20 = vadd.f32 %v5715_v19, %v5567_v15  ;;  %v5717_v21 = vpop.f32.mrb[238].mxu1 }
 0x8de   :  { %v5718_v23 = vpop.f32.mrb[239].mxu1 }
 0x8fb   :  { %v5871_v36 = vpop.f32.mrb[240].mxu1 }
 0x8fc   :  { %v5882_v37 = vadd.f32 %v5871_v36, %v5724_v16  ;;  %v5873_v40 = vpop.f32.mrb[241].mxu1 }
 0x8fd   :  { %v5883_v45 = vadd.f32 %v5873_v40, %v5725_v20  ;;  %v5875_v35 = vpop.f32.mrb[242].mxu1 }
 0x8fe   :  { %v5876_v46 = vpop.f32.mrb[243].mxu1 }
 0x8ff   :  { %v7168_v46 = vld [vmem:[%s23705_s1] sm:$0x7] }
 0x91b   :  { %v6029_v49 = vpop.f32.mrb[244].mxu1 }
 0x91c   :  { %v6040_v51 = vadd.f32 %v6029_v49, %v5882_v37  ;;  %v6031_v52 = vpop.f32.mrb[245].mxu1 }
 0x91d   :  { %v6041_v39 = vadd.f32 %v6031_v52, %v5883_v45  ;;  %v6033_v54 = vpop.f32.mrb[246].mxu1  ;;  %v7224_v45 = vld [vmem:[%s23705_s1 + $0x3] sm:$0x7] }
 0x91e   :  { %v6034_v55 = vpop.f32.mrb[247].mxu1 }
 0x93b   :  { %v6187_v56 = vpop.f32.mrb[248].mxu1 }
 0x93c   :  { %v6198_v57 = vadd.f32 %v6187_v56, %v6040_v51  ;;  %v6189_v58 = vpop.f32.mrb[249].mxu1  ;;  %v7225_v51 = vpack.c.bf16 %v7224_v45, %v7224_v45  ;;  %v7177_v45 = vld [vmem:[%s23706_s0 + $0x181] sm:$0xff] }
 0x93d   :  { %v6199_v60 = vadd.f32 %v6189_v58, %v6041_v39  ;;  %v6191_v61 = vpop.f32.mrb[250].mxu1  ;;  %v7169_v39 = vpack.c.bf16 %v7168_v46, %v7168_v46  ;;  %v7179_v46 = vld [vmem:[%s23706_s0 + $0x191] sm:$0xff] }
 0x93e   :  { %v6192_v62 = vpop.f32.mrb[251].mxu1  ;;  %v6722_v61 = vld [vmem:[%s23715_s9 + $0x10] sm:$0xff] }
 0x93f   :  { %v20864_v62 = vand.u32 %v7169_v39, %v18625_v6  ;;  %v7181_v39 = vld [vmem:[%s23706_s0 + $0x1a1] sm:$0xff] }
 0x95b   :  { %v6345_v2 = vpop.f32.mrb[252].mxu1 }
 0x95c   :  { %v6356_v0 = vadd.f32 %v6345_v2, %v6198_v57  ;;  %v6347_v63 = vpop.f32.mrb[253].mxu1  ;;  %v7281_v57 = vand.u32 %v7225_v51, %v18625_v6  ;;  %v6723_v2 = vld [vmem:[%s23715_s9 + $0x18] sm:$0xff] }
 0x95d   :  { %v6357_v3 = vadd.f32 %v6347_v63, %v6199_v60  ;;  %v6349_v4 = vpop.f32.mrb[254].mxu1  ;;  %v6721_v60 = vld [vmem:[%s23715_s9 + $0x8] sm:$0xff] }
 0x95e   :  { %v6350_v10 = vpop.f32.mrb[255].mxu1  ;;  %v6725_v63 = vld [vmem:[%s23715_s9 + $0x28] sm:$0xff]  ;;  %v6727_v4 = vld [vmem:[%s23715_s9 + $0x38] sm:$0xff] }
 0x95f   :  { %v6728_v10 = vld [vmem:[%s23715_s9 + $0x40] sm:$0xff] }
 0x973   :  { %v6493_v13 = vpop.f32.mrb[220].mxu1 }
 0x974   :  { %v6495_v47 = vpop.f32.mrb[221].mxu1  ;;  %v6528_v5 = vadd.f32 %v6521_v25, %v6493_v13  ;;  %v6733_v13 = vld [vmem:[%s23715_s9 + $0x68] sm:$0xff] }
 0x975   :  { %v6497_v17 = vpop.f32.mrb[222].mxu1  ;;  %v6529_v15 = vadd.f32 %v6525_v12, %v6495_v47  ;;  %v6734_v47 = vld [vmem:[%s23715_s9 + $0x70] sm:$0xff] }
 0x976   :  { %v6499_v50 = vpop.f32.mrb[223].mxu1  ;;  %v6530_v53 = vadd.f32 %v6521_v25, %v6497_v17  ;;  %v6534_v16 = vmax.f32 %v6528_v5, 0.0  ;;  %v6735_v5 = vld [vmem:[%s23715_s9 + $0x78] sm:$0xff]  ;;  %v6736_v17 = vld [vmem:[%s23715_s9 + $0x80] sm:$0xff] }
 0x977   :  { %v6531_v38 = vadd.f32 %v6525_v12, %v6499_v50  ;;  %v6535_v20 = vmax.f32 %v6529_v15, 0.0  ;;  %v6737_v15 = vld [vmem:[%s23715_s9 + $0x88] sm:$0xff]  ;;  %v6738_v50 = vld [vmem:[%s23715_s9 + $0x90] sm:$0xff] }
 0x978   :  { %v6536_v19 = vmax.f32 %v6530_v53, 0.0  ;;  %v6739_v53 = vld [vmem:[%s23715_s9 + $0x98] sm:$0xff] }
 0x979   :  { %v6537_v21 = vmax.f32 %v6531_v38, 0.0  ;;  %v6740_v38 = vld [vmem:[%s23715_s9 + $0xa0] sm:$0xff] }
 0x97a   :  { %v6540_v23 = vpack.c.bf16 %v6536_v19, %v6534_v16  ;;  %v6741_v16 = vld [vmem:[%s23715_s9 + $0xa8] sm:$0xff]  ;;  %v6742_v19 = vld [vmem:[%s23715_s9 + $0xb0] sm:$0xff] }
 0x97b   :  { %v6503_v29 = vpop.f32.mrb[0].mxu1  ;;  %v6541_v9 = vpack.c.bf16 %v6537_v21, %v6535_v20  ;;  %v6743_v20 = vld [vmem:[%s23715_s9 + $0xb8] sm:$0xff]  ;;  %v6744_v21 = vld [vmem:[%s23715_s9 + $0xc0] sm:$0xff] }
 0x97c   :  { %v6514_v24 = vadd.f32 %v6503_v29, %v6356_v0  ;;  %v6505_v26 = vpop.f32.mrb[1].mxu1  ;;  %v6724_v0 = vld [vmem:[%s23715_s9 + $0x20] sm:$0xff]  ;;  %v6746_v29 = vld [vmem:[%s23715_s9 + $0xd0] sm:$0xff] }
 0x97d   :  { %v6515_v11 = vadd.f32 %v6505_v26, %v6357_v3  ;;  %v6507_v18 = vpop.f32.mrb[2].mxu1  ;;  %6704 = vmatprep.mubr.bf16.mxu0 %v6541_v9  ;;  %v6726_v3 = vld [vmem:[%s23715_s9 + $0x30] sm:$0xff]  ;;  %v6747_v9 = vld [vmem:[%s23715_s9 + $0xd8] sm:$0xff]  ;;  %v6749_v26 = vld [vmem:[%s23715_s9 + $0xe8] sm:$0xff] }
 0x97e   :  { %v6508_v1 = vpop.f32.mrb[3].mxu1  ;;  %6705 = vmatmul.mubr.bf16.vlgmr.msra.gmra.mrb[64].mxu0 %v6540_v23  ;;  %v6532_v27 = vadd.f32 %v6521_v25, %v6514_v24  ;;  %v6731_v25 = vld [vmem:[%s23715_s9 + $0x58] sm:$0xff]  ;;  %v6745_v23 = vld [vmem:[%s23715_s9 + $0xc8] sm:$0xff]  ;;  %v6748_v24 = vld [vmem:[%s23715_s9 + $0xe0] sm:$0xff] }
 0x97f   :  { %v6533_v28 = vadd.f32 %v6525_v12, %v6515_v11  ;;  %v6732_v12 = vld [vmem:[%s23715_s9 + $0x60] sm:$0xff]  ;;  %v6750_v11 = vld [vmem:[%s23715_s9 + $0xf0] sm:$0xff] }
 0x980   :  { %v6538_v30 = vmax.f32 %v6532_v27, 0.0  ;;  %v7170_v18 = vld [vmem:[%s23706_s0 + $0x149] sm:$0xff]  ;;  %v7171_v1 = vld [vmem:[%s23706_s0 + $0x151] sm:$0xff]  ;;  %v7748_v27 = vld [vmem:[%s23705_s1 + $0x6] sm:$0x7] }
 0x981   :  { %v6539_v31 = vmax.f32 %v6533_v28, 0.0  ;;  %v6751_v28 = vld [vmem:[%s23715_s9 + $0xf8] sm:$0xff] }
 0x982   :  { %v6542_v32 = vpack.c.bf16 %v6538_v30, %v6538_v30  ;;  %v7206_v30 = vpack.c.bf16 %v7171_v1, %v7170_v18  ;;  %v7114_v18 = vld [vmem:[%s23706_s0 + $0x148] sm:$0xff]  ;;  %v7115_v1 = vld [vmem:[%s23706_s0 + $0x150] sm:$0xff] }
 0x983   :  { %v6543_v14 = vpack.c.bf16 %v6539_v31, %v6539_v31  ;;  %v7172_v31 = vld [vmem:[%s23706_s0 + $0x159] sm:$0xff] }
 0x985   :  { %6712 = vmatprep.mubr.bf16.mxu0 %v6543_v14  ;;  %v7173_v14 = vld [vmem:[%s23706_s0 + $0x161] sm:$0xff] }
 0x986   :  { %6713 = vmatmul.mubr.bf16.gmra.mrb[68].mxu0 %v6542_v32  ;;  %v7174_v32 = vld [vmem:[%s23706_s0 + $0x169] sm:$0xff] }
 0x987   :  { %16550 = vmatprep.mubr.msk.f32.mxu0 %vm6759_vm9, %v6720_v33  ;;  %v7175_v33 = vld [vmem:[%s23706_s0 + $0x171] sm:$0xff] }
 0xa51   :  { %v15462_v34 = vpop.f32.mrb[64].mxu0 }
 0xa52   :  { %v15463_v36 = vpop.f32.mrb[65].mxu0 }
 0xa53   :  { %v15464_v37 = vadd.f32 %v15463_v36, %v15462_v34  ;;  %v15465_v40 = vpop.f32.mrb[66].mxu0  ;;  %v7749_v34 = vpack.c.bf16 %v7748_v27, %v7748_v27  ;;  %v7207_v36 = vpack.c.bf16 %v7173_v14, %v7172_v31  ;;  %v7116_v31 = vld [vmem:[%s23706_s0 + $0x158] sm:$0xff]  ;;  %v7117_v14 = vld [vmem:[%s23706_s0 + $0x160] sm:$0xff] }
 0xa54   :  { %v15466_v41 = vpop.f32.mrb[67].mxu0 }
 0xa55   :  { %v15467_v35 = vadd.f32 %v15466_v41, %v15465_v40  ;;  %v21008_v40 = vand.u32 %v7749_v34, %v18625_v6  ;;  %v7176_v41 = vld [vmem:[%s23706_s0 + $0x179] sm:$0xff] }
 0xa57   :  { %v17298_v49 = vpack.c.bf16 %v15467_v35, %v15464_v37  ;;  %v7208_v37 = vpack.c.bf16 %v7175_v33, %v7174_v32  ;;  %v7178_v35 = vld [vmem:[%s23706_s0 + $0x189] sm:$0xff] }
 0xa58   :  { %v7210_v51 = vpack.c.bf16 %v7179_v46, %v7178_v35  ;;  %v7118_v32 = vld [vmem:[%s23706_s0 + $0x168] sm:$0xff]  ;;  %v7119_v33 = vld [vmem:[%s23706_s0 + $0x170] sm:$0xff]  ;;  %v7121_v35 = vld [vmem:[%s23706_s0 + $0x180] sm:$0xff] }
 0xa59   :  { %v15468_v52 = vpop.f32.mrb[68].mxu0  ;;  %17299 = vmatprep.subr.bf16.mxu0 %v17298_v49  ;;  %v7122_v46 = vld [vmem:[%s23706_s0 + $0x188] sm:$0xff] }
 0xa5a   :  { %v15469_v54 = vpop.f32.mrb[69].mxu0  ;;  %17301 = vmatpush3.bf16.msra.mxu0 %v17298_v49  ;;  %v7209_v49 = vpack.c.bf16 %v7177_v45, %v7176_v41  ;;  %v7120_v45 = vld [vmem:[%s23706_s0 + $0x178] sm:$0xff] }
 0xa5b   :  { %v15470_v55 = vadd.f32 %v15469_v54, %v15468_v52  ;;  %v15471_v56 = vpop.f32.mrb[70].mxu0  ;;  %v7180_v52 = vld [vmem:[%s23706_s0 + $0x199] sm:$0xff]  ;;  %v7182_v54 = vld [vmem:[%s23706_s0 + $0x1a9] sm:$0xff] }
 0xa5c   :  { %v15472_v58 = vpop.f32.mrb[71].mxu0  ;;  %v7211_v56 = vpack.c.bf16 %v7181_v39, %v7180_v52  ;;  %v7125_v39 = vld [vmem:[%s23706_s0 + $0x1a0] sm:$0xff] }
 0xa5d   :  { %16548 = vmatprep.subr.mxu0 %v15470_v55  ;;  %v7184_v58 = vld [vmem:[%s23706_s0 + $0x1b9] sm:$0xff] }
 0xa5e   :  { %16549 = vmatpush3.msra.mxu0 %v15470_v55  ;;  %v7183_v55 = vld [vmem:[%s23706_s0 + $0x1b1] sm:$0xff] }
 0xa5f   :  { %16551 = vmatmul.mubr.msk.f32.vlgmr.msra.gmra.mrb[72].mxu0 %vm6759_vm9, %v6721_v60  ;;  %16598 = vmatprep.subr.bf16.mxu0 %v7281_v57  ;;  %v7185_v60 = vld [vmem:[%s23706_s0 + $0x1c1] sm:$0xff] }
 0xa60   :  { %16553 = vmatprep.mubr.msk.f32.mxu0 %vm6759_vm9, %v6722_v61  ;;  %16599 = vmatpush3.bf16.msra.mxu0 %v7281_v57  ;;  %v7212_v57 = vpack.c.bf16 %v7183_v55, %v7182_v54  ;;  %v7186_v61 = vld [vmem:[%s23706_s0 + $0x1c9] sm:$0xff] }
 0xa61   :  { %16636 = vmatprep.subr.bf16.mxu0 %v20864_v62  ;;  %v7126_v54 = vld [vmem:[%s23706_s0 + $0x1a8] sm:$0xff]  ;;  %v7127_v55 = vld [vmem:[%s23706_s0 + $0x1b0] sm:$0xff] }
 0xa63   :  { %16554 = vmatmul.mubr.msk.f32.gmra.mrb[74].mxu0 %vm6759_vm9, %v6723_v2  ;;  %v7213_v2 = vpack.c.bf16 %v7185_v60, %v7184_v58  ;;  %v7128_v58 = vld [vmem:[%s23706_s0 + $0x1b8] sm:$0xff]  ;;  %v7129_v60 = vld [vmem:[%s23706_s0 + $0x1c0] sm:$0xff] }
 0xa64   :  { %16556 = vmatprep.mubr.msk.f32.mxu0 %vm6759_vm9, %v6724_v0 }
 0xa67   :  { %16557 = vmatmul.mubr.msk.f32.gmra.mrb[76].mxu0 %vm6759_vm9, %v6725_v63  ;;  %v7188_v63 = vld [vmem:[%s23706_s0 + $0x1d9] sm:$0xff] }
 0xa68   :  { %16559 = vmatprep.mubr.msk.f32.mxu0 %vm6759_vm9, %v6726_v3  ;;  %v7189_v3 = vld [vmem:[%s23706_s0 + $0x1e1] sm:$0xff] }
 0xa6b   :  { %16560 = vmatmul.mubr.msk.f32.gmra.mrb[78].mxu0 %vm6759_vm9, %v6727_v4  ;;  %v7190_v4 = vld [vmem:[%s23706_s0 + $0x1e9] sm:$0xff] }
 0xa6c   :  { %16562 = vmatprep.mubr.msk.f32.mxu0 %vm6759_vm9, %v6728_v10  ;;  %v7191_v10 = vld [vmem:[%s23706_s0 + $0x1f1] sm:$0xff] }
 0xa6f   :  { %16563 = vmatmul.mubr.msk.f32.gmra.mrb[80].mxu0 %vm6759_vm9, %v6729_v44  ;;  %v7215_v44 = vpack.c.bf16 %v7189_v3, %v7188_v63  ;;  %v7132_v63 = vld [vmem:[%s23706_s0 + $0x1d8] sm:$0xff]  ;;  %v7133_v3 = vld [vmem:[%s23706_s0 + $0x1e0] sm:$0xff] }
 0xa70   :  { %16565 = vmatprep.mubr.msk.f32.mxu0 %vm6759_vm9, %v6730_v7  ;;  %v7216_v7 = vpack.c.bf16 %v7191_v10, %v7190_v4  ;;  %v7134_v4 = vld [vmem:[%s23706_s0 + $0x1e8] sm:$0xff]  ;;  %v7135_v10 = vld [vmem:[%s23706_s0 + $0x1f0] sm:$0xff] }
 0xa73   :  { %16566 = vmatmul.mubr.msk.f32.gmra.mrb[82].mxu0 %vm6759_vm9, %v6731_v25  ;;  %v7192_v25 = vld [vmem:[%s23706_s0 + $0x1f9] sm:$0xff] }
 0xa74   :  { %16568 = vmatprep.mubr.msk.f32.mxu0 %vm6759_vm9, %v6732_v12  ;;  %v7193_v12 = vld [vmem:[%s23706_s0 + $0x201] sm:$0xff] }
 0xa77   :  { %16569 = vmatmul.mubr.msk.f32.gmra.mrb[84].mxu0 %vm6759_vm9, %v6733_v13  ;;  %v7194_v13 = vld [vmem:[%s23706_s0 + $0x209] sm:$0xff] }
 0xa78   :  { %16571 = vmatprep.mubr.msk.f32.mxu0 %vm6759_vm9, %v6734_v47  ;;  %v7195_v47 = vld [vmem:[%s23706_s0 + $0x211] sm:$0xff] }
 0xa7b   :  { %16572 = vmatmul.mubr.msk.f32.gmra.mrb[86].mxu0 %vm6759_vm9, %v6735_v5  ;;  %v7217_v5 = vpack.c.bf16 %v7193_v12, %v7192_v25  ;;  %v7136_v25 = vld [vmem:[%s23706_s0 + $0x1f8] sm:$0xff]  ;;  %v7137_v12 = vld [vmem:[%s23706_s0 + $0x200] sm:$0xff] }
 0xa7c   :  { %16574 = vmatprep.mubr.msk.f32.mxu0 %vm6759_vm9, %v6736_v17  ;;  %v7218_v17 = vpack.c.bf16 %v7195_v47, %v7194_v13  ;;  %v7138_v13 = vld [vmem:[%s23706_s0 + $0x208] sm:$0xff]  ;;  %v7139_v47 = vld [vmem:[%s23706_s0 + $0x210] sm:$0xff] }
 0xa7f   :  { %16575 = vmatmul.mubr.msk.f32.gmra.mrb[88].mxu0 %vm6759_vm9, %v6737_v15  ;;  %v7196_v15 = vld [vmem:[%s23706_s0 + $0x219] sm:$0xff] }
 0xa80   :  { %16577 = vmatprep.mubr.msk.f32.mxu0 %vm6759_vm9, %v6738_v50  ;;  %v7197_v50 = vld [vmem:[%s23706_s0 + $0x221] sm:$0xff] }
 0xa83   :  { %16578 = vmatmul.mubr.msk.f32.gmra.mrb[90].mxu0 %vm6759_vm9, %v6739_v53  ;;  %v7198_v53 = vld [vmem:[%s23706_s0 + $0x229] sm:$0xff] }
 0xa84   :  { %16580 = vmatprep.mubr.msk.f32.mxu0 %vm6759_vm9, %v6740_v38  ;;  %v7199_v38 = vld [vmem:[%s23706_s0 + $0x231] sm:$0xff] }
 0xa87   :  { %16581 = vmatmul.mubr.msk.f32.gmra.mrb[92].mxu0 %vm6759_vm9, %v6741_v16  ;;  %v7219_v16 = vpack.c.bf16 %v7197_v50, %v7196_v15  ;;  %v7140_v15 = vld [vmem:[%s23706_s0 + $0x218] sm:$0xff]  ;;  %v7141_v50 = vld [vmem:[%s23706_s0 + $0x220] sm:$0xff] }
 0xa88   :  { %16583 = vmatprep.mubr.msk.f32.mxu0 %vm6759_vm9, %v6742_v19  ;;  %v7220_v19 = vpack.c.bf16 %v7199_v38, %v7198_v53  ;;  %v7142_v53 = vld [vmem:[%s23706_s0 + $0x228] sm:$0xff]  ;;  %v7143_v38 = vld [vmem:[%s23706_s0 + $0x230] sm:$0xff] }
 0xa8b   :  { %16584 = vmatmul.mubr.msk.f32.gmra.mrb[94].mxu0 %vm6759_vm9, %v6743_v20  ;;  %v7200_v20 = vld [vmem:[%s23706_s0 + $0x239] sm:$0xff] }
 0xa8c   :  { %16586 = vmatprep.mubr.msk.f32.mxu0 %vm6759_vm9, %v6744_v21  ;;  %v7201_v21 = vld [vmem:[%s23706_s0 + $0x241] sm:$0xff] }
 0xa8f   :  { %16587 = vmatmul.mubr.msk.f32.gmra.mrb[96].mxu0 %vm6759_vm9, %v6745_v23  ;;  %v7202_v23 = vld [vmem:[%s23706_s0 + $0x249] sm:$0xff] }
 0xa90   :  { %16589 = vmatprep.mubr.msk.f32.mxu0 %vm6759_vm9, %v6746_v29  ;;  %v7203_v29 = vld [vmem:[%s23706_s0 + $0x251] sm:$0xff] }
 0xa93   :  { %16590 = vmatmul.mubr.msk.f32.gmra.mrb[98].mxu0 %vm6759_vm9, %v6747_v9  ;;  %v7221_v9 = vpack.c.bf16 %v7201_v21, %v7200_v20  ;;  %v7144_v20 = vld [vmem:[%s23706_s0 + $0x238] sm:$0xff]  ;;  %v7145_v21 = vld [vmem:[%s23706_s0 + $0x240] sm:$0xff] }
 0xa94   :  { %16592 = vmatprep.mubr.msk.f32.mxu0 %vm6759_vm9, %v6748_v24  ;;  %v7222_v24 = vpack.c.bf16 %v7203_v29, %v7202_v23  ;;  %v7146_v23 = vld [vmem:[%s23706_s0 + $0x248] sm:$0xff]  ;;  %v7147_v29 = vld [vmem:[%s23706_s0 + $0x250] sm:$0xff] }
 0xa97   :  { %16593 = vmatmul.mubr.msk.f32.gmra.mrb[100].mxu0 %vm6759_vm9, %v6749_v26  ;;  %v7204_v26 = vld [vmem:[%s23706_s0 + $0x259] sm:$0xff] }
 0xa98   :  { %16595 = vmatprep.mubr.msk.f32.mxu0 %vm6759_vm9, %v6750_v11  ;;  %v7205_v11 = vld [vmem:[%s23706_s0 + $0x261] sm:$0xff] }
 0xa99   :  { %v7223_v27 = vpack.c.bf16 %v7205_v11, %v7204_v26  ;;  %v7148_v26 = vld [vmem:[%s23706_s0 + $0x258] sm:$0xff]  ;;  %v7149_v11 = vld [vmem:[%s23706_s0 + $0x260] sm:$0xff] }
 0xa9b   :  { %16596 = vmatmul.mubr.msk.f32.gmra.mrb[102].mxu0 %vm6759_vm9, %v6751_v28  ;;  %v7150_v28 = vpack.c.bf16 %v7115_v1, %v7114_v18  ;;  %v7694_v18 = vld [vmem:[%s23706_s0 + $0x14a] sm:$0xff]  ;;  %v7695_v1 = vld [vmem:[%s23706_s0 + $0x152] sm:$0xff] }
 0xa9c   :  { %16600 = vmatprep.mubr.msk.bf16.mxu0 %vm154_vm2, %v7206_v30  ;;  %v8074_v30 = vld [vmem:[%s23705_s1 + $0x9] sm:$0x7] }
 0xa9d   :  { %v8075_v34 = vpack.c.bf16 %v8074_v30, %v8074_v30  ;;  %v8400_v30 = vld [vmem:[%s23705_s1 + $0xc] sm:$0x7] }
 0xa9f   :  { %16601 = vmatmul.mubr.msk.bf16.vlgmr.msra.gmra.mrb[104].mxu0 %vm154_vm2, %v7207_v36  ;;  %v7151_v36 = vpack.c.bf16 %v7117_v14, %v7116_v31  ;;  %v21142_v41 = vand.u32 %v8075_v34, %v18625_v6  ;;  %v7696_v31 = vld [vmem:[%s23706_s0 + $0x15a] sm:$0xff]  ;;  %v7697_v14 = vld [vmem:[%s23706_s0 + $0x162] sm:$0xff]  ;;  %v8401_v34 = vpack.c.bf16 %v8400_v30, %v8400_v30 }
 0xaa0   :  { %16604 = vmatprep.mubr.msk.bf16.mxu0 %vm154_vm2, %v7208_v37  ;;  %16637 = vmatpush3.bf16.msra.mxu0 %v20864_v62  ;;  %v7187_v62 = vld [vmem:[%s23706_s0 + $0x1d1] sm:$0xff]  ;;  %v7152_v37 = vpack.c.bf16 %v7119_v33, %v7118_v32 }
 0xaa1   :  { %16674 = vmatprep.subr.bf16.mxu0 %v21008_v40  ;;  %v7214_v0 = vpack.c.bf16 %v7187_v62, %v7186_v61  ;;  %v7130_v61 = vld [vmem:[%s23706_s0 + $0x1c8] sm:$0xff]  ;;  %v7131_v62 = vld [vmem:[%s23706_s0 + $0x1d0] sm:$0xff] }
 0xaa2   :  { %v7698_v32 = vld [vmem:[%s23706_s0 + $0x16a] sm:$0xff]  ;;  %v7699_v33 = vld [vmem:[%s23706_s0 + $0x172] sm:$0xff] }
 0xaa7   :  { %16605 = vmatmul.mubr.msk.bf16.gmra.mrb[108].mxu0 %vm154_vm2, %v7209_v49  ;;  %v7123_v49 = vld [vmem:[%s23706_s0 + $0x190] sm:$0xff] }
 0xaa8   :  { %16608 = vmatprep.mubr.msk.bf16.mxu0 %vm154_vm2, %v7210_v51  ;;  %v7153_v51 = vpack.c.bf16 %v7121_v35, %v7120_v45  ;;  %v7154_v52 = vpack.c.bf16 %v7123_v49, %v7122_v46  ;;  %v21280_v45 = vand.u32 %v8401_v34, %v18625_v6  ;;  %v7700_v35 = vld [vmem:[%s23706_s0 + $0x17a] sm:$0xff]  ;;  %v7701_v46 = vld [vmem:[%s23706_s0 + $0x182] sm:$0xff] }
 0xaa9   :  { %v21295_v49 = vld [vmem:[%s23716_s8] ss:$0 sm:$0xff] }
 0xaaf   :  { %16609 = vmatmul.mubr.msk.bf16.gmra.mrb[112].mxu0 %vm154_vm2, %v7211_v56 }
 0xab0   :  { %16612 = vmatprep.mubr.msk.bf16.mxu0 %vm154_vm2, %v7212_v57  ;;  %v7156_v57 = vpack.c.bf16 %v7127_v55, %v7126_v54 }
 0xab7   :  { %16613 = vmatmul.mubr.msk.bf16.gmra.mrb[116].mxu0 %vm154_vm2, %v7213_v2  ;;  %v7157_v2 = vpack.c.bf16 %v7129_v60, %v7128_v58 }
 0xab8   :  { %16616 = vmatprep.mubr.msk.bf16.mxu0 %vm154_vm2, %v7214_v0  ;;  %v7158_v0 = vpack.c.bf16 %v7131_v62, %v7130_v61  ;;  %v7704_v61 = vld [vmem:[%s23706_s0 + $0x19a] sm:$0xff]  ;;  %v7705_v62 = vld [vmem:[%s23706_s0 + $0x1a2] sm:$0xff] }
 0xabf   :  { %16617 = vmatmul.mubr.msk.bf16.gmra.mrb[120].mxu0 %vm154_vm2, %v7215_v44  ;;  %v7159_v44 = vpack.c.bf16 %v7133_v3, %v7132_v63  ;;  %v7707_v63 = vld [vmem:[%s23706_s0 + $0x1b2] sm:$0xff] }
 0xac0   :  { %16620 = vmatprep.mubr.msk.bf16.mxu0 %vm154_vm2, %v7216_v7  ;;  %v7160_v7 = vpack.c.bf16 %v7135_v10, %v7134_v4  ;;  %v21345_v4 = vpack.c.bf16 %v7705_v62, %v7704_v61 }
 0xac7   :  { %16621 = vmatmul.mubr.msk.bf16.gmra.mrb[124].mxu0 %vm154_vm2, %v7217_v5  ;;  %v7161_v5 = vpack.c.bf16 %v7137_v12, %v7136_v25 }
 0xac8   :  { %16624 = vmatprep.mubr.msk.bf16.mxu0 %vm154_vm2, %v7218_v17  ;;  %v7162_v17 = vpack.c.bf16 %v7139_v47, %v7138_v13 }
 0xacf   :  { %16625 = vmatmul.mubr.msk.bf16.gmra.mrb[128].mxu0 %vm154_vm2, %v7219_v16  ;;  %v7163_v16 = vpack.c.bf16 %v7141_v50, %v7140_v15  ;;  %v7710_v50 = vld [vmem:[%s23706_s0 + $0x1ca] sm:$0xff] }
 0xad0   :  { %16628 = vmatprep.mubr.msk.bf16.mxu0 %vm154_vm2, %v7220_v19  ;;  %v7164_v19 = vpack.c.bf16 %v7143_v38, %v7142_v53  ;;  %v7711_v53 = vld [vmem:[%s23706_s0 + $0x1d2] sm:$0xff] }
 0xad7   :  { %16629 = vmatmul.mubr.msk.bf16.gmra.mrb[132].mxu0 %vm154_vm2, %v7221_v9  ;;  %v7165_v9 = vpack.c.bf16 %v7145_v21, %v7144_v20  ;;  %v21388_v21 = vpack.c.bf16 %v7711_v53, %v7710_v50 }
 0xad8   :  { %16632 = vmatprep.mubr.msk.bf16.mxu0 %vm154_vm2, %v7222_v24  ;;  %v7166_v24 = vpack.c.bf16 %v7147_v29, %v7146_v23 }
 0xadf   :  { %16633 = vmatmul.mubr.msk.bf16.gmra.mrb[136].mxu0 %vm154_vm2, %v7223_v27  ;;  %v7167_v27 = vpack.c.bf16 %v7149_v11, %v7148_v26  ;;  %v7712_v26 = vld [vmem:[%s23706_s0 + $0x1da] sm:$0xff]  ;;  %v7713_v11 = vld [vmem:[%s23706_s0 + $0x1e2] sm:$0xff] }
 0xae0   :  { %16638 = vmatprep.mubr.msk.bf16.mxu0 %vm154_vm2, %v7150_v28  ;;  %v7730_v28 = vpack.c.bf16 %v7695_v1, %v7694_v18  ;;  %v7714_v1 = vld [vmem:[%s23706_s0 + $0x1ea] sm:$0xff]  ;;  %v21425_v30 = vpack.c.bf16 %v7713_v11, %v7712_v26 }
 0xae7   :  { %16639 = vmatmul.mubr.msk.bf16.vlgmr.msra.gmra.mrb[104].mxu0 %vm154_vm2, %v7151_v36  ;;  %v21275_v36 = vpack.c.bf16 %v7697_v14, %v7696_v31 }
 0xae8   :  { %16642 = vmatprep.mubr.msk.bf16.mxu0 %vm154_vm2, %v7152_v37  ;;  %16675 = vmatpush3.bf16.msra.mxu0 %v21008_v40  ;;  %v7124_v40 = vld [vmem:[%s23706_s0 + $0x198] sm:$0xff]  ;;  %v21277_v37 = vpack.c.bf16 %v7699_v33, %v7698_v32 }
 0xae9   :  { %16712 = vmatprep.subr.bf16.mxu0 %v21142_v41  ;;  %v7155_v56 = vpack.c.bf16 %v7125_v39, %v7124_v40  ;;  %v21305_v39 = vpack.c.bf16 %v7701_v46, %v7700_v35 }
 0xaef   :  { %16643 = vmatmul.mubr.msk.bf16.gmra.mrb[108].mxu0 %vm154_vm2, %v7153_v51  ;;  %v7702_v51 = vld [vmem:[%s23706_s0 + $0x18a] sm:$0xff] }
 0xaf0   :  { %16646 = vmatprep.mubr.msk.bf16.mxu0 %vm154_vm2, %v7154_v52  ;;  %v7703_v52 = vld [vmem:[%s23706_s0 + $0x192] sm:$0xff] }
 0xaf7   :  { %16647 = vmatmul.mubr.msk.bf16.gmra.mrb[112].mxu0 %vm154_vm2, %v7155_v56  ;;  %v21308_v56 = vpack.c.bf16 %v7703_v52, %v7702_v51  ;;  %v7716_v51 = vld [vmem:[%s23706_s0 + $0x1fa] sm:$0xff]  ;;  %v7717_v52 = vld [vmem:[%s23706_s0 + $0x202] sm:$0xff] }
 0xaf8   :  { %16650 = vmatprep.mubr.msk.bf16.mxu0 %vm154_vm2, %v7156_v57 }
 0xaff   :  { %16651 = vmatmul.mubr.msk.bf16.gmra.mrb[116].mxu0 %vm154_vm2, %v7157_v2 }
 0xb00   :  { %16654 = vmatprep.mubr.msk.bf16.mxu0 %vm154_vm2, %v7158_v0  ;;  %v7706_v0 = vld [vmem:[%s23706_s0 + $0x1aa] sm:$0xff] }
 0xb07   :  { %16655 = vmatmul.mubr.msk.bf16.gmra.mrb[120].mxu0 %vm154_vm2, %v7159_v44 }
 0xb08   :  { %16658 = vmatprep.mubr.msk.bf16.mxu0 %vm154_vm2, %v7160_v7  ;;  %v21348_v7 = vpack.c.bf16 %v7707_v63, %v7706_v0 }
 0xb0f   :  { %16659 = vmatmul.mubr.msk.bf16.gmra.mrb[124].mxu0 %vm154_vm2, %v7161_v5  ;;  %v7708_v5 = vld [vmem:[%s23706_s0 + $0x1ba] sm:$0xff] }
 0xb10   :  { %16662 = vmatprep.mubr.msk.bf16.mxu0 %vm154_vm2, %v7162_v17  ;;  %v7709_v17 = vld [vmem:[%s23706_s0 + $0x1c2] sm:$0xff] }
 0xb17   :  { %16663 = vmatmul.mubr.msk.bf16.gmra.mrb[128].mxu0 %vm154_vm2, %v7163_v16  ;;  %v21385_v16 = vpack.c.bf16 %v7709_v17, %v7708_v5 }
 0xb18   :  { %16666 = vmatprep.mubr.msk.bf16.mxu0 %vm154_vm2, %v7164_v19 }
 0xb1f   :  { %16667 = vmatmul.mubr.msk.bf16.gmra.mrb[132].mxu0 %vm154_vm2, %v7165_v9 }
 0xb20   :  { %16670 = vmatprep.mubr.msk.bf16.mxu0 %vm154_vm2, %v7166_v24 }
 0xb27   :  { %16671 = vmatmul.mubr.msk.bf16.gmra.mrb[136].mxu0 %vm154_vm2, %v7167_v27  ;;  %v7715_v27 = vld [vmem:[%s23706_s0 + $0x1f2] sm:$0xff] }
 0xb28   :  { %16676 = vmatprep.mubr.msk.bf16.mxu0 %vm154_vm2, %v7730_v28  ;;  %v21428_v32 = vpack.c.bf16 %v7715_v27, %v7714_v1 }
 0xb2f   :  { %16677 = vmatmul.mubr.msk.bf16.vlgmr.msra.gmra.mrb[104].mxu0 %vm154_vm2, %v21275_v36 }
 0xb30   :  { %16680 = vmatprep.mubr.msk.bf16.mxu0 %vm154_vm2, %v21277_v37  ;;  %16713 = vmatpush3.bf16.msra.mxu0 %v21142_v41 }
 0xb31   :  { %16750 = vmatprep.subr.bf16.mxu0 %v21280_v45 }
 0xb32   :  { %v16552_v40 = vpop.f32.mrb[72].mxu0 }
 0xb33   :  { %v6928_v54 = vadd.f32 %v16552_v40, %v21295_v49  ;;  %v6922_v55 = vpop.f32.mrb[73].mxu0 }
 0xb34   :  { %v6923_v41 = vadd.f32 %v21295_v49, %v6922_v55  ;;  %v7719_v55 = vld [vmem:[%s23706_s0 + $0x212] sm:$0xff] }
 0xb35   :  { %7083 = vst.msk [vmem:[%s23717_s12 + $0x8] sm:$0xff] %vm7081_vm10, %v6928_v54  ;;  %v7718_v54 = vld [vmem:[%s23706_s0 + $0x20a] sm:$0xff] }
 0xb36   :  { %7082 = vst.msk [vmem:[%s23717_s12] sm:$0xff] %vm7081_vm10, %v6923_v41  ;;  %v16555_v57 = vpop.f32.mrb[74].mxu0  ;;  %v21468_v61 = vpack.c.bf16 %v7719_v55, %v7718_v54 }
 0xb37   :  { %16681 = vmatmul.mubr.msk.bf16.gmra.mrb[108].mxu0 %vm154_vm2, %v21305_v39  ;;  %v6938_v58 = vadd.f32 %v16555_v57, %v21295_v49  ;;  %v6932_v60 = vpop.f32.mrb[75].mxu0  ;;  %v21465_v57 = vpack.c.bf16 %v7717_v52, %v7716_v51 }
 0xb38   :  { %16684 = vmatprep.mubr.msk.bf16.mxu0 %vm154_vm2, %v21308_v56  ;;  %v6933_v2 = vadd.f32 %v21295_v49, %v6932_v60 }
 0xb39   :  { %7085 = vst.msk [vmem:[%s23717_s12 + $0x18] sm:$0xff] %vm7081_vm10, %v6938_v58 }
 0xb3a   :  { %7084 = vst.msk [vmem:[%s23717_s12 + $0x10] sm:$0xff] %vm7081_vm10, %v6933_v2  ;;  %v16558_v3 = vpop.f32.mrb[76].mxu0 }
 0xb3b   :  { %v6948_v10 = vadd.f32 %v16558_v3, %v21295_v49  ;;  %v6942_v44 = vpop.f32.mrb[77].mxu0  ;;  %v7720_v3 = vld [vmem:[%s23706_s0 + $0x21a] sm:$0xff] }
 0xb3c   :  { %v6943_v25 = vadd.f32 %v21295_v49, %v6942_v44 }
 0xb3d   :  { %7087 = vst.msk [vmem:[%s23717_s12 + $0x28] sm:$0xff] %vm7081_vm10, %v6948_v10  ;;  %v7721_v10 = vld [vmem:[%s23706_s0 + $0x222] sm:$0xff] }
 0xb3e   :  { %7086 = vst.msk [vmem:[%s23717_s12 + $0x20] sm:$0xff] %vm7081_vm10, %v6943_v25  ;;  %v16561_v12 = vpop.f32.mrb[78].mxu0  ;;  %v7722_v25 = vld [vmem:[%s23706_s0 + $0x22a] sm:$0xff] }
 0xb3f   :  { %16685 = vmatmul.mubr.msk.bf16.gmra.mrb[112].mxu0 %vm154_vm2, %v21345_v4  ;;  %v6958_v13 = vadd.f32 %v16561_v12, %v21295_v49  ;;  %v6952_v47 = vpop.f32.mrb[79].mxu0  ;;  %v7723_v12 = vld [vmem:[%s23706_s0 + $0x232] sm:$0xff] }
 0xb40   :  { %16688 = vmatprep.mubr.msk.bf16.mxu0 %vm154_vm2, %v21348_v7  ;;  %v6953_v15 = vadd.f32 %v21295_v49, %v6952_v47  ;;  %v21505_v47 = vpack.c.bf16 %v7721_v10, %v7720_v3  ;;  %v8352_v10 = vld [vmem:[%s23706_s0 + $0x18b] sm:$0xff] }
 0xb41   :  { %7089 = vst.msk [vmem:[%s23717_s12 + $0x38] sm:$0xff] %vm7081_vm10, %v6958_v13 }
 0xb42   :  { %7088 = vst.msk [vmem:[%s23717_s12 + $0x30] sm:$0xff] %vm7081_vm10, %v6953_v15  ;;  %v16564_v38 = vpop.f32.mrb[80].mxu0  ;;  %v21508_v15 = vpack.c.bf16 %v7723_v12, %v7722_v25  ;;  %v8354_v25 = vld [vmem:[%s23706_s0 + $0x19b] sm:$0xff]  ;;  %v8355_v12 = vld [vmem:[%s23706_s0 + $0x1a3] sm:$0xff] }
 0xb43   :  { %v6968_v19 = vadd.f32 %v16564_v38, %v21295_v49  ;;  %v6962_v20 = vpop.f32.mrb[81].mxu0 }
 0xb44   :  { %v6963_v23 = vadd.f32 %v21295_v49, %v6962_v20  ;;  %v7724_v20 = vld [vmem:[%s23706_s0 + $0x23a] sm:$0xff] }
 0xb45   :  { %7091 = vst.msk [vmem:[%s23717_s12 + $0x48] sm:$0xff] %vm7081_vm10, %v6968_v19 }
 0xb46   :  { %7090 = vst.msk [vmem:[%s23717_s12 + $0x40] sm:$0xff] %vm7081_vm10, %v6963_v23  ;;  %v16567_v29 = vpop.f32.mrb[82].mxu0  ;;  %v7725_v23 = vld [vmem:[%s23706_s0 + $0x242] sm:$0xff] }
 0xb47   :  { %16689 = vmatmul.mubr.msk.bf16.gmra.mrb[116].mxu0 %vm154_vm2, %v21385_v16  ;;  %v6978_v9 = vadd.f32 %v16567_v29, %v21295_v49  ;;  %v6972_v24 = vpop.f32.mrb[83].mxu0  ;;  %v7745_v11 = vpack.c.bf16 %v7725_v23, %v7724_v20  ;;  %v8361_v20 = vld [vmem:[%s23706_s0 + $0x1d3] sm:$0xff]  ;;  %v8362_v23 = vld [vmem:[%s23706_s0 + $0x1db] sm:$0xff] }
 0xb48   :  { %16692 = vmatprep.mubr.msk.bf16.mxu0 %vm154_vm2, %v21388_v21  ;;  %v6973_v18 = vadd.f32 %v21295_v49, %v6972_v24  ;;  %v7727_v24 = vld [vmem:[%s23706_s0 + $0x252] sm:$0xff] }
 0xb49   :  { %7093 = vst.msk [vmem:[%s23717_s12 + $0x58] sm:$0xff] %vm7081_vm10, %v6978_v9  ;;  %v7726_v9 = vld [vmem:[%s23706_s0 + $0x24a] sm:$0xff] }
 0xb4a   :  { %7092 = vst.msk [vmem:[%s23717_s12 + $0x50] sm:$0xff] %vm7081_vm10, %v6973_v18  ;;  %v16570_v28 = vpop.f32.mrb[84].mxu0  ;;  %v7746_v27 = vpack.c.bf16 %v7727_v24, %v7726_v9 }
 0xb4b   :  { %v6988_v31 = vadd.f32 %v16570_v28, %v21295_v49  ;;  %v6982_v14 = vpop.f32.mrb[85].mxu0 }
 0xb4c   :  { %v6983_v33 = vadd.f32 %v21295_v49, %v6982_v14 }
 0xb4d   :  { %7095 = vst.msk [vmem:[%s23717_s12 + $0x68] sm:$0xff] %vm7081_vm10, %v6988_v31 }
 0xb4e   :  { %7094 = vst.msk [vmem:[%s23717_s12 + $0x60] sm:$0xff] %vm7081_vm10, %v6983_v33  ;;  %v16573_v34 = vpop.f32.mrb[86].mxu0 }
 0xb4f   :  { %16693 = vmatmul.mubr.msk.bf16.gmra.mrb[120].mxu0 %vm154_vm2, %v21425_v30  ;;  %v6998_v35 = vadd.f32 %v16573_v34, %v21295_v49  ;;  %v6992_v46 = vpop.f32.mrb[87].mxu0  ;;  %v7728_v34 = vld [vmem:[%s23706_s0 + $0x25a] sm:$0xff] }
 0xb50   :  { %16696 = vmatprep.mubr.msk.bf16.mxu0 %vm154_vm2, %v21428_v32  ;;  %v6993_v40 = vadd.f32 %v21295_v49, %v6992_v46 }
 0xb51   :  { %7097 = vst.msk [vmem:[%s23717_s12 + $0x78] sm:$0xff] %vm7081_vm10, %v6998_v35  ;;  %v7729_v35 = vld [vmem:[%s23706_s0 + $0x262] sm:$0xff] }
 0xb52   :  { %7096 = vst.msk [vmem:[%s23717_s12 + $0x70] sm:$0xff] %vm7081_vm10, %v6993_v40  ;;  %v16576_v41 = vpop.f32.mrb[88].mxu0  ;;  %v7747_v52 = vpack.c.bf16 %v7729_v35, %v7728_v34  ;;  %v8371_v34 = vld [vmem:[%s23706_s0 + $0x223] sm:$0xff] }
 0xb53   :  { %v7008_v58 = vadd.f32 %v16576_v41, %v21295_v49  ;;  %v7002_v60 = vpop.f32.mrb[89].mxu0 }
 0xb54   :  { %v7003_v62 = vadd.f32 %v21295_v49, %v7002_v60 }
 0xb55   :  { %7099 = vst.msk [vmem:[%s23717_s12 + $0x88] sm:$0xff] %vm7081_vm10, %v7008_v58  ;;  %v8726_v58 = vld [vmem:[%s23705_s1 + $0xf] sm:$0x7] }
 0xb56   :  { %7098 = vst.msk [vmem:[%s23717_s12 + $0x80] sm:$0xff] %vm7081_vm10, %v7003_v62  ;;  %v16579_v2 = vpop.f32.mrb[90].mxu0 }
 0xb57   :  { %16697 = vmatmul.mubr.msk.bf16.gmra.mrb[124].mxu0 %vm154_vm2, %v21465_v57  ;;  %v7018_v0 = vadd.f32 %v16579_v2, %v21295_v49  ;;  %v7012_v63 = vpop.f32.mrb[91].mxu0 }
 0xb58   :  { %16700 = vmatprep.mubr.msk.bf16.mxu0 %vm154_vm2, %v21468_v61  ;;  %v7013_v44 = vadd.f32 %v21295_v49, %v7012_v63 }
 0xb59   :  { %7101 = vst.msk [vmem:[%s23717_s12 + $0x98] sm:$0xff] %vm7081_vm10, %v7018_v0  ;;  %v8727_v0 = vpack.c.bf16 %v8726_v58, %v8726_v58  ;;  %v8376_v58 = vld [vmem:[%s23706_s0 + $0x24b] sm:$0xff] }
 0xb5a   :  { %7100 = vst.msk [vmem:[%s23717_s12 + $0x90] sm:$0xff] %vm7081_vm10, %v7013_v44  ;;  %v16582_v13 = vpop.f32.mrb[92].mxu0  ;;  %v8353_v44 = vld [vmem:[%s23706_s0 + $0x193] sm:$0xff] }
 0xb5b   :  { %v7028_v5 = vadd.f32 %v16582_v13, %v21295_v49  ;;  %v7022_v17 = vpop.f32.mrb[93].mxu0  ;;  %v8783_v63 = vand.u32 %v8727_v0, %v18625_v6  ;;  %v8385_v13 = vpack.c.bf16 %v8353_v44, %v8352_v10  ;;  %v8678_v44 = vld [vmem:[%s23706_s0 + $0x18c] sm:$0xff] }
 0xb5c   :  { %v7023_v50 = vadd.f32 %v21295_v49, %v7022_v17  ;;  %v8357_v17 = vld [vmem:[%s23706_s0 + $0x1b3] sm:$0xff] }
 0xb5d   :  { %7103 = vst.msk [vmem:[%s23717_s12 + $0xa8] sm:$0xff] %vm7081_vm10, %v7028_v5  ;;  %v8356_v5 = vld [vmem:[%s23706_s0 + $0x1ab] sm:$0xff] }
 0xb5e   :  { %7102 = vst.msk [vmem:[%s23717_s12 + $0xa0] sm:$0xff] %vm7081_vm10, %v7023_v50  ;;  %v16585_v53 = vpop.f32.mrb[94].mxu0  ;;  %v8359_v50 = vld [vmem:[%s23706_s0 + $0x1c3] sm:$0xff] }
 0xb5f   :  { %16701 = vmatmul.mubr.msk.bf16.gmra.mrb[128].mxu0 %vm154_vm2, %v21505_v47  ;;  %v7038_v38 = vadd.f32 %v16585_v53, %v21295_v49  ;;  %v7032_v19 = vpop.f32.mrb[95].mxu0  ;;  %v8387_v53 = vpack.c.bf16 %v8357_v17, %v8356_v5  ;;  %v8683_v17 = vld [vmem:[%s23706_s0 + $0x1b4] sm:$0xff] }
 0xb60   :  { %16704 = vmatprep.mubr.msk.bf16.mxu0 %vm154_vm2, %v21508_v15  ;;  %v7033_v29 = vadd.f32 %v21295_v49, %v7032_v19  ;;  %v8360_v19 = vld [vmem:[%s23706_s0 + $0x1cb] sm:$0xff] }
 0xb61   :  { %7105 = vst.msk [vmem:[%s23717_s12 + $0xb8] sm:$0xff] %vm7081_vm10, %v7038_v38  ;;  %v8389_v9 = vpack.c.bf16 %v8361_v20, %v8360_v19  ;;  %v8686_v19 = vld [vmem:[%s23706_s0 + $0x1cc] sm:$0xff]  ;;  %v8687_v20 = vld [vmem:[%s23706_s0 + $0x1d4] sm:$0xff] }
 0xb62   :  { %7104 = vst.msk [vmem:[%s23717_s12 + $0xb0] sm:$0xff] %vm7081_vm10, %v7033_v29  ;;  %v16588_v26 = vpop.f32.mrb[96].mxu0  ;;  %v8363_v29 = vld [vmem:[%s23706_s0 + $0x1e3] sm:$0xff] }
 0xb63   :  { %v7048_v18 = vadd.f32 %v16588_v26, %v21295_v49  ;;  %v7042_v1 = vpop.f32.mrb[97].mxu0  ;;  %v8390_v24 = vpack.c.bf16 %v8363_v29, %v8362_v23  ;;  %v8364_v26 = vld [vmem:[%s23706_s0 + $0x1eb] sm:$0xff]  ;;  %v8688_v23 = vld [vmem:[%s23706_s0 + $0x1dc] sm:$0xff] }
 0xb64   :  { %v7043_v28 = vadd.f32 %v21295_v49, %v7042_v1  ;;  %v8367_v1 = vld [vmem:[%s23706_s0 + $0x203] sm:$0xff] }
 0xb65   :  { %7107 = vst.msk [vmem:[%s23717_s12 + $0xc8] sm:$0xff] %vm7081_vm10, %v7048_v18  ;;  %v8366_v18 = vld [vmem:[%s23706_s0 + $0x1fb] sm:$0xff]  ;;  %v8689_v29 = vld [vmem:[%s23706_s0 + $0x1e4] sm:$0xff] }
 0xb66   :  { %7106 = vst.msk [vmem:[%s23717_s12 + $0xc0] sm:$0xff] %vm7081_vm10, %v7043_v28  ;;  %v16591_v31 = vpop.f32.mrb[98].mxu0  ;;  %v8392_v28 = vpack.c.bf16 %v8367_v1, %v8366_v18  ;;  %v8692_v18 = vld [vmem:[%s23706_s0 + $0x1fc] sm:$0xff]  ;;  %v8693_v1 = vld [vmem:[%s23706_s0 + $0x204] sm:$0xff] }
 0xb67   :  { %16705 = vmatmul.mubr.msk.bf16.gmra.mrb[132].mxu0 %vm154_vm2, %v7745_v11  ;;  %v7058_v14 = vadd.f32 %v16591_v31, %v21295_v49  ;;  %v7052_v33 = vpop.f32.mrb[99].mxu0  ;;  %v8368_v31 = vld [vmem:[%s23706_s0 + $0x20b] sm:$0xff] }
 0xb68   :  { %16708 = vmatprep.mubr.msk.bf16.mxu0 %vm154_vm2, %v7746_v27  ;;  %v7053_v46 = vadd.f32 %v21295_v49, %v7052_v33  ;;  %v8370_v33 = vld [vmem:[%s23706_s0 + $0x21b] sm:$0xff] }
 0xb69   :  { %7109 = vst.msk [vmem:[%s23717_s12 + $0xd8] sm:$0xff] %vm7081_vm10, %v7058_v14  ;;  %v8369_v14 = vld [vmem:[%s23706_s0 + $0x213] sm:$0xff] }
 0xb6a   :  { %7108 = vst.msk [vmem:[%s23717_s12 + $0xd0] sm:$0xff] %vm7081_vm10, %v7053_v46  ;;  %v16594_v51 = vpop.f32.mrb[100].mxu0  ;;  %v8393_v35 = vpack.c.bf16 %v8369_v14, %v8368_v31  ;;  %v8394_v46 = vpack.c.bf16 %v8371_v34, %v8370_v33  ;;  %v8694_v31 = vld [vmem:[%s23706_s0 + $0x20c] sm:$0xff]  ;;  %v8695_v14 = vld [vmem:[%s23706_s0 + $0x214] sm:$0xff]  ;;  %v8696_v33 = vld [vmem:[%s23706_s0 + $0x21c] sm:$0xff] }
 0xb6b   :  { %v7068_v40 = vadd.f32 %v16594_v51, %v21295_v49  ;;  %v7062_v54 = vpop.f32.mrb[101].mxu0  ;;  %v8372_v51 = vld [vmem:[%s23706_s0 + $0x22b] sm:$0xff] }
 0xb6c   :  { %v7063_v55 = vadd.f32 %v21295_v49, %v7062_v54  ;;  %v8375_v54 = vld [vmem:[%s23706_s0 + $0x243] sm:$0xff] }
 0xb6d   :  { %7111 = vst.msk [vmem:[%s23717_s12 + $0xe8] sm:$0xff] %vm7081_vm10, %v7068_v40  ;;  %v8374_v40 = vld [vmem:[%s23706_s0 + $0x23b] sm:$0xff]  ;;  %v8697_v34 = vld [vmem:[%s23706_s0 + $0x224] sm:$0xff] }
 0xb6e   :  { %7110 = vst.msk [vmem:[%s23717_s12 + $0xe0] sm:$0xff] %vm7081_vm10, %v7063_v55  ;;  %v16597_v41 = vpop.f32.mrb[102].mxu0 }
 0xb6f   :  { %16709 = vmatmul.mubr.msk.bf16.gmra.mrb[136].mxu0 %vm154_vm2, %v7747_v52  ;;  %v7078_v60 = vadd.f32 %v16597_v41, %v21295_v49  ;;  %v7072_v62 = vpop.f32.mrb[103].mxu0  ;;  %v8396_v41 = vpack.c.bf16 %v8375_v54, %v8374_v40  ;;  %v8700_v40 = vld [vmem:[%s23706_s0 + $0x23c] sm:$0xff]  ;;  %v8701_v54 = vld [vmem:[%s23706_s0 + $0x244] sm:$0xff] }
 0xb70   :  { %16714 = vmatprep.mubr.msk.bf16.mxu0 %vm154_vm2, %v21275_v36  ;;  %v7073_v2 = vadd.f32 %v21295_v49, %v7072_v62  ;;  %v8054_v36 = vld [vmem:[%s23706_s0 + $0x26a] sm:$0xff]  ;;  %v8378_v62 = vld [vmem:[%s23706_s0 + $0x25b] sm:$0xff] }
 0xb71   :  { %7113 = vst.msk [vmem:[%s23717_s12 + $0xf8] sm:$0xff] %vm7081_vm10, %v7078_v60  ;;  %v8347_v49 = vld [vmem:[%s23706_s0 + $0x163] sm:$0xff]  ;;  %v8377_v60 = vld [vmem:[%s23706_s0 + $0x253] sm:$0xff] }
 0xb72   :  { %7112 = vst.msk [vmem:[%s23717_s12 + $0xf0] sm:$0xff] %vm7081_vm10, %v7073_v2  ;;  %v8379_v2 = vld [vmem:[%s23706_s0 + $0x263] sm:$0xff]  ;;  %v8397_v0 = vpack.c.bf16 %v8377_v60, %v8376_v58  ;;  %v8702_v58 = vld [vmem:[%s23706_s0 + $0x24c] sm:$0xff]  ;;  %v8703_v60 = vld [vmem:[%s23706_s0 + $0x254] sm:$0xff] }
 0xb77   :  { %16715 = vmatmul.mubr.msk.bf16.vlgmr.msra.gmra.mrb[104].mxu0 %vm154_vm2, %v21277_v37  ;;  %v8055_v37 = vld [vmem:[%s23706_s0 + $0x272] sm:$0xff] }
 0xb78   :  { %16718 = vmatprep.mubr.msk.bf16.mxu0 %vm154_vm2, %v21305_v39  ;;  %16751 = vmatpush3.bf16.msra.mxu0 %v21280_v45  ;;  %v8346_v45 = vld [vmem:[%s23706_s0 + $0x15b] sm:$0xff]  ;;  %v8073_v39 = vpack.c.bf16 %v8055_v37, %v8054_v36  ;;  %v8380_v36 = vld [vmem:[%s23706_s0 + $0x26b] sm:$0xff]  ;;  %v8381_v37 = vld [vmem:[%s23706_s0 + $0x273] sm:$0xff] }
 0xb79   :  { %16788 = vmatprep.subr.bf16.mxu0 %v8783_v63 }
 0xb7f   :  { %16719 = vmatmul.mubr.msk.bf16.gmra.mrb[108].mxu0 %vm154_vm2, %v21308_v56  ;;  %v8382_v56 = vpack.c.bf16 %v8347_v49, %v8346_v45  ;;  %v8672_v45 = vld [vmem:[%s23706_s0 + $0x15c] sm:$0xff]  ;;  %v8673_v49 = vld [vmem:[%s23706_s0 + $0x164] sm:$0xff] }
 0xb80   :  { %16722 = vmatprep.mubr.msk.bf16.mxu0 %vm154_vm2, %v21345_v4  ;;  %v9052_v4 = vld [vmem:[%s23705_s1 + $0x12] sm:$0x7] }
 0xb87   :  { %16723 = vmatmul.mubr.msk.bf16.gmra.mrb[112].mxu0 %vm154_vm2, %v21348_v7  ;;  %v8348_v7 = vld [vmem:[%s23706_s0 + $0x16b] sm:$0xff] }
 0xb88   :  { %16726 = vmatprep.mubr.msk.bf16.mxu0 %vm154_vm2, %v21385_v16  ;;  %v8349_v16 = vld [vmem:[%s23706_s0 + $0x173] sm:$0xff] }
 0xb8f   :  { %16727 = vmatmul.mubr.msk.bf16.gmra.mrb[116].mxu0 %vm154_vm2, %v21388_v21  ;;  %v8350_v21 = vld [vmem:[%s23706_s0 + $0x17b] sm:$0xff] }
 0xb90   :  { %16730 = vmatprep.mubr.msk.bf16.mxu0 %vm154_vm2, %v21425_v30  ;;  %v8351_v30 = vld [vmem:[%s23706_s0 + $0x183] sm:$0xff] }
 0xb97   :  { %16731 = vmatmul.mubr.msk.bf16.gmra.mrb[120].mxu0 %vm154_vm2, %v21428_v32  ;;  %v9053_v32 = vpack.c.bf16 %v9052_v4, %v9052_v4  ;;  %v9378_v4 = vld [vmem:[%s23705_s1 + $0x15] sm:$0x7] }
 0xb98   :  { %16734 = vmatprep.mubr.msk.bf16.mxu0 %vm154_vm2, %v21465_v57  ;;  %v8383_v57 = vpack.c.bf16 %v8349_v16, %v8348_v7  ;;  %v8674_v7 = vld [vmem:[%s23706_s0 + $0x16c] sm:$0xff]  ;;  %v8675_v16 = vld [vmem:[%s23706_s0 + $0x174] sm:$0xff] }
 0xb99   :  { %v21660_v3 = vand.u32 %v9053_v32, %v18625_v6  ;;  %v9379_v32 = vpack.c.bf16 %v9378_v4, %v9378_v4  ;;  %v9032_v4 = vld [vmem:[%s23706_s0 + $0x27c] sm:$0xff] }
 0xb9b   :  { %v21797_v10 = vand.u32 %v9379_v32, %v18625_v6 }
 0xb9f   :  { %16735 = vmatmul.mubr.msk.bf16.gmra.mrb[124].mxu0 %vm154_vm2, %v21468_v61  ;;  %v8384_v61 = vpack.c.bf16 %v8351_v30, %v8350_v21  ;;  %v8676_v21 = vld [vmem:[%s23706_s0 + $0x17c] sm:$0xff]  ;;  %v8677_v30 = vld [vmem:[%s23706_s0 + $0x184] sm:$0xff] }
 0xba0   :  { %16738 = vmatprep.mubr.msk.bf16.mxu0 %vm154_vm2, %v21505_v47  ;;  %v8386_v47 = vpack.c.bf16 %v8355_v12, %v8354_v25  ;;  %v8679_v25 = vld [vmem:[%s23706_s0 + $0x194] sm:$0xff]  ;;  %v8680_v12 = vld [vmem:[%s23706_s0 + $0x19c] sm:$0xff] }
 0xba7   :  { %16739 = vmatmul.mubr.msk.bf16.gmra.mrb[128].mxu0 %vm154_vm2, %v21508_v15  ;;  %v8358_v15 = vld [vmem:[%s23706_s0 + $0x1bb] sm:$0xff] }
 0xba8   :  { %16742 = vmatprep.mubr.msk.bf16.mxu0 %vm154_vm2, %v7745_v11  ;;  %v8388_v38 = vpack.c.bf16 %v8359_v50, %v8358_v15  ;;  %v8365_v11 = vld [vmem:[%s23706_s0 + $0x1f3] sm:$0xff]  ;;  %v8684_v15 = vld [vmem:[%s23706_s0 + $0x1bc] sm:$0xff]  ;;  %v8685_v50 = vld [vmem:[%s23706_s0 + $0x1c4] sm:$0xff] }
 0xbaf   :  { %16743 = vmatmul.mubr.msk.bf16.gmra.mrb[132].mxu0 %vm154_vm2, %v7746_v27  ;;  %v8391_v27 = vpack.c.bf16 %v8365_v11, %v8364_v26  ;;  %v8690_v26 = vld [vmem:[%s23706_s0 + $0x1ec] sm:$0xff]  ;;  %v8691_v11 = vld [vmem:[%s23706_s0 + $0x1f4] sm:$0xff] }
 0xbb0   :  { %16746 = vmatprep.mubr.msk.bf16.mxu0 %vm154_vm2, %v7747_v52  ;;  %v8373_v52 = vld [vmem:[%s23706_s0 + $0x233] sm:$0xff] }
 0xbb1   :  { %v8395_v55 = vpack.c.bf16 %v8373_v52, %v8372_v51  ;;  %v8698_v51 = vld [vmem:[%s23706_s0 + $0x22c] sm:$0xff]  ;;  %v8699_v52 = vld [vmem:[%s23706_s0 + $0x234] sm:$0xff] }
 0xbb7   :  { %16747 = vmatmul.mubr.msk.bf16.gmra.mrb[136].mxu0 %vm154_vm2, %v8073_v39  ;;  %v8399_v39 = vpack.c.bf16 %v8381_v37, %v8380_v36  ;;  %v8706_v36 = vld [vmem:[%s23706_s0 + $0x26c] sm:$0xff]  ;;  %v8707_v37 = vld [vmem:[%s23706_s0 + $0x274] sm:$0xff] }
 0xbb8   :  { %16752 = vmatprep.mubr.msk.bf16.mxu0 %vm154_vm2, %v8382_v56  ;;  %v8708_v56 = vpack.c.bf16 %v8673_v49, %v8672_v45  ;;  %v8725_v45 = vpack.c.bf16 %v8707_v37, %v8706_v36  ;;  %v9704_v49 = vld [vmem:[%s23705_s1 + $0x18] sm:$0x7] }
 0xbb9   :  { %v9357_v36 = vld [vmem:[%s23706_s0 + $0x275] sm:$0xff] }
 0xbbf   :  { %16753 = vmatmul.mubr.msk.bf16.vlgmr.msra.gmra.mrb[104].mxu0 %vm154_vm2, %v8383_v57  ;;  %v21792_v57 = vpack.c.bf16 %v8675_v16, %v8674_v7  ;;  %v9033_v7 = vld [vmem:[%s23706_s0 + $0x284] sm:$0xff]  ;;  %v9324_v16 = vld [vmem:[%s23706_s0 + $0x16d] sm:$0xff] }
 0xbc0   :  { %16756 = vmatprep.mubr.msk.bf16.mxu0 %vm154_vm2, %v8384_v61  ;;  %16789 = vmatpush3.bf16.msra.mxu0 %v8783_v63  ;;  %v8398_v63 = vpack.c.bf16 %v8379_v2, %v8378_v62  ;;  %v21794_v61 = vpack.c.bf16 %v8677_v30, %v8676_v21  ;;  %v8704_v62 = vld [vmem:[%s23706_s0 + $0x25c] sm:$0xff]  ;;  %v8705_v2 = vld [vmem:[%s23706_s0 + $0x264] sm:$0xff]  ;;  %v9051_v30 = vpack.c.bf16 %v9033_v7, %v9032_v4 }
 0xbc1   :  { %16826 = vmatprep.subr.bf16.mxu0 %v21660_v3  ;;  %v9325_v21 = vld [vmem:[%s23706_s0 + $0x175] sm:$0xff] }
 0xbc2   :  { %v9360_v32 = vpack.c.bf16 %v9325_v21, %v9324_v16  ;;  %v9651_v4 = vld [vmem:[%s23706_s0 + $0x176] sm:$0xff]  ;;  %v9652_v21 = vld [vmem:[%s23706_s0 + $0x17e] sm:$0xff] }
 0xbc7   :  { %16757 = vmatmul.mubr.msk.bf16.gmra.mrb[108].mxu0 %vm154_vm2, %v8385_v13  ;;  %v8681_v13 = vld [vmem:[%s23706_s0 + $0x1a4] sm:$0xff] }
 0xbc8   :  { %16760 = vmatprep.mubr.msk.bf16.mxu0 %vm154_vm2, %v8386_v47  ;;  %v8711_v47 = vpack.c.bf16 %v8679_v25, %v8678_v44  ;;  %v21817_v5 = vpack.c.bf16 %v8681_v13, %v8680_v12  ;;  %v9329_v44 = vld [vmem:[%s23706_s0 + $0x195] sm:$0xff]  ;;  %v9330_v13 = vld [vmem:[%s23706_s0 + $0x19d] sm:$0xff] }
 0xbcf   :  { %16761 = vmatmul.mubr.msk.bf16.gmra.mrb[112].mxu0 %vm154_vm2, %v8387_v53 }
 0xbd0   :  { %16764 = vmatprep.mubr.msk.bf16.mxu0 %vm154_vm2, %v8388_v38  ;;  %v8714_v38 = vpack.c.bf16 %v8685_v50, %v8684_v15  ;;  %v9334_v50 = vld [vmem:[%s23706_s0 + $0x1bd] sm:$0xff] }
 0xbd7   :  { %16765 = vmatmul.mubr.msk.bf16.gmra.mrb[116].mxu0 %vm154_vm2, %v8389_v9  ;;  %v8715_v9 = vpack.c.bf16 %v8687_v20, %v8686_v19  ;;  %v9337_v19 = vld [vmem:[%s23706_s0 + $0x1d5] sm:$0xff] }
 0xbd8   :  { %16768 = vmatprep.mubr.msk.bf16.mxu0 %vm154_vm2, %v8390_v24  ;;  %v8716_v24 = vpack.c.bf16 %v8689_v29, %v8688_v23  ;;  %v9338_v29 = vld [vmem:[%s23706_s0 + $0x1dd] sm:$0xff] }
 0xbdf   :  { %16769 = vmatmul.mubr.msk.bf16.gmra.mrb[120].mxu0 %vm154_vm2, %v8391_v27  ;;  %v8717_v27 = vpack.c.bf16 %v8691_v11, %v8690_v26  ;;  %v9341_v26 = vld [vmem:[%s23706_s0 + $0x1f5] sm:$0xff] }
 0xbe0   :  { %16772 = vmatprep.mubr.msk.bf16.mxu0 %vm154_vm2, %v8392_v28  ;;  %v8718_v28 = vpack.c.bf16 %v8693_v1, %v8692_v18  ;;  %v9342_v1 = vld [vmem:[%s23706_s0 + $0x1fd] sm:$0xff] }
 0xbe7   :  { %16773 = vmatmul.mubr.msk.bf16.gmra.mrb[124].mxu0 %vm154_vm2, %v8393_v35  ;;  %v8719_v35 = vpack.c.bf16 %v8695_v14, %v8694_v31  ;;  %v9345_v31 = vld [vmem:[%s23706_s0 + $0x215] sm:$0xff] }
 0xbe8   :  { %16776 = vmatprep.mubr.msk.bf16.mxu0 %vm154_vm2, %v8394_v46  ;;  %v8720_v46 = vpack.c.bf16 %v8697_v34, %v8696_v33  ;;  %v9346_v34 = vld [vmem:[%s23706_s0 + $0x21d] sm:$0xff] }
 0xbef   :  { %16777 = vmatmul.mubr.msk.bf16.gmra.mrb[128].mxu0 %vm154_vm2, %v8395_v55  ;;  %v8721_v55 = vpack.c.bf16 %v8699_v52, %v8698_v51  ;;  %v9349_v51 = vld [vmem:[%s23706_s0 + $0x235] sm:$0xff] }
 0xbf0   :  { %16780 = vmatprep.mubr.msk.bf16.mxu0 %vm154_vm2, %v8396_v41  ;;  %v8722_v41 = vpack.c.bf16 %v8701_v54, %v8700_v40  ;;  %v9350_v54 = vld [vmem:[%s23706_s0 + $0x23d] sm:$0xff] }
 0xbf7   :  { %16781 = vmatmul.mubr.msk.bf16.gmra.mrb[132].mxu0 %vm154_vm2, %v8397_v0  ;;  %v8723_v0 = vpack.c.bf16 %v8703_v60, %v8702_v58  ;;  %v9353_v58 = vld [vmem:[%s23706_s0 + $0x255] sm:$0xff] }
 0xbf8   :  { %16784 = vmatprep.mubr.msk.bf16.mxu0 %vm154_vm2, %v8398_v63  ;;  %v8724_v63 = vpack.c.bf16 %v8705_v2, %v8704_v62  ;;  %v9354_v2 = vld [vmem:[%s23706_s0 + $0x25d] sm:$0xff] }
 0xbff   :  { %16785 = vmatmul.mubr.msk.bf16.gmra.mrb[136].mxu0 %vm154_vm2, %v8399_v39  ;;  %v9705_v39 = vpack.c.bf16 %v9704_v49, %v9704_v49  ;;  %v9358_v49 = vld [vmem:[%s23706_s0 + $0x27d] sm:$0xff] }
 0xc00   :  { %16790 = vmatprep.mubr.msk.bf16.mxu0 %vm154_vm2, %v8708_v56 }
 0xc01   :  { %v9761_v56 = vand.u32 %v9705_v39, %v18625_v6  ;;  %v9359_v39 = vld [vmem:[%s23706_s0 + $0x285] sm:$0xff] }
 0xc02   :  { %v9377_v7 = vpack.c.bf16 %v9359_v39, %v9358_v49  ;;  %v18250_v49 = vld [vmem:[%s23707_s10 + $0x4] ss:$12 sps:$4 sm:$0xff]   ;;  %v22203_v39 = vld [vmem:[%s23708_s2] ss:$0 sm:$0xff] }
 0xc03   :  { %10528 = vmatprep.mubr.bf16.mxu1 %v18250_v49 }
 0xc07   :  { %16791 = vmatmul.mubr.msk.bf16.vlgmr.msra.gmra.mrb[104].mxu0 %vm154_vm2, %v21792_v57 }
 0xc08   :  { %16794 = vmatprep.mubr.msk.bf16.mxu0 %vm154_vm2, %v21794_v61  ;;  %16827 = vmatpush3.bf16.msra.mxu0 %v21660_v3  ;;  %v8682_v3 = vld [vmem:[%s23706_s0 + $0x1ac] sm:$0xff] }
 0xc09   :  { %16864 = vmatprep.subr.bf16.mxu0 %v21797_v10  ;;  %v8713_v53 = vpack.c.bf16 %v8683_v17, %v8682_v3  ;;  %v9333_v3 = vld [vmem:[%s23706_s0 + $0x1b5] sm:$0xff] }
 0xc0f   :  { %16795 = vmatmul.mubr.msk.bf16.gmra.mrb[108].mxu0 %vm154_vm2, %v8711_v47 }
 0xc10   :  { %16798 = vmatprep.mubr.msk.bf16.mxu0 %vm154_vm2, %v21817_v5 }
 0xc17   :  { %16799 = vmatmul.mubr.msk.bf16.gmra.mrb[112].mxu0 %vm154_vm2, %v8713_v53 }
 0xc18   :  { %16802 = vmatprep.mubr.msk.bf16.mxu0 %vm154_vm2, %v8714_v38 }
 0xc1f   :  { %16803 = vmatmul.mubr.msk.bf16.gmra.mrb[116].mxu0 %vm154_vm2, %v8715_v9 }
 0xc20   :  { %16806 = vmatprep.mubr.msk.bf16.mxu0 %vm154_vm2, %v8716_v24 }
 0xc27   :  { %16807 = vmatmul.mubr.msk.bf16.gmra.mrb[120].mxu0 %vm154_vm2, %v8717_v27 }
 0xc28   :  { %16810 = vmatprep.mubr.msk.bf16.mxu0 %vm154_vm2, %v8718_v28 }
 0xc2f   :  { %16811 = vmatmul.mubr.msk.bf16.gmra.mrb[124].mxu0 %vm154_vm2, %v8719_v35 }
 0xc30   :  { %16814 = vmatprep.mubr.msk.bf16.mxu0 %vm154_vm2, %v8720_v46 }
 0xc37   :  { %16815 = vmatmul.mubr.msk.bf16.gmra.mrb[128].mxu0 %vm154_vm2, %v8721_v55 }
 0xc38   :  { %16818 = vmatprep.mubr.msk.bf16.mxu0 %vm154_vm2, %v8722_v41 }
 0xc3f   :  { %16819 = vmatmul.mubr.msk.bf16.gmra.mrb[132].mxu0 %vm154_vm2, %v8723_v0 }
 0xc40   :  { %16822 = vmatprep.mubr.msk.bf16.mxu0 %vm154_vm2, %v8724_v63 }
 0xc47   :  { %16823 = vmatmul.mubr.msk.bf16.gmra.mrb[136].mxu0 %vm154_vm2, %v8725_v45 }
 0xc48   :  { %16828 = vmatprep.mubr.msk.bf16.mxu0 %vm154_vm2, %v21792_v57  ;;  %v9326_v57 = vld [vmem:[%s23706_s0 + $0x17d] sm:$0xff] }
 0xc4f   :  { %16829 = vmatmul.mubr.msk.bf16.vlgmr.msra.gmra.mrb[104].mxu0 %vm154_vm2, %v21794_v61  ;;  %v9327_v61 = vld [vmem:[%s23706_s0 + $0x185] sm:$0xff] }
 0xc50   :  { %16832 = vmatprep.mubr.msk.bf16.mxu0 %vm154_vm2, %v8711_v47  ;;  %16865 = vmatpush3.bf16.msra.mxu0 %v21797_v10  ;;  %v9328_v10 = vld [vmem:[%s23706_s0 + $0x18d] sm:$0xff]  ;;  %v9361_v25 = vpack.c.bf16 %v9327_v61, %v9326_v57  ;;  %v9331_v47 = vld [vmem:[%s23706_s0 + $0x1a5] sm:$0xff]  ;;  %v9655_v57 = vld [vmem:[%s23706_s0 + $0x196] sm:$0xff] }
 0xc51   :  { %16902 = vmatprep.subr.bf16.mxu0 %v9761_v56  ;;  %v9362_v12 = vpack.c.bf16 %v9329_v44, %v9328_v10  ;;  %v9363_v17 = vpack.c.bf16 %v9331_v47, %v9330_v13  ;;  %v9656_v44 = vld [vmem:[%s23706_s0 + $0x19e] sm:$0xff]  ;;  %v9659_v13 = vld [vmem:[%s23706_s0 + $0x1b6] sm:$0xff] }
 0xc57   :  { %16833 = vmatmul.mubr.msk.bf16.gmra.mrb[108].mxu0 %vm154_vm2, %v21817_v5  ;;  %v9332_v5 = vld [vmem:[%s23706_s0 + $0x1ad] sm:$0xff] }
 0xc58   :  { %16836 = vmatprep.mubr.msk.bf16.mxu0 %vm154_vm2, %v8713_v53  ;;  %v9364_v15 = vpack.c.bf16 %v9333_v3, %v9332_v5  ;;  %v9335_v53 = vld [vmem:[%s23706_s0 + $0x1c5] sm:$0xff] }
 0xc59   :  { %v9365_v20 = vpack.c.bf16 %v9335_v53, %v9334_v50  ;;  %v9660_v3 = vld [vmem:[%s23706_s0 + $0x1be] sm:$0xff]  ;;  %v9663_v50 = vld [vmem:[%s23706_s0 + $0x1d6] sm:$0xff] }
 0xc5f   :  { %16837 = vmatmul.mubr.msk.bf16.gmra.mrb[112].mxu0 %vm154_vm2, %v8714_v38  ;;  %v9336_v38 = vld [vmem:[%s23706_s0 + $0x1cd] sm:$0xff] }
 0xc60   :  { %16840 = vmatprep.mubr.msk.bf16.mxu0 %vm154_vm2, %v8715_v9  ;;  %v9366_v23 = vpack.c.bf16 %v9337_v19, %v9336_v38  ;;  %v9339_v9 = vld [vmem:[%s23706_s0 + $0x1e5] sm:$0xff] }
 0xc61   :  { %v9367_v11 = vpack.c.bf16 %v9339_v9, %v9338_v29  ;;  %v9664_v19 = vld [vmem:[%s23706_s0 + $0x1de] sm:$0xff]  ;;  %v9667_v29 = vld [vmem:[%s23706_s0 + $0x1f6] sm:$0xff] }
 0xc67   :  { %16841 = vmatmul.mubr.msk.bf16.gmra.mrb[116].mxu0 %vm154_vm2, %v8716_v24  ;;  %v9340_v24 = vld [vmem:[%s23706_s0 + $0x1ed] sm:$0xff] }
 0xc68   :  { %16844 = vmatprep.mubr.msk.bf16.mxu0 %vm154_vm2, %v8717_v27  ;;  %v9368_v18 = vpack.c.bf16 %v9341_v26, %v9340_v24  ;;  %v9343_v27 = vld [vmem:[%s23706_s0 + $0x205] sm:$0xff] }
 0xc69   :  { %v9369_v14 = vpack.c.bf16 %v9343_v27, %v9342_v1  ;;  %v9668_v26 = vld [vmem:[%s23706_s0 + $0x1fe] sm:$0xff]  ;;  %v9671_v1 = vld [vmem:[%s23706_s0 + $0x216] sm:$0xff] }
 0xc6f   :  { %16845 = vmatmul.mubr.msk.bf16.gmra.mrb[120].mxu0 %vm154_vm2, %v8718_v28  ;;  %v9344_v28 = vld [vmem:[%s23706_s0 + $0x20d] sm:$0xff] }
 0xc70   :  { %16848 = vmatprep.mubr.msk.bf16.mxu0 %vm154_vm2, %v8719_v35  ;;  %v9370_v33 = vpack.c.bf16 %v9345_v31, %v9344_v28  ;;  %v9347_v35 = vld [vmem:[%s23706_s0 + $0x225] sm:$0xff] }
 0xc71   :  { %v9371_v52 = vpack.c.bf16 %v9347_v35, %v9346_v34  ;;  %v9672_v31 = vld [vmem:[%s23706_s0 + $0x21e] sm:$0xff]  ;;  %v9675_v34 = vld [vmem:[%s23706_s0 + $0x236] sm:$0xff] }
 0xc77   :  { %16849 = vmatmul.mubr.msk.bf16.gmra.mrb[124].mxu0 %vm154_vm2, %v8720_v46  ;;  %v9348_v46 = vld [vmem:[%s23706_s0 + $0x22d] sm:$0xff] }
 0xc78   :  { %16852 = vmatprep.mubr.msk.bf16.mxu0 %vm154_vm2, %v8721_v55  ;;  %v9372_v40 = vpack.c.bf16 %v9349_v51, %v9348_v46  ;;  %v9351_v55 = vld [vmem:[%s23706_s0 + $0x245] sm:$0xff] }
 0xc79   :  { %v9373_v60 = vpack.c.bf16 %v9351_v55, %v9350_v54  ;;  %v9676_v51 = vld [vmem:[%s23706_s0 + $0x23e] sm:$0xff]  ;;  %v9679_v54 = vld [vmem:[%s23706_s0 + $0x256] sm:$0xff] }
 0xc7f   :  { %16853 = vmatmul.mubr.msk.bf16.gmra.mrb[128].mxu0 %vm154_vm2, %v8722_v41  ;;  %v9352_v41 = vld [vmem:[%s23706_s0 + $0x24d] sm:$0xff] }
 0xc80   :  { %16856 = vmatprep.mubr.msk.bf16.mxu0 %vm154_vm2, %v8723_v0  ;;  %v9374_v62 = vpack.c.bf16 %v9353_v58, %v9352_v41  ;;  %v9355_v0 = vld [vmem:[%s23706_s0 + $0x265] sm:$0xff] }
 0xc81   :  { %v9375_v37 = vpack.c.bf16 %v9355_v0, %v9354_v2  ;;  %v9680_v58 = vld [vmem:[%s23706_s0 + $0x25e] sm:$0xff]  ;;  %v9683_v2 = vld [vmem:[%s23706_s0 + $0x276] sm:$0xff] }
 0xc87   :  { %16857 = vmatmul.mubr.msk.bf16.gmra.mrb[132].mxu0 %vm154_vm2, %v8724_v63  ;;  %v9356_v63 = vld [vmem:[%s23706_s0 + $0x26d] sm:$0xff] }
 0xc88   :  { %16860 = vmatprep.mubr.msk.bf16.mxu0 %vm154_vm2, %v8725_v45  ;;  %v9376_v45 = vpack.c.bf16 %v9357_v36, %v9356_v63  ;;  %v9684_v36 = vld [vmem:[%s23706_s0 + $0x27e] sm:$0xff] }
 0xc8f   :  { %16861 = vmatmul.mubr.msk.bf16.gmra.mrb[136].mxu0 %vm154_vm2, %v9051_v30  ;;  %v9653_v30 = vld [vmem:[%s23706_s0 + $0x186] sm:$0xff] }
 0xc90   :  { %16866 = vmatprep.mubr.msk.bf16.mxu0 %vm154_vm2, %v9360_v32  ;;  %v9654_v32 = vld [vmem:[%s23706_s0 + $0x18e] sm:$0xff]  ;;  %v9687_v61 = vpack.c.bf16 %v9653_v30, %v9652_v21 }
 0xc91   :  { %v9688_v10 = vpack.c.bf16 %v9655_v57, %v9654_v32 }
 0xc97   :  { %16867 = vmatmul.mubr.msk.bf16.vlgmr.msra.gmra.mrb[104].mxu0 %vm154_vm2, %v9361_v25  ;;  %v9657_v25 = vld [vmem:[%s23706_s0 + $0x1a6] sm:$0xff] }
 0xc98   :  { %16870 = vmatprep.mubr.msk.bf16.mxu0 %vm154_vm2, %v9362_v12  ;;  %16903 = vmatpush3.bf16.msra.mxu0 %v9761_v56  ;;  %v9650_v56 = vld [vmem:[%s23706_s0 + $0x16e] sm:$0xff]  ;;  %v9689_v47 = vpack.c.bf16 %v9657_v25, %v9656_v44 }
 0xc99   :  { %v9686_v16 = vpack.c.bf16 %v9651_v4, %v9650_v56  ;;  %v9658_v12 = vld [vmem:[%s23706_s0 + $0x1ae] sm:$0xff] }
 0xc9a   :  { %v9690_v5 = vpack.c.bf16 %v9659_v13, %v9658_v12 }
 0xc9f   :  { %16871 = vmatmul.mubr.msk.bf16.gmra.mrb[108].mxu0 %vm154_vm2, %v9363_v17  ;;  %v9661_v17 = vld [vmem:[%s23706_s0 + $0x1c6] sm:$0xff] }
 0xca0   :  { %16874 = vmatprep.mubr.msk.bf16.mxu0 %vm154_vm2, %v9364_v15  ;;  %v9662_v15 = vld [vmem:[%s23706_s0 + $0x1ce] sm:$0xff]  ;;  %v9691_v53 = vpack.c.bf16 %v9661_v17, %v9660_v3 }
 0xca1   :  { %v9692_v38 = vpack.c.bf16 %v9663_v50, %v9662_v15 }
 0xca7   :  { %16875 = vmatmul.mubr.msk.bf16.gmra.mrb[112].mxu0 %vm154_vm2, %v9365_v20  ;;  %v9665_v20 = vld [vmem:[%s23706_s0 + $0x1e6] sm:$0xff] }
 0xca8   :  { %16878 = vmatprep.mubr.msk.bf16.mxu0 %vm154_vm2, %v9366_v23  ;;  %v9666_v23 = vld [vmem:[%s23706_s0 + $0x1ee] sm:$0xff]  ;;  %v9693_v9 = vpack.c.bf16 %v9665_v20, %v9664_v19 }
 0xca9   :  { %v9694_v24 = vpack.c.bf16 %v9667_v29, %v9666_v23 }
 0xcaf   :  { %16879 = vmatmul.mubr.msk.bf16.gmra.mrb[116].mxu0 %vm154_vm2, %v9367_v11  ;;  %v9669_v11 = vld [vmem:[%s23706_s0 + $0x206] sm:$0xff] }
 0xcb0   :  { %16882 = vmatprep.mubr.msk.bf16.mxu0 %vm154_vm2, %v9368_v18  ;;  %v9670_v18 = vld [vmem:[%s23706_s0 + $0x20e] sm:$0xff]  ;;  %v9695_v27 = vpack.c.bf16 %v9669_v11, %v9668_v26 }
 0xcb1   :  { %v9696_v28 = vpack.c.bf16 %v9671_v1, %v9670_v18 }
 0xcb7   :  { %16883 = vmatmul.mubr.msk.bf16.gmra.mrb[120].mxu0 %vm154_vm2, %v9369_v14  ;;  %v9673_v14 = vld [vmem:[%s23706_s0 + $0x226] sm:$0xff] }
 0xcb8   :  { %16886 = vmatprep.mubr.msk.bf16.mxu0 %vm154_vm2, %v9370_v33  ;;  %v9674_v33 = vld [vmem:[%s23706_s0 + $0x22e] sm:$0xff]  ;;  %v9697_v35 = vpack.c.bf16 %v9673_v14, %v9672_v31 }
 0xcb9   :  { %v9698_v46 = vpack.c.bf16 %v9675_v34, %v9674_v33 }
 0xcbf   :  { %16887 = vmatmul.mubr.msk.bf16.gmra.mrb[124].mxu0 %vm154_vm2, %v9371_v52  ;;  %v9677_v52 = vld [vmem:[%s23706_s0 + $0x246] sm:$0xff] }
 0xcc0   :  { %16890 = vmatprep.mubr.msk.bf16.mxu0 %vm154_vm2, %v9372_v40  ;;  %v9678_v40 = vld [vmem:[%s23706_s0 + $0x24e] sm:$0xff]  ;;  %v9699_v55 = vpack.c.bf16 %v9677_v52, %v9676_v51 }
 0xcc1   :  { %v9700_v41 = vpack.c.bf16 %v9679_v54, %v9678_v40 }
 0xcc7   :  { %16891 = vmatmul.mubr.msk.bf16.gmra.mrb[128].mxu0 %vm154_vm2, %v9373_v60  ;;  %v9681_v60 = vld [vmem:[%s23706_s0 + $0x266] sm:$0xff] }
 0xcc8   :  { %16894 = vmatprep.mubr.msk.bf16.mxu0 %vm154_vm2, %v9374_v62  ;;  %v9682_v62 = vld [vmem:[%s23706_s0 + $0x26e] sm:$0xff]  ;;  %v9701_v0 = vpack.c.bf16 %v9681_v60, %v9680_v58 }
 0xcc9   :  { %v9702_v63 = vpack.c.bf16 %v9683_v2, %v9682_v62 }
 0xccf   :  { %16895 = vmatmul.mubr.msk.bf16.gmra.mrb[132].mxu0 %vm154_vm2, %v9375_v37  ;;  %v9685_v37 = vld [vmem:[%s23706_s0 + $0x286] sm:$0xff] }
 0xcd0   :  { %16898 = vmatprep.mubr.msk.bf16.mxu0 %vm154_vm2, %v9376_v45  ;;  %v9703_v45 = vpack.c.bf16 %v9685_v37, %v9684_v36 }
 0xcd7   :  { %16899 = vmatmul.mubr.msk.bf16.gmra.mrb[136].mxu0 %vm154_vm2, %v9377_v7 }
 0xcd8   :  { %16904 = vmatprep.mubr.msk.bf16.mxu0 %vm154_vm2, %v9686_v16 }
 0xcdf   :  { %16905 = vmatmul.mubr.msk.bf16.vlgmr.msra.gmra.mrb[104].mxu0 %vm154_vm2, %v9687_v61 }
 0xce0   :  { %16908 = vmatprep.mubr.msk.bf16.mxu0 %vm154_vm2, %v9688_v10 }
 0xce7   :  { %16909 = vmatmul.mubr.msk.bf16.gmra.mrb[108].mxu0 %vm154_vm2, %v9689_v47 }
 0xce8   :  { %16912 = vmatprep.mubr.msk.bf16.mxu0 %vm154_vm2, %v9690_v5 }
 0xcef   :  { %16913 = vmatmul.mubr.msk.bf16.gmra.mrb[112].mxu0 %vm154_vm2, %v9691_v53 }
 0xcf0   :  { %16916 = vmatprep.mubr.msk.bf16.mxu0 %vm154_vm2, %v9692_v38 }
 0xcf7   :  { %16917 = vmatmul.mubr.msk.bf16.gmra.mrb[116].mxu0 %vm154_vm2, %v9693_v9 }
 0xcf8   :  { %16920 = vmatprep.mubr.msk.bf16.mxu0 %vm154_vm2, %v9694_v24 }
 0xcff   :  { %16921 = vmatmul.mubr.msk.bf16.gmra.mrb[120].mxu0 %vm154_vm2, %v9695_v27 }
 0xd00   :  { %16924 = vmatprep.mubr.msk.bf16.mxu0 %vm154_vm2, %v9696_v28 }
 0xd07   :  { %16925 = vmatmul.mubr.msk.bf16.gmra.mrb[124].mxu0 %vm154_vm2, %v9697_v35 }
 0xd08   :  { %16928 = vmatprep.mubr.msk.bf16.mxu0 %vm154_vm2, %v9698_v46 }
 0xd0f   :  { %16929 = vmatmul.mubr.msk.bf16.gmra.mrb[128].mxu0 %vm154_vm2, %v9699_v55 }
 0xd10   :  { %16932 = vmatprep.mubr.msk.bf16.mxu0 %vm154_vm2, %v9700_v41 }
 0xd17   :  { %16933 = vmatmul.mubr.msk.bf16.gmra.mrb[132].mxu0 %vm154_vm2, %v9701_v0 }
 0xd18   :  { %16936 = vmatprep.mubr.msk.bf16.mxu0 %vm154_vm2, %v9702_v63 }
 0xd1f   :  { %16937 = vmatmul.mubr.msk.bf16.gmra.mrb[136].mxu0 %vm154_vm2, %v9703_v45 }
 0xdb2   :  { %v16906_v56 = vpop.f32.mrb[104].mxu0 }
 0xdb3   :  { %v9985_v4 = vadd.f32 %v16906_v56, %v22203_v39  ;;  %v9797_v7 = vpop.f32.mrb[105].mxu0 }
 0xdb4   :  { %v9983_v16 = vadd.f32 %v22203_v39, %v9797_v7  ;;  %v16907_v21 = vpop.f32.mrb[106].mxu0 }
 0xdb5   :  { %v10021_v30 = vmax.f32 %v9985_v4, 0.0  ;;  %v9986_v32 = vadd.f32 %v16907_v21, %v22203_v39  ;;  %v9800_v57 = vpop.f32.mrb[107].mxu0 }
 0xdb6   :  { %v10019_v61 = vmax.f32 %v9983_v16, 0.0  ;;  %v9984_v10 = vadd.f32 %v22203_v39, %v9800_v57 }
 0xdb7   :  { %10057 = vst.msk [vmem:[#allocation2 + $0x10] sm:$0xff] %vm2988_vm4, %v10021_v30  ;;  %v10022_v44 = vmax.f32 %v9986_v32, 0.0 }
 0xdb8   :  { %10055 = vst.msk [vmem:[#allocation2] sm:$0xff] %vm2988_vm4, %v10019_v61  ;;  %v10020_v25 = vmax.f32 %v9984_v10, 0.0 }
 0xdb9   :  { %10058 = vst.msk [vmem:[#allocation2 + $0x18] sm:$0xff] %vm2988_vm4, %v10022_v44 }
 0xdba   :  { %10056 = vst.msk [vmem:[#allocation2 + $0x8] sm:$0xff] %vm2988_vm4, %v10020_v25  ;;  %v16910_v12 = vpop.f32.mrb[108].mxu0 }
 0xdbb   :  { %v9989_v13 = vadd.f32 %v16910_v12, %v22203_v39  ;;  %v9813_v47 = vpop.f32.mrb[109].mxu0 }
 0xdbc   :  { %v9987_v5 = vadd.f32 %v22203_v39, %v9813_v47  ;;  %v16911_v3 = vpop.f32.mrb[110].mxu0 }
 0xdbd   :  { %v10025_v17 = vmax.f32 %v9989_v13, 0.0  ;;  %v9990_v15 = vadd.f32 %v16911_v3, %v22203_v39  ;;  %v9816_v50 = vpop.f32.mrb[111].mxu0 }
 0xdbe   :  { %v10023_v53 = vmax.f32 %v9987_v5, 0.0  ;;  %v9988_v38 = vadd.f32 %v22203_v39, %v9816_v50 }
 0xdbf   :  { %10061 = vst.msk [vmem:[#allocation2 + $0x30] sm:$0xff] %vm2988_vm4, %v10025_v17  ;;  %v10026_v19 = vmax.f32 %v9990_v15, 0.0 }
 0xdc0   :  { %10059 = vst.msk [vmem:[#allocation2 + $0x20] sm:$0xff] %vm2988_vm4, %v10023_v53  ;;  %v10024_v20 = vmax.f32 %v9988_v38, 0.0  ;;  %v10193_v5 = vld [vmem:[#allocation2 + $0x12] sm:$0xff] }
 0xdc1   :  { %10062 = vst.msk [vmem:[#allocation2 + $0x38] sm:$0xff] %vm2988_vm4, %v10026_v19  ;;  %v10125_v47 = vld [vmem:[#allocation2 + $0x1] sm:$0xff]  ;;  %v10227_v3 = vld [vmem:[#allocation2 + $0x13] sm:$0xff]  ;;  %v10126_v53 = vld [vmem:[#allocation2 + $0x9] sm:$0xff] }
 0xdc2   :  { %10060 = vst.msk [vmem:[#allocation2 + $0x28] sm:$0xff] %vm2988_vm4, %v10024_v20  ;;  %v16914_v23 = vpop.f32.mrb[112].mxu0  ;;  %v10092_v50 = vld [vmem:[#allocation2 + $0x8] sm:$0xff]  ;;  %v10091_v19 = vld [vmem:[#allocation2] sm:$0xff] }
 0xdc3   :  { %v9993_v29 = vadd.f32 %v16914_v23, %v22203_v39  ;;  %v9829_v9 = vpop.f32.mrb[113].mxu0 }
 0xdc4   :  { %v9991_v24 = vadd.f32 %v22203_v39, %v9829_v9  ;;  %v16915_v26 = vpop.f32.mrb[114].mxu0  ;;  %v10261_v9 = vmax.f32 %v10193_v5, %v10227_v3 }
 0xdc5   :  { %v10029_v11 = vmax.f32 %v9993_v29, 0.0  ;;  %v9994_v18 = vadd.f32 %v16915_v26, %v22203_v39  ;;  %v9832_v1 = vpop.f32.mrb[115].mxu0  ;;  %v10159_v29 = vmax.f32 %v10091_v19, %v10125_v47  ;;  %v10160_v26 = vmax.f32 %v10092_v50, %v10126_v53 }
 0xdc6   :  { %v10027_v27 = vmax.f32 %v9991_v24, 0.0  ;;  %v9992_v28 = vadd.f32 %v22203_v39, %v9832_v1 }
 0xdc7   :  { %10065 = vst.msk [vmem:[#allocation2 + $0x50] sm:$0xff] %vm2988_vm4, %v10029_v11  ;;  %v10030_v31 = vmax.f32 %v9994_v18, 0.0  ;;  %v10194_v10 = vld [vmem:[#allocation2 + $0x1a] sm:$0xff] }
 0xdc8   :  { %10063 = vst.msk [vmem:[#allocation2 + $0x40] sm:$0xff] %vm2988_vm4, %v10027_v27  ;;  %v10028_v14 = vmax.f32 %v9992_v28, 0.0  ;;  %v10228_v44 = vld [vmem:[#allocation2 + $0x1b] sm:$0xff]  ;;  %v22251_v24 = vld [vmem:[#allocation2 + $0x32] sm:$0xff] }
 0xdc9   :  { %10066 = vst.msk [vmem:[#allocation2 + $0x58] sm:$0xff] %vm2988_vm4, %v10030_v31  ;;  %v10262_v20 = vmax.f32 %v10194_v10, %v10228_v44  ;;  %v22254_v11 = vld [vmem:[#allocation2 + $0x22] sm:$0xff]  ;;  %v22256_v1 = vld [vmem:[#allocation2 + $0x33] sm:$0xff] }
 0xdca   :  { %10064 = vst.msk [vmem:[#allocation2 + $0x48] sm:$0xff] %vm2988_vm4, %v10028_v14  ;;  %v16918_v33 = vpop.f32.mrb[116].mxu0  ;;  %v10229_v18 = vld [vmem:[#allocation2 + $0x23] sm:$0xff]  ;;  %v10127_v28 = vld [vmem:[#allocation2 + $0x11] sm:$0xff]  ;;  %v10128_v31 = vld [vmem:[#allocation2 + $0x19] sm:$0xff] }
 0xdcb   :  { %v9997_v34 = vadd.f32 %v16918_v33, %v22203_v39  ;;  %v9845_v35 = vpop.f32.mrb[117].mxu0  ;;  %v10196_v14 = vld [vmem:[#allocation2 + $0x2a] sm:$0xff] }
 0xdcc   :  { %v9995_v46 = vadd.f32 %v22203_v39, %v9845_v35  ;;  %v16919_v51 = vpop.f32.mrb[118].mxu0  ;;  %v10230_v33 = vld [vmem:[#allocation2 + $0x2b] sm:$0xff] }
 0xdcd   :  { %v10033_v52 = vmax.f32 %v9997_v34, 0.0  ;;  %v9998_v40 = vadd.f32 %v16919_v51, %v22203_v39  ;;  %v9848_v54 = vpop.f32.mrb[119].mxu0  ;;  %v10129_v34 = vld [vmem:[#allocation2 + $0x21] sm:$0xff] }
 0xdce   :  { %v10031_v55 = vmax.f32 %v9995_v46, 0.0  ;;  %v9996_v41 = vadd.f32 %v22203_v39, %v9848_v54  ;;  %v22260_v54 = vmax.f32 %v10160_v26, %v10262_v20  ;;  %v10096_v44 = vld [vmem:[#allocation2 + $0x28] sm:$0xff] }
 0xdcf   :  { %10069 = vst.msk [vmem:[#allocation2 + $0x70] sm:$0xff] %vm2988_vm4, %v10033_v52  ;;  %v10034_v58 = vmax.f32 %v9998_v40, 0.0 }
 0xdd0   :  { %10067 = vst.msk [vmem:[#allocation2 + $0x60] sm:$0xff] %vm2988_vm4, %v10031_v55  ;;  %v10032_v60 = vmax.f32 %v9996_v41, 0.0 }
 0xdd1   :  { %10070 = vst.msk [vmem:[#allocation2 + $0x78] sm:$0xff] %vm2988_vm4, %v10034_v58  ;;  %v22263_v58 = vmax.f32 %v10159_v29, %v10261_v9  ;;  %v22282_v9 = vld [vmem:[#allocation2 + $0x30] sm:$0xff] }
 0xdd2   :  { %10068 = vst.msk [vmem:[#allocation2 + $0x68] sm:$0xff] %vm2988_vm4, %v10032_v60  ;;  %v16922_v62 = vpop.f32.mrb[120].mxu0  ;;  %v10093_v60 = vld [vmem:[#allocation2 + $0x10] sm:$0xff] }
 0xdd3   :  { %v10001_v2 = vadd.f32 %v16922_v62, %v22203_v39  ;;  %v9861_v0 = vpop.f32.mrb[121].mxu0  ;;  %v10094_v62 = vld [vmem:[#allocation2 + $0x18] sm:$0xff]  ;;  %v10355_v3 = vpack.c.bf16 %v22260_v54, %v22263_v58 }
 0xdd4   :  { %v9999_v63 = vadd.f32 %v22203_v39, %v9861_v0  ;;  %v16923_v36 = vpop.f32.mrb[122].mxu0  ;;  %v10095_v0 = vld [vmem:[#allocation2 + $0x20] sm:$0xff]  ;;  %v10162_v50 = vmax.f32 %v10094_v62, %v10128_v31 }
 0xdd5   :  { %v10037_v37 = vmax.f32 %v10001_v2, 0.0  ;;  %v10002_v45 = vadd.f32 %v16923_v36, %v22203_v39  ;;  %v9864_v49 = vpop.f32.mrb[123].mxu0  ;;  %v10263_v2 = vmax.f32 %v22254_v11, %v10229_v18  ;;  %v22268_v36 = vld [vmem:[#allocation2 + $0x3b] sm:$0xff] }
 0xdd6   :  { %v10035_v56 = vmax.f32 %v9999_v63, 0.0  ;;  %v10000_v4 = vadd.f32 %v22203_v39, %v9864_v49  ;;  %v22266_v63 = vld [vmem:[#allocation2 + $0x3a] sm:$0xff] }
 0xdd7   :  { %10073 = vst.msk [vmem:[#allocation2 + $0x90] sm:$0xff] %vm2988_vm4, %v10037_v37  ;;  %v10038_v7 = vmax.f32 %v10002_v45, 0.0  ;;  %v10265_v37 = vmax.f32 %v22251_v24, %v22256_v1  ;;  %v10266_v29 = vmax.f32 %v22266_v63, %v22268_v36  ;;  %v22284_v24 = vld [vmem:[#allocation2 + $0x42] sm:$0xff] }
 0xdd8   :  { %10071 = vst.msk [vmem:[#allocation2 + $0x80] sm:$0xff] %vm2988_vm4, %v10035_v56  ;;  %v10036_v16 = vmax.f32 %v10000_v4, 0.0  ;;  %v22334_v58 = vld [vmem:[#allocation2 + $0x5b] sm:$0xff] }
 0xdd9   :  { %10074 = vst.msk [vmem:[#allocation2 + $0x98] sm:$0xff] %vm2988_vm4, %v10038_v7 }
 0xdda   :  { %10072 = vst.msk [vmem:[#allocation2 + $0x88] sm:$0xff] %vm2988_vm4, %v10036_v16  ;;  %v16926_v21 = vpop.f32.mrb[124].mxu0 }
 0xddb   :  { %v10005_v30 = vadd.f32 %v16926_v21, %v22203_v39  ;;  %v9877_v32 = vpop.f32.mrb[125].mxu0  ;;  %v10264_v21 = vmax.f32 %v10196_v14, %v10230_v33 }
 0xddc   :  { %v10003_v57 = vadd.f32 %v22203_v39, %v9877_v32  ;;  %v16927_v61 = vpop.f32.mrb[126].mxu0 }
 0xddd   :  { %v10041_v25 = vmax.f32 %v10005_v30, 0.0  ;;  %v10006_v12 = vadd.f32 %v16927_v61, %v22203_v39  ;;  %v9880_v13 = vpop.f32.mrb[127].mxu0  ;;  %v10163_v30 = vmax.f32 %v10095_v0, %v10129_v34 }
 0xdde   :  { %v10039_v17 = vmax.f32 %v10003_v57, 0.0  ;;  %v10004_v15 = vadd.f32 %v22203_v39, %v9880_v13  ;;  %v10109_v20 = vld [vmem:[#allocation2 + $0x90] sm:$0xff] }
 0xddf   :  { %10077 = vst.msk [vmem:[#allocation2 + $0xb0] sm:$0xff] %vm2988_vm4, %v10041_v25  ;;  %v10042_v38 = vmax.f32 %v10006_v12, 0.0  ;;  %v10107_v4 = vld [vmem:[#allocation2 + $0x80] sm:$0xff]  ;;  %v10130_v25 = vld [vmem:[#allocation2 + $0x29] sm:$0xff]  ;;  %v22274_v12 = vld [vmem:[#allocation2 + $0x31] sm:$0xff]  ;;  %v22291_v31 = vmax.f32 %v10163_v30, %v10265_v37 }
 0xde0   :  { %10075 = vst.msk [vmem:[#allocation2 + $0xa0] sm:$0xff] %vm2988_vm4, %v10039_v17  ;;  %v10040_v23 = vmax.f32 %v10004_v15, 0.0  ;;  %v10209_v52 = vld [vmem:[#allocation2 + $0x92] sm:$0xff]  ;;  %v10161_v15 = vmax.f32 %v10093_v60, %v10127_v28  ;;  %v10164_v28 = vmax.f32 %v10096_v44, %v10130_v25  ;;  %v10165_v37 = vmax.f32 %v22282_v9, %v22274_v12  ;;  %v22306_v30 = vld [vmem:[#allocation2 + $0x4a] sm:$0xff] }
 0xde1   :  { %10078 = vst.msk [vmem:[#allocation2 + $0xb8] sm:$0xff] %vm2988_vm4, %v10042_v38  ;;  %v10141_v51 = vld [vmem:[#allocation2 + $0x81] sm:$0xff]  ;;  %v10243_v40 = vld [vmem:[#allocation2 + $0x93] sm:$0xff]  ;;  %v10142_v16 = vld [vmem:[#allocation2 + $0x89] sm:$0xff] }
 0xde2   :  { %10076 = vst.msk [vmem:[#allocation2 + $0xa8] sm:$0xff] %vm2988_vm4, %v10040_v23  ;;  %v16930_v27 = vpop.f32.mrb[128].mxu0  ;;  %v10108_v7 = vld [vmem:[#allocation2 + $0x88] sm:$0xff]  ;;  %v10175_v61 = vmax.f32 %v10107_v4, %v10141_v51  ;;  %v10277_v10 = vmax.f32 %v10209_v52, %v10243_v40  ;;  %v10143_v17 = vld [vmem:[#allocation2 + $0x91] sm:$0xff]  ;;  %v22287_v1 = vmax.f32 %v10161_v15, %v10263_v2  ;;  %v22294_v40 = vld [vmem:[#allocation2 + $0x39] sm:$0xff] }
 0xde3   :  { %v10009_v35 = vadd.f32 %v16930_v27, %v22203_v39  ;;  %v9893_v46 = vpop.f32.mrb[129].mxu0  ;;  %v10176_v38 = vmax.f32 %v10108_v7, %v10142_v16  ;;  %v22289_v27 = vmax.f32 %v10162_v50, %v10264_v21  ;;  %v22302_v16 = vmax.f32 %v10164_v28, %v10266_v29  ;;  %v22304_v21 = vld [vmem:[#allocation2 + $0x38] sm:$0xff] }
 0xde4   :  { %v10007_v55 = vadd.f32 %v22203_v39, %v9893_v46  ;;  %v16931_v41 = vpop.f32.mrb[130].mxu0  ;;  %v10311_v33 = vmax.f32 %v10175_v61, %v10277_v10  ;;  %v10177_v46 = vmax.f32 %v10109_v20, %v10143_v17  ;;  %v22319_v20 = vld [vmem:[#allocation2 + $0x41] sm:$0xff]  ;;  %v10166_v28 = vmax.f32 %v22304_v21, %v22294_v40 }
 0xde5   :  { %v10045_v45 = vmax.f32 %v10009_v35, 0.0  ;;  %v10010_v49 = vadd.f32 %v16931_v41, %v22203_v39  ;;  %v9896_v56 = vpop.f32.mrb[131].mxu0  ;;  %v10110_v35 = vld [vmem:[#allocation2 + $0x98] sm:$0xff] }
 0xde6   :  { %v10043_v32 = vmax.f32 %v10007_v55, 0.0  ;;  %v10008_v57 = vadd.f32 %v22203_v39, %v9896_v56  ;;  %v10233_v55 = vld [vmem:[#allocation2 + $0x43] sm:$0xff] }
 0xde7   :  { %10081 = vst.msk [vmem:[#allocation2 + $0xd0] sm:$0xff] %vm2988_vm4, %v10045_v45  ;;  %v10046_v13 = vmax.f32 %v10010_v49, 0.0  ;;  %v10210_v47 = vld [vmem:[#allocation2 + $0x9a] sm:$0xff]  ;;  %v22299_v45 = vld [vmem:[#allocation2 + $0x52] sm:$0xff] }
 0xde8   :  { %v10244_v5 = vld [vmem:[#allocation2 + $0x9b] sm:$0xff]  ;;  %10079 = vst.msk [vmem:[#allocation2 + $0xc0] sm:$0xff] %vm2988_vm4, %v10043_v32  ;;  %v10044_v53 = vmax.f32 %v10008_v57, 0.0  ;;  %v10213_v63 = vld [vmem:[#allocation2 + $0xb2] sm:$0xff] }
 0xde9   :  { %v10278_v19 = vmax.f32 %v10210_v47, %v10244_v5  ;;  %v10144_v23 = vld [vmem:[#allocation2 + $0x99] sm:$0xff]  ;;  %10082 = vst.msk [vmem:[#allocation2 + $0xd8] sm:$0xff] %vm2988_vm4, %v10046_v13  ;;  %v10211_v26 = vld [vmem:[#allocation2 + $0xa2] sm:$0xff]  ;;  %v10212_v11 = vld [vmem:[#allocation2 + $0xaa] sm:$0xff]  ;;  %v10267_v5 = vmax.f32 %v22284_v24, %v10233_v55  ;;  %v10356_v24 = vpack.c.bf16 %v22289_v27, %v22287_v1  ;;  %v10357_v1 = vpack.c.bf16 %v22302_v16, %v22291_v31 }
 0xdea   :  { %v10245_v18 = vld [vmem:[#allocation2 + $0xa3] sm:$0xff]  ;;  %10080 = vst.msk [vmem:[#allocation2 + $0xc8] sm:$0xff] %vm2988_vm4, %v10044_v53  ;;  %v16934_v14 = vpop.f32.mrb[132].mxu0  ;;  %v10246_v51 = vld [vmem:[#allocation2 + $0xab] sm:$0xff]  ;;  %v10178_v62 = vmax.f32 %v10110_v35, %v10144_v23  ;;  %v10247_v36 = vld [vmem:[#allocation2 + $0xb3] sm:$0xff] }
 0xdeb   :  { %v10312_v34 = vmax.f32 %v10176_v38, %v10278_v19  ;;  %v10279_v52 = vmax.f32 %v10211_v26, %v10245_v18  ;;  %v10013_v41 = vadd.f32 %v16934_v14, %v22203_v39  ;;  %v9909_v60 = vpop.f32.mrb[133].mxu0  ;;  %v10280_v2 = vmax.f32 %v10212_v11, %v10246_v51  ;;  %v10145_v0 = vld [vmem:[#allocation2 + $0xa1] sm:$0xff]  ;;  %v22308_v32 = vld [vmem:[#allocation2 + $0x4b] sm:$0xff]  ;;  %v22310_v57 = vld [vmem:[#allocation2 + $0x53] sm:$0xff] }
 0xdec   :  { %v10011_v49 = vadd.f32 %v22203_v39, %v9909_v60  ;;  %v16935_v56 = vpop.f32.mrb[134].mxu0  ;;  %v10111_v12 = vld [vmem:[#allocation2 + $0xa0] sm:$0xff]  ;;  %v10112_v13 = vld [vmem:[#allocation2 + $0xa8] sm:$0xff]  ;;  %v10281_v53 = vmax.f32 %v10213_v63, %v10247_v36  ;;  %v10147_v18 = vld [vmem:[#allocation2 + $0xb1] sm:$0xff]  ;;  %v10268_v40 = vmax.f32 %v22306_v30, %v22308_v32  ;;  %v22343_v55 = vmax.f32 %v10165_v37, %v10267_v5 }
 0xded   :  { %v10363_v4 = vpack.c.bf16 %v10312_v34, %v10311_v33  ;;  %v10313_v7 = vmax.f32 %v10177_v46, %v10279_v52  ;;  %v10049_v61 = vmax.f32 %v10013_v41, 0.0  ;;  %v10014_v10 = vadd.f32 %v16935_v56, %v22203_v39  ;;  %v9912_v44 = vpop.f32.mrb[135].mxu0  ;;  %v10146_v47 = vld [vmem:[#allocation2 + $0xa9] sm:$0xff]  ;;  %v22315_v38 = vld [vmem:[#allocation2 + $0x40] sm:$0xff] }
 0xdee   :  { %v10314_v25 = vmax.f32 %v10178_v62, %v10280_v2  ;;  %v10047_v17 = vmax.f32 %v10011_v49, 0.0  ;;  %v10012_v15 = vadd.f32 %v22203_v39, %v9912_v44  ;;  %v10179_v50 = vmax.f32 %v10111_v12, %v10145_v0  ;;  %v22317_v19 = vld [vmem:[#allocation2 + $0x48] sm:$0xff]  ;;  %v22331_v14 = vld [vmem:[#allocation2 + $0x5a] sm:$0xff]  ;;  %v10113_v46 = vld [vmem:[#allocation2 + $0xb0] sm:$0xff] }
 0xdef   :  { %15680 = vmatprep.subr.bf16.mxu1 %v10363_v4  ;;  %v22321_v23 = vld [vmem:[#allocation2 + $0x49] sm:$0xff]  ;;  %10085 = vst.msk [vmem:[#allocation2 + $0xf0] sm:$0xff] %vm2988_vm4, %v10049_v61  ;;  %v10050_v29 = vmax.f32 %v10014_v10, 0.0  ;;  %v10214_v26 = vld [vmem:[#allocation2 + $0xba] sm:$0xff]  ;;  %v10180_v34 = vmax.f32 %v10112_v13, %v10146_v47  ;;  %v10167_v41 = vmax.f32 %v22315_v38, %v22319_v20  ;;  %v10181_v63 = vmax.f32 %v10113_v46, %v10147_v18 }
 0xdf0   :  { %15681 = vmatpush3.bf16.msra.mxu1 %v10355_v3  ;;  %v10364_v9 = vpack.c.bf16 %v10314_v25, %v10313_v7  ;;  %v10248_v11 = vld [vmem:[#allocation2 + $0xbb] sm:$0xff]  ;;  %10083 = vst.msk [vmem:[#allocation2 + $0xe0] sm:$0xff] %vm2988_vm4, %v10047_v17  ;;  %v10048_v33 = vmax.f32 %v10012_v15, 0.0  ;;  %v10269_v3 = vmax.f32 %v22299_v45, %v22310_v57  ;;  %v10315_v62 = vmax.f32 %v10179_v50, %v10281_v53  ;;  %v22348_v45 = vld [vmem:[#allocation2 + $0x51] sm:$0xff] }
 0xdf1   :  { %v10282_v35 = vmax.f32 %v10214_v26, %v10248_v11  ;;  %v10148_v54 = vld [vmem:[#allocation2 + $0xb9] sm:$0xff]  ;;  %10086 = vst.msk [vmem:[#allocation2 + $0xf8] sm:$0xff] %vm2988_vm4, %v10050_v29  ;;  %v10215_v27 = vld [vmem:[#allocation2 + $0xc2] sm:$0xff]  ;;  %v10216_v51 = vld [vmem:[#allocation2 + $0xca] sm:$0xff]  ;;  %v10168_v30 = vmax.f32 %v22317_v19, %v22321_v23  ;;  %v10270_v44 = vmax.f32 %v22331_v14, %v22334_v58  ;;  %v10302_v53 = vmax.f32 %v10166_v28, %v10268_v40 }
 0xdf2   :  { %15682 = vmatprep.subr.bf16.mxu1 %v10364_v9  ;;  %v10249_v52 = vld [vmem:[#allocation2 + $0xc3] sm:$0xff]  ;;  %10084 = vst.msk [vmem:[#allocation2 + $0xe8] sm:$0xff] %vm2988_vm4, %v10048_v33  ;;  %v16938_v60 = vpop.f32.mrb[136].mxu0  ;;  %v10114_v0 = vld [vmem:[#allocation2 + $0xb8] sm:$0xff]  ;;  %v10250_v36 = vld [vmem:[#allocation2 + $0xcb] sm:$0xff] }
 0xdf3   :  { %v10316_v2 = vmax.f32 %v10180_v34, %v10282_v35  ;;  %v10283_v31 = vmax.f32 %v10215_v27, %v10249_v52  ;;  %v10017_v49 = vadd.f32 %v16938_v60, %v22203_v39  ;;  %v9925_v56 = vpop.f32.mrb[137].mxu0  ;;  %v10182_v37 = vmax.f32 %v10114_v0, %v10148_v54  ;;  %v22351_v7 = vld [vmem:[#allocation2 + $0xc1] sm:$0xff]  ;;  %v10217_v16 = vld [vmem:[#allocation2 + $0xd2] sm:$0xff]  ;;  %v22364_v47 = vld [vmem:[#allocation2 + $0x6a] sm:$0xff] }
 0xdf4   :  { %15683 = vmatpush3.bf16.msra.mxu1 %v10356_v24  ;;  %v10284_v4 = vmax.f32 %v10216_v51, %v10250_v36  ;;  %v10251_v21 = vld [vmem:[#allocation2 + $0xd3] sm:$0xff]  ;;  %v10015_v32 = vadd.f32 %v22203_v39, %v9925_v56  ;;  %v16939_v57 = vpop.f32.mrb[138].mxu0  ;;  %v22362_v13 = vld [vmem:[#allocation2 + $0x62] sm:$0xff]  ;;  %v10238_v18 = vld [vmem:[#allocation2 + $0x6b] sm:$0xff]  ;;  %v10303_v54 = vmax.f32 %v10167_v41, %v10269_v3  ;;  %v10358_v3 = vpack.c.bf16 %v10302_v53, %v22343_v55 }
 0xdf5   :  { %v10365_v61 = vpack.c.bf16 %v10316_v2, %v10315_v62  ;;  %v10317_v10 = vmax.f32 %v10181_v63, %v10283_v31  ;;  %v22358_v25 = vld [vmem:[#allocation2 + $0x50] sm:$0xff]  ;;  %v22360_v12 = vld [vmem:[#allocation2 + $0x59] sm:$0xff]  ;;  %v10053_v5 = vmax.f32 %v10017_v49, 0.0  ;;  %v10018_v17 = vadd.f32 %v16939_v57, %v22203_v39  ;;  %v9928_v15 = vpop.f32.mrb[139].mxu0  ;;  %v10116_v19 = vld [vmem:[#allocation2 + $0xc8] sm:$0xff] }
 0xdf6   :  { %v10318_v50 = vmax.f32 %v10182_v37, %v10284_v4  ;;  %v10115_v38 = vld [vmem:[#allocation2 + $0xc0] sm:$0xff]  ;;  %v10150_v20 = vld [vmem:[#allocation2 + $0xc9] sm:$0xff]  ;;  %v10051_v23 = vmax.f32 %v10015_v32, 0.0  ;;  %v10016_v29 = vadd.f32 %v22203_v39, %v9928_v15  ;;  %v10285_v24 = vmax.f32 %v10217_v16, %v10251_v21  ;;  %v10102_v26 = vld [vmem:[#allocation2 + $0x58] sm:$0xff] }
 0xdf7   :  { %15684 = vmatprep.subr.bf16.mxu1 %v10365_v61  ;;  %v10183_v9 = vmax.f32 %v10115_v38, %v22351_v7  ;;  %v10237_v11 = vld [vmem:[#allocation2 + $0x63] sm:$0xff]  ;;  %v22369_v14 = vld [vmem:[#allocation2 + $0x72] sm:$0xff]  ;;  %v22371_v33 = vld [vmem:[#allocation2 + $0x7a] sm:$0xff]  ;;  %10089 = vst.msk [vmem:[#allocation2 + $0x110] sm:$0xff] %vm2988_vm4, %v10053_v5  ;;  %v10054_v28 = vmax.f32 %v10018_v17, 0.0  ;;  %v10169_v27 = vmax.f32 %v22358_v25, %v22348_v45  ;;  %v10184_v40 = vmax.f32 %v10116_v19, %v10150_v20 }
 0xdf8   :  { %v22373_v34 = vld [vmem:[#allocation2 + $0x73] sm:$0xff]  ;;  %15685 = vmatpush3.bf16.msra.mxu1 %v10357_v1  ;;  %v10366_v35 = vpack.c.bf16 %v10318_v50, %v10317_v10  ;;  %v10252_v39 = vld [vmem:[#allocation2 + $0xdb] sm:$0xff]  ;;  %10087 = vst.msk [vmem:[#allocation2 + $0x100] sm:$0xff] %vm2988_vm4, %v10051_v23  ;;  %v10052_v52 = vmax.f32 %v10016_v29, 0.0  ;;  %v10304_v62 = vmax.f32 %v10168_v30, %v10270_v44  ;;  %v10104_v63 = vld [vmem:[#allocation2 + $0x68] sm:$0xff]  ;;  %v10170_v45 = vmax.f32 %v10102_v26, %v22360_v12 }
 0xdf9   :  { %v10218_v46 = vld [vmem:[#allocation2 + $0xda] sm:$0xff]  ;;  %v10151_v58 = vld [vmem:[#allocation2 + $0xd1] sm:$0xff]  ;;  %10090 = vst.msk [vmem:[#allocation2 + $0x118] sm:$0xff] %vm2988_vm4, %v10054_v28  ;;  %v10219_v41 = vld [vmem:[#allocation2 + $0xe2] sm:$0xff]  ;;  %v10271_v49 = vmax.f32 %v22362_v13, %v10237_v11  ;;  %v10272_v56 = vmax.f32 %v22364_v47, %v10238_v18  ;;  %v10319_v4 = vmax.f32 %v10183_v9, %v10285_v24  ;;  %v10273_v12 = vmax.f32 %v22369_v14, %v22373_v34 }
 0xdfa   :  { %v22378_v51 = vld [vmem:[#allocation2 + $0x61] sm:$0xff]  ;;  %v10286_v60 = vmax.f32 %v10218_v46, %v10252_v39  ;;  %v10117_v2 = vld [vmem:[#allocation2 + $0xd0] sm:$0xff]  ;;  %v10152_v0 = vld [vmem:[#allocation2 + $0xd9] sm:$0xff]  ;;  %15686 = vmatprep.subr.bf16.mxu1 %v10366_v35  ;;  %10088 = vst.msk [vmem:[#allocation2 + $0x108] sm:$0xff] %vm2988_vm4, %v10052_v52  ;;  %v10359_v17 = vpack.c.bf16 %v10304_v62, %v10303_v54 }
 0xdfb   :  { %v10240_v1 = vld [vmem:[#allocation2 + $0x7b] sm:$0xff]  ;;  %v10220_v36 = vld [vmem:[#allocation2 + $0xea] sm:$0xff]  ;;  %v10185_v21 = vmax.f32 %v10117_v2, %v10151_v58  ;;  %v10221_v44 = vld [vmem:[#allocation2 + $0xf2] sm:$0xff]  ;;  %v10305_v23 = vmax.f32 %v10169_v27, %v10271_v49  ;;  %v10306_v29 = vmax.f32 %v10170_v45, %v10272_v56 }
 0xdfc   :  { %v10253_v31 = vld [vmem:[#allocation2 + $0xe3] sm:$0xff]  ;;  %v10320_v7 = vmax.f32 %v10184_v40, %v10286_v60  ;;  %v10118_v16 = vld [vmem:[#allocation2 + $0xd8] sm:$0xff]  ;;  %v10254_v30 = vld [vmem:[#allocation2 + $0xeb] sm:$0xff]  ;;  %15687 = vmatpush3.bf16.msra.mxu1 %v10358_v3  ;;  %v10274_v13 = vmax.f32 %v22371_v33, %v10240_v1 }
 0xdfd   :  { %v10103_v37 = vld [vmem:[#allocation2 + $0x60] sm:$0xff]  ;;  %v10287_v32 = vmax.f32 %v10219_v41, %v10253_v31  ;;  %v10138_v57 = vld [vmem:[#allocation2 + $0x69] sm:$0xff]  ;;  %v10186_v55 = vmax.f32 %v10118_v16, %v10152_v0  ;;  %v10288_v61 = vmax.f32 %v10220_v36, %v10254_v30  ;;  %v10255_v25 = vld [vmem:[#allocation2 + $0xf3] sm:$0xff]  ;;  %v10360_v41 = vpack.c.bf16 %v10306_v29, %v10305_v23 }
 0xdfe   :  { %v10153_v10 = vld [vmem:[#allocation2 + $0xe1] sm:$0xff]  ;;  %v22390_v47 = vld [vmem:[#allocation2 + $0x71] sm:$0xff]  ;;  %v10367_v5 = vpack.c.bf16 %v10320_v7, %v10319_v4  ;;  %v10171_v50 = vmax.f32 %v10103_v37, %v22378_v51  ;;  %v22393_v53 = vld [vmem:[#allocation2 + $0x79] sm:$0xff]  ;;  %v10172_v11 = vmax.f32 %v10104_v63, %v10138_v57  ;;  %v10289_v33 = vmax.f32 %v10221_v44, %v10255_v25 }
 0xdff   :  { %v10321_v15 = vmax.f32 %v10185_v21, %v10287_v32  ;;  %v10207_v38 = vld [vmem:[#allocation2 + $0x82] sm:$0xff]  ;;  %v10208_v19 = vld [vmem:[#allocation2 + $0x8a] sm:$0xff]  ;;  %v10322_v20 = vmax.f32 %v10186_v55, %v10288_v61  ;;  %v10106_v28 = vld [vmem:[#allocation2 + $0x78] sm:$0xff] }
 0xe00   :  { %v10119_v9 = vld [vmem:[#allocation2 + $0xe0] sm:$0xff]  ;;  %v10120_v24 = vld [vmem:[#allocation2 + $0xe8] sm:$0xff]  ;;  %v10105_v18 = vld [vmem:[#allocation2 + $0x70] sm:$0xff]  ;;  %15688 = vmatprep.subr.bf16.mxu1 %v10367_v5  ;;  %v10308_v51 = vmax.f32 %v10172_v11, %v10274_v13  ;;  %v10307_v62 = vmax.f32 %v10171_v50, %v10273_v12  ;;  %v10174_v49 = vmax.f32 %v10106_v28, %v22393_v53 }
 0xe01   :  { %v10154_v26 = vld [vmem:[#allocation2 + $0xe9] sm:$0xff]  ;;  %v10187_v14 = vmax.f32 %v10119_v9, %v10153_v10  ;;  %v10155_v34 = vld [vmem:[#allocation2 + $0xf1] sm:$0xff]  ;;  %15689 = vmatpush3.bf16.msra.mxu1 %v10359_v17  ;;  %v10368_v39 = vpack.c.bf16 %v10322_v20, %v10321_v15  ;;  %v10222_v54 = vld [vmem:[#allocation2 + $0xfa] sm:$0xff]  ;;  %v10173_v0 = vmax.f32 %v10105_v18, %v22390_v47 }
 0xe02   :  { %v10241_v35 = vld [vmem:[#allocation2 + $0x83] sm:$0xff]  ;;  %v10242_v46 = vld [vmem:[#allocation2 + $0x8b] sm:$0xff]  ;;  %v10256_v58 = vld [vmem:[#allocation2 + $0xfb] sm:$0xff]  ;;  %v10188_v40 = vmax.f32 %v10120_v24, %v10154_v26  ;;  %v10361_v55 = vpack.c.bf16 %v10308_v51, %v10307_v62 }
 0xe03   :  { %v10121_v52 = vld [vmem:[#allocation2 + $0xf0] sm:$0xff]  ;;  %v10156_v27 = vld [vmem:[#allocation2 + $0xf9] sm:$0xff]  ;;  %v10290_v60 = vmax.f32 %v10222_v54, %v10256_v58  ;;  %15690 = vmatprep.subr.bf16.mxu1 %v10368_v39  ;;  %v10223_v36 = vld [vmem:[#allocation2 + $0x102] sm:$0xff]  ;;  %v10275_v56 = vmax.f32 %v10207_v38, %v10241_v35  ;;  %v10276_v37 = vmax.f32 %v10208_v19, %v10242_v46  ;;  %v10323_v4 = vmax.f32 %v10187_v14, %v10289_v33 }
 0xe04   :  { %v10122_v2 = vld [vmem:[#allocation2 + $0xf8] sm:$0xff]  ;;  %v10123_v63 = vld [vmem:[#allocation2 + $0x100] sm:$0xff]  ;;  %v10224_v31 = vld [vmem:[#allocation2 + $0x10a] sm:$0xff]  ;;  %v10189_v16 = vmax.f32 %v10121_v52, %v10155_v34 }
 0xe05   :  { %v10225_v1 = vld [vmem:[#allocation2 + $0x112] sm:$0xff]  ;;  %v10226_v3 = vld [vmem:[#allocation2 + $0x11a] sm:$0x7]  ;;  %v10257_v45 = vld [vmem:[#allocation2 + $0x103] sm:$0xff]  ;;  %v10324_v7 = vmax.f32 %v10188_v40, %v10290_v60  ;;  %15691 = vmatpush3.bf16.msra.mxu1 %v10360_v41  ;;  %v10190_v61 = vmax.f32 %v10122_v2, %v10156_v27  ;;  %v10309_v53 = vmax.f32 %v10173_v0, %v10275_v56  ;;  %v10310_v38 = vmax.f32 %v10174_v49, %v10276_v37 }
 0xe06   :  { %v10258_v21 = vld [vmem:[#allocation2 + $0x10b] sm:$0xff]  ;;  %v10291_v30 = vmax.f32 %v10223_v36, %v10257_v45  ;;  %v10124_v32 = vld [vmem:[#allocation2 + $0x108] sm:$0x7]  ;;  %v10259_v12 = vld [vmem:[#allocation2 + $0x113] sm:$0xff] }
 0xe07   :  { %v10157_v57 = vld [vmem:[#allocation2 + $0x101] sm:$0xff]  ;;  %v10292_v10 = vmax.f32 %v10224_v31, %v10258_v21  ;;  %v10158_v44 = vld [vmem:[#allocation2 + $0x109] sm:$0x7]  ;;  %v10260_v13 = vld [vmem:[#allocation2 + $0x11b] sm:$0x7]  ;;  %v10369_v47 = vpack.c.bf16 %v10324_v7, %v10323_v4  ;;  %v10293_v15 = vmax.f32 %v10225_v1, %v10259_v12  ;;  %v10362_v9 = vpack.c.bf16 %v10310_v38, %v10309_v53 }
 0xe08   :  { %v10191_v25 = vmax.f32 %v10123_v63, %v10157_v57  ;;  %v10325_v5 = vmax.f32 %v10189_v16, %v10291_v30  ;;  %v10192_v17 = vmax.f32 %v10124_v32, %v10158_v44  ;;  %v10294_v19 = vmax.f32 %v10226_v3, %v10260_v13  ;;  %v18248_v26 = vld [vmem:[%s23707_s10] ss:$12 sps:$4 sm:$0xff]   ;;  %v18253_v11 = vld [vmem:[%s23707_s10 + $0x1c] ss:$12 sps:$4 sm:$0xff]   ;;  %v18251_v14 = vld [vmem:[%s23707_s10 + $0x18] ss:$12 sps:$4 sm:$0xff]  }
 0xe09   :  { %v10326_v50 = vmax.f32 %v10190_v61, %v10292_v10  ;;  %15692 = vmatprep.subr.bf16.mxu1 %v10369_v47  ;;  %v18256_v33 = vld [vmem:[%s23707_s10 + $0x34] ss:$12 sps:$4 sm:$0xff]   ;;  %v18254_v34 = vld [vmem:[%s23707_s10 + $0x30] ss:$12 sps:$4 sm:$0xff]   ;;  %v18263_v58 = vld [vmem:[%s23707_s10 + $0x78] ss:$12 sps:$4 sm:$0xff]  }
 0xe0a   :  { %v10327_v20 = vmax.f32 %v10191_v25, %v10293_v15  ;;  %15693 = vmatpush3.bf16.msra.mxu1 %v10361_v55  ;;  %v10328_v29 = vmax.f32 %v10192_v17, %v10294_v19  ;;  %v18257_v28 = vld [vmem:[%s23707_s10 + $0x48] ss:$12 sps:$4 sm:$0xff]   ;;  %v18262_v35 = vld [vmem:[%s23707_s10 + $0x64] ss:$12 sps:$4 sm:$0xff]   ;;  %v18260_v46 = vld [vmem:[%s23707_s10 + $0x60] ss:$12 sps:$4 sm:$0xff]  }
 0xe0b   :  { %v10370_v23 = vpack.c.bf16 %v10326_v50, %v10325_v5  ;;  %v18265_v39 = vld [vmem:[%s23707_s10 + $0x7c] ss:$12 sps:$4 sm:$0xff]   ;;  %v10353_v54 = vld [vmem:[%s23707_s10 + $0x90] sm:$0xff]  ;;  %v18269_v40 = vld [vmem:[%s23707_s10 + $0x20] ss:$12 sps:$4 sm:$0xff]  }
 0xe0c   :  { %v10371_v24 = vpack.c.bf16 %v10328_v29, %v10327_v20  ;;  %v14830_v51 = vcombine.high %v10353_v54, %v10353_v54  ;;  %v14829_v52 = vcombine.low %v10353_v54, %v10353_v54  ;;  %v18268_v27 = vld [vmem:[%s23707_s10 + $0x8] ss:$12 sps:$4 sm:$0xff]   ;;  %v18270_v60 = vld [vmem:[%s23707_s10 + $0x38] ss:$12 sps:$4 sm:$0xff]   ;;  %v18271_v62 = vld [vmem:[%s23707_s10 + $0x50] ss:$12 sps:$4 sm:$0xff]  }
 0xe0d   :  { %15694 = vmatprep.subr.bf16.mxu1 %v10370_v23  ;;  %v18272_v2 = vld [vmem:[%s23707_s10 + $0x68] ss:$12 sps:$4 sm:$0xff]   ;;  %v18273_v0 = vld [vmem:[%s23707_s10 + $0x80] ss:$12 sps:$4 sm:$0xff]   ;;  %v18274_v63 = vld [vmem:[%s23707_s10 + $0x98] ss:$0 sps:$4 sm:$0xff]  }
 0xe0e   :  { %15695 = vmatpush3.bf16.msra.mxu1 %v10362_v9  ;;  %v10494_v18 = vand.u32 %v10371_v24, %v19846_v48  ;;  %v18259_v48 = vld [vmem:[%s23707_s10 + $0x4c] ss:$12 sps:$4 sm:$0xff]   ;;  %v18275_v1 = vld [vmem:[%s23709_s3 + $0x20] sm:$0xff]   ;;  %v18277_v41 = vld [vmem:[%s23709_s3 + $0x30] sm:$0xff]  }
 0xe0f   :  { %16940 = vmatprep.subr.bf16.mxu1 %v18547_v42  ;;  %v18276_v3 = vld [vmem:[%s23709_s3 + $0x28] sm:$0xff]   ;;  %v18278_v36 = vld [vmem:[%s23709_s3 + $0x38] sm:$0xff]  }
 0xe11   :  { %10529 = vmatmul.mubr.bf16.vlgmr.msra.gmra.mrb[4].mxu1 %v18248_v26 }
 0xe12   :  { %16941 = vmatpush3.bf16.msra.mxu1 %v10494_v18  ;;  %10536 = vmatprep.mubr.bf16.mxu1 %v18253_v11 }
 0xe13   :  { %16970 = vmatprep.subr.bf16.mxu1 %v18547_v42 }
 0xe19   :  { %10537 = vmatmul.mubr.bf16.gmra.mrb[8].mxu1 %v18251_v14 }
 0xe1a   :  { %10544 = vmatprep.mubr.bf16.mxu1 %v18256_v33 }
 0xe21   :  { %10545 = vmatmul.mubr.bf16.gmra.mrb[12].mxu1 %v18254_v34 }
 0xe22   :  { %10552 = vmatprep.mubr.bf16.mxu1 %v18259_v48 }
 0xe29   :  { %10553 = vmatmul.mubr.bf16.gmra.mrb[16].mxu1 %v18257_v28 }
 0xe2a   :  { %10560 = vmatprep.mubr.bf16.mxu1 %v18262_v35 }
 0xe31   :  { %10561 = vmatmul.mubr.bf16.gmra.mrb[20].mxu1 %v18260_v46 }
 0xe32   :  { %10568 = vmatprep.mubr.bf16.mxu1 %v18265_v39 }
 0xe39   :  { %10569 = vmatmul.mubr.bf16.gmra.mrb[24].mxu1 %v18263_v58 }
 0xe3a   :  { %10576 = vmatprep.mubr.bf16.mxu1 %v14830_v51 }
 0xe41   :  { %10577 = vmatmul.mubr.bf16.gmra.mrb[28].mxu1 %v14829_v52 }
 0xe42   :  { %16942 = vmatprep.mubr.msk.bf16.mxu1 %vm18548_vm3, %v18547_v42 }
 0xe49   :  { %16943 = vmatmul.mubr.msk.bf16.vlgmr.msra.gmra.mrb[32].mxu1 %vm3406_vm7, %v18268_v27 }
 0xe4a   :  { %16946 = vmatprep.mubr.msk.bf16.mxu1 %vm18548_vm3, %v18547_v42  ;;  %16971 = vmatpush3.bf16.msra.mxu1 %v18275_v1 }
 0xe4b   :  { %16972 = vmatprep.subr.bf16.mxu1 %v18547_v42 }
 0xe4e   :  { %16973 = vmatpush3.bf16.msra.mxu1 %v18276_v3 }
 0xe4f   :  { %16974 = vmatprep.subr.bf16.mxu1 %v18547_v42 }
 0xe51   :  { %16947 = vmatmul.mubr.msk.bf16.gmra.mrb[36].mxu1 %vm3406_vm7, %v18269_v40 }
 0xe52   :  { %16950 = vmatprep.mubr.msk.bf16.mxu1 %vm18548_vm3, %v18547_v42  ;;  %16975 = vmatpush3.bf16.msra.mxu1 %v18277_v41 }
 0xe53   :  { %16976 = vmatprep.subr.bf16.mxu1 %v18547_v42 }
 0xe56   :  { %16977 = vmatpush3.bf16.msra.mxu1 %v18278_v36 }
 0xe57   :  { %16998 = vmatprep.subr.bf16.mxu1 %v18547_v42 }
 0xe59   :  { %16951 = vmatmul.mubr.msk.bf16.gmra.mrb[40].mxu1 %vm3406_vm7, %v18270_v60 }
 0xe5a   :  { %16954 = vmatprep.mubr.msk.bf16.mxu1 %vm18548_vm3, %v18547_v42 }
 0xe61   :  { %16955 = vmatmul.mubr.msk.bf16.gmra.mrb[44].mxu1 %vm3406_vm7, %v18271_v62 }
 0xe62   :  { %16958 = vmatprep.mubr.msk.bf16.mxu1 %vm18548_vm3, %v18547_v42 }
 0xe69   :  { %16959 = vmatmul.mubr.msk.bf16.gmra.mrb[48].mxu1 %vm3406_vm7, %v18272_v2 }
 0xe6a   :  { %16962 = vmatprep.mubr.msk.bf16.mxu1 %vm18548_vm3, %v18547_v42 }
 0xe71   :  { %16963 = vmatmul.mubr.msk.bf16.gmra.mrb[52].mxu1 %vm3406_vm7, %v18273_v0 }
 0xe72   :  { %16966 = vmatprep.mubr.msk.bf16.mxu1 %vm18548_vm3, %v18547_v42 }
 0xe79   :  { %16967 = vmatmul.mubr.msk.bf16.gmra.mrb[56].mxu1 %vm3406_vm7, %v18274_v63 }
 0xe7a   :  { %16978 = vmatprep.mubr.msk.bf16.mxu1 %vm18548_vm3, %v18547_v42 }
 0xee4   :  { %v15696_v31 = vpop.f32.mrb[4].mxu1 }
 0xee5   :  { %v15697_v45 = vpop.f32.mrb[5].mxu1 }
 0xee6   :  { %v15698_v49 = vadd.f32 %v15697_v45, %v15696_v31  ;;  %v15699_v56 = vpop.f32.mrb[6].mxu1  ;;  %v18279_v45 = vld [vmem:[%s23709_s3] sm:$0xff]  }
 0xee7   :  { %v15700_v37 = vpop.f32.mrb[7].mxu1 }
 0xee8   :  { %v15701_v4 = vadd.f32 %v15700_v37, %v15699_v56 }
 0xeec   :  { %v15702_v7 = vpop.f32.mrb[8].mxu1 }
 0xeed   :  { %v15703_v16 = vpop.f32.mrb[9].mxu1 }
 0xeee   :  { %v15705_v21 = vpop.f32.mrb[10].mxu1  ;;  %v15704_v30 = vadd.f32 %v15703_v16, %v15702_v7 }
 0xeef   :  { %v15706_v32 = vpop.f32.mrb[11].mxu1 }
 0xef0   :  { %v15707_v57 = vadd.f32 %v15706_v32, %v15705_v21 }
 0xef4   :  { %v15708_v55 = vpop.f32.mrb[12].mxu1 }
 0xef5   :  { %v15709_v61 = vpop.f32.mrb[13].mxu1 }
 0xef6   :  { %v15711_v10 = vpop.f32.mrb[14].mxu1  ;;  %v15710_v44 = vadd.f32 %v15709_v61, %v15708_v55  ;;  %v18281_v55 = vld [vmem:[%s23709_s3 + $0x10] sm:$0xff]  }
 0xef7   :  { %v15712_v25 = vpop.f32.mrb[15].mxu1 }
 0xef8   :  { %v15713_v12 = vadd.f32 %v15712_v25, %v15711_v10  ;;  %v18282_v25 = vld [vmem:[%s23709_s3 + $0x18] sm:$0xff]  }
 0xefc   :  { %v15714_v13 = vpop.f32.mrb[16].mxu1 }
 0xefd   :  { %v15715_v47 = vpop.f32.mrb[17].mxu1 }
 0xefe   :  { %v15717_v5 = vpop.f32.mrb[18].mxu1  ;;  %v15716_v17 = vadd.f32 %v15715_v47, %v15714_v13 }
 0xeff   :  { %v15718_v15 = vpop.f32.mrb[19].mxu1 }
 0xf00   :  { %v15719_v50 = vadd.f32 %v15718_v15, %v15717_v5 }
 0xf04   :  { %v15720_v53 = vpop.f32.mrb[20].mxu1 }
 0xf05   :  { %v15721_v38 = vpop.f32.mrb[21].mxu1 }
 0xf06   :  { %v15723_v19 = vpop.f32.mrb[22].mxu1  ;;  %v22496_v20 = vadd.f32 %v15721_v38, %v15720_v53 }
 0xf07   :  { %v15724_v23 = vpop.f32.mrb[23].mxu1 }
 0xf08   :  { %v22498_v29 = vadd.f32 %v15724_v23, %v15723_v19 }
 0xf0c   :  { %v15726_v9 = vpop.f32.mrb[24].mxu1 }
 0xf0d   :  { %v15727_v24 = vpop.f32.mrb[25].mxu1 }
 0xf0e   :  { %v15729_v26 = vpop.f32.mrb[26].mxu1  ;;  %v22500_v11 = vadd.f32 %v15727_v24, %v15726_v9 }
 0xf0f   :  { %v15730_v18 = vpop.f32.mrb[27].mxu1 }
 0xf10   :  { %v22502_v14 = vadd.f32 %v15730_v18, %v15729_v26 }
 0xf14   :  { %v15732_v33 = vpop.f32.mrb[28].mxu1 }
 0xf15   :  { %v15733_v34 = vpop.f32.mrb[29].mxu1 }
 0xf16   :  { %v15735_v48 = vpop.f32.mrb[30].mxu1  ;;  %v22504_v28 = vadd.f32 %v15733_v34, %v15732_v33 }
 0xf17   :  { %v15736_v35 = vpop.f32.mrb[31].mxu1 }
 0xf1c   :  { %v10618_v46 = vpop.f32.mrb[32].mxu1 }
 0xf1d   :  { %v10619_v39 = vadd.f32 %v15698_v49, %v10618_v46  ;;  %v16944_v54 = vpop.f32.mrb[33].mxu1 }
 0xf1e   :  { %v10621_v58 = vpop.f32.mrb[34].mxu1 }
 0xf1f   :  { %10672 = vst.msk [vmem:[#allocation3] sm:$0xff] %vm2988_vm4, %v10619_v39  ;;  %v10622_v51 = vadd.f32 %v15701_v4, %v10621_v58  ;;  %v16945_v52 = vpop.f32.mrb[35].mxu1  ;;  %v18280_v4 = vld [vmem:[%s23709_s3 + $0x8] sm:$0xff]  }
 0xf20   :  { %v18283_v52 = vld [vmem:[%s23709_s3 + $0x40] sm:$0xff]  }
 0xf21   :  { %10673 = vst.msk [vmem:[#allocation3 + $0x8] sm:$0xff] %vm2988_vm4, %v10622_v51 }
 0xf24   :  { %v10626_v27 = vpop.f32.mrb[36].mxu1 }
 0xf25   :  { %v10627_v40 = vadd.f32 %v15704_v30, %v10626_v27  ;;  %v16948_v60 = vpop.f32.mrb[37].mxu1  ;;  %v18284_v27 = vld [vmem:[%s23709_s3 + $0x48] sm:$0xff]  }
 0xf26   :  { %v10629_v62 = vpop.f32.mrb[38].mxu1  ;;  %v10685_v51 = vld [vmem:[#allocation3] sm:$0xff] }
 0xf27   :  { %10674 = vst.msk [vmem:[#allocation3 + $0x10] sm:$0xff] %vm2988_vm4, %v10627_v40  ;;  %v10630_v2 = vadd.f32 %v15707_v57, %v10629_v62  ;;  %v16949_v0 = vpop.f32.mrb[39].mxu1  ;;  %v18285_v62 = vld [vmem:[%s23709_s3 + $0x50] sm:$0xff]  }
 0xf28   :  { %v10708_v36 = vld [vmem:[#allocation3 + $0x1] sm:$0xff]  ;;  %v18286_v0 = vld [vmem:[%s23709_s3 + $0x58] sm:$0xff]  }
 0xf29   :  { %10675 = vst.msk [vmem:[#allocation3 + $0x18] sm:$0xff] %vm2988_vm4, %v10630_v2  ;;  %v10686_v58 = vld [vmem:[#allocation3 + $0x8] sm:$0xff] }
 0xf2c   :  { %v10634_v63 = vpop.f32.mrb[40].mxu1 }
 0xf2d   :  { %v10635_v1 = vadd.f32 %v15710_v44, %v10634_v63  ;;  %v16952_v3 = vpop.f32.mrb[41].mxu1 }
 0xf2e   :  { %v10637_v41 = vpop.f32.mrb[42].mxu1  ;;  %v10709_v31 = vld [vmem:[#allocation3 + $0x9] sm:$0xff] }
 0xf2f   :  { %10676 = vst.msk [vmem:[#allocation3 + $0x20] sm:$0xff] %vm2988_vm4, %v10635_v1  ;;  %v10638_v49 = vadd.f32 %v15713_v12, %v10637_v41  ;;  %v10718_v56 = vpack.c.bf16 %v10709_v31, %v10708_v36  ;;  %v16953_v37 = vpop.f32.mrb[43].mxu1  ;;  %v10687_v60 = vld [vmem:[#allocation3 + $0x10] sm:$0xff] }
 0xf30   :  { %v10710_v32 = vld [vmem:[#allocation3 + $0x11] sm:$0xff] }
 0xf31   :  { %10677 = vst.msk [vmem:[#allocation3 + $0x28] sm:$0xff] %vm2988_vm4, %v10638_v49  ;;  %16979 = vmatmul.mubr.msk.bf16.vlgmr.msra.gmra.mrb[60].mxu1 %vm2988_vm4, %v10718_v56  ;;  %v10688_v40 = vld [vmem:[#allocation3 + $0x18] sm:$0xff]  ;;  %v10956_v37 = vld [vmem:[#allocation3 + $0xa] sm:$0xff] }
 0xf32   :  { %16982 = vmatprep.mubr.msk.bf16.mxu1 %vm18548_vm3, %v18547_v42  ;;  %16999 = vmatpush3.bf16.msra.mxu1 %v18279_v45  ;;  %v10696_v2 = vpack.c.bf16 %v10688_v40, %v10687_v60 }
 0xf33   :  { %17000 = vmatprep.subr.bf16.mxu1 %v18547_v42 }
 0xf34   :  { %v10642_v7 = vpop.f32.mrb[44].mxu1 }
 0xf35   :  { %v10643_v16 = vadd.f32 %v15716_v17, %v10642_v7  ;;  %v16956_v21 = vpop.f32.mrb[45].mxu1  ;;  %v18287_v7 = vld [vmem:[%s23709_s3 + $0x60] sm:$0xff]  }
 0xf36   :  { %v10645_v30 = vpop.f32.mrb[46].mxu1  ;;  %v10711_v57 = vld [vmem:[#allocation3 + $0x19] sm:$0xff]  ;;  %17001 = vmatpush3.bf16.msra.mxu1 %v18280_v4  ;;  %v10955_v4 = vld [vmem:[#allocation3 + $0x2] sm:$0xff] }
 0xf37   :  { %10678 = vst.msk [vmem:[#allocation3 + $0x30] sm:$0xff] %vm2988_vm4, %v10643_v16  ;;  %v10646_v61 = vadd.f32 %v15719_v50, %v10645_v30  ;;  %v10719_v10 = vpack.c.bf16 %v10711_v57, %v10710_v32  ;;  %v16957_v44 = vpop.f32.mrb[47].mxu1  ;;  %17002 = vmatprep.subr.bf16.mxu1 %v18547_v42  ;;  %v10689_v1 = vld [vmem:[#allocation3 + $0x20] sm:$0xff]  ;;  %v10965_v16 = vpack.c.bf16 %v10956_v37, %v10955_v4  ;;  %v18288_v21 = vld [vmem:[%s23709_s3 + $0x68] sm:$0xff]   ;;  %v10957_v32 = vld [vmem:[#allocation3 + $0x12] sm:$0xff] }
 0xf38   :  { %v10712_v17 = vld [vmem:[#allocation3 + $0x21] sm:$0xff]  ;;  %v18289_v57 = vld [vmem:[%s23709_s3 + $0x70] sm:$0xff]  }
 0xf39   :  { %10679 = vst.msk [vmem:[#allocation3 + $0x38] sm:$0xff] %vm2988_vm4, %v10646_v61  ;;  %16983 = vmatmul.mubr.msk.bf16.gmra.mrb[64].mxu1 %vm2988_vm4, %v10719_v10  ;;  %v10690_v63 = vld [vmem:[#allocation3 + $0x28] sm:$0xff]  ;;  %v10958_v30 = vld [vmem:[#allocation3 + $0x1a] sm:$0xff] }
 0xf3a   :  { %16986 = vmatprep.mubr.msk.bf16.mxu1 %vm18548_vm3, %v18547_v42  ;;  %17003 = vmatpush3.bf16.msra.mxu1 %v18281_v55  ;;  %v10697_v3 = vpack.c.bf16 %v10690_v63, %v10689_v1  ;;  %v10966_v55 = vpack.c.bf16 %v10958_v30, %v10957_v32  ;;  %v18290_v61 = vld [vmem:[%s23709_s3 + $0x78] sm:$0xff]   ;;  %v10959_v44 = vld [vmem:[#allocation3 + $0x22] sm:$0xff]  ;;  %v11390_v63 = vld [vmem:[#allocation3 + $0xc] sm:$0xff] }
 0xf3b   :  { %17004 = vmatprep.subr.bf16.mxu1 %v18547_v42  ;;  %v18299_v1 = vld [vmem:[%s23709_s3 + $0xc0] sm:$0xff]  }
 0xf3c   :  { %v10650_v12 = vpop.f32.mrb[48].mxu1 }
 0xf3d   :  { %v10651_v13 = vadd.f32 %v22496_v20, %v10650_v12  ;;  %v16960_v47 = vpop.f32.mrb[49].mxu1 }
 0xf3e   :  { %v10653_v5 = vpop.f32.mrb[50].mxu1  ;;  %v10713_v15 = vld [vmem:[#allocation3 + $0x29] sm:$0xff]  ;;  %17005 = vmatpush3.bf16.msra.mxu1 %v18282_v25 }
 0xf3f   :  { %10680 = vst.msk [vmem:[#allocation3 + $0x40] sm:$0xff] %vm2988_vm4, %v10651_v13  ;;  %v10654_v50 = vadd.f32 %v22498_v29, %v10653_v5  ;;  %v10720_v53 = vpack.c.bf16 %v10713_v15, %v10712_v17  ;;  %v16961_v38 = vpop.f32.mrb[51].mxu1  ;;  %17026 = vmatprep.subr.bf16.mxu1 %v18547_v42  ;;  %v10691_v36 = vld [vmem:[#allocation3 + $0x30] sm:$0xff] }
 0xf40   :  { %v10714_v24 = vld [vmem:[#allocation3 + $0x31] sm:$0xff]  ;;  %v18292_v38 = vld [vmem:[%s23709_s3 + $0x88] sm:$0xff]  }
 0xf41   :  { %10681 = vst.msk [vmem:[#allocation3 + $0x48] sm:$0xff] %vm2988_vm4, %v10654_v50  ;;  %16987 = vmatmul.mubr.msk.bf16.gmra.mrb[68].mxu1 %vm2988_vm4, %v10720_v53  ;;  %v10692_v41 = vld [vmem:[#allocation3 + $0x38] sm:$0xff]  ;;  %v10960_v10 = vld [vmem:[#allocation3 + $0x2a] sm:$0xff]  ;;  %v18291_v50 = vld [vmem:[%s23709_s3 + $0x80] sm:$0xff]   ;;  %v11110_v53 = vpack.c.bf16 %v10957_v32, %v10956_v37 }
 0xf42   :  { %16990 = vmatprep.mubr.msk.bf16.mxu1 %vm18548_vm3, %v18547_v42  ;;  %v10698_v31 = vpack.c.bf16 %v10692_v41, %v10691_v36  ;;  %v10967_v25 = vpack.c.bf16 %v10960_v10, %v10959_v44  ;;  %v10961_v13 = vld [vmem:[#allocation3 + $0x32] sm:$0xff]  ;;  %v18300_v41 = vld [vmem:[%s23709_s3 + $0xc8] sm:$0xff]  }
 0xf43   :  { %v11393_v36 = vld [vmem:[#allocation3 + $0x24] sm:$0xff]  ;;  %v11395_v4 = vld [vmem:[#allocation3 + $0x34] sm:$0xff] }
 0xf44   :  { %v10658_v19 = vpop.f32.mrb[52].mxu1 }
 0xf45   :  { %v10659_v20 = vadd.f32 %v22500_v11, %v10658_v19  ;;  %v16964_v23 = vpop.f32.mrb[53].mxu1  ;;  %v18293_v19 = vld [vmem:[%s23709_s3 + $0x90] sm:$0xff]  }
 0xf46   :  { %v10661_v9 = vpop.f32.mrb[54].mxu1  ;;  %v10715_v26 = vld [vmem:[#allocation3 + $0x39] sm:$0xff] }
 0xf47   :  { %10682 = vst.msk [vmem:[#allocation3 + $0x50] sm:$0xff] %vm2988_vm4, %v10659_v20  ;;  %v10662_v29 = vadd.f32 %v22502_v14, %v10661_v9  ;;  %v10721_v18 = vpack.c.bf16 %v10715_v26, %v10714_v24  ;;  %v16965_v33 = vpop.f32.mrb[55].mxu1  ;;  %v10693_v49 = vld [vmem:[#allocation3 + $0x40] sm:$0xff]  ;;  %v11111_v20 = vpack.c.bf16 %v10959_v44, %v10958_v30  ;;  %v18294_v23 = vld [vmem:[%s23709_s3 + $0x98] sm:$0xff]   ;;  %v11112_v9 = vpack.c.bf16 %v10961_v13, %v10960_v10 }
 0xf48   :  { %v10716_v35 = vld [vmem:[#allocation3 + $0x41] sm:$0xff]  ;;  %v11245_v33 = vld [vmem:[#allocation3 + $0xb] sm:$0xff] }
 0xf49   :  { %10683 = vst.msk [vmem:[#allocation3 + $0x58] sm:$0xff] %vm2988_vm4, %v10662_v29  ;;  %16991 = vmatmul.mubr.msk.bf16.gmra.mrb[72].mxu1 %vm2988_vm4, %v10721_v18  ;;  %v10694_v45 = vld [vmem:[#allocation3 + $0x48] sm:$0xff]  ;;  %v10962_v12 = vld [vmem:[#allocation3 + $0x3a] sm:$0xff] }
 0xf4a   :  { %16994 = vmatprep.mubr.msk.bf16.mxu1 %vm18548_vm3, %v18547_v42  ;;  %v10699_v56 = vpack.c.bf16 %v10694_v45, %v10693_v49  ;;  %v10968_v47 = vpack.c.bf16 %v10962_v12, %v10961_v13  ;;  %v10963_v17 = vld [vmem:[#allocation3 + $0x42] sm:$0xff]  ;;  %v11246_v18 = vld [vmem:[#allocation3 + $0x13] sm:$0xff] }
 0xf4b   :  { %v11113_v24 = vpack.c.bf16 %v10963_v17, %v10962_v12  ;;  %v18301_v45 = vld [vmem:[%s23709_s3 + $0xd0] sm:$0xff]   ;;  %v11396_v44 = vld [vmem:[#allocation3 + $0x3c] sm:$0xff] }
 0xf4c   :  { %v10666_v34 = vpop.f32.mrb[56].mxu1 }
 0xf4d   :  { %v10667_v11 = vadd.f32 %v22504_v28, %v10666_v34  ;;  %v16968_v48 = vpop.f32.mrb[57].mxu1  ;;  %v10695_v28 = vpack.c.bf16 %v10686_v58, %v10685_v51  ;;  %v18295_v34 = vld [vmem:[%s23709_s3 + $0xa0] sm:$0xff]   ;;  %v11250_v58 = vld [vmem:[#allocation3 + $0x33] sm:$0xff]  ;;  %v11249_v51 = vld [vmem:[#allocation3 + $0x2b] sm:$0xff] }
 0xf4e   :  { %v10717_v46 = vld [vmem:[#allocation3 + $0x49] sm:$0xff]  ;;  %v10669_v39 = vpop.f32.mrb[58].mxu1 }
 0xf4f   :  { %10684 = vst.msk [vmem:[#allocation3 + $0x60] sm:$0xff] %vm2988_vm4, %v10667_v11  ;;  %v10722_v54 = vpack.c.bf16 %v10717_v46, %v10716_v35  ;;  %v16969_v14 = vpop.f32.mrb[59].mxu1  ;;  %v10964_v5 = vld [vmem:[#allocation3 + $0x4a] sm:$0xff]  ;;  %v11255_v11 = vpack.c.bf16 %v11246_v18, %v11245_v33  ;;  %v11247_v46 = vld [vmem:[#allocation3 + $0x1b] sm:$0xff] }
 0xf50   :  { %v10969_v15 = vpack.c.bf16 %v10964_v5, %v10963_v17  ;;  %v11109_v26 = vld [vmem:[#allocation3 + $0x52] sm:$0xff]  ;;  %v18296_v48 = vld [vmem:[%s23709_s3 + $0xa8] sm:$0xff]  }
 0xf51   :  { %16995 = vmatmul.mubr.msk.bf16.gmra.mrb[76].mxu1 %vm2988_vm4, %v10722_v54  ;;  %v11114_v29 = vpack.c.bf16 %v11109_v26, %v10964_v5  ;;  %v11248_v35 = vld [vmem:[#allocation3 + $0x23] sm:$0xff]  ;;  %v18297_v39 = vld [vmem:[%s23709_s3 + $0xb0] sm:$0xff]   ;;  %v18298_v14 = vld [vmem:[%s23709_s3 + $0xb8] sm:$0xff]  }
 0xf52   :  { %17006 = vmatprep.mubr.msk.bf16.mxu1 %vm18548_vm3, %v18547_v42  ;;  %v11256_v54 = vpack.c.bf16 %v11248_v35, %v11247_v46  ;;  %v11254_v60 = vld [vmem:[#allocation3 + $0x53] sm:$0xff]  ;;  %v18304_v26 = vld [vmem:[%s23709_s3 + $0xe8] sm:$0xff]  }
 0xf53   :  { %v18306_v35 = vld [vmem:[%s23709_s3 + $0xf8] sm:$0xff]  }
 0xf59   :  { %17007 = vmatmul.mubr.msk.bf16.vlgmr.msra.gmra.mrb[80].mxu1 %vm2988_vm4, %v10695_v28  ;;  %v11252_v28 = vld [vmem:[#allocation3 + $0x43] sm:$0xff] }
 0xf5a   :  { %17010 = vmatprep.mubr.msk.bf16.mxu1 %vm18548_vm3, %v18547_v42  ;;  %17027 = vmatpush3.bf16.msra.mxu1 %v18283_v52  ;;  %v11257_v52 = vpack.c.bf16 %v11250_v58, %v11249_v51 }
 0xf5b   :  { %17028 = vmatprep.subr.bf16.mxu1 %v18547_v42 }
 0xf5e   :  { %17029 = vmatpush3.bf16.msra.mxu1 %v18284_v27  ;;  %v11251_v27 = vld [vmem:[#allocation3 + $0x3b] sm:$0xff] }
 0xf5f   :  { %17030 = vmatprep.subr.bf16.mxu1 %v18547_v42  ;;  %v11258_v40 = vpack.c.bf16 %v11252_v28, %v11251_v27 }
 0xf61   :  { %17011 = vmatmul.mubr.msk.bf16.gmra.mrb[84].mxu1 %vm2988_vm4, %v10696_v2 }
 0xf62   :  { %17014 = vmatprep.mubr.msk.bf16.mxu1 %vm18548_vm3, %v18547_v42  ;;  %17031 = vmatpush3.bf16.msra.mxu1 %v18285_v62  ;;  %v11253_v62 = vld [vmem:[#allocation3 + $0x4b] sm:$0xff] }
 0xf63   :  { %17032 = vmatprep.subr.bf16.mxu1 %v18547_v42  ;;  %v11259_v2 = vpack.c.bf16 %v11254_v60, %v11253_v62 }
 0xf66   :  { %17033 = vmatpush3.bf16.msra.mxu1 %v18286_v0  ;;  %v11391_v0 = vld [vmem:[#allocation3 + $0x14] sm:$0xff] }
 0xf67   :  { %17054 = vmatprep.subr.bf16.mxu1 %v18547_v42 }
 0xf69   :  { %17015 = vmatmul.mubr.msk.bf16.gmra.mrb[88].mxu1 %vm2988_vm4, %v10697_v3  ;;  %v11400_v3 = vpack.c.bf16 %v11391_v0, %v11390_v63 }
 0xf6a   :  { %17018 = vmatprep.mubr.msk.bf16.mxu1 %vm18548_vm3, %v18547_v42 }
 0xf71   :  { %17019 = vmatmul.mubr.msk.bf16.gmra.mrb[92].mxu1 %vm2988_vm4, %v10698_v31  ;;  %v11392_v31 = vld [vmem:[#allocation3 + $0x1c] sm:$0xff] }
 0xf72   :  { %17022 = vmatprep.mubr.msk.bf16.mxu1 %vm18548_vm3, %v18547_v42  ;;  %v11401_v49 = vpack.c.bf16 %v11393_v36, %v11392_v31 }
 0xf79   :  { %17023 = vmatmul.mubr.msk.bf16.gmra.mrb[96].mxu1 %vm2988_vm4, %v10699_v56  ;;  %v18302_v56 = vld [vmem:[%s23709_s3 + $0xd8] sm:$0xff]  }
 0xf7a   :  { %17034 = vmatprep.mubr.msk.bf16.mxu1 %vm18548_vm3, %v18547_v42 }
 0xf81   :  { %17035 = vmatmul.mubr.msk.bf16.vlgmr.msra.gmra.mrb[100].mxu1 %vm2988_vm4, %v10965_v16 }
 0xf82   :  { %17038 = vmatprep.mubr.msk.bf16.mxu1 %vm18548_vm3, %v18547_v42  ;;  %17055 = vmatpush3.bf16.msra.mxu1 %v18287_v7 }
 0xf83   :  { %17056 = vmatprep.subr.bf16.mxu1 %v18547_v42 }
 0xf86   :  { %17057 = vmatpush3.bf16.msra.mxu1 %v18288_v21  ;;  %v11394_v21 = vld [vmem:[#allocation3 + $0x2c] sm:$0xff] }
 0xf87   :  { %17058 = vmatprep.subr.bf16.mxu1 %v18547_v42  ;;  %v11402_v32 = vpack.c.bf16 %v11395_v4, %v11394_v21 }
 0xf89   :  { %17039 = vmatmul.mubr.msk.bf16.gmra.mrb[104].mxu1 %vm2988_vm4, %v10966_v55  ;;  %v11397_v55 = vld [vmem:[#allocation3 + $0x44] sm:$0xff] }
 0xf8a   :  { %17042 = vmatprep.mubr.msk.bf16.mxu1 %vm18548_vm3, %v18547_v42  ;;  %17059 = vmatpush3.bf16.msra.mxu1 %v18289_v57  ;;  %v11403_v12 = vpack.c.bf16 %v11397_v55, %v11396_v44 }
 0xf8b   :  { %17060 = vmatprep.subr.bf16.mxu1 %v18547_v42 }
 0xf8e   :  { %17061 = vmatpush3.bf16.msra.mxu1 %v18290_v61 }
 0xf8f   :  { %17082 = vmatprep.subr.bf16.mxu1 %v18547_v42 }
 0xf91   :  { %17043 = vmatmul.mubr.msk.bf16.gmra.mrb[108].mxu1 %vm2988_vm4, %v10967_v25 }
 0xf92   :  { %17046 = vmatprep.mubr.msk.bf16.mxu1 %vm18548_vm3, %v18547_v42 }
 0xf99   :  { %17047 = vmatmul.mubr.msk.bf16.gmra.mrb[112].mxu1 %vm2988_vm4, %v10968_v47  ;;  %v11399_v47 = vld [vmem:[#allocation3 + $0x54] sm:$0xff] }
 0xf9a   :  { %17050 = vmatprep.mubr.msk.bf16.mxu1 %vm18548_vm3, %v18547_v42 }
 0xfa1   :  { %17051 = vmatmul.mubr.msk.bf16.gmra.mrb[116].mxu1 %vm2988_vm4, %v10969_v15  ;;  %v11398_v15 = vld [vmem:[#allocation3 + $0x4c] sm:$0xff] }
 0xfa2   :  { %17062 = vmatprep.mubr.msk.bf16.mxu1 %vm18548_vm3, %v18547_v42 }
 0xfa9   :  { %17063 = vmatmul.mubr.msk.bf16.vlgmr.msra.gmra.mrb[120].mxu1 %vm2988_vm4, %v11110_v53  ;;  %v11404_v53 = vpack.c.bf16 %v11399_v47, %v11398_v15 }
 0xfaa   :  { %17066 = vmatprep.mubr.msk.bf16.mxu1 %vm18548_vm3, %v18547_v42  ;;  %17083 = vmatpush3.bf16.msra.mxu1 %v18291_v50 }
 0xfab   :  { %17084 = vmatprep.subr.bf16.mxu1 %v18547_v42 }
 0xfae   :  { %17085 = vmatpush3.bf16.msra.mxu1 %v18292_v38 }
 0xfaf   :  { %17086 = vmatprep.subr.bf16.mxu1 %v18547_v42 }
 0xfb1   :  { %17067 = vmatmul.mubr.msk.bf16.gmra.mrb[124].mxu1 %vm2988_vm4, %v11111_v20 }
 0xfb2   :  { %17070 = vmatprep.mubr.msk.bf16.mxu1 %vm18548_vm3, %v18547_v42  ;;  %17087 = vmatpush3.bf16.msra.mxu1 %v18293_v19 }
 0xfb3   :  { %17088 = vmatprep.subr.bf16.mxu1 %v18547_v42 }
 0xfb6   :  { %17089 = vmatpush3.bf16.msra.mxu1 %v18294_v23  ;;  %v18303_v23 = vld [vmem:[%s23709_s3 + $0xe0] sm:$0xff]  }
 0xfb7   :  { %17110 = vmatprep.subr.bf16.mxu1 %v18547_v42 }
 0xfb9   :  { %17071 = vmatmul.mubr.msk.bf16.gmra.mrb[128].mxu1 %vm2988_vm4, %v11112_v9 }
 0xfba   :  { %17074 = vmatprep.mubr.msk.bf16.mxu1 %vm18548_vm3, %v18547_v42 }
 0xfc1   :  { %17075 = vmatmul.mubr.msk.bf16.gmra.mrb[132].mxu1 %vm2988_vm4, %v11113_v24  ;;  %v11545_v24 = vpack.c.bf16 %v11392_v31, %v11391_v0  ;;  %v11548_v0 = vpack.c.bf16 %v11398_v15, %v11397_v55 }
 0xfc2   :  { %17078 = vmatprep.mubr.msk.bf16.mxu1 %vm18548_vm3, %v18547_v42 }
 0xfc9   :  { %17079 = vmatmul.mubr.msk.bf16.gmra.mrb[136].mxu1 %vm2988_vm4, %v11114_v29 }
 0xfca   :  { %17090 = vmatprep.mubr.msk.bf16.mxu1 %vm18548_vm3, %v18547_v42 }
 0xfd1   :  { %17091 = vmatmul.mubr.msk.bf16.vlgmr.msra.gmra.mrb[140].mxu1 %vm2988_vm4, %v11255_v11 }
 0xfd2   :  { %17094 = vmatprep.mubr.msk.bf16.mxu1 %vm18548_vm3, %v18547_v42  ;;  %17111 = vmatpush3.bf16.msra.mxu1 %v18295_v34  ;;  %v18305_v34 = vld [vmem:[%s23709_s3 + $0xf0] sm:$0xff]  }
 0xfd3   :  { %17112 = vmatprep.subr.bf16.mxu1 %v18547_v42 }
 0xfd6   :  { %17113 = vmatpush3.bf16.msra.mxu1 %v18296_v48  ;;  %v11546_v48 = vpack.c.bf16 %v11394_v21, %v11393_v36  ;;  %v11680_v21 = vld [vmem:[#allocation3 + $0x15] sm:$0xff] }
 0xfd7   :  { %17114 = vmatprep.subr.bf16.mxu1 %v18547_v42 }
 0xfd9   :  { %17095 = vmatmul.mubr.msk.bf16.gmra.mrb[144].mxu1 %vm2988_vm4, %v11256_v54 }
 0xfda   :  { %17098 = vmatprep.mubr.msk.bf16.mxu1 %vm18548_vm3, %v18547_v42  ;;  %17115 = vmatpush3.bf16.msra.mxu1 %v18297_v39 }
 0xfdb   :  { %17116 = vmatprep.subr.bf16.mxu1 %v18547_v42 }
 0xfde   :  { %17117 = vmatpush3.bf16.msra.mxu1 %v18298_v14 }
 0xfdf   :  { %17138 = vmatprep.subr.bf16.mxu1 %v18547_v42 }
 0xfe1   :  { %17099 = vmatmul.mubr.msk.bf16.gmra.mrb[148].mxu1 %vm2988_vm4, %v11257_v52  ;;  %v11547_v52 = vpack.c.bf16 %v11396_v44, %v11395_v4  ;;  %v11683_v44 = vld [vmem:[#allocation3 + $0x2d] sm:$0xff] }
 0xfe2   :  { %17102 = vmatprep.mubr.msk.bf16.mxu1 %vm18548_vm3, %v18547_v42 }
 0xfe9   :  { %17103 = vmatmul.mubr.msk.bf16.gmra.mrb[152].mxu1 %vm2988_vm4, %v11258_v40 }
 0xfea   :  { %17106 = vmatprep.mubr.msk.bf16.mxu1 %vm18548_vm3, %v18547_v42 }
 0xff1   :  { %17107 = vmatmul.mubr.msk.bf16.gmra.mrb[156].mxu1 %vm2988_vm4, %v11259_v2 }
 0xff2   :  { %17118 = vmatprep.mubr.msk.bf16.mxu1 %vm18548_vm3, %v18547_v42 }
 0xff9   :  { %17119 = vmatmul.mubr.msk.bf16.vlgmr.msra.gmra.mrb[160].mxu1 %vm2988_vm4, %v11400_v3 }
 0xffa   :  { %17122 = vmatprep.mubr.msk.bf16.mxu1 %vm18548_vm3, %v18547_v42  ;;  %17139 = vmatpush3.bf16.msra.mxu1 %v18299_v1  ;;  %v11544_v1 = vld [vmem:[#allocation3 + $0x5c] sm:$0xff] }
 0xffb   :  { %17140 = vmatprep.subr.bf16.mxu1 %v18547_v42 }
 0xffe   :  { %17141 = vmatpush3.bf16.msra.mxu1 %v18300_v41 }
 0xfff   :  { %17142 = vmatprep.subr.bf16.mxu1 %v18547_v42 }
0x1001   :  { %17123 = vmatmul.mubr.msk.bf16.gmra.mrb[164].mxu1 %vm2988_vm4, %v11401_v49  ;;  %v11549_v49 = vpack.c.bf16 %v11544_v1, %v11399_v47  ;;  %v11682_v47 = vld [vmem:[#allocation3 + $0x25] sm:$0xff] }
0x1002   :  { %17126 = vmatprep.mubr.msk.bf16.mxu1 %vm18548_vm3, %v18547_v42  ;;  %17143 = vmatpush3.bf16.msra.mxu1 %v18301_v45 }
0x1003   :  { %17144 = vmatprep.subr.bf16.mxu1 %v18547_v42 }
0x1004   :  { %v10804_v37 = vpop.f32.mrb[60].mxu1 }
0x1005   :  { %v16980_v7 = vpop.f32.mrb[61].mxu1 }
0x1006   :  { %v10807_v16 = vpop.f32.mrb[62].mxu1  ;;  %17145 = vmatpush3.bf16.msra.mxu1 %v18302_v56 }
0x1007   :  { %v16981_v30 = vpop.f32.mrb[63].mxu1  ;;  %17166 = vmatprep.subr.bf16.mxu1 %v18547_v42 }
0x1008   :  { %v18307_v30 = vld [vmem:[%s23709_s3 + $0x100] sm:$0xff]  }
0x1009   :  { %17127 = vmatmul.mubr.msk.bf16.gmra.mrb[168].mxu1 %vm2988_vm4, %v11402_v32 }
0x100a   :  { %17130 = vmatprep.mubr.msk.bf16.mxu1 %vm18548_vm3, %v18547_v42 }
0x100c   :  { %v10812_v57 = vpop.f32.mrb[64].mxu1 }
0x100d   :  { %v16984_v61 = vpop.f32.mrb[65].mxu1 }
0x100e   :  { %v10815_v10 = vpop.f32.mrb[66].mxu1  ;;  %v18308_v61 = vld [vmem:[%s23709_s3 + $0x108] sm:$0xff]  }
0x100f   :  { %v16985_v25 = vpop.f32.mrb[67].mxu1 }
0x1011   :  { %17131 = vmatmul.mubr.msk.bf16.gmra.mrb[172].mxu1 %vm2988_vm4, %v11403_v12 }
0x1012   :  { %17134 = vmatprep.mubr.msk.bf16.mxu1 %vm18548_vm3, %v18547_v42 }
0x1014   :  { %v10820_v13 = vpop.f32.mrb[68].mxu1 }
0x1015   :  { %v16988_v5 = vpop.f32.mrb[69].mxu1 }
0x1016   :  { %v10823_v17 = vpop.f32.mrb[70].mxu1  ;;  %v18309_v5 = vld [vmem:[%s23709_s3 + $0x110] sm:$0xff]  }
0x1017   :  { %v16989_v50 = vpop.f32.mrb[71].mxu1 }
0x1018   :  { %v11691_v50 = vpack.c.bf16 %v11683_v44, %v11682_v47 }
0x1019   :  { %17135 = vmatmul.mubr.msk.bf16.gmra.mrb[176].mxu1 %vm2988_vm4, %v11404_v53  ;;  %v18310_v53 = vld [vmem:[%s23709_s3 + $0x118] sm:$0xff]  }
0x101a   :  { %17146 = vmatprep.mubr.msk.bf16.mxu1 %vm18548_vm3, %v18547_v42 }
0x101c   :  { %v10828_v38 = vpop.f32.mrb[72].mxu1 }
0x101d   :  { %v16992_v19 = vpop.f32.mrb[73].mxu1 }
0x101e   :  { %v10831_v20 = vpop.f32.mrb[74].mxu1  ;;  %v11685_v19 = vld [vmem:[#allocation3 + $0x3d] sm:$0xff] }
0x101f   :  { %v16993_v9 = vpop.f32.mrb[75].mxu1 }
0x1021   :  { %17147 = vmatmul.mubr.msk.bf16.vlgmr.msra.gmra.mrb[180].mxu1 %vm2988_vm4, %v11545_v24  ;;  %v11684_v24 = vld [vmem:[#allocation3 + $0x35] sm:$0xff] }
0x1022   :  { %17150 = vmatprep.mubr.msk.bf16.mxu1 %vm18548_vm3, %v18547_v42  ;;  %17167 = vmatpush3.bf16.msra.mxu1 %v18303_v23 }
0x1023   :  { %17168 = vmatprep.subr.bf16.mxu1 %v18547_v42 }
0x1024   :  { %v10836_v29 = vpop.f32.mrb[76].mxu1 }
0x1025   :  { %v16996_v18 = vpop.f32.mrb[77].mxu1 }
0x1026   :  { %v22720_v33 = vpop.f32.mrb[78].mxu1  ;;  %17169 = vmatpush3.bf16.msra.mxu1 %v18304_v26  ;;  %v11692_v18 = vpack.c.bf16 %v11685_v19, %v11684_v24  ;;  %v11831_v19 = vld [vmem:[#allocation3 + $0x46] sm:$0xff] }
0x1027   :  { %v16997_v11 = vpop.f32.mrb[79].mxu1  ;;  %17170 = vmatprep.subr.bf16.mxu1 %v18547_v42 }
0x1029   :  { %17151 = vmatmul.mubr.msk.bf16.gmra.mrb[184].mxu1 %vm2988_vm4, %v11546_v48 }
0x102a   :  { %17154 = vmatprep.mubr.msk.bf16.mxu1 %vm18548_vm3, %v18547_v42  ;;  %17171 = vmatpush3.bf16.msra.mxu1 %v18305_v34  ;;  %v11687_v34 = vld [vmem:[#allocation3 + $0x4d] sm:$0xff] }
0x102b   :  { %17172 = vmatprep.subr.bf16.mxu1 %v18547_v42 }
0x102c   :  { %v10916_v46 = vpop.f32.mrb[80].mxu1 }
0x102d   :  { %v22733_v39 = vadd.f32 %v10916_v46, %v10804_v37  ;;  %v17008_v54 = vpop.f32.mrb[81].mxu1  ;;  %v11681_v37 = vld [vmem:[#allocation3 + $0x1d] sm:$0xff]  ;;  %v11686_v46 = vld [vmem:[#allocation3 + $0x45] sm:$0xff] }
0x102e   :  { %v10919_v14 = vpop.f32.mrb[82].mxu1  ;;  %17173 = vmatpush3.bf16.msra.mxu1 %v18306_v35  ;;  %v11690_v55 = vpack.c.bf16 %v11681_v37, %v11680_v21  ;;  %v11828_v37 = vld [vmem:[#allocation3 + $0x2e] sm:$0xff] }
0x102f   :  { %v22735_v58 = vadd.f32 %v10919_v14, %v10807_v16  ;;  %v17009_v51 = vpop.f32.mrb[83].mxu1  ;;  %17194 = vmatprep.subr.bf16.mxu1 %v18547_v42  ;;  %v11693_v14 = vpack.c.bf16 %v11687_v34, %v11686_v46  ;;  %v11833_v34 = vld [vmem:[#allocation3 + $0x56] sm:$0xff] }
0x1030   :  { %v11689_v51 = vld [vmem:[#allocation3 + $0x5d] sm:$0xff] }
0x1031   :  { %17155 = vmatmul.mubr.msk.bf16.gmra.mrb[188].mxu1 %vm2988_vm4, %v11547_v52 }
0x1032   :  { %17158 = vmatprep.mubr.msk.bf16.mxu1 %vm18548_vm3, %v18547_v42 }
0x1034   :  { %v10924_v28 = vpop.f32.mrb[84].mxu1 }
0x1035   :  { %v22741_v27 = vadd.f32 %v10924_v28, %v10812_v57  ;;  %v17012_v40 = vpop.f32.mrb[85].mxu1 }
0x1036   :  { %v10927_v60 = vpop.f32.mrb[86].mxu1 }
0x1037   :  { %v22743_v62 = vadd.f32 %v10927_v60, %v10815_v10  ;;  %v17013_v2 = vpop.f32.mrb[87].mxu1  ;;  %v11688_v60 = vld [vmem:[#allocation3 + $0x55] sm:$0xff] }
0x1039   :  { %17159 = vmatmul.mubr.msk.bf16.gmra.mrb[192].mxu1 %vm2988_vm4, %v11548_v0  ;;  %v11694_v0 = vpack.c.bf16 %v11689_v51, %v11688_v60 }
0x103a   :  { %17162 = vmatprep.mubr.msk.bf16.mxu1 %vm18548_vm3, %v18547_v42 }
0x103c   :  { %v10932_v63 = vpop.f32.mrb[88].mxu1 }
0x103d   :  { %v22748_v3 = vadd.f32 %v10932_v63, %v10820_v13  ;;  %v17016_v41 = vpop.f32.mrb[89].mxu1  ;;  %v11826_v63 = vld [vmem:[#allocation3 + $0x1e] sm:$0xff] }
0x103e   :  { %v10935_v36 = vpop.f32.mrb[90].mxu1 }
0x103f   :  { %v22750_v31 = vadd.f32 %v10935_v36, %v10823_v17  ;;  %v17017_v45 = vpop.f32.mrb[91].mxu1 }
0x1040   :  { %v11825_v45 = vld [vmem:[#allocation3 + $0x16] sm:$0xff] }
0x1041   :  { %17163 = vmatmul.mubr.msk.bf16.gmra.mrb[196].mxu1 %vm2988_vm4, %v11549_v49 }
0x1042   :  { %17174 = vmatprep.mubr.msk.bf16.mxu1 %vm18548_vm3, %v18547_v42 }
0x1044   :  { %v10940_v56 = vpop.f32.mrb[92].mxu1 }
0x1045   :  { %v22755_v4 = vadd.f32 %v10940_v56, %v10828_v38  ;;  %v17020_v7 = vpop.f32.mrb[93].mxu1  ;;  %v11835_v56 = vpack.c.bf16 %v11826_v63, %v11825_v45 }
0x1046   :  { %v10943_v16 = vpop.f32.mrb[94].mxu1 }
0x1047   :  { %v22760_v32 = vadd.f32 %v10943_v16, %v10831_v20  ;;  %v17021_v57 = vpop.f32.mrb[95].mxu1 }
0x1049   :  { %17175 = vmatmul.mubr.msk.bf16.vlgmr.msra.gmra.mrb[200].mxu1 %vm2988_vm4, %v11690_v55 }
0x104a   :  { %17178 = vmatprep.mubr.msk.bf16.mxu1 %vm18548_vm3, %v18547_v42  ;;  %17195 = vmatpush3.bf16.msra.mxu1 %v18307_v30  ;;  %v11827_v30 = vld [vmem:[#allocation3 + $0x26] sm:$0xff] }
0x104b   :  { %17196 = vmatprep.subr.bf16.mxu1 %v18547_v42  ;;  %v11836_v55 = vpack.c.bf16 %v11828_v37, %v11827_v30 }
0x104c   :  { %v10948_v10 = vpop.f32.mrb[96].mxu1 }
0x104d   :  { %v22769_v25 = vadd.f32 %v10948_v10, %v10836_v29  ;;  %v17024_v12 = vpop.f32.mrb[97].mxu1 }
0x104e   :  { %v10951_v13 = vpop.f32.mrb[98].mxu1  ;;  %17197 = vmatpush3.bf16.msra.mxu1 %v18308_v61  ;;  %v11830_v61 = vld [vmem:[#allocation3 + $0x3e] sm:$0xff] }
0x104f   :  { %v10952_v17 = vadd.f32 %v10951_v13, %v22720_v33  ;;  %v17025_v15 = vpop.f32.mrb[99].mxu1  ;;  %17198 = vmatprep.subr.bf16.mxu1 %v18547_v42  ;;  %v11829_v13 = vld [vmem:[#allocation3 + $0x36] sm:$0xff] }
0x1050   :  { %v11832_v15 = vld [vmem:[#allocation3 + $0x4e] sm:$0xff] }
0x1051   :  { %17179 = vmatmul.mubr.msk.bf16.gmra.mrb[204].mxu1 %vm2988_vm4, %v11691_v50 }
0x1052   :  { %17182 = vmatprep.mubr.msk.bf16.mxu1 %vm18548_vm3, %v18547_v42  ;;  %17199 = vmatpush3.bf16.msra.mxu1 %v18309_v5 }
0x1053   :  { %17200 = vmatprep.subr.bf16.mxu1 %v18547_v42 }
0x1054   :  { %v11051_v38 = vpop.f32.mrb[100].mxu1 }
0x1055   :  { %v11090_v20 = vadd.f32 %v11051_v38, %v22733_v39  ;;  %v17036_v23 = vpop.f32.mrb[101].mxu1 }
0x1056   :  { %v11054_v9 = vpop.f32.mrb[102].mxu1  ;;  %17201 = vmatpush3.bf16.msra.mxu1 %v18310_v53 }
0x1057   :  { %v11091_v26 = vadd.f32 %v11054_v9, %v22735_v58  ;;  %v17037_v29 = vpop.f32.mrb[103].mxu1  ;;  %17222 = vmatprep.subr.bf16.mxu1 %v18547_v42 }
0x1059   :  { %17183 = vmatmul.mubr.msk.bf16.gmra.mrb[208].mxu1 %vm2988_vm4, %v11692_v18 }
0x105a   :  { %17186 = vmatprep.mubr.msk.bf16.mxu1 %vm18548_vm3, %v18547_v42 }
0x105c   :  { %v11059_v33 = vpop.f32.mrb[104].mxu1 }
0x105d   :  { %v11092_v11 = vadd.f32 %v11059_v33, %v22741_v27  ;;  %v17040_v48 = vpop.f32.mrb[105].mxu1 }
0x105e   :  { %v11062_v35 = vpop.f32.mrb[106].mxu1 }
0x105f   :  { %v11093_v39 = vadd.f32 %v11062_v35, %v22743_v62  ;;  %v17041_v54 = vpop.f32.mrb[107].mxu1 }
0x1061   :  { %17187 = vmatmul.mubr.msk.bf16.gmra.mrb[212].mxu1 %vm2988_vm4, %v11693_v14 }
0x1062   :  { %17190 = vmatprep.mubr.msk.bf16.mxu1 %vm18548_vm3, %v18547_v42 }
0x1064   :  { %v11067_v58 = vpop.f32.mrb[108].mxu1 }
0x1065   :  { %v11094_v52 = vadd.f32 %v11067_v58, %v22748_v3  ;;  %v17044_v28 = vpop.f32.mrb[109].mxu1 }
0x1066   :  { %v11070_v40 = vpop.f32.mrb[110].mxu1 }
0x1067   :  { %v11095_v27 = vadd.f32 %v11070_v40, %v22750_v31  ;;  %v17045_v2 = vpop.f32.mrb[111].mxu1 }
0x1069   :  { %17191 = vmatmul.mubr.msk.bf16.gmra.mrb[216].mxu1 %vm2988_vm4, %v11694_v0 }
0x106a   :  { %17202 = vmatprep.mubr.msk.bf16.mxu1 %vm18548_vm3, %v18547_v42 }
0x106c   :  { %v11075_v62 = vpop.f32.mrb[112].mxu1 }
0x106d   :  { %v11096_v1 = vadd.f32 %v11075_v62, %v22755_v4  ;;  %v17048_v41 = vpop.f32.mrb[113].mxu1 }
0x106e   :  { %v11078_v36 = vpop.f32.mrb[114].mxu1 }
0x106f   :  { %v11097_v3 = vadd.f32 %v11078_v36, %v22760_v32  ;;  %v17049_v49 = vpop.f32.mrb[115].mxu1 }
0x1071   :  { %17203 = vmatmul.mubr.msk.bf16.vlgmr.msra.gmra.mrb[224].mxu1 %vm2988_vm4, %v11835_v56 }
0x1072   :  { %17206 = vmatprep.mubr.msk.bf16.mxu1 %vm18548_vm3, %v18547_v42 }
0x1074   :  { %v11083_v31 = vpop.f32.mrb[116].mxu1 }
0x1075   :  { %v11098_v7 = vadd.f32 %v11083_v31, %v22769_v25  ;;  %v17052_v16 = vpop.f32.mrb[117].mxu1  ;;  %v11837_v25 = vpack.c.bf16 %v11830_v61, %v11829_v13 }
0x1076   :  { %v11086_v21 = vpop.f32.mrb[118].mxu1 }
0x1077   :  { %v11099_v4 = vadd.f32 %v11086_v21, %v10952_v17  ;;  %v17053_v57 = vpop.f32.mrb[119].mxu1 }
0x1079   :  { %17207 = vmatmul.mubr.msk.bf16.gmra.mrb[228].mxu1 %vm2988_vm4, %v11836_v55 }
0x107a   :  { %17210 = vmatprep.mubr.msk.bf16.mxu1 %vm18548_vm3, %v18547_v42 }
0x107c   :  { %v11196_v32 = vpop.f32.mrb[120].mxu1 }
0x107d   :  { %v11235_v10 = vadd.f32 %v11196_v32, %v11090_v20  ;;  %v17064_v44 = vpop.f32.mrb[121].mxu1  ;;  %v11838_v20 = vpack.c.bf16 %v11832_v15, %v11831_v19 }
0x107e   :  { %v11199_v12 = vpop.f32.mrb[122].mxu1 }
0x107f   :  { %v11236_v47 = vadd.f32 %v11199_v12, %v11091_v26  ;;  %v17065_v5 = vpop.f32.mrb[123].mxu1  ;;  %v11834_v26 = vld [vmem:[#allocation3 + $0x5e] sm:$0xff] }
0x1081   :  { %17211 = vmatmul.mubr.msk.bf16.gmra.mrb[232].mxu1 %vm2988_vm4, %v11837_v25 }
0x1082   :  { %17214 = vmatprep.mubr.msk.bf16.mxu1 %vm18548_vm3, %v18547_v42 }
0x1084   :  { %v11204_v17 = vpop.f32.mrb[124].mxu1 }
0x1085   :  { %v11237_v50 = vadd.f32 %v11204_v17, %v11092_v11  ;;  %v17068_v53 = vpop.f32.mrb[125].mxu1  ;;  %v11839_v11 = vpack.c.bf16 %v11834_v26, %v11833_v34 }
0x1086   :  { %v11207_v38 = vpop.f32.mrb[126].mxu1 }
0x1087   :  { %v11238_v23 = vadd.f32 %v11207_v38, %v11093_v39  ;;  %v17069_v9 = vpop.f32.mrb[127].mxu1 }
0x1089   :  { %17215 = vmatmul.mubr.msk.bf16.gmra.mrb[236].mxu1 %vm2988_vm4, %v11838_v20 }
0x108a   :  { %17218 = vmatprep.mubr.msk.bf16.mxu1 %vm18548_vm3, %v18547_v42 }
0x108c   :  { %v11212_v24 = vpop.f32.mrb[128].mxu1 }
0x108d   :  { %v11239_v29 = vadd.f32 %v11212_v24, %v11094_v52  ;;  %v17072_v18 = vpop.f32.mrb[129].mxu1 }
0x108e   :  { %v11215_v33 = vpop.f32.mrb[130].mxu1 }
0x108f   :  { %v11240_v48 = vadd.f32 %v11215_v33, %v11095_v27  ;;  %v17073_v35 = vpop.f32.mrb[131].mxu1 }
0x1091   :  { %17219 = vmatmul.mubr.msk.bf16.gmra.mrb[240].mxu1 %vm2988_vm4, %v11839_v11 }
0x1092   :  { %17232 = vmatprep.mubr.msk.bf16.mxu1 %vm18548_vm3, %v18547_v42 }
0x1094   :  { %v11220_v46 = vpop.f32.mrb[132].mxu1 }
0x1095   :  { %v11241_v39 = vadd.f32 %v11220_v46, %v11096_v1  ;;  %v17076_v54 = vpop.f32.mrb[133].mxu1 }
0x1096   :  { %v11223_v14 = vpop.f32.mrb[134].mxu1 }
0x1097   :  { %v11242_v58 = vadd.f32 %v11223_v14, %v11097_v3  ;;  %v17077_v51 = vpop.f32.mrb[135].mxu1 }
0x109c   :  { %v11228_v28 = vpop.f32.mrb[136].mxu1 }
0x109d   :  { %v11243_v40 = vadd.f32 %v11228_v28, %v11098_v7  ;;  %v17080_v52 = vpop.f32.mrb[137].mxu1 }
0x109e   :  { %v11231_v60 = vpop.f32.mrb[138].mxu1 }
0x109f   :  { %v11244_v2 = vadd.f32 %v11231_v60, %v11099_v4  ;;  %v17081_v0 = vpop.f32.mrb[139].mxu1 }
0x10a4   :  { %v11341_v27 = vpop.f32.mrb[140].mxu1 }
0x10a5   :  { %v11380_v62 = vadd.f32 %v11341_v27, %v11235_v10  ;;  %v17092_v63 = vpop.f32.mrb[141].mxu1 }
0x10a6   :  { %v11344_v41 = vpop.f32.mrb[142].mxu1 }
0x10a7   :  { %v11381_v36 = vadd.f32 %v11344_v41, %v11236_v47  ;;  %v17093_v45 = vpop.f32.mrb[143].mxu1 }
0x10ac   :  { %v11349_v49 = vpop.f32.mrb[144].mxu1 }
0x10ad   :  { %v11382_v56 = vadd.f32 %v11349_v49, %v11237_v50  ;;  %v17096_v31 = vpop.f32.mrb[145].mxu1 }
0x10ae   :  { %v11352_v1 = vpop.f32.mrb[146].mxu1 }
0x10af   :  { %v11383_v37 = vadd.f32 %v11352_v1, %v11238_v23  ;;  %v17097_v16 = vpop.f32.mrb[147].mxu1 }
0x10b4   :  { %v11357_v3 = vpop.f32.mrb[148].mxu1 }
0x10b5   :  { %v11384_v21 = vadd.f32 %v11357_v3, %v11239_v29  ;;  %v17100_v30 = vpop.f32.mrb[149].mxu1 }
0x10b6   :  { %v11360_v7 = vpop.f32.mrb[150].mxu1 }
0x10b7   :  { %v11385_v57 = vadd.f32 %v11360_v7, %v11240_v48  ;;  %v17101_v55 = vpop.f32.mrb[151].mxu1 }
0x10bc   :  { %v11365_v4 = vpop.f32.mrb[152].mxu1 }
0x10bd   :  { %v11386_v32 = vadd.f32 %v11365_v4, %v11241_v39  ;;  %v17104_v61 = vpop.f32.mrb[153].mxu1 }
0x10be   :  { %v11368_v10 = vpop.f32.mrb[154].mxu1 }
0x10bf   :  { %v11387_v44 = vadd.f32 %v11368_v10, %v11242_v58  ;;  %v17105_v12 = vpop.f32.mrb[155].mxu1 }
0x10c4   :  { %v11373_v13 = vpop.f32.mrb[156].mxu1 }
0x10c5   :  { %v11388_v47 = vadd.f32 %v11373_v13, %v11243_v40  ;;  %v17108_v5 = vpop.f32.mrb[157].mxu1 }
0x10c6   :  { %v11376_v25 = vpop.f32.mrb[158].mxu1 }
0x10c7   :  { %v11389_v17 = vadd.f32 %v11376_v25, %v11244_v2  ;;  %v17109_v15 = vpop.f32.mrb[159].mxu1 }
0x10cc   :  { %v11486_v50 = vpop.f32.mrb[160].mxu1 }
0x10cd   :  { %v11525_v53 = vadd.f32 %v11486_v50, %v11380_v62  ;;  %v17120_v38 = vpop.f32.mrb[161].mxu1 }
0x10ce   :  { %v11489_v19 = vpop.f32.mrb[162].mxu1 }
0x10cf   :  { %v11526_v23 = vadd.f32 %v11489_v19, %v11381_v36  ;;  %v17121_v9 = vpop.f32.mrb[163].mxu1 }
0x10d4   :  { %v11494_v20 = vpop.f32.mrb[164].mxu1 }
0x10d5   :  { %v11527_v24 = vadd.f32 %v11494_v20, %v11382_v56  ;;  %v17124_v26 = vpop.f32.mrb[165].mxu1 }
0x10d6   :  { %v11497_v29 = vpop.f32.mrb[166].mxu1 }
0x10d7   :  { %v11528_v18 = vadd.f32 %v11497_v29, %v11383_v37  ;;  %v17125_v33 = vpop.f32.mrb[167].mxu1 }
0x10dc   :  { %v11502_v34 = vpop.f32.mrb[168].mxu1 }
0x10dd   :  { %v11529_v48 = vadd.f32 %v11502_v34, %v11384_v21  ;;  %v17128_v35 = vpop.f32.mrb[169].mxu1 }
0x10de   :  { %v11505_v11 = vpop.f32.mrb[170].mxu1 }
0x10df   :  { %v11530_v46 = vadd.f32 %v11505_v11, %v11385_v57  ;;  %v17129_v39 = vpop.f32.mrb[171].mxu1 }
0x10e4   :  { %v11510_v54 = vpop.f32.mrb[172].mxu1 }
0x10e5   :  { %v11531_v14 = vadd.f32 %v11510_v54, %v11386_v32  ;;  %v17132_v58 = vpop.f32.mrb[173].mxu1 }
0x10e6   :  { %v11513_v51 = vpop.f32.mrb[174].mxu1 }
0x10e7   :  { %v11532_v28 = vadd.f32 %v11513_v51, %v11387_v44  ;;  %v17133_v40 = vpop.f32.mrb[175].mxu1 }
0x10ec   :  { %v11518_v52 = vpop.f32.mrb[176].mxu1 }
0x10ed   :  { %v11533_v60 = vadd.f32 %v11518_v52, %v11388_v47  ;;  %v17136_v2 = vpop.f32.mrb[177].mxu1 }
0x10ee   :  { %v11521_v0 = vpop.f32.mrb[178].mxu1 }
0x10ef   :  { %v11534_v27 = vadd.f32 %v11521_v0, %v11389_v17  ;;  %v17137_v62 = vpop.f32.mrb[179].mxu1 }
0x10f4   :  { %v11631_v63 = vpop.f32.mrb[180].mxu1 }
0x10f5   :  { %v11670_v41 = vadd.f32 %v11631_v63, %v11525_v53  ;;  %v17148_v36 = vpop.f32.mrb[181].mxu1 }
0x10f6   :  { %v11634_v45 = vpop.f32.mrb[182].mxu1 }
0x10f7   :  { %v11671_v49 = vadd.f32 %v11634_v45, %v11526_v23  ;;  %v17149_v56 = vpop.f32.mrb[183].mxu1  ;;  %v22824_v45 = vld [vmem:[%s23712_s4] ss:$0 sm:$0xff] }
0x10fc   :  { %v11639_v31 = vpop.f32.mrb[184].mxu1 }
0x10fd   :  { %v11672_v1 = vadd.f32 %v11639_v31, %v11527_v24  ;;  %v17152_v37 = vpop.f32.mrb[185].mxu1 }
0x10fe   :  { %v11642_v16 = vpop.f32.mrb[186].mxu1 }
0x10ff   :  { %v11673_v3 = vadd.f32 %v11642_v16, %v11528_v18  ;;  %v17153_v21 = vpop.f32.mrb[187].mxu1 }
0x1104   :  { %v11647_v30 = vpop.f32.mrb[188].mxu1 }
0x1105   :  { %v11674_v7 = vadd.f32 %v11647_v30, %v11529_v48  ;;  %v17156_v57 = vpop.f32.mrb[189].mxu1 }
0x1106   :  { %v11650_v55 = vpop.f32.mrb[190].mxu1 }
0x1107   :  { %v11675_v4 = vadd.f32 %v11650_v55, %v11530_v46  ;;  %v17157_v32 = vpop.f32.mrb[191].mxu1 }
0x110c   :  { %v11655_v61 = vpop.f32.mrb[192].mxu1 }
0x110d   :  { %v11676_v10 = vadd.f32 %v11655_v61, %v11531_v14  ;;  %v17160_v44 = vpop.f32.mrb[193].mxu1 }
0x110e   :  { %v11658_v12 = vpop.f32.mrb[194].mxu1 }
0x110f   :  { %v11677_v13 = vadd.f32 %v11658_v12, %v11532_v28  ;;  %v17161_v47 = vpop.f32.mrb[195].mxu1 }
0x1114   :  { %v11663_v5 = vpop.f32.mrb[196].mxu1 }
0x1115   :  { %v11678_v25 = vadd.f32 %v11663_v5, %v11533_v60  ;;  %v17164_v17 = vpop.f32.mrb[197].mxu1 }
0x1116   :  { %v11666_v15 = vpop.f32.mrb[198].mxu1 }
0x1117   :  { %v11679_v50 = vadd.f32 %v11666_v15, %v11534_v27  ;;  %v17165_v53 = vpop.f32.mrb[199].mxu1 }
0x111c   :  { %v11776_v38 = vpop.f32.mrb[200].mxu1 }
0x111d   :  { %v11815_v19 = vadd.f32 %v11776_v38, %v11670_v41  ;;  %v17176_v23 = vpop.f32.mrb[201].mxu1 }
0x111e   :  { %v11779_v9 = vpop.f32.mrb[202].mxu1 }
0x111f   :  { %v11816_v20 = vadd.f32 %v11779_v9, %v11671_v49  ;;  %v17177_v24 = vpop.f32.mrb[203].mxu1 }
0x1124   :  { %v11784_v26 = vpop.f32.mrb[204].mxu1 }
0x1125   :  { %v11817_v29 = vadd.f32 %v11784_v26, %v11672_v1  ;;  %v17180_v18 = vpop.f32.mrb[205].mxu1 }
0x1126   :  { %v11787_v33 = vpop.f32.mrb[206].mxu1 }
0x1127   :  { %v11818_v34 = vadd.f32 %v11787_v33, %v11673_v3  ;;  %v17181_v48 = vpop.f32.mrb[207].mxu1 }
0x112c   :  { %v11792_v35 = vpop.f32.mrb[208].mxu1 }
0x112d   :  { %v11819_v11 = vadd.f32 %v11792_v35, %v11674_v7  ;;  %v17184_v46 = vpop.f32.mrb[209].mxu1 }
0x112e   :  { %v11795_v39 = vpop.f32.mrb[210].mxu1 }
0x112f   :  { %v11820_v54 = vadd.f32 %v11795_v39, %v11675_v4  ;;  %v17185_v14 = vpop.f32.mrb[211].mxu1 }
0x1134   :  { %v11800_v58 = vpop.f32.mrb[212].mxu1 }
0x1135   :  { %v11821_v51 = vadd.f32 %v11800_v58, %v11676_v10  ;;  %v17188_v28 = vpop.f32.mrb[213].mxu1 }
0x1136   :  { %v11803_v40 = vpop.f32.mrb[214].mxu1 }
0x1137   :  { %v11822_v52 = vadd.f32 %v11803_v40, %v11677_v13  ;;  %v17189_v60 = vpop.f32.mrb[215].mxu1 }
0x113c   :  { %v11808_v2 = vpop.f32.mrb[216].mxu1 }
0x113d   :  { %v22817_v0 = vadd.f32 %v11808_v2, %v11678_v25  ;;  %v17192_v27 = vpop.f32.mrb[217].mxu1 }
0x113e   :  { %v11811_v62 = vpop.f32.mrb[218].mxu1 }
0x113f   :  { %v22819_v63 = vadd.f32 %v11811_v62, %v11679_v50  ;;  %v17193_v41 = vpop.f32.mrb[219].mxu1 }
0x1144   :  { %v11921_v36 = vpop.f32.mrb[224].mxu1 }
0x1145   :  { %v11960_v49 = vadd.f32 %v11921_v36, %v11815_v19  ;;  %v17204_v56 = vpop.f32.mrb[225].mxu1 }
0x1146   :  { %v11924_v31 = vpop.f32.mrb[226].mxu1 }
0x1147   :  { %v11977_v1 = vadd.f32 %v22824_v45, %v11960_v49  ;;  %v11961_v37 = vadd.f32 %v11924_v31, %v11816_v20  ;;  %v17205_v16 = vpop.f32.mrb[227].mxu1 }
0x1149   :  { %v11987_v3 = vmax.f32 %v11977_v1, 0.0  ;;  %v11978_v21 = vadd.f32 %v22824_v45, %v11961_v37 }
0x114b   :  { %11997 = vst [vmem:[#allocation4] sm:$0xff] %v11987_v3  ;;  %v11988_v30 = vmax.f32 %v11978_v21, 0.0 }
0x114c   :  { %v11929_v7 = vpop.f32.mrb[228].mxu1 }
0x114d   :  { %11998 = vst [vmem:[#allocation4 + $0x8] sm:$0xff] %v11988_v30  ;;  %v11962_v57 = vadd.f32 %v11929_v7, %v11817_v29  ;;  %v17208_v55 = vpop.f32.mrb[229].mxu1 }
0x114e   :  { %v11932_v4 = vpop.f32.mrb[230].mxu1 }
0x114f   :  { %v11979_v32 = vadd.f32 %v22824_v45, %v11962_v57  ;;  %v11963_v61 = vadd.f32 %v11932_v4, %v11818_v34  ;;  %v17209_v10 = vpop.f32.mrb[231].mxu1 }
0x1151   :  { %v11989_v44 = vmax.f32 %v11979_v32, 0.0  ;;  %v11980_v12 = vadd.f32 %v22824_v45, %v11963_v61 }
0x1153   :  { %11999 = vst [vmem:[#allocation4 + $0x10] sm:$0xff] %v11989_v44  ;;  %v11990_v13 = vmax.f32 %v11980_v12, 0.0 }
0x1154   :  { %v11937_v47 = vpop.f32.mrb[232].mxu1  ;;  %v12016_v23 = vld [vmem:[#allocation4 + $0x1] sm:$0xff] }
0x1155   :  { %12000 = vst [vmem:[#allocation4 + $0x18] sm:$0xff] %v11990_v13  ;;  %v11964_v5 = vadd.f32 %v11937_v47, %v11819_v11  ;;  %v17212_v25 = vpop.f32.mrb[233].mxu1  ;;  %v12025_v11 = vmax.f32 %v11987_v3, %v12016_v23 }
0x1156   :  { %v11940_v17 = vpop.f32.mrb[234].mxu1 }
0x1157   :  { %v22831_v15 = vadd.f32 %v22824_v45, %v11964_v5  ;;  %v11965_v50 = vadd.f32 %v11940_v17, %v11820_v54  ;;  %v17213_v53 = vpop.f32.mrb[235].mxu1 }
0x1159   :  { %v11991_v38 = vmax.f32 %v22831_v15, 0.0  ;;  %v22835_v19 = vadd.f32 %v22824_v45, %v11965_v50 }
0x115a   :  { %v12017_v9 = vld [vmem:[#allocation4 + $0x9] sm:$0xff] }
0x115b   :  { %v12034_v20 = vld [vmem:[#allocation4 + $0xa] sm:$0xff]  ;;  %12001 = vst [vmem:[#allocation4 + $0x20] sm:$0xff] %v11991_v38  ;;  %v11992_v26 = vmax.f32 %v22835_v19, 0.0  ;;  %v12026_v46 = vmax.f32 %v11988_v30, %v12017_v9 }
0x115c   :  { %v12043_v24 = vld [vmem:[#allocation4 + $0xb] sm:$0xff]  ;;  %v11945_v18 = vpop.f32.mrb[236].mxu1  ;;  %v12044_v34 = vld [vmem:[#allocation4 + $0x13] sm:$0xff] }
0x115d   :  { %v12052_v29 = vmax.f32 %v12034_v20, %v12043_v24  ;;  %v12035_v33 = vld [vmem:[#allocation4 + $0x12] sm:$0xff]  ;;  %12002 = vst [vmem:[#allocation4 + $0x28] sm:$0xff] %v11992_v26  ;;  %v11966_v48 = vadd.f32 %v11945_v18, %v11821_v51  ;;  %v17216_v35 = vpop.f32.mrb[237].mxu1 }
0x115e   :  { %v12053_v39 = vmax.f32 %v12035_v33, %v12044_v34  ;;  %v11948_v54 = vpop.f32.mrb[238].mxu1  ;;  %v12018_v41 = vld [vmem:[#allocation4 + $0x11] sm:$0xff] }
0x115f   :  { %v22841_v14 = vadd.f32 %v22824_v45, %v11966_v48  ;;  %v11967_v58 = vadd.f32 %v11948_v54, %v11822_v52  ;;  %v17217_v28 = vpop.f32.mrb[239].mxu1  ;;  %v12061_v40 = vmax.f32 %v12025_v11, %v12052_v29  ;;  %v12027_v21 = vmax.f32 %v11989_v44, %v12018_v41 }
0x1160   :  { %v12062_v60 = vmax.f32 %v12026_v46, %v12053_v39 }
0x1161   :  { %v11993_v2 = vmax.f32 %v22841_v14, 0.0  ;;  %v11984_v27 = vadd.f32 %v22824_v45, %v11967_v58 }
0x1162   :  { %v12075_v62 = vpack.c.bf16 %v12062_v60, %v12061_v40  ;;  %v12019_v36 = vld [vmem:[#allocation4 + $0x19] sm:$0xff] }
0x1163   :  { %v12036_v51 = vld [vmem:[#allocation4 + $0x1a] sm:$0xff]  ;;  %12003 = vst [vmem:[#allocation4 + $0x30] sm:$0xff] %v11993_v2  ;;  %v11994_v56 = vmax.f32 %v11984_v27, 0.0  ;;  %v12028_v30 = vmax.f32 %v11990_v13, %v12019_v36 }
0x1164   :  { %v12045_v49 = vld [vmem:[#allocation4 + $0x1b] sm:$0xff]  ;;  %17223 = vmatpush3.bf16.msra.mxu1 %v12075_v62  ;;  %v11953_v1 = vpop.f32.mrb[240].mxu1  ;;  %v12046_v37 = vld [vmem:[#allocation4 + $0x23] sm:$0xff] }
0x1165   :  { %v12054_v31 = vmax.f32 %v12036_v51, %v12045_v49  ;;  %17224 = vmatprep.subr.bf16.mxu1 %v18547_v42  ;;  %v12037_v52 = vld [vmem:[#allocation4 + $0x22] sm:$0xff]  ;;  %12004 = vst [vmem:[#allocation4 + $0x38] sm:$0xff] %v11994_v56  ;;  %v11968_v16 = vadd.f32 %v11953_v1, %v22817_v0  ;;  %v17220_v3 = vpop.f32.mrb[241].mxu1 }
0x1166   :  { %v12055_v7 = vmax.f32 %v12037_v52, %v12046_v37  ;;  %v11956_v57 = vpop.f32.mrb[242].mxu1  ;;  %v12020_v25 = vld [vmem:[#allocation4 + $0x21] sm:$0xff]  ;;  %v18325_v37 = vld [vmem:[%s23711_s5 + $0xb4] ss:$8 sps:$4 sm:$0xff]  }
0x1167   :  { %v11985_v55 = vadd.f32 %v22824_v45, %v11968_v16  ;;  %v11969_v4 = vadd.f32 %v11956_v57, %v22819_v63  ;;  %v17221_v32 = vpop.f32.mrb[243].mxu1  ;;  %v12063_v61 = vmax.f32 %v12027_v21, %v12054_v31  ;;  %v12029_v63 = vmax.f32 %v11991_v38, %v12020_v25  ;;  %v18316_v36 = vld [vmem:[%s23711_s5 + $0x84] ss:$8 sps:$4 sm:$0xff]   ;;  %v18314_v49 = vld [vmem:[%s23711_s5 + $0x80] ss:$8 sps:$4 sm:$0xff]  }
0x1168   :  { %v12064_v10 = vmax.f32 %v12028_v30, %v12055_v7  ;;  %v18322_v31 = vld [vmem:[%s23711_s5 + $0xa4] ss:$8 sps:$4 sm:$0xff]   ;;  %v18320_v52 = vld [vmem:[%s23711_s5 + $0xa0] ss:$8 sps:$4 sm:$0xff]   ;;  %v18323_v16 = vld [vmem:[%s23711_s5 + $0xb0] ss:$8 sps:$4 sm:$0xff]  }
0x1169   :  { %v11995_v12 = vmax.f32 %v11985_v55, 0.0  ;;  %v11986_v47 = vadd.f32 %v22824_v45, %v11969_v4  ;;  %v18312_v1 = vld [vmem:[%s23710_s11 + $0x8] sm:$0xff]   ;;  %v18313_v21 = vld [vmem:[%s23710_s11 + $0x10] ss:$0 sps:$4 sm:$0xff]   ;;  %v18331_v7 = vld [vmem:[%s23711_s5 + $0xd4] ss:$8 sps:$4 sm:$0xff]  }
0x116a   :  { %v12076_v5 = vpack.c.bf16 %v12064_v10, %v12063_v61  ;;  %v12021_v17 = vld [vmem:[#allocation4 + $0x29] sm:$0xff]  ;;  %v18328_v3 = vld [vmem:[%s23711_s5 + $0xc4] ss:$8 sps:$4 sm:$0xff]   ;;  %v18326_v30 = vld [vmem:[%s23711_s5 + $0xc0] ss:$8 sps:$4 sm:$0xff]  }
0x116b   :  { %v12038_v50 = vld [vmem:[#allocation4 + $0x2a] sm:$0xff]  ;;  %12005 = vst [vmem:[#allocation4 + $0x40] sm:$0xff] %v11995_v12  ;;  %v11996_v44 = vmax.f32 %v11986_v47, 0.0  ;;  %v12030_v23 = vmax.f32 %v11992_v26, %v12021_v17  ;;  %v18332_v57 = vld [vmem:[%s23711_s5 + $0xe0] ss:$8 sps:$4 sm:$0xff]  }
0x116c   :  { %v12047_v0 = vld [vmem:[#allocation4 + $0x2b] sm:$0xff]  ;;  %17225 = vmatpush3.bf16.msra.mxu1 %v12076_v5  ;;  %v12048_v19 = vld [vmem:[#allocation4 + $0x33] sm:$0xff]  ;;  %v18334_v55 = vld [vmem:[%s23711_s5 + $0xe4] ss:$8 sps:$4 sm:$0xff]  }
0x116d   :  { %v12056_v13 = vmax.f32 %v12038_v50, %v12047_v0  ;;  %17226 = vmatprep.subr.bf16.mxu1 %v18547_v42  ;;  %v12039_v53 = vld [vmem:[#allocation4 + $0x32] sm:$0xff]  ;;  %12006 = vst [vmem:[#allocation4 + $0x48] sm:$0xff] %v11996_v44  ;;  %v18340_v61 = vld [vmem:[%s23711_s5 + $0x4] ss:$8 sps:$4 sm:$0xff]  }
0x116e   :  { %v12057_v9 = vmax.f32 %v12039_v53, %v12048_v19  ;;  %v12022_v29 = vld [vmem:[#allocation4 + $0x31] sm:$0xff] }
0x116f   :  { %v12065_v45 = vmax.f32 %v12029_v63, %v12056_v13  ;;  %v12031_v15 = vmax.f32 %v11993_v2, %v12022_v29  ;;  %v18311_v2 = vld [vmem:[%s23710_s11] sm:$0xff]   ;;  %v18337_v4 = vld [vmem:[%s23711_s5 + $0xf4] ss:$8 sps:$4 sm:$0xff]   ;;  %v18335_v32 = vld [vmem:[%s23711_s5 + $0xf0] ss:$8 sps:$4 sm:$0xff]  }
0x1170   :  { %v12066_v20 = vmax.f32 %v12030_v23, %v12057_v9  ;;  %v18338_v53 = vld [vmem:[%s23711_s5] ss:$8 sps:$4 sm:$0xff]  }
0x1172   :  { %v12077_v24 = vpack.c.bf16 %v12066_v20, %v12065_v45  ;;  %v12023_v18 = vld [vmem:[#allocation4 + $0x39] sm:$0xff]  ;;  %v12024_v11 = vld [vmem:[#allocation4 + $0x41] sm:$0x7]  ;;  %v18343_v45 = vld [vmem:[%s23711_s5 + $0x14] ss:$8 sps:$4 sm:$0xff]  }
0x1173   :  { %v12040_v33 = vld [vmem:[#allocation4 + $0x3a] sm:$0xff]  ;;  %v12032_v38 = vmax.f32 %v11994_v56, %v12023_v18  ;;  %v18319_v56 = vld [vmem:[%s23711_s5 + $0x94] ss:$8 sps:$4 sm:$0xff]  }
0x1174   :  { %v12049_v34 = vld [vmem:[#allocation4 + $0x3b] sm:$0xff]  ;;  %17227 = vmatpush3.bf16.msra.mxu1 %v12077_v24  ;;  %v12050_v39 = vld [vmem:[#allocation4 + $0x43] sm:$0xff]  ;;  %v12051_v14 = vld [vmem:[#allocation4 + $0x4b] sm:$0x7] }
0x1175   :  { %v12058_v48 = vmax.f32 %v12040_v33, %v12049_v34  ;;  %v12015_v35 = vld [vmem:[#allocation4 + $0x40] sm:$0x7]  ;;  %17228 = vmatprep.subr.bf16.mxu1 %v18547_v42  ;;  %v12042_v54 = vld [vmem:[#allocation4 + $0x4a] sm:$0x7] }
0x1176   :  { %v12041_v46 = vld [vmem:[#allocation4 + $0x42] sm:$0xff]  ;;  %v12033_v58 = vmax.f32 %v12015_v35, %v12024_v11  ;;  %v12060_v28 = vmax.f32 %v12042_v54, %v12051_v14  ;;  %v18355_v14 = vld [vmem:[%s23711_s5 + $0x54] ss:$8 sps:$4 sm:$0xff]  }
0x1177   :  { %v12059_v26 = vmax.f32 %v12041_v46, %v12050_v39  ;;  %v12067_v40 = vmax.f32 %v12031_v15, %v12058_v48  ;;  %v18341_v48 = vld [vmem:[%s23711_s5 + $0x10] ss:$8 sps:$4 sm:$0xff]   ;;  %v18346_v35 = vld [vmem:[%s23711_s5 + $0x24] ss:$8 sps:$4 sm:$0xff]   ;;  %v18344_v46 = vld [vmem:[%s23711_s5 + $0x20] ss:$8 sps:$4 sm:$0xff]  }
0x1178   :  { %v12069_v27 = vmax.f32 %v12033_v58, %v12060_v28  ;;  %v18349_v39 = vld [vmem:[%s23711_s5 + $0x34] ss:$8 sps:$4 sm:$0xff]   ;;  %v18347_v15 = vld [vmem:[%s23711_s5 + $0x30] ss:$8 sps:$4 sm:$0xff]   ;;  %v18358_v28 = vld [vmem:[%s23711_s5 + $0x64] ss:$8 sps:$4 sm:$0xff]  }
0x1179   :  { %v12068_v60 = vmax.f32 %v12032_v38, %v12059_v26  ;;  %v18352_v38 = vld [vmem:[%s23711_s5 + $0x44] ss:$8 sps:$4 sm:$0xff]   ;;  %v18350_v26 = vld [vmem:[%s23711_s5 + $0x40] ss:$8 sps:$4 sm:$0xff]   ;;  %v18353_v58 = vld [vmem:[%s23711_s5 + $0x50] ss:$8 sps:$4 sm:$0xff]  }
0x117a   :  { %v12079_v41 = vpack.c.bf16 %v12069_v27, %v12069_v27  ;;  %v18359_v27 = vld [vmem:[%s23711_s5 + $0x70] ss:$8 sps:$4 sm:$0xff]  }
0x117b   :  { %v12078_v62 = vpack.c.bf16 %v12068_v60, %v12067_v40  ;;  %v18356_v40 = vld [vmem:[%s23711_s5 + $0x60] ss:$8 sps:$4 sm:$0xff]   ;;  %v18361_v60 = vld [vmem:[%s23711_s5 + $0x74] ss:$8 sps:$4 sm:$0xff]  }
0x117c   :  { %v12103_v51 = vand.u32 %v12079_v41, %v18625_v6  ;;  %v18317_v6 = vld [vmem:[%s23711_s5 + $0x90] ss:$8 sps:$4 sm:$0xff]   ;;  %v18362_v41 = vld [vmem:[%s23711_s5 + $0x100] ss:$8 sps:$4 sm:$0xff]  }
0x117d   :  { %17229 = vmatpush3.bf16.msra.mxu1 %v12078_v62  ;;  %v18364_v62 = vld [vmem:[%s23711_s5 + $0x104] ss:$8 sps:$4 sm:$0xff]  }
0x117e   :  { %17230 = vmatprep.subr.bf16.mxu1 %v18547_v42 }
0x1181   :  { %17231 = vmatpush3.bf16.msra.mxu1 %v12103_v51  ;;  %v18365_v51 = vld [vmem:[%s23711_s5 + $0x110] ss:$8 sps:$4 sm:$0xff]  }
0x1182   :  { %12288 = vmatprep.subr.bf16.mxu1 %v18316_v36  ;;  %v18367_v36 = vld [vmem:[%s23711_s5 + $0x114] ss:$8 sps:$4 sm:$0xff]  }
0x1184   :  { %17233 = vmatmul.mubr.msk.bf16.vlgmr.msra.gmra.mrb[244].mxu1 %vm5032_vm8, %v18311_v2  ;;  %v18370_v2 = vld [vmem:[%s23711_s5 + $0x124] ss:$8 sps:$4 sm:$0xff]  }
0x1185   :  { %17236 = vmatprep.mubr.msk.bf16.mxu1 %vm18548_vm3, %v18547_v42  ;;  %12289 = vmatpush1.bf16.msra.mxu1 %v18314_v49  ;;  %v18368_v49 = vld [vmem:[%s23711_s5 + $0x120] ss:$8 sps:$4 sm:$0xff]  }
0x1186   :  { %12290 = vmatprep.subr.bf16.mxu1 %v18319_v56 }
0x1189   :  { %12291 = vmatpush1.bf16.msra.mxu1 %v18317_v6  ;;  %v18373_v6 = vld [vmem:[%s23711_s5 + $0x134] ss:$8 sps:$4 sm:$0xff]  }
0x118a   :  { %12292 = vmatprep.subr.bf16.mxu1 %v18322_v31  ;;  %v18371_v31 = vld [vmem:[%s23711_s5 + $0x130] ss:$8 sps:$4 sm:$0xff]  }
0x118c   :  { %17237 = vmatmul.mubr.msk.bf16.gmra.mrb[248].mxu1 %vm5032_vm8, %v18312_v1  ;;  %v18376_v1 = vld [vmem:[%s23711_s5 + $0x144] ss:$8 sps:$4 sm:$0xff]  }
0x118d   :  { %17240 = vmatprep.mubr.msk.bf16.mxu1 %vm18548_vm3, %v18547_v42  ;;  %12293 = vmatpush1.bf16.msra.mxu1 %v18320_v52  ;;  %v18329_v42 = vld [vmem:[%s23711_s5 + $0xd0] ss:$8 sps:$4 sm:$0xff]   ;;  %v18374_v52 = vld [vmem:[%s23711_s5 + $0x140] ss:$8 sps:$4 sm:$0xff]  }
0x118e   :  { %12294 = vmatprep.subr.bf16.mxu1 %v18325_v37  ;;  %v18379_v37 = vld [vmem:[%s23711_s5 + $0x154] ss:$8 sps:$4 sm:$0xff]  }
0x1191   :  { %12295 = vmatpush1.bf16.msra.mxu1 %v18323_v16  ;;  %v18377_v16 = vld [vmem:[%s23711_s5 + $0x150] ss:$8 sps:$4 sm:$0xff]  }
0x1192   :  { %12296 = vmatprep.subr.bf16.mxu1 %v18328_v3  ;;  %v18382_v3 = vld [vmem:[%s23711_s5 + $0x164] ss:$8 sps:$4 sm:$0xff]  }
0x1194   :  { %17241 = vmatmul.mubr.msk.bf16.gmra.mrb[252].mxu1 %vm5032_vm8, %v18313_v21  ;;  %v18380_v21 = vld [vmem:[%s23711_s5 + $0x160] ss:$8 sps:$4 sm:$0xff]  }
0x1195   :  { %12297 = vmatpush1.bf16.msra.mxu1 %v18326_v30  ;;  %12320 = vmatprep.mubr.bf16.mxu1 %v18549_v59  ;;  %v18385_v30 = vld [vmem:[%s23711_s5 + $0x174] ss:$8 sps:$4 sm:$0xff]  }
0x1196   :  { %12298 = vmatprep.subr.bf16.mxu1 %v18331_v7  ;;  %v18388_v7 = vld [vmem:[%s23711_s5 + $0x184] ss:$8 sps:$4 sm:$0xff]  }
0x1199   :  { %12299 = vmatpush1.bf16.msra.mxu1 %v18329_v42  ;;  %v18383_v42 = vld [vmem:[%s23711_s5 + $0x170] ss:$8 sps:$4 sm:$0xff]  }
0x119a   :  { %12300 = vmatprep.subr.bf16.mxu1 %v18334_v55 }
0x119d   :  { %12301 = vmatpush1.bf16.msra.mxu1 %v18332_v57 }
0x119e   :  { %12302 = vmatprep.subr.bf16.mxu1 %v18337_v4  ;;  %v18386_v4 = vld [vmem:[%s23711_s5 + $0x180] ss:$8 sps:$4 sm:$0xff]  }
0x11a1   :  { %12303 = vmatpush1.bf16.msra.mxu1 %v18335_v32 }
0x11a2   :  { %12419 = vmatprep.subr.bf16.mxu1 %v18340_v61  ;;  %v18391_v61 = vld [vmem:[%s23711_s5 + $0x194] ss:$8 sps:$4 sm:$0xff]  }
0x1257   :  { %v22924_v10 = vpop.f32.mrb[244].mxu1 }
0x1258   :  { %12161 = vst [vmem:[#allocation5] sm:$0xff] %v22924_v10  ;;  %v17234_v12 = vpop.f32.mrb[245].mxu1 }
0x1259   :  { %v22927_v47 = vpop.f32.mrb[246].mxu1  ;;  %v18394_v12 = vld [vmem:[%s23711_s5 + $0x1a4] ss:$8 sps:$4 sm:$0xff]  }
0x125a   :  { %12162 = vst [vmem:[#allocation5 + $0x8] sm:$0xff] %v22927_v47  ;;  %v17235_v5 = vpop.f32.mrb[247].mxu1  ;;  %v12169_v25 = vpack.c.bf16 %v22927_v47, %v22924_v10  ;;  %v18389_v10 = vld [vmem:[%s23711_s5 + $0x190] ss:$8 sps:$4 sm:$0xff]  }
0x125f   :  { %v22932_v17 = vpop.f32.mrb[248].mxu1 }
0x1260   :  { %12163 = vst [vmem:[#allocation5 + $0x10] sm:$0xff] %v22932_v17  ;;  %v17238_v50 = vpop.f32.mrb[249].mxu1  ;;  %v12947_v0 = vpack.c.bf16 %v22932_v17, %v22927_v47  ;;  %v12170_v56 = vpack.c.bf16 %v22932_v17, %v22932_v17  ;;  %v18469_v17 = vld [vmem:[%s23711_s5 + $0x334] ss:$8 sps:$4 sm:$0xff]  }
0x1261   :  { %v22937_v44 = vpop.f32.mrb[250].mxu1  ;;  %v12187_v19 = vld [vmem:[#allocation5 + $0x1] sm:$0xff] }
0x1262   :  { %12164 = vst [vmem:[#allocation5 + $0x18] sm:$0xff] %v22937_v44  ;;  %v17239_v13 = vpop.f32.mrb[251].mxu1  ;;  %v12470_v55 = vld [vmem:[#allocation5 + $0x2] sm:$0xff]  ;;  %v12948_v47 = vpack.c.bf16 %v22937_v44, %v22937_v44 }
0x1263   :  { %v18397_v13 = vld [vmem:[%s23711_s5 + $0x1b4] ss:$8 sps:$4 sm:$0xff]   ;;  %v18470_v44 = vld [vmem:[%s23711_s5 + $0x340] ss:$8 sps:$4 sm:$0xff]  }
0x1267   :  { %v12188_v63 = vld [vmem:[#allocation5 + $0x9] sm:$0xff]  ;;  %v12155_v23 = vpop.f32.mrb[252].mxu1 }
0x1268   :  { %v12190_v9 = vpack.c.bf16 %v12188_v63, %v12187_v19  ;;  %12165 = vst [vmem:[#allocation5 + $0x20] sm:$0xff] %v12155_v23  ;;  %v17242_v20 = vpop.f32.mrb[253].mxu1  ;;  %v22946_v24 = vld [vmem:[#allocation5 + $0xe] sm:$0xff]  ;;  %v18403_v23 = vld [vmem:[%s23711_s5 + $0x1d4] ss:$8 sps:$4 sm:$0xff]  }
0x1269   :  { %v22948_v29 = vld [vmem:[#allocation5 + $0x16] sm:$0xff]  ;;  %v12158_v18 = vpop.f32.mrb[254].mxu1  ;;  %v12471_v57 = vld [vmem:[#allocation5 + $0xa] sm:$0xff] }
0x126a   :  { %12321 = vmatmul.mubr.bf16.vlgmr.msra.gmra.mrb[220].mxu1 %v12190_v9  ;;  %v17243_v33 = vpop.f32.mrb[255].mxu1  ;;  %v13421_v34 = vpack.c.bf16 %v22948_v29, %v22946_v24  ;;  %v12189_v11 = vld [vmem:[#allocation5 + $0x11] sm:$0xff]  ;;  %v12473_v32 = vpack.c.bf16 %v12471_v57, %v12470_v55  ;;  %v18409_v18 = vld [vmem:[%s23711_s5 + $0x1f4] ss:$8 sps:$4 sm:$0xff]  }
0x126b   :  { %12420 = vmatpush1.bf16.msra.mxu1 %v18338_v53  ;;  %12330 = vmatprep.mubr.bf16.mxu1 %v18549_v59  ;;  %v12191_v54 = vpack.c.bf16 %v12189_v11, %v12189_v11  ;;  %v12472_v5 = vld [vmem:[#allocation5 + $0x12] sm:$0xff]  ;;  %v18451_v55 = vld [vmem:[%s23711_s5 + $0x2d4] ss:$8 sps:$4 sm:$0xff]  }
0x126c   :  { %12421 = vmatprep.subr.bf16.mxu1 %v18343_v45  ;;  %v12474_v50 = vpack.c.bf16 %v12472_v5, %v12472_v5  ;;  %v18395_v53 = vld [vmem:[%s23711_s5 + $0x1b0] ss:$8 sps:$4 sm:$0xff]   ;;  %v18400_v19 = vld [vmem:[%s23711_s5 + $0x1c4] ss:$8 sps:$4 sm:$0xff]   ;;  %v18398_v63 = vld [vmem:[%s23711_s5 + $0x1c0] ss:$8 sps:$4 sm:$0xff]  }
0x126d   :  { %v18401_v9 = vld [vmem:[%s23711_s5 + $0x1d0] ss:$8 sps:$4 sm:$0xff]   ;;  %v18406_v45 = vld [vmem:[%s23711_s5 + $0x1e4] ss:$8 sps:$4 sm:$0xff]   ;;  %v18404_v20 = vld [vmem:[%s23711_s5 + $0x1e0] ss:$8 sps:$4 sm:$0xff]  }
0x126e   :  { %v18407_v33 = vld [vmem:[%s23711_s5 + $0x1f0] ss:$8 sps:$4 sm:$0xff]   ;;  %v18410_v11 = vld [vmem:[%s23711_s5 + $0x200] ss:$8 sps:$4 sm:$0xff]   ;;  %v18460_v5 = vld [vmem:[%s23711_s5 + $0x304] ss:$8 sps:$4 sm:$0xff]  }
0x126f   :  { %12422 = vmatpush1.bf16.msra.mxu1 %v18341_v48  ;;  %v18412_v48 = vld [vmem:[%s23711_s5 + $0x204] ss:$8 sps:$4 sm:$0xff]   ;;  %v18446_v57 = vld [vmem:[%s23711_s5 + $0x2c0] ss:$8 sps:$4 sm:$0xff]  }
0x1270   :  { %12423 = vmatprep.subr.bf16.mxu1 %v18346_v35  ;;  %v12628_v35 = vld [vmem:[#allocation5 + $0x6] sm:$0xff] }
0x1272   :  { %12331 = vmatmul.mubr.bf16.gmra.mrb[0].mxu1 %v12191_v54  ;;  %v18413_v54 = vld [vmem:[%s23711_s5 + $0x210] ss:$8 sps:$4 sm:$0xff]  }
0x1273   :  { %12424 = vmatpush1.bf16.msra.mxu1 %v18344_v46  ;;  %12451 = vmatprep.mubr.bf16.mxu1 %v18549_v59  ;;  %v12631_v46 = vpack.c.bf16 %v22946_v24, %v12628_v35  ;;  %v13103_v35 = vld [vmem:[#allocation5 + $0x14] sm:$0xff]  ;;  %v18530_v24 = vld [vmem:[%s23713_s7 + $0x40] sm:$0xff]  }
0x1274   :  { %12425 = vmatprep.subr.bf16.mxu1 %v18349_v39  ;;  %v18415_v39 = vld [vmem:[%s23711_s5 + $0x214] ss:$8 sps:$4 sm:$0xff]   ;;  %15835 = vmatprep.subr.bf16.mxu0 %v18530_v24 }
0x1277   :  { %12426 = vmatpush1.bf16.msra.mxu1 %v18347_v15  ;;  %v18418_v15 = vld [vmem:[%s23711_s5 + $0x224] ss:$8 sps:$4 sm:$0xff]  }
0x1278   :  { %12427 = vmatprep.subr.bf16.mxu1 %v18352_v38  ;;  %v18416_v38 = vld [vmem:[%s23711_s5 + $0x220] ss:$8 sps:$4 sm:$0xff]  }
0x127b   :  { %12428 = vmatpush1.bf16.msra.mxu1 %v18350_v26  ;;  %v12632_v26 = vpack.c.bf16 %v22948_v29, %v22948_v29  ;;  %v18532_v29 = vld [vmem:[%s23713_s7 + $0x48] sm:$0xff]  }
0x127c   :  { %12429 = vmatprep.subr.bf16.mxu1 %v18355_v14  ;;  %v18421_v14 = vld [vmem:[%s23711_s5 + $0x234] ss:$8 sps:$4 sm:$0xff]  }
0x127f   :  { %12430 = vmatpush1.bf16.msra.mxu1 %v18353_v58  ;;  %v18419_v58 = vld [vmem:[%s23711_s5 + $0x230] ss:$8 sps:$4 sm:$0xff]  }
0x1280   :  { %12431 = vmatprep.subr.bf16.mxu1 %v18358_v28  ;;  %v18424_v28 = vld [vmem:[%s23711_s5 + $0x244] ss:$8 sps:$4 sm:$0xff]  }
0x1283   :  { %12432 = vmatpush1.bf16.msra.mxu1 %v18356_v40  ;;  %v18422_v40 = vld [vmem:[%s23711_s5 + $0x240] ss:$8 sps:$4 sm:$0xff]  }
0x1284   :  { %12433 = vmatprep.subr.bf16.mxu1 %v18361_v60  ;;  %v18427_v60 = vld [vmem:[%s23711_s5 + $0x254] ss:$8 sps:$4 sm:$0xff]  }
0x1287   :  { %12434 = vmatpush1.bf16.msra.mxu1 %v18359_v27  ;;  %v18425_v27 = vld [vmem:[%s23711_s5 + $0x250] ss:$8 sps:$4 sm:$0xff]  }
0x1288   :  { %12571 = vmatprep.subr.bf16.mxu1 %v18364_v62  ;;  %v18430_v62 = vld [vmem:[%s23711_s5 + $0x264] ss:$8 sps:$4 sm:$0xff]  }
0x128a   :  { %12452 = vmatmul.mubr.bf16.vlgmr.msra.gmra.mrb[220].mxu1 %v12169_v25  ;;  %v18392_v25 = vld [vmem:[%s23711_s5 + $0x1a0] ss:$8 sps:$4 sm:$0xff]  }
0x128b   :  { %12572 = vmatpush1.bf16.msra.mxu1 %v18362_v41  ;;  %12461 = vmatprep.mubr.bf16.mxu1 %v18549_v59  ;;  %v18428_v41 = vld [vmem:[%s23711_s5 + $0x260] ss:$8 sps:$4 sm:$0xff]  }
0x128c   :  { %12573 = vmatprep.subr.bf16.mxu1 %v18367_v36  ;;  %v18433_v36 = vld [vmem:[%s23711_s5 + $0x274] ss:$8 sps:$4 sm:$0xff]  }
0x128f   :  { %12574 = vmatpush1.bf16.msra.mxu1 %v18365_v51  ;;  %v18431_v51 = vld [vmem:[%s23711_s5 + $0x270] ss:$8 sps:$4 sm:$0xff]  }
0x1290   :  { %12575 = vmatprep.subr.bf16.mxu1 %v18370_v2  ;;  %v18436_v2 = vld [vmem:[%s23711_s5 + $0x284] ss:$8 sps:$4 sm:$0xff]  }
0x1292   :  { %12462 = vmatmul.mubr.bf16.gmra.mrb[4].mxu1 %v12170_v56  ;;  %v12786_v56 = vld [vmem:[#allocation5 + $0x7] sm:$0xff] }
0x1293   :  { %12576 = vmatpush1.bf16.msra.mxu1 %v18368_v49  ;;  %12603 = vmatprep.mubr.bf16.mxu1 %v18549_v59  ;;  %v12787_v49 = vld [vmem:[#allocation5 + $0xf] sm:$0xff] }
0x1294   :  { %12577 = vmatprep.subr.bf16.mxu1 %v18373_v6  ;;  %v18434_v6 = vld [vmem:[%s23711_s5 + $0x280] ss:$8 sps:$4 sm:$0xff]  }
0x1297   :  { %12578 = vmatpush1.bf16.msra.mxu1 %v18371_v31  ;;  %v12789_v31 = vpack.c.bf16 %v12787_v49, %v12786_v56  ;;  %v18503_v49 = vld [vmem:[%s23711_s5 + $0x3f0] ss:$8 sps:$4 sm:$0xff]   ;;  %v18508_v56 = vld [vmem:[%s23711_s5 + $0x404] ss:$8 sps:$4 sm:$0xff]  }
0x1298   :  { %12579 = vmatprep.subr.bf16.mxu1 %v18376_v1  ;;  %v18439_v1 = vld [vmem:[%s23711_s5 + $0x294] ss:$8 sps:$4 sm:$0xff]  }
0x129b   :  { %12580 = vmatpush1.bf16.msra.mxu1 %v18374_v52  ;;  %v18437_v52 = vld [vmem:[%s23711_s5 + $0x290] ss:$8 sps:$4 sm:$0xff]  }
0x129c   :  { %12581 = vmatprep.subr.bf16.mxu1 %v18379_v37  ;;  %v18442_v37 = vld [vmem:[%s23711_s5 + $0x2a4] ss:$8 sps:$4 sm:$0xff]  }
0x129f   :  { %12582 = vmatpush1.bf16.msra.mxu1 %v18377_v16  ;;  %v12788_v16 = vld [vmem:[#allocation5 + $0x17] sm:$0xff] }
0x12a0   :  { %12583 = vmatprep.subr.bf16.mxu1 %v18382_v3  ;;  %v18440_v3 = vld [vmem:[%s23711_s5 + $0x2a0] ss:$8 sps:$4 sm:$0xff]  }
0x12a3   :  { %12584 = vmatpush1.bf16.msra.mxu1 %v18380_v21  ;;  %v12790_v21 = vpack.c.bf16 %v12788_v16, %v12788_v16 }
0x12a4   :  { %12585 = vmatprep.subr.bf16.mxu1 %v18385_v30  ;;  %v18445_v30 = vld [vmem:[%s23711_s5 + $0x2b4] ss:$8 sps:$4 sm:$0xff]  }
0x12a7   :  { %12586 = vmatpush1.bf16.msra.mxu1 %v18383_v42  ;;  %v18443_v42 = vld [vmem:[%s23711_s5 + $0x2b0] ss:$8 sps:$4 sm:$0xff]  }
0x12a8   :  { %12729 = vmatprep.subr.bf16.mxu1 %v18388_v7  ;;  %v18448_v7 = vld [vmem:[%s23711_s5 + $0x2c4] ss:$8 sps:$4 sm:$0xff]  }
0x12aa   :  { %12604 = vmatmul.mubr.bf16.vlgmr.msra.gmra.mrb[220].mxu1 %v12473_v32  ;;  %v18454_v32 = vld [vmem:[%s23711_s5 + $0x2e4] ss:$8 sps:$4 sm:$0xff]  }
0x12ab   :  { %12730 = vmatpush1.bf16.msra.mxu1 %v18386_v4  ;;  %12613 = vmatprep.mubr.bf16.mxu1 %v18549_v59  ;;  %v18449_v4 = vld [vmem:[%s23711_s5 + $0x2d0] ss:$8 sps:$4 sm:$0xff]  }
0x12ac   :  { %12731 = vmatprep.subr.bf16.mxu1 %v18391_v61  ;;  %v18452_v61 = vld [vmem:[%s23711_s5 + $0x2e0] ss:$8 sps:$4 sm:$0xff]  }
0x12af   :  { %12732 = vmatpush1.bf16.msra.mxu1 %v18389_v10  ;;  %v18457_v10 = vld [vmem:[%s23711_s5 + $0x2f4] ss:$8 sps:$4 sm:$0xff]  }
0x12b0   :  { %12733 = vmatprep.subr.bf16.mxu1 %v18394_v12  ;;  %v18455_v12 = vld [vmem:[%s23711_s5 + $0x2f0] ss:$8 sps:$4 sm:$0xff]  }
0x12b2   :  { %12614 = vmatmul.mubr.bf16.gmra.mrb[8].mxu1 %v12474_v50  ;;  %v18463_v50 = vld [vmem:[%s23711_s5 + $0x314] ss:$8 sps:$4 sm:$0xff]  }
0x12b3   :  { %12734 = vmatpush1.bf16.msra.mxu1 %v18392_v25  ;;  %12761 = vmatprep.mubr.bf16.mxu1 %v18549_v59  ;;  %v18458_v25 = vld [vmem:[%s23711_s5 + $0x300] ss:$8 sps:$4 sm:$0xff]  }
0x12b4   :  { %12735 = vmatprep.subr.bf16.mxu1 %v18397_v13  ;;  %v18461_v13 = vld [vmem:[%s23711_s5 + $0x310] ss:$8 sps:$4 sm:$0xff]  }
0x12b7   :  { %12736 = vmatpush1.bf16.msra.mxu1 %v18395_v53  ;;  %v18466_v53 = vld [vmem:[%s23711_s5 + $0x324] ss:$8 sps:$4 sm:$0xff]  }
0x12b8   :  { %12737 = vmatprep.subr.bf16.mxu1 %v18400_v19  ;;  %v18464_v19 = vld [vmem:[%s23711_s5 + $0x320] ss:$8 sps:$4 sm:$0xff]  }
0x12bb   :  { %12738 = vmatpush1.bf16.msra.mxu1 %v18398_v63  ;;  %v18472_v63 = vld [vmem:[%s23711_s5 + $0x344] ss:$8 sps:$4 sm:$0xff]  }
0x12bc   :  { %12739 = vmatprep.subr.bf16.mxu1 %v18403_v23  ;;  %v18475_v23 = vld [vmem:[%s23711_s5 + $0x354] ss:$8 sps:$4 sm:$0xff]  }
0x12bf   :  { %12740 = vmatpush1.bf16.msra.mxu1 %v18401_v9  ;;  %v18473_v9 = vld [vmem:[%s23711_s5 + $0x350] ss:$8 sps:$4 sm:$0xff]  }
0x12c0   :  { %12741 = vmatprep.subr.bf16.mxu1 %v18406_v45  ;;  %v18478_v45 = vld [vmem:[%s23711_s5 + $0x364] ss:$8 sps:$4 sm:$0xff]  }
0x12c3   :  { %12742 = vmatpush1.bf16.msra.mxu1 %v18404_v20  ;;  %v18476_v20 = vld [vmem:[%s23711_s5 + $0x360] ss:$8 sps:$4 sm:$0xff]  }
0x12c4   :  { %12743 = vmatprep.subr.bf16.mxu1 %v18409_v18  ;;  %v18481_v18 = vld [vmem:[%s23711_s5 + $0x374] ss:$8 sps:$4 sm:$0xff]  }
0x12c7   :  { %12744 = vmatpush1.bf16.msra.mxu1 %v18407_v33  ;;  %v18479_v33 = vld [vmem:[%s23711_s5 + $0x370] ss:$8 sps:$4 sm:$0xff]  }
0x12c8   :  { %12887 = vmatprep.subr.bf16.mxu1 %v18412_v48  ;;  %v18484_v48 = vld [vmem:[%s23711_s5 + $0x384] ss:$8 sps:$4 sm:$0xff]  }
0x12ca   :  { %12762 = vmatmul.mubr.bf16.vlgmr.msra.gmra.mrb[220].mxu1 %v12631_v46  ;;  %v18482_v46 = vld [vmem:[%s23711_s5 + $0x380] ss:$8 sps:$4 sm:$0xff]  }
0x12cb   :  { %12888 = vmatpush1.bf16.msra.mxu1 %v18410_v11  ;;  %12771 = vmatprep.mubr.bf16.mxu1 %v18549_v59  ;;  %v13102_v11 = vld [vmem:[#allocation5 + $0xc] sm:$0xff] }
0x12cc   :  { %12889 = vmatprep.subr.bf16.mxu1 %v18415_v39  ;;  %v13105_v39 = vpack.c.bf16 %v13103_v35, %v13102_v11 }
0x12cf   :  { %12890 = vmatpush1.bf16.msra.mxu1 %v18413_v54  ;;  %v18487_v54 = vld [vmem:[%s23711_s5 + $0x394] ss:$8 sps:$4 sm:$0xff]  }
0x12d0   :  { %12891 = vmatprep.subr.bf16.mxu1 %v18418_v15  ;;  %v18485_v15 = vld [vmem:[%s23711_s5 + $0x390] ss:$8 sps:$4 sm:$0xff]  }
0x12d2   :  { %12772 = vmatmul.mubr.bf16.gmra.mrb[12].mxu1 %v12632_v26  ;;  %v13104_v26 = vld [vmem:[#allocation5 + $0x1c] sm:$0xff] }
0x12d3   :  { %12892 = vmatpush1.bf16.msra.mxu1 %v18416_v38  ;;  %12919 = vmatprep.mubr.bf16.mxu1 %v18549_v59  ;;  %v18490_v38 = vld [vmem:[%s23711_s5 + $0x3a4] ss:$8 sps:$4 sm:$0xff]  }
0x12d4   :  { %12893 = vmatprep.subr.bf16.mxu1 %v18421_v14  ;;  %v18488_v14 = vld [vmem:[%s23711_s5 + $0x3a0] ss:$8 sps:$4 sm:$0xff]  }
0x12d7   :  { %12894 = vmatpush1.bf16.msra.mxu1 %v18419_v58  ;;  %v13106_v58 = vpack.c.bf16 %v13104_v26, %v13104_v26 }
0x12d8   :  { %12895 = vmatprep.subr.bf16.mxu1 %v18424_v28  ;;  %v18493_v28 = vld [vmem:[%s23711_s5 + $0x3b4] ss:$8 sps:$4 sm:$0xff]  }
0x12db   :  { %12896 = vmatpush1.bf16.msra.mxu1 %v18422_v40  ;;  %v18491_v40 = vld [vmem:[%s23711_s5 + $0x3b0] ss:$8 sps:$4 sm:$0xff]  }
0x12dc   :  { %12897 = vmatprep.subr.bf16.mxu1 %v18427_v60  ;;  %v18496_v60 = vld [vmem:[%s23711_s5 + $0x3c4] ss:$8 sps:$4 sm:$0xff]  }
0x12df   :  { %12898 = vmatpush1.bf16.msra.mxu1 %v18425_v27  ;;  %v18494_v27 = vld [vmem:[%s23711_s5 + $0x3c0] ss:$8 sps:$4 sm:$0xff]  }
0x12e0   :  { %12899 = vmatprep.subr.bf16.mxu1 %v18430_v62  ;;  %v18499_v62 = vld [vmem:[%s23711_s5 + $0x3d4] ss:$8 sps:$4 sm:$0xff]  }
0x12e3   :  { %12900 = vmatpush1.bf16.msra.mxu1 %v18428_v41  ;;  %v18497_v41 = vld [vmem:[%s23711_s5 + $0x3d0] ss:$8 sps:$4 sm:$0xff]  }
0x12e4   :  { %12901 = vmatprep.subr.bf16.mxu1 %v18433_v36  ;;  %v18502_v36 = vld [vmem:[%s23711_s5 + $0x3e4] ss:$8 sps:$4 sm:$0xff]  }
0x12e7   :  { %12902 = vmatpush1.bf16.msra.mxu1 %v18431_v51  ;;  %v18500_v51 = vld [vmem:[%s23711_s5 + $0x3e0] ss:$8 sps:$4 sm:$0xff]  }
0x12e8   :  { %13045 = vmatprep.subr.bf16.mxu1 %v18436_v2  ;;  %v18505_v2 = vld [vmem:[%s23711_s5 + $0x3f4] ss:$8 sps:$4 sm:$0xff]  }
0x12ea   :  { %12920 = vmatmul.mubr.bf16.vlgmr.msra.gmra.mrb[220].mxu1 %v12789_v31 }
0x12eb   :  { %13046 = vmatpush1.bf16.msra.mxu1 %v18434_v6  ;;  %12929 = vmatprep.mubr.bf16.mxu1 %v18549_v59  ;;  %v13261_v6 = vld [vmem:[#allocation5 + $0x15] sm:$0xff] }
0x12ec   :  { %13047 = vmatprep.subr.bf16.mxu1 %v18439_v1 }
0x12ef   :  { %13048 = vmatpush1.bf16.msra.mxu1 %v18437_v52  ;;  %v13260_v52 = vld [vmem:[#allocation5 + $0xd] sm:$0xff] }
0x12f0   :  { %13049 = vmatprep.subr.bf16.mxu1 %v18442_v37  ;;  %v18506_v37 = vld [vmem:[%s23711_s5 + $0x400] ss:$8 sps:$4 sm:$0xff]  }
0x12f2   :  { %12930 = vmatmul.mubr.bf16.gmra.mrb[16].mxu1 %v12790_v21  ;;  %v18511_v21 = vld [vmem:[%s23711_s5 + $0x414] ss:$8 sps:$4 sm:$0xff]  }
0x12f3   :  { %13050 = vmatpush1.bf16.msra.mxu1 %v18440_v3  ;;  %13077 = vmatprep.mubr.bf16.mxu1 %v18549_v59  ;;  %v13263_v3 = vpack.c.bf16 %v13261_v6, %v13260_v52  ;;  %v18545_v52 = vld [vmem:[%s23713_s7 + $0x38] sm:$0xff]  }
0x12f4   :  { %13051 = vmatprep.subr.bf16.mxu1 %v18445_v30 }
0x12f7   :  { %13052 = vmatpush1.bf16.msra.mxu1 %v18443_v42  ;;  %v18509_v42 = vld [vmem:[%s23711_s5 + $0x410] ss:$8 sps:$4 sm:$0xff]  }
0x12f8   :  { %13053 = vmatprep.subr.bf16.mxu1 %v18448_v7  ;;  %v18514_v7 = vld [vmem:[%s23711_s5 + $0x424] ss:$8 sps:$4 sm:$0xff]  }
0x12fb   :  { %13054 = vmatpush1.bf16.msra.mxu1 %v18446_v57  ;;  %v13262_v57 = vld [vmem:[#allocation5 + $0x1d] sm:$0xff] }
0x12fc   :  { %13055 = vmatprep.subr.bf16.mxu1 %v18451_v55  ;;  %v18512_v55 = vld [vmem:[%s23711_s5 + $0x420] ss:$8 sps:$4 sm:$0xff]  }
0x12ff   :  { %13056 = vmatpush1.bf16.msra.mxu1 %v18449_v4  ;;  %v13264_v4 = vpack.c.bf16 %v13262_v57, %v13262_v57 }
0x1300   :  { %13057 = vmatprep.subr.bf16.mxu1 %v18454_v32  ;;  %v18517_v32 = vld [vmem:[%s23711_s5 + $0x434] ss:$8 sps:$4 sm:$0xff]  }
0x1303   :  { %13058 = vmatpush1.bf16.msra.mxu1 %v18452_v61  ;;  %v18515_v61 = vld [vmem:[%s23711_s5 + $0x430] ss:$8 sps:$4 sm:$0xff]  }
0x1304   :  { %13059 = vmatprep.subr.bf16.mxu1 %v18457_v10  ;;  %v18520_v10 = vld [vmem:[%s23711_s5 + $0x444] ss:$8 sps:$4 sm:$0xff]  }
0x1307   :  { %13060 = vmatpush1.bf16.msra.mxu1 %v18455_v12  ;;  %v18518_v12 = vld [vmem:[%s23711_s5 + $0x440] ss:$8 sps:$4 sm:$0xff]  }
0x1308   :  { %13203 = vmatprep.subr.bf16.mxu1 %v18460_v5  ;;  %v18523_v5 = vld [vmem:[%s23711_s5 + $0x454] ss:$8 sps:$4 sm:$0xff]  }
0x130a   :  { %13078 = vmatmul.mubr.bf16.vlgmr.msra.gmra.mrb[220].mxu1 %v12947_v0  ;;  %v18467_v0 = vld [vmem:[%s23711_s5 + $0x330] ss:$8 sps:$4 sm:$0xff]  }
0x130b   :  { %13204 = vmatpush1.bf16.msra.mxu1 %v18458_v25  ;;  %13087 = vmatprep.mubr.bf16.mxu1 %v18549_v59  ;;  %v18521_v25 = vld [vmem:[%s23711_s5 + $0x450] ss:$8 sps:$4 sm:$0xff]  }
0x130c   :  { %13205 = vmatprep.subr.bf16.mxu1 %v18463_v50  ;;  %v18526_v50 = vld [vmem:[%s23711_s5 + $0x464] ss:$8 sps:$4 sm:$0xff]  }
0x130f   :  { %13206 = vmatpush1.bf16.msra.mxu1 %v18461_v13  ;;  %v18524_v13 = vld [vmem:[%s23711_s5 + $0x460] ss:$8 sps:$4 sm:$0xff]  }
0x1310   :  { %13207 = vmatprep.subr.bf16.mxu1 %v18466_v53  ;;  %v18529_v53 = vld [vmem:[%s23711_s5 + $0x474] ss:$8 sps:$4 sm:$0xff]  }
0x1312   :  { %13088 = vmatmul.mubr.bf16.gmra.mrb[20].mxu1 %v12948_v47 }
0x1313   :  { %13208 = vmatpush1.bf16.msra.mxu1 %v18464_v19  ;;  %13235 = vmatprep.mubr.bf16.mxu1 %v18549_v59  ;;  %v18527_v19 = vld [vmem:[%s23711_s5 + $0x470] ss:$8 sps:$4 sm:$0xff]  }
0x1314   :  { %13209 = vmatprep.subr.bf16.mxu1 %v18469_v17 }
0x1317   :  { %13210 = vmatpush1.bf16.msra.mxu1 %v18467_v0 }
0x1318   :  { %13211 = vmatprep.subr.bf16.mxu1 %v18472_v63 }
0x131b   :  { %13212 = vmatpush1.bf16.msra.mxu1 %v18470_v44 }
0x131c   :  { %13213 = vmatprep.subr.bf16.mxu1 %v18475_v23 }
0x131f   :  { %13214 = vmatpush1.bf16.msra.mxu1 %v18473_v9  ;;  %v13420_v9 = vld [vmem:[#allocation5 + $0x1e] sm:$0xff] }
0x1320   :  { %13215 = vmatprep.subr.bf16.mxu1 %v18478_v45  ;;  %v13422_v45 = vpack.c.bf16 %v13420_v9, %v13420_v9 }
0x1323   :  { %13216 = vmatpush1.bf16.msra.mxu1 %v18476_v20 }
0x1324   :  { %13217 = vmatprep.subr.bf16.mxu1 %v18481_v18 }
0x1327   :  { %13218 = vmatpush1.bf16.msra.mxu1 %v18479_v33 }
0x1328   :  { %13361 = vmatprep.subr.bf16.mxu1 %v18484_v48 }
0x132a   :  { %13236 = vmatmul.mubr.bf16.vlgmr.msra.gmra.mrb[220].mxu1 %v13105_v39 }
0x132b   :  { %13362 = vmatpush1.bf16.msra.mxu1 %v18482_v46  ;;  %13245 = vmatprep.mubr.bf16.mxu1 %v18549_v59 }
0x132c   :  { %13363 = vmatprep.subr.bf16.mxu1 %v18487_v54 }
0x132f   :  { %13364 = vmatpush1.bf16.msra.mxu1 %v18485_v15 }
0x1330   :  { %13365 = vmatprep.subr.bf16.mxu1 %v18490_v38 }
0x1332   :  { %13246 = vmatmul.mubr.bf16.gmra.mrb[24].mxu1 %v13106_v58  ;;  %v18535_v58 = vld [vmem:[%s23713_s7 + $0x10] sm:$0xff]  }
0x1333   :  { %13366 = vmatpush1.bf16.msra.mxu1 %v18488_v14  ;;  %13393 = vmatprep.mubr.bf16.mxu1 %v18549_v59  ;;  %v18534_v14 = vld [vmem:[%s23713_s7 + $0x50] sm:$0xff]  }
0x1334   :  { %13367 = vmatprep.subr.bf16.mxu1 %v18493_v28  ;;  %v18536_v28 = vld [vmem:[%s23713_s7 + $0x58] sm:$0xff]  }
0x1337   :  { %13368 = vmatpush1.bf16.msra.mxu1 %v18491_v40  ;;  %v18537_v40 = vld [vmem:[%s23713_s7 + $0x18] sm:$0xff]  }
0x1338   :  { %13369 = vmatprep.subr.bf16.mxu1 %v18496_v60  ;;  %v18538_v60 = vld [vmem:[%s23713_s7 + $0x60] sm:$0xff]  }
0x133b   :  { %13370 = vmatpush1.bf16.msra.mxu1 %v18494_v27  ;;  %v18539_v27 = vld [vmem:[%s23713_s7 + $0x20] sm:$0xff]  }
0x133c   :  { %13371 = vmatprep.subr.bf16.mxu1 %v18499_v62  ;;  %v18540_v62 = vld [vmem:[%s23713_s7 + $0x68] sm:$0xff]  }
0x133f   :  { %13372 = vmatpush1.bf16.msra.mxu1 %v18497_v41  ;;  %v18541_v41 = vld [vmem:[%s23713_s7 + $0x28] sm:$0xff]  }
0x1340   :  { %13373 = vmatprep.subr.bf16.mxu1 %v18502_v36  ;;  %v18542_v36 = vld [vmem:[%s23713_s7 + $0x70] sm:$0xff]  }
0x1343   :  { %13374 = vmatpush1.bf16.msra.mxu1 %v18500_v51  ;;  %v18543_v51 = vld [vmem:[%s23713_s7 + $0x30] sm:$0xff]  }
0x1344   :  { %13375 = vmatprep.subr.bf16.mxu1 %v18505_v2 }
0x1345   :  { %v12332_v31 = vpop.f32.mrb[0].mxu1 }
0x1346   :  { %v12334_v1 = vpop.f32.mrb[1].mxu1 }
0x1347   :  { %13376 = vmatpush1.bf16.msra.mxu1 %v18503_v49  ;;  %v12336_v16 = vpop.f32.mrb[2].mxu1  ;;  %v18544_v49 = vld [vmem:[%s23713_s7 + $0x78] sm:$0xff]  }
0x1348   :  { %13519 = vmatprep.subr.bf16.mxu1 %v18508_v56  ;;  %v12337_v30 = vpop.f32.mrb[3].mxu1 }
0x134a   :  { %13394 = vmatmul.mubr.bf16.vlgmr.msra.gmra.mrb[220].mxu1 %v13263_v3 }
0x134b   :  { %13520 = vmatpush1.bf16.msra.mxu1 %v18506_v37  ;;  %13403 = vmatprep.mubr.bf16.mxu1 %v18549_v59 }
0x134c   :  { %13521 = vmatprep.subr.bf16.mxu1 %v18511_v21 }
0x134f   :  { %13522 = vmatpush1.bf16.msra.mxu1 %v18509_v42 }
0x1350   :  { %13523 = vmatprep.subr.bf16.mxu1 %v18514_v7 }
0x1352   :  { %13404 = vmatmul.mubr.bf16.gmra.mrb[28].mxu1 %v13264_v4 }
0x1353   :  { %13524 = vmatpush1.bf16.msra.mxu1 %v18512_v55  ;;  %13551 = vmatprep.mubr.bf16.mxu1 %v18549_v59 }
0x1354   :  { %13525 = vmatprep.subr.bf16.mxu1 %v18517_v32 }
0x1357   :  { %13526 = vmatpush1.bf16.msra.mxu1 %v18515_v61 }
0x1358   :  { %13527 = vmatprep.subr.bf16.mxu1 %v18520_v10 }
0x135b   :  { %13528 = vmatpush1.bf16.msra.mxu1 %v18518_v12 }
0x135c   :  { %13529 = vmatprep.subr.bf16.mxu1 %v18523_v5 }
0x135f   :  { %13530 = vmatpush1.bf16.msra.mxu1 %v18521_v25 }
0x1360   :  { %13531 = vmatprep.subr.bf16.mxu1 %v18526_v50 }
0x1363   :  { %13532 = vmatpush1.bf16.msra.mxu1 %v18524_v13 }
0x1364   :  { %13533 = vmatprep.subr.bf16.mxu1 %v18529_v53 }
0x1365   :  { %v12463_v47 = vpop.f32.mrb[4].mxu1 }
0x1366   :  { %v12464_v17 = vadd.f32 %v12463_v47, %v12332_v31  ;;  %v12465_v0 = vpop.f32.mrb[5].mxu1 }
0x1367   :  { %v12466_v63 = vadd.f32 %v12465_v0, %v12334_v1  ;;  %v12467_v44 = vpop.f32.mrb[6].mxu1  ;;  %13534 = vmatpush1.bf16.msra.mxu1 %v18527_v19  ;;  %v13576_v19 = vld [vmem:[%s23714_s6] sm:$0x3] }
0x1368   :  { %v12468_v23 = vpop.f32.mrb[7].mxu1  ;;  %v13581_v47 = vrot.slane %v13576_v19, %v6520_v43 }
0x136a   :  { %13552 = vmatmul.mubr.bf16.vlgmr.msra.gmra.mrb[220].mxu1 %v13421_v34  ;;  %v18533_v34 = vld [vmem:[%s23713_s7 + $0x8] sm:$0xff]  }
0x136b   :  { %13561 = vmatprep.mubr.bf16.mxu1 %v18549_v59  ;;  %v18531_v59 = vld [vmem:[%s23713_s7] sm:$0xff]  }
0x136c   :  { %15836 = vmatpush3.bf16.msra.mxu0 %v18531_v59 }
0x136d   :  { %15837 = vmatprep.subr.bf16.mxu0 %v18532_v29 }
0x1370   :  { %15838 = vmatpush3.bf16.msra.mxu0 %v18533_v34 }
0x1371   :  { %15839 = vmatprep.subr.bf16.mxu0 %v18534_v14 }
0x1372   :  { %13562 = vmatmul.mubr.bf16.gmra.mrb[32].mxu1 %v13422_v45 }
0x1374   :  { %15840 = vmatpush3.bf16.msra.mxu0 %v18535_v58  ;;  %v13780_v58 = vld [vmem:[%s23715_s9] sm:$0xff] }
0x1375   :  { %15841 = vmatprep.subr.bf16.mxu0 %v18536_v28 }
0x1378   :  { %15842 = vmatpush3.bf16.msra.mxu0 %v18537_v40 }
0x1379   :  { %15843 = vmatprep.subr.bf16.mxu0 %v18538_v60 }
0x137c   :  { %15844 = vmatpush3.bf16.msra.mxu0 %v18539_v27 }
0x137d   :  { %15845 = vmatprep.subr.bf16.mxu0 %v18540_v62 }
0x1380   :  { %15846 = vmatpush3.bf16.msra.mxu0 %v18541_v41 }
0x1381   :  { %15847 = vmatprep.subr.bf16.mxu0 %v18542_v36 }
0x1384   :  { %15848 = vmatpush3.bf16.msra.mxu0 %v18543_v51 }
0x1385   :  { %v12615_v20 = vpop.f32.mrb[8].mxu1  ;;  %15849 = vmatprep.subr.bf16.mxu0 %v18544_v49 }
0x1386   :  { %v12626_v18 = vadd.f32 %v12615_v20, %v12464_v17  ;;  %v12617_v33 = vpop.f32.mrb[9].mxu1  ;;  %v13585_v17 = vrot.slane %v13576_v19, %v6524_v8  ;;  %v13803_v19 = vld [vmem:[%s23715_s9 + $0xb8] sm:$0xff] }
0x1387   :  { %v12627_v48 = vadd.f32 %v12617_v33, %v12466_v63  ;;  %v12619_v35 = vpop.f32.mrb[10].mxu1 }
0x1388   :  { %v12620_v11 = vpop.f32.mrb[11].mxu1  ;;  %15850 = vmatpush3.bf16.msra.mxu0 %v18545_v52  ;;  %v13783_v52 = vld [vmem:[%s23715_s9 + $0x18] sm:$0xff] }
0x13a5   :  { %v12773_v46 = vpop.f32.mrb[12].mxu1 }
0x13a6   :  { %v12784_v39 = vadd.f32 %v12773_v46, %v12626_v18  ;;  %v12775_v54 = vpop.f32.mrb[13].mxu1 }
0x13a7   :  { %v12785_v15 = vadd.f32 %v12775_v54, %v12627_v48  ;;  %v12777_v38 = vpop.f32.mrb[14].mxu1 }
0x13a8   :  { %v12778_v26 = vpop.f32.mrb[15].mxu1 }
0x13c5   :  { %v12931_v2 = vpop.f32.mrb[16].mxu1 }
0x13c6   :  { %v12942_v56 = vadd.f32 %v12931_v2, %v12784_v39  ;;  %v12933_v6 = vpop.f32.mrb[17].mxu1 }
0x13c7   :  { %v12943_v31 = vadd.f32 %v12933_v6, %v12785_v15  ;;  %v12935_v1 = vpop.f32.mrb[18].mxu1 }
0x13c8   :  { %v12936_v37 = vpop.f32.mrb[19].mxu1  ;;  %v13782_v1 = vld [vmem:[%s23715_s9 + $0x10] sm:$0xff] }
0x13c9   :  { %v13784_v37 = vld [vmem:[%s23715_s9 + $0x20] sm:$0xff] }
0x13e5   :  { %v13089_v16 = vpop.f32.mrb[20].mxu1 }
0x13e6   :  { %v13100_v3 = vadd.f32 %v13089_v16, %v12942_v56  ;;  %v13091_v21 = vpop.f32.mrb[21].mxu1  ;;  %v13785_v16 = vld [vmem:[%s23715_s9 + $0x28] sm:$0xff] }
0x13e7   :  { %v13101_v30 = vadd.f32 %v13091_v21, %v12943_v31  ;;  %v13093_v42 = vpop.f32.mrb[22].mxu1  ;;  %v13781_v31 = vld [vmem:[%s23715_s9 + $0x8] sm:$0xff]  ;;  %v13787_v21 = vld [vmem:[%s23715_s9 + $0x38] sm:$0xff] }
0x13e8   :  { %v13094_v7 = vpop.f32.mrb[23].mxu1  ;;  %v13789_v42 = vld [vmem:[%s23715_s9 + $0x48] sm:$0xff] }
0x13e9   :  { %v13790_v7 = vld [vmem:[%s23715_s9 + $0x50] sm:$0xff] }
0x1405   :  { %v13247_v57 = vpop.f32.mrb[24].mxu1 }
0x1406   :  { %v13258_v55 = vadd.f32 %v13247_v57, %v13100_v3  ;;  %v13249_v4 = vpop.f32.mrb[25].mxu1  ;;  %v13786_v3 = vld [vmem:[%s23715_s9 + $0x30] sm:$0xff]  ;;  %v13791_v57 = vld [vmem:[%s23715_s9 + $0x58] sm:$0xff] }
0x1407   :  { %v13259_v32 = vadd.f32 %v13249_v4, %v13101_v30  ;;  %v13251_v61 = vpop.f32.mrb[26].mxu1  ;;  %v13788_v30 = vld [vmem:[%s23715_s9 + $0x40] sm:$0xff]  ;;  %v13793_v4 = vld [vmem:[%s23715_s9 + $0x68] sm:$0xff] }
0x1408   :  { %v13252_v10 = vpop.f32.mrb[27].mxu1  ;;  %v13795_v61 = vld [vmem:[%s23715_s9 + $0x78] sm:$0xff] }
0x1409   :  { %v13796_v10 = vld [vmem:[%s23715_s9 + $0x80] sm:$0xff] }
0x1425   :  { %v13405_v12 = vpop.f32.mrb[28].mxu1 }
0x1426   :  { %v13416_v5 = vadd.f32 %v13405_v12, %v13258_v55  ;;  %v13407_v25 = vpop.f32.mrb[29].mxu1  ;;  %v13792_v55 = vld [vmem:[%s23715_s9 + $0x60] sm:$0xff]  ;;  %v13797_v12 = vld [vmem:[%s23715_s9 + $0x88] sm:$0xff] }
0x1427   :  { %v13417_v50 = vadd.f32 %v13407_v25, %v13259_v32  ;;  %v13409_v13 = vpop.f32.mrb[30].mxu1  ;;  %v13794_v32 = vld [vmem:[%s23715_s9 + $0x70] sm:$0xff]  ;;  %v13799_v25 = vld [vmem:[%s23715_s9 + $0x98] sm:$0xff] }
0x1428   :  { %v13410_v53 = vpop.f32.mrb[31].mxu1  ;;  %v13801_v13 = vld [vmem:[%s23715_s9 + $0xa8] sm:$0xff] }
0x1429   :  { %v13802_v53 = vld [vmem:[%s23715_s9 + $0xb0] sm:$0xff] }
0x143d   :  { %v13553_v0 = vpop.f32.mrb[220].mxu1 }
0x143e   :  { %v13588_v63 = vadd.f32 %v13581_v47, %v13553_v0  ;;  %v13555_v44 = vpop.f32.mrb[221].mxu1  ;;  %v13806_v0 = vld [vmem:[%s23715_s9 + $0xd0] sm:$0xff] }
0x143f   :  { %v13589_v23 = vadd.f32 %v13585_v17, %v13555_v44  ;;  %v13557_v9 = vpop.f32.mrb[222].mxu1  ;;  %v13808_v44 = vld [vmem:[%s23715_s9 + $0xe0] sm:$0xff] }
0x1440   :  { %v13590_v45 = vadd.f32 %v13581_v47, %v13557_v9  ;;  %v13559_v20 = vpop.f32.mrb[223].mxu1  ;;  %v13594_v33 = vmax.f32 %v13588_v63, 0.0  ;;  %v13807_v63 = vld [vmem:[%s23715_s9 + $0xd8] sm:$0xff]  ;;  %v13810_v9 = vld [vmem:[%s23715_s9 + $0xf0] sm:$0xff] }
0x1441   :  { %v13591_v18 = vadd.f32 %v13585_v17, %v13559_v20  ;;  %v13595_v35 = vmax.f32 %v13589_v23, 0.0  ;;  %v13809_v23 = vld [vmem:[%s23715_s9 + $0xe8] sm:$0xff]  ;;  %v23543_v20 = vld [vmem:[%s23716_s8] ss:$0 sm:$0xff] }
0x1442   :  { %v13596_v48 = vmax.f32 %v13590_v45, 0.0  ;;  %v13811_v45 = vld [vmem:[%s23715_s9 + $0xf8] sm:$0xff] }
0x1443   :  { %v13597_v11 = vmax.f32 %v13591_v18, 0.0 }
0x1444   :  { %v13600_v46 = vpack.c.bf16 %v13596_v48, %v13594_v33 }
0x1445   :  { %v13601_v39 = vpack.c.bf16 %v13597_v11, %v13595_v35  ;;  %v13563_v54 = vpop.f32.mrb[32].mxu1 }
0x1446   :  { %v13574_v15 = vadd.f32 %v13563_v54, %v13416_v5  ;;  %v13565_v43 = vpop.f32.mrb[33].mxu1  ;;  %v13798_v5 = vld [vmem:[%s23715_s9 + $0x90] sm:$0xff] }
0x1447   :  { %v13575_v38 = vadd.f32 %v13565_v43, %v13417_v50  ;;  %v13567_v22 = vpop.f32.mrb[34].mxu1  ;;  %13764 = vmatprep.mubr.bf16.mxu0 %v13601_v39  ;;  %v13800_v50 = vld [vmem:[%s23715_s9 + $0xa0] sm:$0xff] }
0x1448   :  { %v13592_v8 = vadd.f32 %v13581_v47, %v13574_v15  ;;  %v13568_v26 = vpop.f32.mrb[35].mxu1  ;;  %13765 = vmatmul.mubr.bf16.vlgmr.msra.gmra.mrb[140].mxu0 %v13600_v46  ;;  %v13804_v47 = vld [vmem:[%s23715_s9 + $0xc0] sm:$0xff] }
0x1449   :  { %v13593_v24 = vadd.f32 %v13585_v17, %v13575_v38  ;;  %v13805_v17 = vld [vmem:[%s23715_s9 + $0xc8] sm:$0xff] }
0x144a   :  { %v13598_v59 = vmax.f32 %v13592_v8, 0.0 }
0x144b   :  { %v13599_v29 = vmax.f32 %v13593_v24, 0.0 }
0x144c   :  { %v13602_v14 = vpack.c.bf16 %v13598_v59, %v13598_v59 }
0x144d   :  { %v13603_v34 = vpack.c.bf16 %v13599_v29, %v13599_v29 }
0x144f   :  { %13772 = vmatprep.mubr.bf16.mxu0 %v13603_v34 }
0x1450   :  { %13773 = vmatmul.mubr.bf16.gmra.mrb[144].mxu0 %v13602_v14 }
0x1451   :  { %17250 = vmatprep.mubr.msk.f32.mxu0 %vm6759_vm9, %v13780_v58 }
0x151b   :  { %v15851_v28 = vpop.f32.mrb[140].mxu0 }
0x151c   :  { %v15852_v40 = vpop.f32.mrb[141].mxu0 }
0x151d   :  { %v15853_v60 = vadd.f32 %v15852_v40, %v15851_v28  ;;  %v15854_v27 = vpop.f32.mrb[142].mxu0 }
0x151e   :  { %v15855_v62 = vpop.f32.mrb[143].mxu0 }
0x151f   :  { %v15856_v41 = vadd.f32 %v15855_v62, %v15854_v27 }
0x1521   :  { %v17302_v36 = vpack.c.bf16 %v15856_v41, %v15853_v60 }
0x1523   :  { %v15857_v51 = vpop.f32.mrb[144].mxu0  ;;  %17303 = vmatprep.subr.bf16.mxu0 %v17302_v36 }
0x1524   :  { %v15858_v2 = vpop.f32.mrb[145].mxu0  ;;  %17305 = vmatpush3.bf16.msra.mxu0 %v17302_v36 }
0x1525   :  { %v15859_v49 = vadd.f32 %v15858_v2, %v15857_v51  ;;  %v15860_v56 = vpop.f32.mrb[146].mxu0 }
0x1526   :  { %v15861_v6 = vpop.f32.mrb[147].mxu0 }
0x1527   :  { %17248 = vmatprep.subr.mxu0 %v15859_v49 }
0x1528   :  { %17249 = vmatpush3.msra.mxu0 %v15859_v49 }
0x1529   :  { %17251 = vmatmul.mubr.msk.f32.vlgmr.msra.gmra.mrb[148].mxu0 %vm6759_vm9, %v13781_v31 }
0x152a   :  { %17253 = vmatprep.mubr.msk.f32.mxu0 %vm6759_vm9, %v13782_v1 }
0x152d   :  { %17254 = vmatmul.mubr.msk.f32.gmra.mrb[150].mxu0 %vm6759_vm9, %v13783_v52 }
0x152e   :  { %17256 = vmatprep.mubr.msk.f32.mxu0 %vm6759_vm9, %v13784_v37 }
0x1531   :  { %17257 = vmatmul.mubr.msk.f32.gmra.mrb[152].mxu0 %vm6759_vm9, %v13785_v16 }
0x1532   :  { %17259 = vmatprep.mubr.msk.f32.mxu0 %vm6759_vm9, %v13786_v3 }
0x1535   :  { %17260 = vmatmul.mubr.msk.f32.gmra.mrb[154].mxu0 %vm6759_vm9, %v13787_v21 }
0x1536   :  { %17262 = vmatprep.mubr.msk.f32.mxu0 %vm6759_vm9, %v13788_v30 }
0x1539   :  { %17263 = vmatmul.mubr.msk.f32.gmra.mrb[156].mxu0 %vm6759_vm9, %v13789_v42 }
0x153a   :  { %17265 = vmatprep.mubr.msk.f32.mxu0 %vm6759_vm9, %v13790_v7 }
0x153d   :  { %17266 = vmatmul.mubr.msk.f32.gmra.mrb[158].mxu0 %vm6759_vm9, %v13791_v57 }
0x153e   :  { %17268 = vmatprep.mubr.msk.f32.mxu0 %vm6759_vm9, %v13792_v55 }
0x1541   :  { %17269 = vmatmul.mubr.msk.f32.gmra.mrb[160].mxu0 %vm6759_vm9, %v13793_v4 }
0x1542   :  { %17271 = vmatprep.mubr.msk.f32.mxu0 %vm6759_vm9, %v13794_v32 }
0x1545   :  { %17272 = vmatmul.mubr.msk.f32.gmra.mrb[162].mxu0 %vm6759_vm9, %v13795_v61 }
0x1546   :  { %17274 = vmatprep.mubr.msk.f32.mxu0 %vm6759_vm9, %v13796_v10 }
0x1549   :  { %17275 = vmatmul.mubr.msk.f32.gmra.mrb[164].mxu0 %vm6759_vm9, %v13797_v12 }
0x154a   :  { %17277 = vmatprep.mubr.msk.f32.mxu0 %vm6759_vm9, %v13798_v5 }
0x154d   :  { %17278 = vmatmul.mubr.msk.f32.gmra.mrb[166].mxu0 %vm6759_vm9, %v13799_v25 }
0x154e   :  { %17280 = vmatprep.mubr.msk.f32.mxu0 %vm6759_vm9, %v13800_v50 }
0x1551   :  { %17281 = vmatmul.mubr.msk.f32.gmra.mrb[168].mxu0 %vm6759_vm9, %v13801_v13 }
0x1552   :  { %17283 = vmatprep.mubr.msk.f32.mxu0 %vm6759_vm9, %v13802_v53 }
0x1555   :  { %17284 = vmatmul.mubr.msk.f32.gmra.mrb[170].mxu0 %vm6759_vm9, %v13803_v19 }
0x1556   :  { %17286 = vmatprep.mubr.msk.f32.mxu0 %vm6759_vm9, %v13804_v47 }
0x1559   :  { %17287 = vmatmul.mubr.msk.f32.gmra.mrb[172].mxu0 %vm6759_vm9, %v13805_v17 }
0x155a   :  { %17289 = vmatprep.mubr.msk.f32.mxu0 %vm6759_vm9, %v13806_v0 }
0x155d   :  { %17290 = vmatmul.mubr.msk.f32.gmra.mrb[174].mxu0 %vm6759_vm9, %v13807_v63 }
0x155e   :  { %17292 = vmatprep.mubr.msk.f32.mxu0 %vm6759_vm9, %v13808_v44 }
0x1561   :  { %17293 = vmatmul.mubr.msk.f32.gmra.mrb[176].mxu0 %vm6759_vm9, %v13809_v23 }
0x1562   :  { %17295 = vmatprep.mubr.msk.f32.mxu0 %vm6759_vm9, %v13810_v9 }
0x1565   :  { %17296 = vmatmul.mubr.msk.f32.gmra.mrb[178].mxu0 %vm6759_vm9, %v13811_v45 }
0x15fc   :  { %v17252_v18 = vpop.f32.mrb[148].mxu0 }
0x15fd   :  { %v13987_v33 = vadd.f32 %v17252_v18, %v23543_v20  ;;  %v13981_v48 = vpop.f32.mrb[149].mxu0 }
0x15fe   :  { %v13982_v35 = vadd.f32 %v23543_v20, %v13981_v48 }
0x15ff   :  { %14141 = vst.msk [vmem:[%s23717_s12 + $0x108] sm:$0xff] %vm7081_vm10, %v13987_v33 }
0x1600   :  { %14140 = vst.msk [vmem:[%s23717_s12 + $0x100] sm:$0xff] %vm7081_vm10, %v13982_v35  ;;  %v17255_v11 = vpop.f32.mrb[150].mxu0 }
0x1601   :  { %v13997_v46 = vadd.f32 %v17255_v11, %v23543_v20  ;;  %v13991_v39 = vpop.f32.mrb[151].mxu0 }
0x1602   :  { %v13992_v54 = vadd.f32 %v23543_v20, %v13991_v39 }
0x1603   :  { %14143 = vst.msk [vmem:[%s23717_s12 + $0x118] sm:$0xff] %vm7081_vm10, %v13997_v46 }
0x1604   :  { %14142 = vst.msk [vmem:[%s23717_s12 + $0x110] sm:$0xff] %vm7081_vm10, %v13992_v54  ;;  %v17258_v15 = vpop.f32.mrb[152].mxu0 }
0x1605   :  { %v14007_v43 = vadd.f32 %v17258_v15, %v23543_v20  ;;  %v14001_v38 = vpop.f32.mrb[153].mxu0 }
0x1606   :  { %v14002_v22 = vadd.f32 %v23543_v20, %v14001_v38 }
0x1607   :  { %14145 = vst.msk [vmem:[%s23717_s12 + $0x128] sm:$0xff] %vm7081_vm10, %v14007_v43 }
0x1608   :  { %14144 = vst.msk [vmem:[%s23717_s12 + $0x120] sm:$0xff] %vm7081_vm10, %v14002_v22  ;;  %v17261_v8 = vpop.f32.mrb[154].mxu0 }
0x1609   :  { %v14017_v26 = vadd.f32 %v17261_v8, %v23543_v20  ;;  %v14011_v24 = vpop.f32.mrb[155].mxu0 }
0x160a   :  { %v14012_v59 = vadd.f32 %v23543_v20, %v14011_v24 }
0x160b   :  { %14147 = vst.msk [vmem:[%s23717_s12 + $0x138] sm:$0xff] %vm7081_vm10, %v14017_v26 }
0x160c   :  { %14146 = vst.msk [vmem:[%s23717_s12 + $0x130] sm:$0xff] %vm7081_vm10, %v14012_v59  ;;  %v17264_v29 = vpop.f32.mrb[156].mxu0 }
0x160d   :  { %v14027_v34 = vadd.f32 %v17264_v29, %v23543_v20  ;;  %v14021_v14 = vpop.f32.mrb[157].mxu0 }
0x160e   :  { %v14022_v58 = vadd.f32 %v23543_v20, %v14021_v14 }
0x160f   :  { %14149 = vst.msk [vmem:[%s23717_s12 + $0x148] sm:$0xff] %vm7081_vm10, %v14027_v34 }
0x1610   :  { %14148 = vst.msk [vmem:[%s23717_s12 + $0x140] sm:$0xff] %vm7081_vm10, %v14022_v58  ;;  %v17267_v28 = vpop.f32.mrb[158].mxu0 }
0x1611   :  { %v14037_v40 = vadd.f32 %v17267_v28, %v23543_v20  ;;  %v14031_v60 = vpop.f32.mrb[159].mxu0 }
0x1612   :  { %v14032_v27 = vadd.f32 %v23543_v20, %v14031_v60 }
0x1613   :  { %14151 = vst.msk [vmem:[%s23717_s12 + $0x158] sm:$0xff] %vm7081_vm10, %v14037_v40 }
0x1614   :  { %14150 = vst.msk [vmem:[%s23717_s12 + $0x150] sm:$0xff] %vm7081_vm10, %v14032_v27  ;;  %v17270_v62 = vpop.f32.mrb[160].mxu0 }
0x1615   :  { %v14047_v41 = vadd.f32 %v17270_v62, %v23543_v20  ;;  %v14041_v36 = vpop.f32.mrb[161].mxu0 }
0x1616   :  { %v14042_v51 = vadd.f32 %v23543_v20, %v14041_v36 }
0x1617   :  { %14153 = vst.msk [vmem:[%s23717_s12 + $0x168] sm:$0xff] %vm7081_vm10, %v14047_v41 }
0x1618   :  { %14152 = vst.msk [vmem:[%s23717_s12 + $0x160] sm:$0xff] %vm7081_vm10, %v14042_v51  ;;  %v17273_v2 = vpop.f32.mrb[162].mxu0 }
0x1619   :  { %v14057_v49 = vadd.f32 %v17273_v2, %v23543_v20  ;;  %v14051_v56 = vpop.f32.mrb[163].mxu0 }
0x161a   :  { %v14052_v6 = vadd.f32 %v23543_v20, %v14051_v56 }
0x161b   :  { %14155 = vst.msk [vmem:[%s23717_s12 + $0x178] sm:$0xff] %vm7081_vm10, %v14057_v49 }
0x161c   :  { %14154 = vst.msk [vmem:[%s23717_s12 + $0x170] sm:$0xff] %vm7081_vm10, %v14052_v6  ;;  %v17276_v31 = vpop.f32.mrb[164].mxu0 }
0x161d   :  { %v14067_v1 = vadd.f32 %v17276_v31, %v23543_v20  ;;  %v14061_v52 = vpop.f32.mrb[165].mxu0 }
0x161e   :  { %v14062_v37 = vadd.f32 %v23543_v20, %v14061_v52 }
0x161f   :  { %14157 = vst.msk [vmem:[%s23717_s12 + $0x188] sm:$0xff] %vm7081_vm10, %v14067_v1 }
0x1620   :  { %14156 = vst.msk [vmem:[%s23717_s12 + $0x180] sm:$0xff] %vm7081_vm10, %v14062_v37  ;;  %v17279_v16 = vpop.f32.mrb[166].mxu0 }
0x1621   :  { %v14077_v3 = vadd.f32 %v17279_v16, %v23543_v20  ;;  %v14071_v21 = vpop.f32.mrb[167].mxu0 }
0x1622   :  { %v14072_v30 = vadd.f32 %v23543_v20, %v14071_v21 }
0x1623   :  { %14159 = vst.msk [vmem:[%s23717_s12 + $0x198] sm:$0xff] %vm7081_vm10, %v14077_v3 }
0x1624   :  { %14158 = vst.msk [vmem:[%s23717_s12 + $0x190] sm:$0xff] %vm7081_vm10, %v14072_v30  ;;  %v17282_v42 = vpop.f32.mrb[168].mxu0 }
0x1625   :  { %v14087_v7 = vadd.f32 %v17282_v42, %v23543_v20  ;;  %v14081_v57 = vpop.f32.mrb[169].mxu0 }
0x1626   :  { %v14082_v55 = vadd.f32 %v23543_v20, %v14081_v57 }
0x1627   :  { %14161 = vst.msk [vmem:[%s23717_s12 + $0x1a8] sm:$0xff] %vm7081_vm10, %v14087_v7 }
0x1628   :  { %14160 = vst.msk [vmem:[%s23717_s12 + $0x1a0] sm:$0xff] %vm7081_vm10, %v14082_v55  ;;  %v17285_v4 = vpop.f32.mrb[170].mxu0 }
0x1629   :  { %v14097_v32 = vadd.f32 %v17285_v4, %v23543_v20  ;;  %v14091_v61 = vpop.f32.mrb[171].mxu0 }
0x162a   :  { %v14092_v10 = vadd.f32 %v23543_v20, %v14091_v61 }
0x162b   :  { %14163 = vst.msk [vmem:[%s23717_s12 + $0x1b8] sm:$0xff] %vm7081_vm10, %v14097_v32 }
0x162c   :  { %14162 = vst.msk [vmem:[%s23717_s12 + $0x1b0] sm:$0xff] %vm7081_vm10, %v14092_v10  ;;  %v17288_v12 = vpop.f32.mrb[172].mxu0 }
0x162d   :  { %v14107_v5 = vadd.f32 %v17288_v12, %v23543_v20  ;;  %v14101_v25 = vpop.f32.mrb[173].mxu0 }
0x162e   :  { %v14102_v50 = vadd.f32 %v23543_v20, %v14101_v25 }
0x162f   :  { %14165 = vst.msk [vmem:[%s23717_s12 + $0x1c8] sm:$0xff] %vm7081_vm10, %v14107_v5 }
0x1630   :  { %14164 = vst.msk [vmem:[%s23717_s12 + $0x1c0] sm:$0xff] %vm7081_vm10, %v14102_v50  ;;  %v17291_v13 = vpop.f32.mrb[174].mxu0 }
0x1631   :  { %v14117_v53 = vadd.f32 %v17291_v13, %v23543_v20  ;;  %v14111_v19 = vpop.f32.mrb[175].mxu0 }
0x1632   :  { %v14112_v47 = vadd.f32 %v23543_v20, %v14111_v19 }
0x1633   :  { %14167 = vst.msk [vmem:[%s23717_s12 + $0x1d8] sm:$0xff] %vm7081_vm10, %v14117_v53 }
0x1634   :  { %14166 = vst.msk [vmem:[%s23717_s12 + $0x1d0] sm:$0xff] %vm7081_vm10, %v14112_v47  ;;  %v17294_v17 = vpop.f32.mrb[176].mxu0 }
0x1635   :  { %v14127_v0 = vadd.f32 %v17294_v17, %v23543_v20  ;;  %v14121_v63 = vpop.f32.mrb[177].mxu0 }
0x1636   :  { %v14122_v44 = vadd.f32 %v23543_v20, %v14121_v63 }
0x1637   :  { %14169 = vst.msk [vmem:[%s23717_s12 + $0x1e8] sm:$0xff] %vm7081_vm10, %v14127_v0 }
0x1638   :  { %14168 = vst.msk [vmem:[%s23717_s12 + $0x1e0] sm:$0xff] %vm7081_vm10, %v14122_v44  ;;  %v17297_v23 = vpop.f32.mrb[178].mxu0 }
0x1639   :  { %v14137_v9 = vadd.f32 %v17297_v23, %v23543_v20  ;;  %v14131_v45 = vpop.f32.mrb[179].mxu0 }
0x163a   :  { %v14132_v18 = vadd.f32 %v23543_v20, %v14131_v45 }
0x163b   :  { %14171 = vst.msk [vmem:[%s23717_s12 + $0x1f8] sm:$0xff] %vm7081_vm10, %v14137_v9 }
0x163c   :  { %14170 = vst.msk [vmem:[%s23717_s12 + $0x1f0] sm:$0xff] %vm7081_vm10, %v14132_v18 }

</bundles_post_ra>
